<compile_context>
chip_gen: v5e
topology: v5e:2x2
jax: 0.10.0
libtpu: 0.0.40
codegen_flags: <defaults>
</compile_context>

<pallas_src>
import functools

import jax
import jax.numpy as jnp
from jax.experimental import pallas as pl
from jax.experimental.pallas import tpu as pltpu

_H0 = 64                     # the module hard-codes 64x64 single-channel images
_R1, _R2, _R3 = 24, 12, 6    # live (pool-reachable) output rows of conv1/2/3


# ------------------------------ Pallas kernel ------------------------------ #

def _mnist_fused_kernel(x1_ref, a1_ref, b1_ref, a2_ref, b2_ref, a3_ref, b3_ref,
                        pool_ref, o_ref, l1_scr, l2_scr, *, batch):
    bt = batch

    # Zero the padding row-block (block 0) of each activation scratch.  Re-zeroed
    # every grid step (tiny stores) so v7x megacore sharding -- where each core owns
    # its own scratch and its own slice of the grid -- stays correct.
    l1_scr[0:bt, :] = jnp.zeros((bt, l1_scr.shape[1]), l1_scr.dtype)
    l2_scr[0:bt, :] = jnp.zeros((bt, l2_scr.shape[1]), l2_scr.dtype)

    # ---- Layer 1: kh taps pre-gathered into x1's feature axis (wrapper) -------- #
    # x1 row-blocks arrive already deinterleaved (odd output rows 1,3,..,23 first,
    # then even rows 0,2,..,22), so this single contiguous store leaves l1_scr in
    # exactly the layout layer 2 reads with plain contiguous slices.
    h1 = jnp.dot(x1_ref[0], a1_ref[...], preferred_element_type=jnp.float32)
    l1_scr[bt:, :] = jnp.maximum(h1 + b1_ref[...], 0.0).astype(l1_scr.dtype)

    # ---- Layer 2: 12 live rows; every kh tap is a contiguous scratch slice ----- #
    # l1_scr blocks: [0]=zeros, [1..12]=rows 1,3,..,23, [13..24]=rows 0,2,..,22.
    #   kh=0 needs rows 2r-1 (r=0..11) -> blocks 0..11
    #   kh=1 needs rows 2r             -> blocks 13..24
    #   kh=2 needs rows 2r+1           -> blocks 1..12
    h2 = jnp.dot(l1_scr[0:_R2 * bt, :], a2_ref[0],
                 preferred_element_type=jnp.float32)
    h2 += jnp.dot(l1_scr[(_R2 + 1) * bt:, :], a2_ref[1],
                  preferred_element_type=jnp.float32)
    h2 += jnp.dot(l1_scr[bt:(_R2 + 1) * bt, :], a2_ref[2],
                  preferred_element_type=jnp.float32)
    h2 = jnp.maximum(h2 + b2_ref[...], 0.0).astype(l2_scr.dtype)
    # Deinterleave layer-2 rows while storing (same store volume as a contiguous
    # store): odd rows -> blocks 1..6, even rows -> blocks 7..12.
    for r in range(_R2):
        dst = 1 + (r - 1) // 2 if r % 2 else 1 + _R3 + r // 2
        l2_scr[dst * bt:(dst + 1) * bt, :] = h2[r * bt:(r + 1) * bt, :]

    # ---- Layer 3: 6 live rows, Cout padded 10 -> 16 (lane-dense 8*16 = 128) ---- #
    h3 = jnp.dot(l2_scr[0:_R3 * bt, :], a3_ref[0],
                 preferred_element_type=jnp.float32)
    h3 += jnp.dot(l2_scr[(_R3 + 1) * bt:, :], a3_ref[1],
                  preferred_element_type=jnp.float32)
    h3 += jnp.dot(l2_scr[bt:(_R3 + 1) * bt, :], a3_ref[2],
                  preferred_element_type=jnp.float32)
    h3 = jnp.maximum(h3 + b3_ref[...], 0.0)                     # (6*bt, 128) f32

    # ---- F.avg_pool2d(., 6) (floor mode) fused as a (128, 10) matmul ----------- #
    pooled = jnp.dot(h3, pool_ref[...], preferred_element_type=jnp.float32)
    acc = pooled[0:bt, :]
    for r in range(1, _R3):
        acc = acc + pooled[r * bt:(r + 1) * bt, :]
    o_ref[0] = acc                                              # (bt, 10)


# ------------------------------- JAX wrapper -------------------------------- #

def _fold_conv_weights(w_oihw, in_w):
    """Fold kw taps + stride-2 W-downsampling of one conv into 3 dense matrices.

    a[kh, w*Cin+ci, j*Cout+co] = W[co, ci, kh, w-2j+1]  (0 if the tap is outside [0,2])
    so that   out_row(i) = relu( sum_kh in_row(2i+kh-1) @ a[kh] + bias_row ).
    """
    cout, cin = w_oihw.shape[0], w_oihw.shape[1]
    out_w = in_w // 2
    wt = jnp.transpose(w_oihw, (2, 3, 1, 0)).astype(jnp.float32)   # (kh, kw, Cin, Cout)
    w_idx = jnp.arange(in_w)[:, None]
    j_idx = jnp.arange(out_w)[None, :]
    tap = w_idx - 2 * j_idx + 1                                    # kw index, (W, Wo)
    valid = ((tap >= 0) & (tap <= 2)).astype(jnp.float32)
    a = wt[:, jnp.clip(tap, 0, 2), :, :]                           # (3, W, Wo, Cin, Cout)
    a = a * valid[None, :, :, None, None]
    a = jnp.transpose(a, (0, 1, 3, 2, 4))                          # (3, W, Cin, Wo, Cout)
    return a.reshape(3, in_w * cin, out_w * cout)


def _default_batch_tile(n):
    """Largest multiple-of-16 batch tile (<= 64) that minimizes batch padding."""
    best = 16
    for bt in (16, 32, 48, 64):
        if -(-n // bt) * bt <= -(-n // best) * best:
            best = bt
    return best


def mnist_cnn_forward(x, params):
    """Reproduces Mnist_CNN.forward -> (N, 10)."""
    x = x.reshape(-1, 1, _H0, _H0).astype(jnp.float32)
    n = x.shape[0]
    bt = _default_batch_tile(n)
    n_pad = -(-n // bt) * bt
    steps = n_pad // bt

    # Dead-row elimination: the floor-mode 6x6 pool only ever sees conv3 rows 0..5
    # -> conv2 rows 0..11 -> conv1 rows 0..23 -> image rows 0..47.
    img = x[:, 0, 0:2 * _R1, :]                                      # (N, 48, 64)
    if n_pad != n:
        img = jnp.concatenate(
            [img, jnp.zeros((n_pad - n, 2 * _R1, _H0), jnp.float32)], axis=0)

    # Layer-1 LHS: for output row r, image rows (2r-1, 2r, 2r+1) concatenated along
    # the feature axis (zero row for the top padding) -> one bf16 matmul in-kernel.
    xpad = jnp.concatenate(
        [jnp.zeros((n_pad, 1, _H0), jnp.float32), img], axis=1)     # (N, 49, 64)
    x1 = jnp.concatenate(
        [xpad[:, s:s + 2 * _R1:2, :] for s in range(3)], axis=-1)   # (N, 24, 192)
    # Deinterleave rows (odd first) so layer 2 reads contiguous tap windows, and
    # switch to (row, batch) ordering inside each batch tile.
    row_order = list(range(1, _R1, 2)) + list(range(0, _R1, 2))
    x1 = x1[:, row_order, :]
    x1 = x1.reshape(steps, bt, _R1, 3 * _H0).transpose(0, 2, 1, 3)
    x1 = x1.reshape(steps, _R1 * bt, 3 * _H0).astype(jnp.bfloat16)

    # Folded conv matrices as bf16 MXU operands (f32 accumulation in-kernel).
    a1 = _fold_conv_weights(params["w1"], _H0).reshape(3 * _H0, 32 * 16)   # (192, 512)
    a2 = _fold_conv_weights(params["w2"], 32)                              # (3, 512, 256)
    w3p = jnp.zeros((16, 16, 3, 3), jnp.float32).at[0:10].set(
        params["w3"].astype(jnp.float32))                                  # pad Cout 10->16
    a3 = _fold_conv_weights(w3p, 16)                                       # (3, 256, 128)
    a1, a2, a3 = (m.astype(jnp.bfloat16) for m in (a1, a2, a3))

    b1r = jnp.tile(params["b1"].astype(jnp.float32), 32)[None, :]          # (1, 512)
    b2r = jnp.tile(params["b2"].astype(jnp.float32), 16)[None, :]          # (1, 256)
    b3p = jnp.zeros((16,), jnp.float32).at[0:10].set(
        params["b3"].astype(jnp.float32))
    b3r = jnp.tile(b3p, 8)[None, :]                                        # (1, 128)

    # Pool matrix (128, 10): picks channel c (<10) of columns w < 6, scales by 1/36
    # (floor-mode 6x6 average pool); padded channels 10..15 contribute nothing.
    eye_pad = jnp.concatenate(
        [jnp.eye(10, dtype=jnp.float32), jnp.zeros((6, 10), jnp.float32)], axis=0)
    pool = jnp.concatenate(
        [jnp.tile(eye_pad, (6, 1)), jnp.zeros((32, 10), jnp.float32)],
        axis=0) / 36.0                                                     # (128, 10)

    flops = 2 * n_pad * (_R1 * 192 * 512 + _R2 * 3 * 512 * 256
                         + _R3 * 3 * 256 * 128 + _R3 * 128 * 10)
    bytes_accessed = (x1.size * 2 + n_pad * 10 * 4
                      + (a1.size + a2.size + a3.size) * 2
                      + (b1r.size + b2r.size + b3r.size + pool.size) * 4)

    out = pl.pallas_call(
        functools.partial(_mnist_fused_kernel, batch=bt),
        out_shape=jax.ShapeDtypeStruct((steps, bt, 10), jnp.float32),
        grid_spec=pltpu.PrefetchScalarGridSpec(
            num_scalar_prefetch=0,
            grid=(steps,),
            in_specs=[
                pl.BlockSpec((1, _R1 * bt, 3 * _H0), lambda i: (i, 0, 0)),  # x1 tile
                pl.BlockSpec((3 * _H0, 512), lambda i: (0, 0)),             # a1
                pl.BlockSpec((1, 512), lambda i: (0, 0)),                   # b1 row
                pl.BlockSpec((3, 512, 256), lambda i: (0, 0, 0)),           # a2
                pl.BlockSpec((1, 256), lambda i: (0, 0)),                   # b2 row
                pl.BlockSpec((3, 256, 128), lambda i: (0, 0, 0)),           # a3
                pl.BlockSpec((1, 128), lambda i: (0, 0)),                   # b3 row
                pl.BlockSpec((128, 10), lambda i: (0, 0)),                  # pool matrix
            ],
            out_specs=pl.BlockSpec((1, bt, 10), lambda i: (i, 0, 0)),
            scratch_shapes=[
                pltpu.VMEM(((1 + _R1) * bt, 512), jnp.bfloat16),  # conv1 acts (+pad blk)
                pltpu.VMEM(((1 + _R2) * bt, 256), jnp.bfloat16),  # conv2 acts (+pad blk)
            ],
        ),
        compiler_params=pltpu.CompilerParams(
            dimension_semantics=("parallel",),
            vmem_limit_bytes=32 * 1024 * 1024),
        cost_estimate=pl.CostEstimate(
            flops=int(flops), transcendentals=0,
            bytes_accessed=int(bytes_accessed)),
    )(x1, a1, b1r, a2, b2r, a3, b3r, pool)

    return out.reshape(n_pad, 10)[:n]


# -------------------------- params / reference ------------------------------ #

def init_params(key):
    def conv_init(k, cout, cin, ksize=3):
        wkey, bkey = jax.random.split(k)
        fan_in = cin * ksize * ksize
        bound = 1.0 / jnp.sqrt(jnp.float32(fan_in))
        w = jax.random.uniform(wkey, (cout, cin, ksize, ksize), jnp.float32,
                               -bound, bound)
        b = jax.random.uniform(bkey, (cout,), jnp.float32, -bound, bound)
        return w, b
    k1, k2, k3 = jax.random.split(key, 3)
    w1, b1 = conv_init(k1, 16, 1)
    w2, b2 = conv_init(k2, 16, 16)
    w3, b3 = conv_init(k3, 10, 16)
    return dict(w1=w1, b1=b1, w2=w2, b2=b2, w3=w3, b3=b3)


def reference_forward(x, p):
    def conv(h, w, b):
        out = jax.lax.conv_general_dilated(
            h, w, window_strides=(2, 2), padding=((1, 1), (1, 1)),
            dimension_numbers=("NCHW", "OIHW", "NCHW"))
        return jax.nn.relu(out + b[None, :, None, None])
    h = x.reshape(-1, 1, 64, 64).astype(jnp.float32)
    h = conv(h, p["w1"], p["b1"])
    h = conv(h, p["w2"], p["b2"])
    h = conv(h, p["w3"], p["b3"])
    return jnp.mean(h[:, :, 0:6, 0:6], axis=(2, 3))                 # (N, 10)


# ---------------------------------- main ------------------------------------ #

if __name__ == "__main__":
    key = jax.random.PRNGKey(0)
    pkey, xkey = jax.random.split(key)
    params = init_params(pkey)

    # Module hard-codes 64x64 single-channel images; use batch=2.
    x = jax.random.normal(xkey, (2, 1, 64, 64), dtype=jnp.float32)

    out = jax.block_until_ready(jax.jit(mnist_cnn_forward)(x, params))
    ref = jax.block_until_ready(reference_forward(x, params))

    assert out.shape == (2, 10), out.shape
    assert bool(jnp.all(jnp.isfinite(out)))
    err = float(jnp.max(jnp.abs(out - ref)))
    # bf16 MXU operands with f32 accumulation: a slightly looser tolerance than the
    # pure-f32 path, still far below any structural-bug error magnitude.
    assert bool(jnp.allclose(out, ref, atol=2e-2, rtol=2e-2)), f"max abs err {err}"

    print("KERNEL_OK")
</pallas_src>

<mosaic_0001>
module attributes {stable_mosaic.version = 11 : i64} {
  func.func @_mnist_fused_kernel(%arg0: i32, %arg1: memref<1x384x192xbf16, #tpu.memory_space<vmem>>, %arg2: memref<192x512xbf16, #tpu.memory_space<vmem>>, %arg3: memref<1x512xf32, #tpu.memory_space<vmem>>, %arg4: memref<3x512x256xbf16, #tpu.memory_space<vmem>>, %arg5: memref<1x256xf32, #tpu.memory_space<vmem>>, %arg6: memref<3x256x128xbf16, #tpu.memory_space<vmem>>, %arg7: memref<1x128xf32, #tpu.memory_space<vmem>>, %arg8: memref<128x10xf32, #tpu.memory_space<vmem>>, %arg9: memref<1x16x10xf32, #tpu.memory_space<vmem>>, %arg10: memref<400x512xbf16, #tpu.memory_space<vmem>>, %arg11: memref<208x256xbf16, #tpu.memory_space<vmem>>) attributes {dimension_semantics = [#tpu.dimension_semantics<parallel>], iteration_bounds = array<i64: 1>, scalar_prefetch = 0 : i64, scratch_operands = 2 : i64, tpu.core_type = #tpu.core_type<tc>, window_params = [{transform_indices = @transform_0, window_bounds = array<i64: 1, 384, 192>}, {pipeline_mode = #tpu.pipeline_mode<synchronous>, transform_indices = @transform_1, window_bounds = array<i64: 192, 512>}, {pipeline_mode = #tpu.pipeline_mode<synchronous>, transform_indices = @transform_2, window_bounds = array<i64: 1, 512>}, {pipeline_mode = #tpu.pipeline_mode<synchronous>, transform_indices = @transform_3, window_bounds = array<i64: 3, 512, 256>}, {pipeline_mode = #tpu.pipeline_mode<synchronous>, transform_indices = @transform_4, window_bounds = array<i64: 1, 256>}, {pipeline_mode = #tpu.pipeline_mode<synchronous>, transform_indices = @transform_5, window_bounds = array<i64: 3, 256, 128>}, {pipeline_mode = #tpu.pipeline_mode<synchronous>, transform_indices = @transform_6, window_bounds = array<i64: 1, 128>}, {pipeline_mode = #tpu.pipeline_mode<synchronous>, transform_indices = @transform_7, window_bounds = array<i64: 128, 10>}, {transform_indices = @transform_8, window_bounds = array<i64: 1, 16, 10>}]} {
    %cst = arith.constant 0.000000e+00 : bf16
    %0 = vector.broadcast %cst : bf16 to vector<16x512xbf16>
    %c0 = arith.constant 0 : index
    %c0_0 = arith.constant 0 : index
    %1 = vector.load %arg10[%c0, %c0_0] : memref<400x512xbf16, #tpu.memory_space<vmem>>, vector<16x512xbf16>
    tpu.vector_store %arg10[%c0, %c0_0], %0 {strides = array<i32>} : memref<400x512xbf16, #tpu.memory_space<vmem>>, vector<16x512xbf16>,
    %cst_1 = arith.constant 0.000000e+00 : bf16
    %2 = vector.broadcast %cst_1 : bf16 to vector<16x256xbf16>
    %c0_2 = arith.constant 0 : index
    %c0_3 = arith.constant 0 : index
    %3 = vector.load %arg11[%c0_2, %c0_3] : memref<208x256xbf16, #tpu.memory_space<vmem>>, vector<16x256xbf16>
    tpu.vector_store %arg11[%c0_2, %c0_3], %2 {strides = array<i32>} : memref<208x256xbf16, #tpu.memory_space<vmem>>, vector<16x256xbf16>,
    %c0_4 = arith.constant 0 : index
    %c0_5 = arith.constant 0 : index
    %c0_6 = arith.constant 0 : index
    %4 = vector.load %arg1[%c0_4, %c0_5, %c0_6] : memref<1x384x192xbf16, #tpu.memory_space<vmem>>, vector<1x384x192xbf16>
    %5 = vector.shape_cast %4 : vector<1x384x192xbf16> to vector<384x192xbf16>
    %c0_7 = arith.constant 0 : index
    %c0_8 = arith.constant 0 : index
    %6 = vector.load %arg2[%c0_7, %c0_8] : memref<192x512xbf16, #tpu.memory_space<vmem>>, vector<192x512xbf16>
    %cst_9 = arith.constant dense<0.000000e+00> : vector<384x512xf32>
    %7 = tpu.matmul %5, %6, %cst_9 {dimension_numbers = #tpu.dot_dimension_numbers<[1], [0], [0], [1], [0, 0, 1, 1], [], []>} : vector<384x192xbf16>, vector<192x512xbf16>, vector<384x512xf32> -> vector<384x512xf32>
    %c0_10 = arith.constant 0 : index
    %c0_11 = arith.constant 0 : index
    %8 = vector.load %arg3[%c0_10, %c0_11] : memref<1x512xf32, #tpu.memory_space<vmem>>, vector<1x512xf32>
    %9 = vector.broadcast %8 : vector<1x512xf32> to vector<384x512xf32>
    %10 = arith.addf %7, %9 : vector<384x512xf32>
    %cst_12 = arith.constant 0.000000e+00 : f32
    %11 = vector.broadcast %cst_12 : f32 to vector<384x512xf32>
    %12 = arith.maximumf %10, %11 : vector<384x512xf32>
    %13 = arith.truncf %12 : vector<384x512xf32> to vector<384x512xbf16>
    %c16 = arith.constant 16 : index
    %c0_13 = arith.constant 0 : index
    %14 = vector.load %arg10[%c16, %c0_13] : memref<400x512xbf16, #tpu.memory_space<vmem>>, vector<384x512xbf16>
    tpu.vector_store %arg10[%c16, %c0_13], %13 {strides = array<i32>} : memref<400x512xbf16, #tpu.memory_space<vmem>>, vector<384x512xbf16>,
    %c0_14 = arith.constant 0 : index
    %c0_15 = arith.constant 0 : index
    %15 = vector.load %arg10[%c0_14, %c0_15] : memref<400x512xbf16, #tpu.memory_space<vmem>>, vector<192x512xbf16>
    %c0_16 = arith.constant 0 : index
    %c0_17 = arith.constant 0 : index
    %c0_18 = arith.constant 0 : index
    %16 = vector.load %arg4[%c0_16, %c0_17, %c0_18] : memref<3x512x256xbf16, #tpu.memory_space<vmem>>, vector<1x512x256xbf16>
    %17 = vector.shape_cast %16 : vector<1x512x256xbf16> to vector<512x256xbf16>
    %cst_19 = arith.constant dense<0.000000e+00> : vector<192x256xf32>
    %18 = tpu.matmul %15, %17, %cst_19 {dimension_numbers = #tpu.dot_dimension_numbers<[1], [0], [0], [1], [0, 0, 1, 1], [], []>} : vector<192x512xbf16>, vector<512x256xbf16>, vector<192x256xf32> -> vector<192x256xf32>
    %c208 = arith.constant 208 : index
    %c0_20 = arith.constant 0 : index
    %19 = vector.load %arg10[%c208, %c0_20] : memref<400x512xbf16, #tpu.memory_space<vmem>>, vector<192x512xbf16>
    %c1 = arith.constant 1 : index
    %c0_21 = arith.constant 0 : index
    %c0_22 = arith.constant 0 : index
    %20 = vector.load %arg4[%c1, %c0_21, %c0_22] : memref<3x512x256xbf16, #tpu.memory_space<vmem>>, vector<1x512x256xbf16>
    %21 = vector.shape_cast %20 : vector<1x512x256xbf16> to vector<512x256xbf16>
    %cst_23 = arith.constant dense<0.000000e+00> : vector<192x256xf32>
    %22 = tpu.matmul %19, %21, %cst_23 {dimension_numbers = #tpu.dot_dimension_numbers<[1], [0], [0], [1], [0, 0, 1, 1], [], []>} : vector<192x512xbf16>, vector<512x256xbf16>, vector<192x256xf32> -> vector<192x256xf32>
    %23 = arith.addf %18, %22 : vector<192x256xf32>
    %c16_24 = arith.constant 16 : index
    %c0_25 = arith.constant 0 : index
    %24 = vector.load %arg10[%c16_24, %c0_25] : memref<400x512xbf16, #tpu.memory_space<vmem>>, vector<192x512xbf16>
    %c2 = arith.constant 2 : index
    %c0_26 = arith.constant 0 : index
    %c0_27 = arith.constant 0 : index
    %25 = vector.load %arg4[%c2, %c0_26, %c0_27] : memref<3x512x256xbf16, #tpu.memory_space<vmem>>, vector<1x512x256xbf16>
    %26 = vector.shape_cast %25 : vector<1x512x256xbf16> to vector<512x256xbf16>
    %cst_28 = arith.constant dense<0.000000e+00> : vector<192x256xf32>
    %27 = tpu.matmul %24, %26, %cst_28 {dimension_numbers = #tpu.dot_dimension_numbers<[1], [0], [0], [1], [0, 0, 1, 1], [], []>} : vector<192x512xbf16>, vector<512x256xbf16>, vector<192x256xf32> -> vector<192x256xf32>
    %28 = arith.addf %23, %27 : vector<192x256xf32>
    %c0_29 = arith.constant 0 : index
    %c0_30 = arith.constant 0 : index
    %29 = vector.load %arg5[%c0_29, %c0_30] : memref<1x256xf32, #tpu.memory_space<vmem>>, vector<1x256xf32>
    %30 = vector.broadcast %29 : vector<1x256xf32> to vector<192x256xf32>
    %31 = arith.addf %28, %30 : vector<192x256xf32>
    %cst_31 = arith.constant 0.000000e+00 : f32
    %32 = vector.broadcast %cst_31 : f32 to vector<192x256xf32>
    %33 = arith.maximumf %31, %32 : vector<192x256xf32>
    %34 = arith.truncf %33 : vector<192x256xf32> to vector<192x256xbf16>
    %35 = vector.extract_strided_slice %34 {offsets = [0, 0], sizes = [16, 256], strides = [1, 1]} : vector<192x256xbf16> to vector<16x256xbf16>
    %c112 = arith.constant 112 : index
    %c0_32 = arith.constant 0 : index
    %36 = vector.load %arg11[%c112, %c0_32] : memref<208x256xbf16, #tpu.memory_space<vmem>>, vector<16x256xbf16>
    tpu.vector_store %arg11[%c112, %c0_32], %35 {strides = array<i32>} : memref<208x256xbf16, #tpu.memory_space<vmem>>, vector<16x256xbf16>,
    %37 = vector.extract_strided_slice %34 {offsets = [16, 0], sizes = [16, 256], strides = [1, 1]} : vector<192x256xbf16> to vector<16x256xbf16>
    %c16_33 = arith.constant 16 : index
    %c0_34 = arith.constant 0 : index
    %38 = vector.load %arg11[%c16_33, %c0_34] : memref<208x256xbf16, #tpu.memory_space<vmem>>, vector<16x256xbf16>
    tpu.vector_store %arg11[%c16_33, %c0_34], %37 {strides = array<i32>} : memref<208x256xbf16, #tpu.memory_space<vmem>>, vector<16x256xbf16>,
    %39 = vector.extract_strided_slice %34 {offsets = [32, 0], sizes = [16, 256], strides = [1, 1]} : vector<192x256xbf16> to vector<16x256xbf16>
    %c128 = arith.constant 128 : index
    %c0_35 = arith.constant 0 : index
    %40 = vector.load %arg11[%c128, %c0_35] : memref<208x256xbf16, #tpu.memory_space<vmem>>, vector<16x256xbf16>
    tpu.vector_store %arg11[%c128, %c0_35], %39 {strides = array<i32>} : memref<208x256xbf16, #tpu.memory_space<vmem>>, vector<16x256xbf16>,
    %41 = vector.extract_strided_slice %34 {offsets = [48, 0], sizes = [16, 256], strides = [1, 1]} : vector<192x256xbf16> to vector<16x256xbf16>
    %c32 = arith.constant 32 : index
    %c0_36 = arith.constant 0 : index
    %42 = vector.load %arg11[%c32, %c0_36] : memref<208x256xbf16, #tpu.memory_space<vmem>>, vector<16x256xbf16>
    tpu.vector_store %arg11[%c32, %c0_36], %41 {strides = array<i32>} : memref<208x256xbf16, #tpu.memory_space<vmem>>, vector<16x256xbf16>,
    %43 = vector.extract_strided_slice %34 {offsets = [64, 0], sizes = [16, 256], strides = [1, 1]} : vector<192x256xbf16> to vector<16x256xbf16>
    %c144 = arith.constant 144 : index
    %c0_37 = arith.constant 0 : index
    %44 = vector.load %arg11[%c144, %c0_37] : memref<208x256xbf16, #tpu.memory_space<vmem>>, vector<16x256xbf16>
    tpu.vector_store %arg11[%c144, %c0_37], %43 {strides = array<i32>} : memref<208x256xbf16, #tpu.memory_space<vmem>>, vector<16x256xbf16>,
    %45 = vector.extract_strided_slice %34 {offsets = [80, 0], sizes = [16, 256], strides = [1, 1]} : vector<192x256xbf16> to vector<16x256xbf16>
    %c48 = arith.constant 48 : index
    %c0_38 = arith.constant 0 : index
    %46 = vector.load %arg11[%c48, %c0_38] : memref<208x256xbf16, #tpu.memory_space<vmem>>, vector<16x256xbf16>
    tpu.vector_store %arg11[%c48, %c0_38], %45 {strides = array<i32>} : memref<208x256xbf16, #tpu.memory_space<vmem>>, vector<16x256xbf16>,
    %47 = vector.extract_strided_slice %34 {offsets = [96, 0], sizes = [16, 256], strides = [1, 1]} : vector<192x256xbf16> to vector<16x256xbf16>
    %c160 = arith.constant 160 : index
    %c0_39 = arith.constant 0 : index
    %48 = vector.load %arg11[%c160, %c0_39] : memref<208x256xbf16, #tpu.memory_space<vmem>>, vector<16x256xbf16>
    tpu.vector_store %arg11[%c160, %c0_39], %47 {strides = array<i32>} : memref<208x256xbf16, #tpu.memory_space<vmem>>, vector<16x256xbf16>,
    %49 = vector.extract_strided_slice %34 {offsets = [112, 0], sizes = [16, 256], strides = [1, 1]} : vector<192x256xbf16> to vector<16x256xbf16>
    %c64 = arith.constant 64 : index
    %c0_40 = arith.constant 0 : index
    %50 = vector.load %arg11[%c64, %c0_40] : memref<208x256xbf16, #tpu.memory_space<vmem>>, vector<16x256xbf16>
    tpu.vector_store %arg11[%c64, %c0_40], %49 {strides = array<i32>} : memref<208x256xbf16, #tpu.memory_space<vmem>>, vector<16x256xbf16>,
    %51 = vector.extract_strided_slice %34 {offsets = [128, 0], sizes = [16, 256], strides = [1, 1]} : vector<192x256xbf16> to vector<16x256xbf16>
    %c176 = arith.constant 176 : index
    %c0_41 = arith.constant 0 : index
    %52 = vector.load %arg11[%c176, %c0_41] : memref<208x256xbf16, #tpu.memory_space<vmem>>, vector<16x256xbf16>
    tpu.vector_store %arg11[%c176, %c0_41], %51 {strides = array<i32>} : memref<208x256xbf16, #tpu.memory_space<vmem>>, vector<16x256xbf16>,
    %53 = vector.extract_strided_slice %34 {offsets = [144, 0], sizes = [16, 256], strides = [1, 1]} : vector<192x256xbf16> to vector<16x256xbf16>
    %c80 = arith.constant 80 : index
    %c0_42 = arith.constant 0 : index
    %54 = vector.load %arg11[%c80, %c0_42] : memref<208x256xbf16, #tpu.memory_space<vmem>>, vector<16x256xbf16>
    tpu.vector_store %arg11[%c80, %c0_42], %53 {strides = array<i32>} : memref<208x256xbf16, #tpu.memory_space<vmem>>, vector<16x256xbf16>,
    %55 = vector.extract_strided_slice %34 {offsets = [160, 0], sizes = [16, 256], strides = [1, 1]} : vector<192x256xbf16> to vector<16x256xbf16>
    %c192 = arith.constant 192 : index
    %c0_43 = arith.constant 0 : index
    %56 = vector.load %arg11[%c192, %c0_43] : memref<208x256xbf16, #tpu.memory_space<vmem>>, vector<16x256xbf16>
    tpu.vector_store %arg11[%c192, %c0_43], %55 {strides = array<i32>} : memref<208x256xbf16, #tpu.memory_space<vmem>>, vector<16x256xbf16>,
    %57 = vector.extract_strided_slice %34 {offsets = [176, 0], sizes = [16, 256], strides = [1, 1]} : vector<192x256xbf16> to vector<16x256xbf16>
    %c96 = arith.constant 96 : index
    %c0_44 = arith.constant 0 : index
    %58 = vector.load %arg11[%c96, %c0_44] : memref<208x256xbf16, #tpu.memory_space<vmem>>, vector<16x256xbf16>
    tpu.vector_store %arg11[%c96, %c0_44], %57 {strides = array<i32>} : memref<208x256xbf16, #tpu.memory_space<vmem>>, vector<16x256xbf16>,
    %c0_45 = arith.constant 0 : index
    %c0_46 = arith.constant 0 : index
    %59 = vector.load %arg11[%c0_45, %c0_46] : memref<208x256xbf16, #tpu.memory_space<vmem>>, vector<96x256xbf16>
    %c0_47 = arith.constant 0 : index
    %c0_48 = arith.constant 0 : index
    %c0_49 = arith.constant 0 : index
    %60 = vector.load %arg6[%c0_47, %c0_48, %c0_49] : memref<3x256x128xbf16, #tpu.memory_space<vmem>>, vector<1x256x128xbf16>
    %61 = vector.shape_cast %60 : vector<1x256x128xbf16> to vector<256x128xbf16>
    %cst_50 = arith.constant dense<0.000000e+00> : vector<96x128xf32>
    %62 = tpu.matmul %59, %61, %cst_50 {dimension_numbers = #tpu.dot_dimension_numbers<[1], [0], [0], [1], [0, 0, 1, 1], [], []>} : vector<96x256xbf16>, vector<256x128xbf16>, vector<96x128xf32> -> vector<96x128xf32>
    %c112_51 = arith.constant 112 : index
    %c0_52 = arith.constant 0 : index
    %63 = vector.load %arg11[%c112_51, %c0_52] : memref<208x256xbf16, #tpu.memory_space<vmem>>, vector<96x256xbf16>
    %c1_53 = arith.constant 1 : index
    %c0_54 = arith.constant 0 : index
    %c0_55 = arith.constant 0 : index
    %64 = vector.load %arg6[%c1_53, %c0_54, %c0_55] : memref<3x256x128xbf16, #tpu.memory_space<vmem>>, vector<1x256x128xbf16>
    %65 = vector.shape_cast %64 : vector<1x256x128xbf16> to vector<256x128xbf16>
    %cst_56 = arith.constant dense<0.000000e+00> : vector<96x128xf32>
    %66 = tpu.matmul %63, %65, %cst_56 {dimension_numbers = #tpu.dot_dimension_numbers<[1], [0], [0], [1], [0, 0, 1, 1], [], []>} : vector<96x256xbf16>, vector<256x128xbf16>, vector<96x128xf32> -> vector<96x128xf32>
    %67 = arith.addf %62, %66 : vector<96x128xf32>
    %c16_57 = arith.constant 16 : index
    %c0_58 = arith.constant 0 : index
    %68 = vector.load %arg11[%c16_57, %c0_58] : memref<208x256xbf16, #tpu.memory_space<vmem>>, vector<96x256xbf16>
    %c2_59 = arith.constant 2 : index
    %c0_60 = arith.constant 0 : index
    %c0_61 = arith.constant 0 : index
    %69 = vector.load %arg6[%c2_59, %c0_60, %c0_61] : memref<3x256x128xbf16, #tpu.memory_space<vmem>>, vector<1x256x128xbf16>
    %70 = vector.shape_cast %69 : vector<1x256x128xbf16> to vector<256x128xbf16>
    %cst_62 = arith.constant dense<0.000000e+00> : vector<96x128xf32>
    %71 = tpu.matmul %68, %70, %cst_62 {dimension_numbers = #tpu.dot_dimension_numbers<[1], [0], [0], [1], [0, 0, 1, 1], [], []>} : vector<96x256xbf16>, vector<256x128xbf16>, vector<96x128xf32> -> vector<96x128xf32>
    %72 = arith.addf %67, %71 : vector<96x128xf32>
    %c0_63 = arith.constant 0 : index
    %c0_64 = arith.constant 0 : index
    %73 = vector.load %arg7[%c0_63, %c0_64] : memref<1x128xf32, #tpu.memory_space<vmem>>, vector<1x128xf32>
    %74 = vector.broadcast %73 : vector<1x128xf32> to vector<96x128xf32>
    %75 = arith.addf %72, %74 : vector<96x128xf32>
    %cst_65 = arith.constant 0.000000e+00 : f32
    %76 = vector.broadcast %cst_65 : f32 to vector<96x128xf32>
    %77 = arith.maximumf %75, %76 : vector<96x128xf32>
    %c0_66 = arith.constant 0 : index
    %c0_67 = arith.constant 0 : index
    %78 = vector.load %arg8[%c0_66, %c0_67] : memref<128x10xf32, #tpu.memory_space<vmem>>, vector<128x10xf32>
    %cst_68 = arith.constant dense<0.000000e+00> : vector<96x10xf32>
    %79 = tpu.matmul %77, %78, %cst_68 {dimension_numbers = #tpu.dot_dimension_numbers<[1], [0], [0], [1], [0, 0, 1, 1], [], []>} : vector<96x128xf32>, vector<128x10xf32>, vector<96x10xf32> -> vector<96x10xf32>
    %80 = vector.extract_strided_slice %79 {offsets = [0, 0], sizes = [16, 10], strides = [1, 1]} : vector<96x10xf32> to vector<16x10xf32>
    %81 = vector.extract_strided_slice %79 {offsets = [16, 0], sizes = [16, 10], strides = [1, 1]} : vector<96x10xf32> to vector<16x10xf32>
    %82 = arith.addf %80, %81 : vector<16x10xf32>
    %83 = vector.extract_strided_slice %79 {offsets = [32, 0], sizes = [16, 10], strides = [1, 1]} : vector<96x10xf32> to vector<16x10xf32>
    %84 = arith.addf %82, %83 : vector<16x10xf32>
    %85 = vector.extract_strided_slice %79 {offsets = [48, 0], sizes = [16, 10], strides = [1, 1]} : vector<96x10xf32> to vector<16x10xf32>
    %86 = arith.addf %84, %85 : vector<16x10xf32>
    %87 = vector.extract_strided_slice %79 {offsets = [64, 0], sizes = [16, 10], strides = [1, 1]} : vector<96x10xf32> to vector<16x10xf32>
    %88 = arith.addf %86, %87 : vector<16x10xf32>
    %89 = vector.extract_strided_slice %79 {offsets = [80, 0], sizes = [16, 10], strides = [1, 1]} : vector<96x10xf32> to vector<16x10xf32>
    %90 = arith.addf %88, %89 : vector<16x10xf32>
    %c0_69 = arith.constant 0 : index
    %c0_70 = arith.constant 0 : index
    %c0_71 = arith.constant 0 : index
    %91 = vector.load %arg9[%c0_69, %c0_70, %c0_71] : memref<1x16x10xf32, #tpu.memory_space<vmem>>, vector<1x16x10xf32>
    %92 = vector.shape_cast %91 : vector<1x16x10xf32> to vector<16x10xf32>
    %93 = vector.shape_cast %90 : vector<16x10xf32> to vector<1x16x10xf32>
    tpu.vector_store %arg9[%c0_69, %c0_70, %c0_71], %93 {strides = array<i32>} : memref<1x16x10xf32, #tpu.memory_space<vmem>>, vector<1x16x10xf32>,
    return
  }
  func.func @transform_0(%arg0: i32) -> (i32, i32, i32) {
    %c0_i32 = arith.constant 0 : i32
    %c0_i32_0 = arith.constant 0 : i32
    %c0_i32_1 = arith.constant 0 : i32
    return %arg0, %c0_i32, %c0_i32_0 : i32, i32, i32
  }
  func.func @transform_1(%arg0: i32) -> (i32, i32) {
    %c0_i32 = arith.constant 0 : i32
    %c0_i32_0 = arith.constant 0 : i32
    %c0_i32_1 = arith.constant 0 : i32
    return %c0_i32, %c0_i32_0 : i32, i32
  }
  func.func @transform_2(%arg0: i32) -> (i32, i32) {
    %c0_i32 = arith.constant 0 : i32
    %c0_i32_0 = arith.constant 0 : i32
    %c0_i32_1 = arith.constant 0 : i32
    return %c0_i32, %c0_i32_0 : i32, i32
  }
  func.func @transform_3(%arg0: i32) -> (i32, i32, i32) {
    %c0_i32 = arith.constant 0 : i32
    %c0_i32_0 = arith.constant 0 : i32
    %c0_i32_1 = arith.constant 0 : i32
    %c0_i32_2 = arith.constant 0 : i32
    return %c0_i32, %c0_i32_0, %c0_i32_1 : i32, i32, i32
  }
  func.func @transform_4(%arg0: i32) -> (i32, i32) {
    %c0_i32 = arith.constant 0 : i32
    %c0_i32_0 = arith.constant 0 : i32
    %c0_i32_1 = arith.constant 0 : i32
    return %c0_i32, %c0_i32_0 : i32, i32
  }
  func.func @transform_5(%arg0: i32) -> (i32, i32, i32) {
    %c0_i32 = arith.constant 0 : i32
    %c0_i32_0 = arith.constant 0 : i32
    %c0_i32_1 = arith.constant 0 : i32
    %c0_i32_2 = arith.constant 0 : i32
    return %c0_i32, %c0_i32_0, %c0_i32_1 : i32, i32, i32
  }
  func.func @transform_6(%arg0: i32) -> (i32, i32) {
    %c0_i32 = arith.constant 0 : i32
    %c0_i32_0 = arith.constant 0 : i32
    %c0_i32_1 = arith.constant 0 : i32
    return %c0_i32, %c0_i32_0 : i32, i32
  }
  func.func @transform_7(%arg0: i32) -> (i32, i32) {
    %c0_i32 = arith.constant 0 : i32
    %c0_i32_0 = arith.constant 0 : i32
    %c0_i32_1 = arith.constant 0 : i32
    return %c0_i32, %c0_i32_0 : i32, i32
  }
  func.func @transform_8(%arg0: i32) -> (i32, i32, i32) {
    %c0_i32 = arith.constant 0 : i32
    %c0_i32_0 = arith.constant 0 : i32
    %c0_i32_1 = arith.constant 0 : i32
    return %arg0, %c0_i32, %c0_i32_0 : i32, i32, i32
  }
}

</mosaic_0001>

<bundles_post_ra>
// kernel: tile.23
= control target key start
LH: loop header
LB: loop body
LE: loop exit
PB: predicated region body
PF: predicated region fallthrough
CT: control target
= control target key end

     0   :  { %s40_s0 = inlined_call_operand.vmem [shape: f32[16], index: 0, kind: input, shape index: {}]   ;;  %s41_s1 = inlined_call_operand.vmem [shape: f32[32,16], index: 1, kind: output, shape index: {}]  }
   0x1   :  { %v4_v0 = vld [vmem:[%s40_s0] ss:$0 sm:$0xff] }
   0x2   :  { %5 = vst [vmem:[%s41_s1] sm:$0xff] %v4_v0 }
   0x3   :  { %12 = vst [vmem:[%s41_s1 + $0x8] sm:$0xff] %v4_v0 }
   0x4   :  { %13 = vst [vmem:[%s41_s1 + $0x10] sm:$0xff] %v4_v0 }
   0x5   :  { %14 = vst [vmem:[%s41_s1 + $0x18] sm:$0xff] %v4_v0 }

// kernel: tile.24
= control target key start
LH: loop header
LB: loop body
LE: loop exit
PB: predicated region body
PF: predicated region fallthrough
CT: control target
= control target key end

     0   :  { %s88_s8 = smov 112   ;;  %s89_s11 = smov 80   ;;  %vm3_vm0 = vcmask 130048   ;;  %vm9_vm1 = vcmask 1048448   ;;  %vm15_vm2 = vcmask 917248   ;;  %vm21_vm3 = vcmask 786048   ;;  %s141_s0 = inlined_call_operand.vmem [shape: f32[32,16], index: 0, kind: input, shape index: {}]   ;;  %s142_s1 = inlined_call_operand.vmem [shape: f32[1,512], index: 1, kind: output, shape index: {}]  }
   0x1   :  { %v71_v0 = vld [vmem:[%s141_s0 + $0x7] ss:$8 sm:$0xf]   ;;  %v73_v1 = vld [vmem:[%s141_s0 + $0x5] ss:$8 sm:$0xf]  }
   0x2   :  { %7 = vrot.lane.b32.xlu0 %v71_v0, %s88_s8  ;;  %19 = vrot.lane.b32.xlu1 %v73_v1, %s89_s11  ;;  %v75_v2 = vld [vmem:[%s141_s0 + $0x3] ss:$8 sm:$0xf]   ;;  %s90_s14 = smov 48   ;;  %s91_s19 = smov 96   ;;  %vm27_vm4 = vcmask 654848  }
   0x3   :  { %31 = vrot.lane.b32.xlu2 %v75_v2, %s90_s14  ;;  %v72_v3 = vld [vmem:[%s141_s0 + $0x6] ss:$8 sm:$0xf]   ;;  %v74_v4 = vld [vmem:[%s141_s0 + $0x4] ss:$8 sm:$0xf]  }
   0x4   :  { %s92_s20 = smov 64   ;;  %v76_v5 = vld [vmem:[%s141_s0 + $0x2] ss:$8 sm:$0xf]   ;;  %s93_s23 = smov 32   ;;  %vm33_vm5 = vcmask 523648  }
   0x5   :  { %v77_v6 = vld [vmem:[%s141_s0 + $0x1] ss:$8 sm:$0xf]   ;;  %s94_s26 = smov 16   ;;  %vm39_vm6 = vcmask 392448   ;;  %vm45_vm7 = vcmask 261248  }
   0x6   :  { %v2_v7 = vld [vmem:[%s141_s0] ss:$8 sm:$0xf]  }
   0x7   :  { %4 = vst.msk [vmem:[#allocation0] ss:$8 sm:$0xf] %vm3_vm0, %v2_v7  }
   0xa   :  { %13 = vrot.lane.b32.xlu0 %v72_v3, %s91_s19  ;;  %25 = vrot.lane.b32.xlu1 %v74_v4, %s92_s20 }
   0xb   :  { %37 = vrot.lane.b32.xlu2 %v76_v5, %s93_s23 }
  0x12   :  { %43 = vrot.lane.b32.xlu0 %v77_v6, %s94_s26 }
  0x5d   :  { %v32_v8 = vpop.permute.xlu2 %31  }
  0x65   :  { %v38_v9 = vpop.permute.xlu2 %37  }
  0x74   :  { %v8_v10 = vpop.permute.xlu0 %7   ;;  %v20_v11 = vpop.permute.xlu1 %19  }
  0x75   :  { %10 = vst.msk [vmem:[#allocation0] ss:$8 sm:$0xf] %vm9_vm1, %v8_v10  }
  0x7c   :  { %v14_v12 = vpop.permute.xlu0 %13   ;;  %v26_v13 = vpop.permute.xlu1 %25  }
  0x7d   :  { %16 = vst.msk [vmem:[#allocation0] ss:$8 sm:$0xf] %vm15_vm2, %v14_v12  }
  0x7e   :  { %22 = vst.msk [vmem:[#allocation0] ss:$8 sm:$0xf] %vm21_vm3, %v20_v11  }
  0x7f   :  { %28 = vst.msk [vmem:[#allocation0] ss:$8 sm:$0xf] %vm27_vm4, %v26_v13  }
  0x80   :  { %34 = vst.msk [vmem:[#allocation0] ss:$8 sm:$0xf] %vm33_vm5, %v32_v8  }
  0x81   :  { %40 = vst.msk [vmem:[#allocation0] ss:$8 sm:$0xf] %vm39_vm6, %v38_v9  }
  0x84   :  { %v44_v14 = vpop.permute.xlu0 %43  }
  0x85   :  { %46 = vst.msk [vmem:[#allocation0] ss:$8 sm:$0xf] %vm45_vm7, %v44_v14  }
  0x8c   :  { %v49_v15 = vld [vmem:[#allocation0] sm:$0x1]  ;;  %v54_v16 = vld [vmem:[#allocation0 + $0x8] sm:$0x1]  ;;  %v60_v17 = vld [vmem:[#allocation0 + $0x10] sm:$0x1] }
  0x8d   :  { %52 = vst [vmem:[%s142_s1] sm:$0x1] %v49_v15  ;;  %v66_v18 = vld [vmem:[#allocation0 + $0x18] sm:$0x1] }
  0x8e   :  { %78 = vst [vmem:[%s142_s1 + $0x1] sm:$0x1] %v54_v16 }
  0x8f   :  { %79 = vst [vmem:[%s142_s1 + $0x2] sm:$0x1] %v60_v17 }
  0x90   :  { %80 = vst [vmem:[%s142_s1 + $0x3] sm:$0x1] %v66_v18 }

// kernel: tile.28
= control target key start
LH: loop header
LB: loop body
LE: loop exit
PB: predicated region body
PF: predicated region fallthrough
CT: control target
= control target key end

     0   :  { %s28_s0 = inlined_call_operand.vmem [shape: f32[16], index: 0, kind: input, shape index: {}]   ;;  %s29_s1 = inlined_call_operand.vmem [shape: f32[16,16], index: 1, kind: output, shape index: {}]  }
   0x1   :  { %v4_v0 = vld [vmem:[%s28_s0] ss:$0 sm:$0xff] }
   0x2   :  { %5 = vst [vmem:[%s29_s1] sm:$0xff] %v4_v0 }
   0x3   :  { %8 = vst [vmem:[%s29_s1 + $0x8] sm:$0xff] %v4_v0 }

// kernel: tile.29
= control target key start
LH: loop header
LB: loop body
LE: loop exit
PB: predicated region body
PF: predicated region fallthrough
CT: control target
= control target key end

     0   :  { %s7_s6 = smov 3  ;;  %s21_s9 = smov 3  ;;  %vm4_vm0 = vcmask 130048   ;;  %vm11_vm1 = vcmask 1048448   ;;  %vm18_vm2 = vcmask 917248   ;;  %vm25_vm3 = vcmask 786048   ;;  %s129_s0 = inlined_call_operand.vmem [shape: f32[16,16], index: 0, kind: input, shape index: {}]   ;;  %s130_s1 = inlined_call_operand.vmem [shape: f32[1,256], index: 1, kind: output, shape index: {}]  }
   0x1   :  { %v67_v0 = vld [vmem:[%s129_s0 + $0x7] ss:$8 sm:%s7_s6]   ;;  %s82_s10 = smov 112   ;;  %v69_v1 = vld [vmem:[%s129_s0 + $0x5] ss:$8 sm:%s21_s9]   ;;  %s83_s13 = smov 80  }
   0x2   :  { %9 = vrot.lane.b32.xlu0 %v67_v0, %s82_s10  ;;  %23 = vrot.lane.b32.xlu1 %v69_v1, %s83_s13  ;;  %s14_s14 = smov 3  ;;  %s28_s15 = smov 3  ;;  %vm32_vm4 = vcmask 654848   ;;  %vm39_vm5 = vcmask 523648   ;;  %vm46_vm6 = vcmask 392448   ;;  %vm53_vm7 = vcmask 261248  }
   0x3   :  { %s35_s16 = smov 3  ;;  %v68_v3 = vld [vmem:[%s129_s0 + $0x6] ss:$8 sm:%s14_s14]   ;;  %s84_s21 = smov 48   ;;  %v70_v4 = vld [vmem:[%s129_s0 + $0x4] ss:$8 sm:%s28_s15]  }
   0x4   :  { %v71_v2 = vld [vmem:[%s129_s0 + $0x3] ss:$8 sm:%s35_s16]   ;;  %s42_s24 = smov 3  ;;  %s85_s25 = smov 96  }
   0x5   :  { %37 = vrot.lane.b32.xlu2 %v71_v2, %s84_s21  ;;  %s86_s26 = smov 64   ;;  %s49_s27 = smov 3  ;;  %v72_v5 = vld [vmem:[%s129_s0 + $0x2] ss:$8 sm:%s42_s24]  }
   0x6   :  { %v73_v6 = vld [vmem:[%s129_s0 + $0x1] ss:$8 sm:%s49_s27]   ;;  %s87_s3 = smov 32   ;;  %s88_s4 = smov 16  }
   0x7   :  { %s2_s5 = smov 3 }
   0x8   :  { %v3_v7 = vld [vmem:[%s129_s0] ss:$8 sm:%s2_s5]  }
   0x9   :  { %5 = vst.msk [vmem:[#allocation0] ss:$8 sm:$0x3] %vm4_vm0, %v3_v7  }
   0xa   :  { %16 = vrot.lane.b32.xlu0 %v68_v3, %s85_s25  ;;  %30 = vrot.lane.b32.xlu1 %v70_v4, %s86_s26 }
   0xd   :  { %44 = vrot.lane.b32.xlu2 %v72_v5, %s87_s3 }
  0x12   :  { %51 = vrot.lane.b32.xlu0 %v73_v6, %s88_s4 }
  0x5f   :  { %v38_v8 = vpop.permute.xlu2 %37  }
  0x67   :  { %v45_v9 = vpop.permute.xlu2 %44  }
  0x74   :  { %v10_v10 = vpop.permute.xlu0 %9   ;;  %v24_v11 = vpop.permute.xlu1 %23  }
  0x75   :  { %12 = vst.msk [vmem:[#allocation0] ss:$8 sm:$0x3] %vm11_vm1, %v10_v10  }
  0x7c   :  { %v17_v12 = vpop.permute.xlu0 %16   ;;  %v31_v13 = vpop.permute.xlu1 %30  }
  0x7d   :  { %19 = vst.msk [vmem:[#allocation0] ss:$8 sm:$0x3] %vm18_vm2, %v17_v12  }
  0x7e   :  { %26 = vst.msk [vmem:[#allocation0] ss:$8 sm:$0x3] %vm25_vm3, %v24_v11  }
  0x7f   :  { %33 = vst.msk [vmem:[#allocation0] ss:$8 sm:$0x3] %vm32_vm4, %v31_v13  }
  0x80   :  { %40 = vst.msk [vmem:[#allocation0] ss:$8 sm:$0x3] %vm39_vm5, %v38_v8  }
  0x81   :  { %47 = vst.msk [vmem:[#allocation0] ss:$8 sm:$0x3] %vm46_vm6, %v45_v9  }
  0x84   :  { %v52_v14 = vpop.permute.xlu0 %51  }
  0x85   :  { %54 = vst.msk [vmem:[#allocation0] ss:$8 sm:$0x3] %vm53_vm7, %v52_v14  }
  0x8c   :  { %v57_v15 = vld [vmem:[#allocation0] sm:$0x1]  ;;  %v62_v16 = vld [vmem:[#allocation0 + $0x8] sm:$0x1] }
  0x8d   :  { %60 = vst [vmem:[%s130_s1] sm:$0x1] %v57_v15 }
  0x8e   :  { %74 = vst [vmem:[%s130_s1 + $0x1] sm:$0x1] %v62_v16 }

// kernel: tile.33
= control target key start
LH: loop header
LB: loop body
LE: loop exit
PB: predicated region body
PF: predicated region fallthrough
CT: control target
= control target key end

     0   :  { %s22_s0 = inlined_call_operand.vmem [shape: f32[16], index: 0, kind: input, shape index: {}]   ;;  %s23_s1 = inlined_call_operand.vmem [shape: f32[8,16], index: 1, kind: output, shape index: {}]  }
   0x1   :  { %v4_v0 = vld [vmem:[%s22_s0] ss:$0 sm:$0xff] }
   0x2   :  { %5 = vst [vmem:[%s23_s1] sm:$0xff] %v4_v0 }

// kernel: tile.34
= control target key start
LH: loop header
LB: loop body
LE: loop exit
PB: predicated region body
PF: predicated region fallthrough
CT: control target
= control target key end

     0   :  { %s67_s10 = smov 112   ;;  %s68_s11 = smov 80   ;;  %vm3_vm0 = vcmask 130048   ;;  %vm9_vm1 = vcmask 1048448   ;;  %vm15_vm2 = vcmask 917248   ;;  %vm21_vm3 = vcmask 786048   ;;  %s111_s0 = inlined_call_operand.vmem [shape: f32[8,16], index: 0, kind: input, shape index: {}]   ;;  %s112_s1 = inlined_call_operand.vmem [shape: f32[1,128], index: 1, kind: output, shape index: {}]  }
   0x1   :  { %v53_v0 = vld [vmem:[%s111_s0 + $0x7] sm:$0x1]   ;;  %v55_v1 = vld [vmem:[%s111_s0 + $0x5] sm:$0x1]   ;;  %v57_v2 = vld [vmem:[%s111_s0 + $0x3] sm:$0x1]  }
   0x2   :  { %7 = vrot.lane.b32.xlu0 %v53_v0, %s67_s10  ;;  %19 = vrot.lane.b32.xlu1 %v55_v1, %s68_s11  ;;  %s69_s14 = smov 48   ;;  %v54_v3 = vld [vmem:[%s111_s0 + $0x6] sm:$0x1]   ;;  %v56_v4 = vld [vmem:[%s111_s0 + $0x4] sm:$0x1]   ;;  %s70_s21 = smov 96  }
   0x3   :  { %31 = vrot.lane.b32.xlu2 %v57_v2, %s69_s14  ;;  %v58_v5 = vld [vmem:[%s111_s0 + $0x2] sm:$0x1]   ;;  %s71_s22 = smov 64   ;;  %s72_s23 = smov 32   ;;  %v59_v6 = vld [vmem:[%s111_s0 + $0x1] sm:$0x1]  }
   0x4   :  { %s73_s26 = smov 16   ;;  %v2_v7 = vld [vmem:[%s111_s0] sm:$0x1]   ;;  %vm27_vm4 = vcmask 654848   ;;  %vm33_vm5 = vcmask 523648   ;;  %vm39_vm6 = vcmask 392448  }
   0x5   :  { %4 = vst.msk [vmem:[#allocation0] sm:$0x1] %vm3_vm0, %v2_v7   ;;  %vm45_vm7 = vcmask 261248  }
   0xa   :  { %13 = vrot.lane.b32.xlu0 %v54_v3, %s70_s21  ;;  %25 = vrot.lane.b32.xlu1 %v56_v4, %s71_s22 }
   0xb   :  { %37 = vrot.lane.b32.xlu2 %v58_v5, %s72_s23 }
  0x12   :  { %43 = vrot.lane.b32.xlu0 %v59_v6, %s73_s26 }
  0x5d   :  { %v32_v8 = vpop.permute.xlu2 %31  }
  0x65   :  { %v38_v9 = vpop.permute.xlu2 %37  }
  0x74   :  { %v8_v10 = vpop.permute.xlu0 %7   ;;  %v20_v11 = vpop.permute.xlu1 %19  }
  0x75   :  { %10 = vst.msk [vmem:[#allocation0] sm:$0x1] %vm9_vm1, %v8_v10  }
  0x7c   :  { %v14_v12 = vpop.permute.xlu0 %13   ;;  %v26_v13 = vpop.permute.xlu1 %25  }
  0x7d   :  { %16 = vst.msk [vmem:[#allocation0] sm:$0x1] %vm15_vm2, %v14_v12  }
  0x7e   :  { %22 = vst.msk [vmem:[#allocation0] sm:$0x1] %vm21_vm3, %v20_v11  }
  0x7f   :  { %28 = vst.msk [vmem:[#allocation0] sm:$0x1] %vm27_vm4, %v26_v13  }
  0x80   :  { %34 = vst.msk [vmem:[#allocation0] sm:$0x1] %vm33_vm5, %v32_v8  }
  0x81   :  { %40 = vst.msk [vmem:[#allocation0] sm:$0x1] %vm39_vm6, %v38_v9  }
  0x84   :  { %v44_v14 = vpop.permute.xlu0 %43  }
  0x85   :  { %46 = vst.msk [vmem:[#allocation0] sm:$0x1] %vm45_vm7, %v44_v14  }
  0x8c   :  { %v49_v15 = vld [vmem:[#allocation0] sm:$0x1] }
  0x8d   :  { %52 = vst [vmem:[%s112_s1] sm:$0x1] %v49_v15 }

// kernel: mnist_cnn_forward.1
= control target key start
LH: loop header
LB: loop body
LE: loop exit
PB: predicated region body
PF: predicated region fallthrough
CT: control target
= control target key end

     0   :  { %vm598_vm0 = vcmask 523264   ;;  %vm6914_vm1 = vcmask 80896   ;;  %s15029_s1 = inlined_call_operand.vmem [shape: bf16[192,512], index: 1, kind: input, shape index: {}]   ;;  %s15030_s0 = inlined_call_operand.vmem [shape: bf16[1,384,192], index: 0, kind: input, shape index: {}]   ;;  %s15031_s2 = inlined_call_operand.vmem [shape: f32[1,512], index: 2, kind: input, shape index: {}]   ;;  %s15032_s3 = inlined_call_operand.vmem [shape: bf16[3,512,256], index: 3, kind: input, shape index: {}]   ;;  %s15033_s5 = inlined_call_operand.vmem [shape: bf16[3,256,128], index: 5, kind: input, shape index: {}]   ;;  %s15034_s4 = inlined_call_operand.vmem [shape: f32[1,256], index: 4, kind: input, shape index: {}]   ;;  %s15035_s6 = inlined_call_operand.vmem [shape: f32[1,128], index: 6, kind: input, shape index: {}]   ;;  %s15036_s7 = inlined_call_operand.vmem [shape: f32[128,10], index: 7, kind: input, shape index: {}]   ;;  %s15037_s8 = inlined_call_operand.vmem [shape: f32[1,16,10], index: 8, kind: output, shape index: {}]  }
   0x1   :  { %v7227_v0 = vld [vmem:[%s15029_s1 + $0xe0] sm:$0xf]  ;;  %v9351_v1 = vld [vmem:[%s15029_s1 + $0xec] sm:$0xf0]  ;;  %v9365_v5 = vld [vmem:[%s15029_s1 + $0x164] sm:$0xf] }
   0x2   :  { %v7291_v2 = vld [vmem:[%s15029_s1 + $0x160] sm:$0xf]  ;;  %v7228_v3 = vor.u32 %v9351_v1, %v7227_v0  ;;  %v9367_v4 = vld [vmem:[%s15029_s1 + $0x16c] sm:$0xf0]  ;;  %v7293_v6 = vld [vmem:[%s15029_s1 + $0x170] sm:$0xf0] }
   0x3   :  { %v7292_v7 = vor.u32 %v9367_v4, %v7291_v2  ;;  %v7296_v8 = vor.u32 %v9365_v5, %v7293_v6  ;;  %v7211_v9 = vld [vmem:[%s15029_s1 + $0xc0] sm:$0xf]  ;;  %v9347_v10 = vld [vmem:[%s15029_s1 + $0xcc] sm:$0xf0]  ;;  %v9361_v14 = vld [vmem:[%s15029_s1 + $0x144] sm:$0xf] }
   0x4   :  { %v7275_v11 = vld [vmem:[%s15029_s1 + $0x140] sm:$0xf]  ;;  %9789 = vmatpush.bf16.msra.mxu2 %v7228_v3  ;;  %v7212_v12 = vor.u32 %v9347_v10, %v7211_v9  ;;  %v9363_v13 = vld [vmem:[%s15029_s1 + $0x14c] sm:$0xf0]  ;;  %v7277_v15 = vld [vmem:[%s15029_s1 + $0x150] sm:$0xf0]  ;;  %671 = vmatpush.bf16.msra.mxu0 %v7228_v3 }
   0x5   :  { %804 = vmatpush.bf16.msra.mxu1 %v7292_v7  ;;  %1062 = vmatpush.bf16.msra.mxu3 %v7296_v8  ;;  %v7276_v16 = vor.u32 %v9363_v13, %v7275_v11  ;;  %v7280_v17 = vor.u32 %v9361_v14, %v7277_v15  ;;  %v7195_v18 = vld [vmem:[%s15029_s1 + $0xa0] sm:$0xf]  ;;  %v9343_v19 = vld [vmem:[%s15029_s1 + $0xac] sm:$0xf0]  ;;  %v9357_v22 = vld [vmem:[%s15029_s1 + $0x124] sm:$0xf] }
   0x6   :  { %v7259_v20 = vld [vmem:[%s15029_s1 + $0x120] sm:$0xf]  ;;  %v9359_v21 = vld [vmem:[%s15029_s1 + $0x12c] sm:$0xf0]  ;;  %v7261_v23 = vld [vmem:[%s15029_s1 + $0x130] sm:$0xf0]  ;;  %v7196_v24 = vor.u32 %v9343_v19, %v7195_v18 }
   0x7   :  { %v7260_v25 = vor.u32 %v9359_v21, %v7259_v20  ;;  %v7264_v26 = vor.u32 %v9357_v22, %v7261_v23  ;;  %v7179_v27 = vld [vmem:[%s15029_s1 + $0x80] sm:$0xf]  ;;  %v9339_v28 = vld [vmem:[%s15029_s1 + $0x8c] sm:$0xf0]  ;;  %v9353_v31 = vld [vmem:[%s15029_s1 + $0x104] sm:$0xf] }
   0x8   :  { %9790 = vmatpush.bf16.msra.mxu2 %v7212_v12  ;;  %672 = vmatpush.bf16.msra.mxu0 %v7212_v12  ;;  %v7243_v29 = vld [vmem:[%s15029_s1 + $0x100] sm:$0xf]  ;;  %v9355_v30 = vld [vmem:[%s15029_s1 + $0x10c] sm:$0xf0]  ;;  %v7245_v32 = vld [vmem:[%s15029_s1 + $0x110] sm:$0xf0]  ;;  %v7180_v33 = vor.u32 %v9339_v28, %v7179_v27 }
   0x9   :  { %805 = vmatpush.bf16.msra.mxu1 %v7276_v16  ;;  %1063 = vmatpush.bf16.msra.mxu3 %v7280_v17  ;;  %v7244_v34 = vor.u32 %v9355_v30, %v7243_v29  ;;  %v7248_v35 = vor.u32 %v9353_v31, %v7245_v32  ;;  %v9273_v36 = vld [vmem:[%s15030_s0 + $0x4] sm:$0xf]  ;;  %v6925_v37 = vld [vmem:[%s15030_s0 + $0x8] sm:$0xf0]  ;;  %v7163_v38 = vld [vmem:[%s15029_s1 + $0x60] sm:$0xf] }
   0xa   :  { %v9335_v39 = vld [vmem:[%s15029_s1 + $0x6c] sm:$0xf0]  ;;  %v9942_v40 = vor.u32 %v9273_v36, %v6925_v37  ;;  %v7147_v42 = vld [vmem:[%s15029_s1 + $0x40] sm:$0xf]  ;;  %v9349_v50 = vld [vmem:[%s15029_s1 + $0xe4] sm:$0xf] }
   0xb   :  { %v7164_v41 = vor.u32 %v9335_v39, %v7163_v38  ;;  %v9331_v43 = vld [vmem:[%s15029_s1 + $0x4c] sm:$0xf0]  ;;  %v7131_v45 = vld [vmem:[%s15029_s1 + $0x20] sm:$0xf]  ;;  %v7229_v51 = vld [vmem:[%s15029_s1 + $0xf0] sm:$0xf0] }
   0xc   :  { %9791 = vmatpush.bf16.msra.mxu2 %v7196_v24  ;;  %673 = vmatpush.bf16.msra.mxu0 %v7196_v24  ;;  %v7148_v44 = vor.u32 %v9331_v43, %v7147_v42  ;;  %v9327_v46 = vld [vmem:[%s15029_s1 + $0x2c] sm:$0xf0]  ;;  %v7115_v48 = vld [vmem:[%s15029_s1] sm:$0xf]  ;;  %v9318_v54 = vld [vmem:[%s15030_s0 + $0x164] sm:$0xf0]  ;;  %v7232_v57 = vor.u32 %v9349_v50, %v7229_v51 }
   0xd   :  { %806 = vmatpush.bf16.msra.mxu1 %v7260_v25  ;;  %1064 = vmatpush.bf16.msra.mxu3 %v7264_v26  ;;  %v7132_v47 = vor.u32 %v9327_v46, %v7131_v45  ;;  %v9323_v49 = vld [vmem:[%s15029_s1 + $0xc] sm:$0xf0]  ;;  %v7099_v52 = vld [vmem:[%s15030_s0 + $0x160] sm:$0xf]  ;;  %v9275_v55 = vld [vmem:[%s15030_s0 + $0x14] sm:$0xf] }
   0xe   :  { %v7116_v53 = vor.u32 %v9323_v49, %v7115_v48  ;;  %v6933_v56 = vld [vmem:[%s15030_s0 + $0x18] sm:$0xf0]  ;;  %v9345_v58 = vld [vmem:[%s15029_s1 + $0xc4] sm:$0xf]  ;;  %v7213_v59 = vld [vmem:[%s15029_s1 + $0xd0] sm:$0xf0]  ;;  %v9990_v60 = vor.u32 %v9318_v54, %v7099_v52 }
   0xf   :  { %v9992_v61 = vor.u32 %v9275_v55, %v6933_v56  ;;  %v7216_v62 = vor.u32 %v9345_v58, %v7213_v59  ;;  %v6923_v63 = vld [vmem:[%s15030_s0] sm:$0xf]  ;;  %v9274_v0 = vld [vmem:[%s15030_s0 + $0x4] sm:$0xf0]  ;;  %v9341_v1 = vld [vmem:[%s15029_s1 + $0xa4] sm:$0xf] }
  0x10   :  { %9792 = vmatpush.bf16.msra.mxu2 %v7180_v33  ;;  %674 = vmatpush.bf16.msra.mxu0 %v7180_v33  ;;  %v7197_v2 = vld [vmem:[%s15029_s1 + $0xb0] sm:$0xf0]  ;;  %v10006_v3 = vor.u32 %v9274_v0, %v6923_v63  ;;  %v7235_v4 = vld [vmem:[%s15029_s1 + $0xe8] sm:$0xf]  ;;  %v9352_v5 = vld [vmem:[%s15029_s1 + $0xf4] sm:$0xf0] }
  0x11   :  { %807 = vmatpush.bf16.msra.mxu1 %v7244_v34  ;;  %1065 = vmatpush.bf16.msra.mxu3 %v7248_v35  ;;  %v7200_v6 = vor.u32 %v9341_v1, %v7197_v2  ;;  %v7236_v7 = vor.u32 %v9352_v5, %v7235_v4  ;;  %v9337_v8 = vld [vmem:[%s15029_s1 + $0x84] sm:$0xf]  ;;  %v7181_v9 = vld [vmem:[%s15029_s1 + $0x90] sm:$0xf0]  ;;  %v7107_v13 = vld [vmem:[%s15030_s0 + $0x170] sm:$0xf] }
  0x12   :  { %v7184_v10 = vor.u32 %v9337_v8, %v7181_v9  ;;  %v9333_v11 = vld [vmem:[%s15029_s1 + $0x64] sm:$0xf]  ;;  %v7165_v12 = vld [vmem:[%s15029_s1 + $0x70] sm:$0xf0]  ;;  %v9320_v14 = vld [vmem:[%s15030_s0 + $0x174] sm:$0xf0] }
  0x13   :  { %v9277_v15 = vld [vmem:[%s15030_s0 + $0x24] sm:$0xf]  ;;  %v6941_v16 = vld [vmem:[%s15030_s0 + $0x28] sm:$0xf0]  ;;  %v7168_v17 = vor.u32 %v9333_v11, %v7165_v12  ;;  %v7149_v19 = vld [vmem:[%s15029_s1 + $0x50] sm:$0xf0]  ;;  %v10050_v20 = vor.u32 %v9320_v14, %v7107_v13 }
  0x14   :  { %7305 = vmatmul.msk.bf16.vlgmr.msra.gmra.mxu1 %vm598_vm0, %v9942_v40  ;;  %7329 = vmatmul.msk.bf16.vlgmr.msra.gmra.mxu3 %vm598_vm0, %v9942_v40  ;;  %v9329_v18 = vld [vmem:[%s15029_s1 + $0x44] sm:$0xf]  ;;  %v10052_v21 = vor.u32 %v9277_v15, %v6941_v16  ;;  %v6931_v23 = vld [vmem:[%s15030_s0 + $0x10] sm:$0xf]  ;;  %v9276_v24 = vld [vmem:[%s15030_s0 + $0x14] sm:$0xf0] }
  0x15   :  { %9793 = vmatpush.bf16.msra.mxu2 %v7164_v41  ;;  %675 = vmatpush.bf16.msra.mxu0 %v7164_v41  ;;  %v7152_v22 = vor.u32 %v9329_v18, %v7149_v19  ;;  %v9325_v25 = vld [vmem:[%s15029_s1 + $0x24] sm:$0xf]  ;;  %v7133_v26 = vld [vmem:[%s15029_s1 + $0x30] sm:$0xf0]  ;;  %v10066_v27 = vor.u32 %v9276_v24, %v6931_v23  ;;  %v6949_v33 = vld [vmem:[%s15030_s0 + $0x38] sm:$0xf0] }
  0x16   :  { %1187 = vmatpush.bf16.msrb.mxu1 %v7236_v7  ;;  %v7136_v28 = vor.u32 %v9325_v25, %v7133_v26  ;;  %v9321_v29 = vld [vmem:[%s15029_s1 + $0x4] sm:$0xf]  ;;  %v7117_v30 = vld [vmem:[%s15029_s1 + $0x10] sm:$0xf0]  ;;  %v6939_v35 = vld [vmem:[%s15030_s0 + $0x20] sm:$0xf] }
  0x17   :  { %v7120_v31 = vor.u32 %v9321_v29, %v7117_v30  ;;  %v9279_v32 = vld [vmem:[%s15030_s0 + $0x34] sm:$0xf]  ;;  %v9278_v36 = vld [vmem:[%s15030_s0 + $0x24] sm:$0xf0]  ;;  %v9368_v39 = vld [vmem:[%s15029_s1 + $0x174] sm:$0xf0] }
  0x18   :  { %v10086_v34 = vor.u32 %v9279_v32, %v6949_v33  ;;  %v10094_v37 = vor.u32 %v9278_v36, %v6939_v35  ;;  %v7299_v38 = vld [vmem:[%s15029_s1 + $0x168] sm:$0xf]  ;;  %v9281_v42 = vld [vmem:[%s15030_s0 + $0x44] sm:$0xf]  ;;  %v6957_v43 = vld [vmem:[%s15030_s0 + $0x48] sm:$0xf0] }
  0x19   :  { %9794 = vmatpush.bf16.msra.mxu2 %v7148_v44  ;;  %676 = vmatpush.bf16.msra.mxu0 %v7148_v44  ;;  %v10108_v41 = vor.u32 %v9368_v39, %v7299_v38  ;;  %v10117_v44 = vor.u32 %v9281_v42, %v6957_v43  ;;  %v6947_v45 = vld [vmem:[%s15030_s0 + $0x30] sm:$0xf]  ;;  %v9280_v46 = vld [vmem:[%s15030_s0 + $0x34] sm:$0xf0]  ;;  %v7219_v48 = vld [vmem:[%s15029_s1 + $0xc8] sm:$0xf] }
  0x1a   :  { %v9348_v49 = vld [vmem:[%s15029_s1 + $0xd4] sm:$0xf0]  ;;  %v9283_v51 = vld [vmem:[%s15030_s0 + $0x54] sm:$0xf]  ;;  %v6965_v52 = vld [vmem:[%s15030_s0 + $0x58] sm:$0xf0] }
  0x1b   :  { %9805 = vmatpush.bf16.msrb.mxu3 %v10108_v41  ;;  %v7220_v50 = vor.u32 %v9348_v49, %v7219_v48  ;;  %v6955_v54 = vld [vmem:[%s15030_s0 + $0x40] sm:$0xf]  ;;  %v9282_v55 = vld [vmem:[%s15030_s0 + $0x44] sm:$0xf0]  ;;  %v7237_v58 = vld [vmem:[%s15029_s1 + $0xf8] sm:$0xf0] }
  0x1c   :  { %v10153_v56 = vor.u32 %v9282_v55, %v6955_v54  ;;  %v6973_v63 = vld [vmem:[%s15030_s0 + $0x68] sm:$0xf0]  ;;  %v6963_v1 = vld [vmem:[%s15030_s0 + $0x50] sm:$0xf]  ;;  %v9284_v2 = vld [vmem:[%s15030_s0 + $0x54] sm:$0xf0] }
  0x1d   :  { %9795 = vmatpush.bf16.msra.mxu2 %v7132_v47  ;;  %677 = vmatpush.bf16.msra.mxu0 %v7132_v47  ;;  %v10125_v47 = vor.u32 %v9280_v46, %v6947_v45  ;;  %v10181_v4 = vor.u32 %v9284_v2, %v6963_v1  ;;  %v9287_v5 = vld [vmem:[%s15030_s0 + $0x74] sm:$0xf]  ;;  %v6971_v8 = vld [vmem:[%s15030_s0 + $0x60] sm:$0xf]  ;;  %v9286_v9 = vld [vmem:[%s15030_s0 + $0x64] sm:$0xf0] }
  0x1e   :  { %1188 = vmatpush.bf16.msrb.mxu1 %v7220_v50  ;;  %v7203_v11 = vld [vmem:[%s15029_s1 + $0xa8] sm:$0xf]  ;;  %v9344_v12 = vld [vmem:[%s15029_s1 + $0xb4] sm:$0xf0]  ;;  %v9289_v14 = vld [vmem:[%s15030_s0 + $0x84] sm:$0xf] }
  0x1f   :  { %v7204_v13 = vor.u32 %v9344_v12, %v7203_v11  ;;  %v6989_v15 = vld [vmem:[%s15030_s0 + $0x88] sm:$0xf0]  ;;  %v6979_v18 = vld [vmem:[%s15030_s0 + $0x70] sm:$0xf]  ;;  %v9288_v19 = vld [vmem:[%s15030_s0 + $0x74] sm:$0xf0] }
  0x20   :  { %v10223_v16 = vor.u32 %v9289_v14, %v6989_v15  ;;  %v9346_v23 = vld [vmem:[%s15029_s1 + $0xcc] sm:$0xf]  ;;  %v7221_v24 = vld [vmem:[%s15029_s1 + $0xd8] sm:$0xf0]  ;;  %v9291_v29 = vld [vmem:[%s15030_s0 + $0x94] sm:$0xf] }
  0x21   :  { %9796 = vmatpush.bf16.msra.mxu2 %v7116_v53  ;;  %678 = vmatpush.bf16.msra.mxu0 %v7116_v53  ;;  %v10145_v53 = vor.u32 %v9283_v51, %v6965_v52  ;;  %v7224_v25 = vor.u32 %v9346_v23, %v7221_v24  ;;  %v6997_v30 = vld [vmem:[%s15030_s0 + $0x98] sm:$0xf0]  ;;  %v6987_v35 = vld [vmem:[%s15030_s0 + $0x80] sm:$0xf]  ;;  %v9290_v36 = vld [vmem:[%s15030_s0 + $0x84] sm:$0xf0] }
  0x22   :  { %1189 = vmatpush.bf16.msrb.mxu1 %v7204_v13  ;;  %v10259_v32 = vor.u32 %v9291_v29, %v6997_v30  ;;  %v10269_v38 = vor.u32 %v9290_v36, %v6987_v35  ;;  %v9293_v46 = vld [vmem:[%s15030_s0 + $0xa4] sm:$0xf]  ;;  %v7005_v48 = vld [vmem:[%s15030_s0 + $0xa8] sm:$0xf0]  ;;  %v6995_v55 = vld [vmem:[%s15030_s0 + $0x90] sm:$0xf] }
  0x23   :  { %v10293_v51 = vor.u32 %v9293_v46, %v7005_v48  ;;  %v9364_v1 = vld [vmem:[%s15029_s1 + $0x154] sm:$0xf0]  ;;  %v7187_v2 = vld [vmem:[%s15029_s1 + $0x88] sm:$0xf]  ;;  %v132_v12 = vld [vmem:[%s15031_s2] sm:$0xf] }
  0x24   :  { %789 = vmatmul.bf16.vlgmr.msra.gmra.mxu2 %v9990_v60  ;;  %7306 = vmatmul.msk.bf16.gmra.mxu1 %vm598_vm0, %v9992_v61  ;;  %v7013_v14 = vld [vmem:[%s15030_s0 + $0xb8] sm:$0xf0]  ;;  %v7003_v30 = vld [vmem:[%s15030_s0 + $0xa0] sm:$0xf]  ;;  %v9294_v35 = vld [vmem:[%s15030_s0 + $0xa4] sm:$0xf0] }
  0x25   :  { %929 = vmatpush.bf16.msrb.mxu2 %v7232_v57  ;;  %7330 = vmatmul.msk.bf16.gmra.mxu3 %vm598_vm0, %v9992_v61  ;;  %v9350_v57 = vld [vmem:[%s15029_s1 + $0xec] sm:$0xf]  ;;  %v10361_v36 = vperm.slane %v132_v12, 1  ;;  %v10363_v46 = vor.u32 %v9294_v35, %v7003_v30 }
  0x26   :  { %679 = vmatmul.bf16.vlgmr.msra.gmra.mxu0 %v10006_v3  ;;  %v7240_v59 = vor.u32 %v9350_v57, %v7237_v58  ;;  %v9292_v57 = vld [vmem:[%s15030_s0 + $0x94] sm:$0xf0]  ;;  %v7021_v30 = vld [vmem:[%s15030_s0 + $0xc8] sm:$0xf0] }
  0x27   :  { %v10306_v58 = vor.u32 %v9292_v57, %v6995_v55  ;;  %15127 = vst [vmem:[#allocation8_spill] sm:$0xff] %v10363_v46 }
  0x28   :  { %1445 = vmatpush.bf16.msrb.mxu0 %v7240_v59 }
  0x29   :  { %930 = vmatpush.bf16.msrb.mxu2 %v7216_v62  ;;  %v9285_v62 = vld [vmem:[%s15030_s0 + $0x64] sm:$0xf] }
  0x2a   :  { %v10173_v0 = vor.u32 %v9285_v62, %v6973_v63  ;;  %v7283_v63 = vld [vmem:[%s15029_s1 + $0x148] sm:$0xf] }
  0x2c   :  { %1446 = vmatpush.bf16.msrb.mxu0 %v7224_v25 }
  0x2d   :  { %931 = vmatpush.bf16.msrb.mxu2 %v7200_v6  ;;  %v6981_v6 = vld [vmem:[%s15030_s0 + $0x78] sm:$0xf0] }
  0x31   :  { %932 = vmatpush.bf16.msrb.mxu2 %v7184_v10  ;;  %v10203_v10 = vor.u32 %v9286_v9, %v6971_v8  ;;  %v10326_v8 = vor.u32 %v9364_v1, %v7283_v63  ;;  %v9340_v9 = vld [vmem:[%s15029_s1 + $0x94] sm:$0xf0]  ;;  %v9342_v63 = vld [vmem:[%s15029_s1 + $0xac] sm:$0xf]  ;;  %v7205_v1 = vld [vmem:[%s15029_s1 + $0xb8] sm:$0xf0] }
  0x32   :  { %v7188_v11 = vor.u32 %v9340_v9, %v7187_v2 }
  0x33   :  { %9806 = vmatpush.bf16.msrb.mxu3 %v10326_v8 }
  0x34   :  { %794 = vmatmul.bf16.gmra.mxu2 %v10050_v20  ;;  %7307 = vmatmul.msk.bf16.gmra.mxu1 %vm598_vm0, %v10052_v21 }
  0x35   :  { %933 = vmatpush.bf16.msrb.mxu2 %v7168_v17  ;;  %7331 = vmatmul.msk.bf16.gmra.mxu3 %vm598_vm0, %v10052_v21 }
  0x36   :  { %684 = vmatmul.bf16.gmra.mxu0 %v10066_v27  ;;  %1190 = vmatpush.bf16.msrb.mxu1 %v7188_v11 }
  0x39   :  { %934 = vmatpush.bf16.msrb.mxu2 %v7152_v22  ;;  %v10233_v22 = vor.u32 %v9288_v19, %v6979_v18  ;;  %v10343_v18 = vperm.slane %v132_v12, 0 }
  0x3d   :  { %935 = vmatpush.bf16.msrb.mxu2 %v7136_v28 }
  0x41   :  { %936 = vmatpush.bf16.msrb.mxu2 %v7120_v31 }
  0x44   :  { %7308 = vmatmul.msk.bf16.gmra.mxu1 %vm598_vm0, %v10086_v34  ;;  %937 = vmatmul.bf16.vlgmr.msrb.gmra.mxu2 %v10006_v3 }
  0x45   :  { %9797 = vmatpush.bf16.msra.mxu2 %v7236_v7  ;;  %7332 = vmatmul.msk.bf16.gmra.mxu3 %vm598_vm0, %v10086_v34  ;;  %v10195_v7 = vor.u32 %v9287_v5, %v6981_v6 }
  0x46   :  { %689 = vmatmul.bf16.gmra.mxu0 %v10094_v37 }
  0x49   :  { %9798 = vmatpush.bf16.msra.mxu2 %v7220_v50 }
  0x4d   :  { %9799 = vmatpush.bf16.msra.mxu2 %v7204_v13  ;;  %v9295_v13 = vld [vmem:[%s15030_s0 + $0xb4] sm:$0xf] }
  0x4e   :  { %v10347_v23 = vor.u32 %v9295_v13, %v7013_v14 }
  0x50   :  { %15126 = vst [vmem:[#allocation7_spill] sm:$0xff] %v10347_v23 }
  0x51   :  { %9800 = vmatpush.bf16.msra.mxu2 %v7188_v11  ;;  %v7208_v11 = vor.u32 %v9342_v63, %v7205_v1 }
  0x53   :  { %1447 = vmatpush.bf16.msrb.mxu0 %v7208_v11 }
  0x54   :  { %7309 = vmatmul.msk.bf16.gmra.mxu1 %vm598_vm0, %v10117_v44  ;;  %942 = vmatmul.bf16.gmra.mxu2 %v10066_v27 }
  0x55   :  { %7333 = vmatmul.msk.bf16.gmra.mxu3 %vm598_vm0, %v10117_v44 }
  0x56   :  { %694 = vmatmul.bf16.gmra.mxu0 %v10125_v47 }
  0x64   :  { %7310 = vmatmul.msk.bf16.gmra.mxu1 %vm598_vm0, %v10145_v53  ;;  %947 = vmatmul.bf16.gmra.mxu2 %v10094_v37 }
  0x65   :  { %7334 = vmatmul.msk.bf16.gmra.mxu3 %vm598_vm0, %v10145_v53 }
  0x66   :  { %699 = vmatmul.bf16.gmra.mxu0 %v10153_v56 }
  0x74   :  { %7311 = vmatmul.msk.bf16.gmra.mxu1 %vm598_vm0, %v10173_v0  ;;  %952 = vmatmul.bf16.gmra.mxu2 %v10125_v47 }
  0x75   :  { %7335 = vmatmul.msk.bf16.gmra.mxu3 %vm598_vm0, %v10173_v0 }
  0x76   :  { %704 = vmatmul.bf16.gmra.mxu0 %v10181_v4 }
  0x84   :  { %7312 = vmatmul.msk.bf16.gmra.mxu1 %vm598_vm0, %v10195_v7  ;;  %957 = vmatmul.bf16.gmra.mxu2 %v10153_v56 }
  0x85   :  { %7336 = vmatmul.msk.bf16.gmra.mxu3 %vm598_vm0, %v10195_v7 }
  0x86   :  { %709 = vmatmul.bf16.gmra.mxu0 %v10203_v10 }
  0x91   :  { %v10225_v17 = vpop.f32.mrf.mxu1 }
  0x94   :  { %7313 = vmatmul.msk.bf16.gmra.mxu1 %vm598_vm0, %v10223_v16  ;;  %962 = vmatmul.bf16.gmra.mxu2 %v10181_v4 }
  0x95   :  { %7337 = vmatmul.msk.bf16.gmra.mxu3 %vm598_vm0, %v10223_v16 }
  0x96   :  { %714 = vmatmul.bf16.gmra.mxu0 %v10233_v22 }
  0x97   :  { %v10247_v26 = vpop.f32.mrf.mxu3 }
  0x99   :  { %v10249_v28 = vpop.f32.mrf.mxu1 }
  0x9f   :  { %v10257_v31 = vpop.f32.mrf.mxu3 }
  0xa1   :  { %v10261_v33 = vpop.f32.mrf.mxu1 }
  0xa3   :  { %v680_v39 = vpop.f32.mrf.mxu0 }
  0xa4   :  { %7314 = vmatmul.msk.bf16.gmra.mxu1 %vm598_vm0, %v10259_v32  ;;  %967 = vmatmul.bf16.gmra.mxu2 %v10203_v10  ;;  %v681_v29 = vadd.f32 %v680_v39, %v10343_v18 }
  0xa5   :  { %7338 = vmatmul.msk.bf16.gmra.mxu3 %vm598_vm0, %v10259_v32 }
  0xa6   :  { %719 = vmatmul.bf16.gmra.mxu0 %v10269_v38  ;;  %v810_v39 = vadd.f32 %v10225_v17, %v681_v29  ;;  %v9297_v29 = vld [vmem:[%s15030_s0 + $0xc4] sm:$0xf] }
  0xa7   :  { %v10277_v42 = vpop.f32.mrf.mxu2 }
  0xa8   :  { %v10279_v43 = vpop.f32.mrf.mxu3  ;;  %v1703_v17 = vmax.f32 %v810_v39, 0.0 }
  0xa9   :  { %v10281_v45 = vpop.f32.mrf.mxu1 }
  0xab   :  { %v682_v52 = vpop.f32.mrf.mxu0 }
  0xac   :  { %v683_v13 = vadd.f32 %v682_v52, %v10343_v18  ;;  %v10392_v52 = vor.u32 %v9297_v29, %v7021_v30 }
  0xae   :  { %15128 = vst [vmem:[#allocation9_spill] sm:$0xff] %v10392_v52 }
  0xaf   :  { %v10289_v49 = vpop.f32.mrf.mxu2 }
  0xb0   :  { %15123 = vst [vmem:[#allocation4_spill] sm:$0xff] %v10289_v49  ;;  %v10291_v50 = vpop.f32.mrf.mxu3 }
  0xb1   :  { %v10295_v54 = vpop.f32.mrf.mxu1 }
  0xb3   :  { %v685_v5 = vpop.f32.mrf.mxu0 }
  0xb4   :  { %7315 = vmatmul.msk.bf16.gmra.mxu1 %vm598_vm0, %v10293_v51  ;;  %972 = vmatmul.bf16.gmra.mxu2 %v10233_v22 }
  0xb5   :  { %7339 = vmatmul.msk.bf16.gmra.mxu3 %vm598_vm0, %v10293_v51 }
  0xb6   :  { %724 = vmatmul.bf16.gmra.mxu0 %v10306_v58 }
  0xb7   :  { %v10311_v59 = vpop.f32.mrf.mxu2 }
  0xb8   :  { %15124 = vst [vmem:[#allocation5_spill] sm:$0xff] %v10311_v59  ;;  %v10313_v62 = vpop.f32.mrf.mxu3 }
  0xb9   :  { %v10324_v6 = vpop.f32.mrf.mxu1 }
  0xbb   :  { %v687_v24 = vpop.f32.mrf.mxu0 }
  0xbf   :  { %v10341_v15 = vpop.f32.mrf.mxu2 }
  0xc0   :  { %15125 = vst [vmem:[#allocation6_spill] sm:$0xff] %v10341_v15  ;;  %v10345_v19 = vpop.f32.mrf.mxu3 }
  0xc1   :  { %v10349_v25 = vpop.f32.mrf.mxu1 }
  0xc3   :  { %v690_v2 = vpop.f32.mrf.mxu0 }
  0xc4   :  { %7316 = vmatmul.msk.bf16.gmra.mxu1 %vm598_vm0, %v10347_v23  ;;  %977 = vmatmul.bf16.gmra.mxu2 %v10269_v38  ;;  %v691_v59 = vadd.f32 %v690_v2, %v10343_v18 }
  0xc5   :  { %7340 = vmatmul.msk.bf16.gmra.mxu3 %vm598_vm0, %v10347_v23 }
  0xc6   :  { %729 = vmatmul.bf16.gmra.mxu0 %v10363_v46  ;;  %v820_v2 = vadd.f32 %v10295_v54, %v691_v59 }
  0xc7   :  { %v938_v48 = vpop.f32.mrf.mxu2 }
  0xc8   :  { %v939_v55 = vadd.f32 %v938_v48, %v10361_v36  ;;  %v10370_v57 = vpop.f32.mrf.mxu3  ;;  %v812_v48 = vadd.f32 %v10249_v28, %v683_v13  ;;  %v7011_v28 = vld [vmem:[%s15030_s0 + $0xb0] sm:$0xf]  ;;  %v1719_v59 = vmax.f32 %v820_v2, 0.0 }
  0xc9   :  { %v10378_v9 = vpop.f32.mrf.mxu1 }
  0xca   :  { %v1068_v12 = vadd.f32 %v10247_v26, %v939_v55  ;;  %v1707_v1 = vmax.f32 %v812_v48, 0.0 }
  0xcb   :  { %v692_v55 = vpop.f32.mrf.mxu0 }
  0xcc   :  { %v1704_v14 = vmax.f32 %v1068_v12, 0.0  ;;  %v686_v12 = vadd.f32 %v685_v5, %v10343_v18 }
  0xce   :  { %v1895_v35 = vpack.c.bf16 %v1704_v14, %v1703_v17  ;;  %v815_v5 = vadd.f32 %v10261_v33, %v686_v12  ;;  %v9299_v33 = vld [vmem:[%s15030_s0 + $0xd4] sm:$0xf] }
  0xcf   :  { %v940_v15 = vpop.f32.mrf.mxu2 }
  0xd0   :  { %1991 = vst [vmem:[#allocation2 + $0x20] sm:$0xff] %v1895_v35  ;;  %v941_v39 = vadd.f32 %v940_v15, %v10361_v36  ;;  %v10390_v26 = vpop.f32.mrf.mxu3  ;;  %v9296_v15 = vld [vmem:[%s15030_s0 + $0xb4] sm:$0xf0] }
  0xd1   :  { %v10394_v63 = vpop.f32.mrf.mxu1  ;;  %v10407_v13 = vor.u32 %v9296_v15, %v7011_v28  ;;  %v688_v28 = vadd.f32 %v687_v24, %v10343_v18 }
  0xd2   :  { %v1070_v11 = vadd.f32 %v10257_v31, %v941_v39  ;;  %v1711_v39 = vmax.f32 %v815_v5, 0.0 }
  0xd3   :  { %15129 = vst [vmem:[#allocation10_spill] sm:$0xff] %v10407_v13  ;;  %v695_v35 = vpop.f32.mrf.mxu0 }
  0xd4   :  { %v1708_v17 = vmax.f32 %v1070_v11, 0.0  ;;  %7317 = vmatmul.msk.bf16.gmra.mxu1 %vm598_vm0, %v10392_v52  ;;  %982 = vmatmul.bf16.gmra.mxu2 %v10306_v58 }
  0xd5   :  { %7341 = vmatmul.msk.bf16.gmra.mxu3 %vm598_vm0, %v10392_v52 }
  0xd6   :  { %v1897_v31 = vpack.c.bf16 %v1708_v17, %v1707_v1  ;;  %734 = vmatmul.bf16.gmra.mxu0 %v10407_v13  ;;  %v7029_v1 = vld [vmem:[%s15030_s0 + $0xd8] sm:$0xf0]  ;;  %v817_v17 = vadd.f32 %v10281_v45, %v688_v28  ;;  %v7019_v45 = vld [vmem:[%s15030_s0 + $0xc0] sm:$0xf] }
  0xd7   :  { %v943_v14 = vpop.f32.mrf.mxu2 }
  0xd8   :  { %1993 = vst [vmem:[#allocation2 + $0x30] sm:$0xff] %v1897_v31  ;;  %v944_v29 = vadd.f32 %v943_v14, %v10361_v36  ;;  %v10414_v30 = vpop.f32.mrf.mxu3 }
  0xd9   :  { %v10416_v48 = vpop.f32.mrf.mxu1 }
  0xda   :  { %v1073_v11 = vadd.f32 %v10279_v43, %v944_v29  ;;  %v10430_v43 = vor.u32 %v9299_v33, %v7029_v1 }
  0xdb   :  { %v10432_v24 = vpop.f32.mrf.mxu0 }
  0xdc   :  { %v1712_v15 = vmax.f32 %v1073_v11, 0.0  ;;  %15130 = vst [vmem:[#allocation11_spill] sm:$0xff] %v10430_v43  ;;  %v1715_v11 = vmax.f32 %v817_v17, 0.0  ;;  %v9336_v17 = vld [vmem:[%s15029_s1 + $0x74] sm:$0xf0] }
  0xde   :  { %v1899_v12 = vpack.c.bf16 %v1712_v15, %v1711_v39  ;;  %v9298_v39 = vld [vmem:[%s15030_s0 + $0xc4] sm:$0xf0] }
  0xdf   :  { %v945_v31 = vpop.f32.mrf.mxu2  ;;  %v10447_v15 = vor.u32 %v9298_v39, %v7019_v45  ;;  %v693_v45 = vadd.f32 %v692_v55, %v10343_v18 }
  0xe0   :  { %1995 = vst [vmem:[#allocation2 + $0x40] sm:$0xff] %v1899_v12  ;;  %v946_v5 = vadd.f32 %v945_v31, %v10361_v36  ;;  %v10428_v14 = vpop.f32.mrf.mxu3  ;;  %v7171_v12 = vld [vmem:[%s15029_s1 + $0x68] sm:$0xf] }
  0xe1   :  { %v10434_v29 = vpop.f32.mrf.mxu1  ;;  %15131 = vst [vmem:[#allocation12_spill] sm:$0xff] %v10447_v15  ;;  %v7172_v54 = vor.u32 %v9336_v17, %v7171_v12  ;;  %v7189_v17 = vld [vmem:[%s15029_s1 + $0x98] sm:$0xf0] }
  0xe2   :  { %v1075_v52 = vadd.f32 %v10291_v50, %v946_v5 }
  0xe3   :  { %v700_v31 = vpop.f32.mrf.mxu0  ;;  %9801 = vmatpush.bf16.msra.mxu2 %v7172_v54  ;;  %1191 = vmatpush.bf16.msrb.mxu1 %v7172_v54 }
  0xe4   :  { %v1716_v28 = vmax.f32 %v1075_v52, 0.0  ;;  %7318 = vmatmul.msk.bf16.gmra.mxu1 %vm598_vm0, %v10430_v43  ;;  %987 = vmatmul.bf16.gmra.mxu2 %v10363_v46  ;;  %v701_v23 = vadd.f32 %v700_v31, %v10343_v18 }
  0xe5   :  { %7342 = vmatmul.msk.bf16.gmra.mxu3 %vm598_vm0, %v10430_v43  ;;  %v822_v43 = vadd.f32 %v10324_v6, %v693_v45 }
  0xe6   :  { %v1901_v50 = vpack.c.bf16 %v1716_v28, %v1715_v11  ;;  %739 = vmatmul.bf16.gmra.mxu0 %v10447_v15  ;;  %v9301_v28 = vld [vmem:[%s15030_s0 + $0xe4] sm:$0xf]  ;;  %v830_v31 = vadd.f32 %v10394_v63, %v701_v23  ;;  %v7053_v63 = vld [vmem:[%s15030_s0 + $0x108] sm:$0xf0] }
  0xe7   :  { %v948_v33 = vpop.f32.mrf.mxu2  ;;  %v9305_v23 = vld [vmem:[%s15030_s0 + $0x104] sm:$0xf] }
  0xe8   :  { %1997 = vst [vmem:[#allocation2 + $0x50] sm:$0xff] %v1901_v50  ;;  %v949_v1 = vadd.f32 %v948_v33, %v10361_v36  ;;  %v10454_v52 = vpop.f32.mrf.mxu3  ;;  %v7037_v50 = vld [vmem:[%s15030_s0 + $0xe8] sm:$0xf0] }
  0xe9   :  { %v10462_v5 = vpop.f32.mrf.mxu1  ;;  %v10476_v55 = vor.u32 %v9301_v28, %v7037_v50  ;;  %v7027_v28 = vld [vmem:[%s15030_s0 + $0xd0] sm:$0xf]  ;;  %v9300_v50 = vld [vmem:[%s15030_s0 + $0xd4] sm:$0xf0] }
  0xea   :  { %v1078_v11 = vadd.f32 %v10313_v62, %v949_v1  ;;  %v9338_v1 = vld [vmem:[%s15029_s1 + $0x8c] sm:$0xf] }
  0xeb   :  { %15132 = vst [vmem:[#allocation13_spill] sm:$0xff] %v10476_v55  ;;  %v702_v54 = vpop.f32.mrf.mxu0  ;;  %v7192_v6 = vor.u32 %v9338_v1, %v7189_v17 }
  0xec   :  { %v1720_v39 = vmax.f32 %v1078_v11, 0.0  ;;  %v1723_v11 = vmax.f32 %v822_v43, 0.0  ;;  %v10497_v43 = vor.u32 %v9300_v50, %v7027_v28  ;;  %v698_v50 = vadd.f32 %v10432_v24, %v10343_v18 }
  0xed   :  { %1448 = vmatpush.bf16.msrb.mxu0 %v7192_v6 }
  0xee   :  { %v1903_v33 = vpack.c.bf16 %v1720_v39, %v1719_v59  ;;  %v696_v39 = vadd.f32 %v695_v35, %v10343_v18  ;;  %15133 = vst [vmem:[#allocation14_spill] sm:$0xff] %v10497_v43 }
  0xef   :  { %v950_v12 = vpop.f32.mrf.mxu2 }
  0xf0   :  { %1999 = vst [vmem:[#allocation2 + $0x60] sm:$0xff] %v1903_v33  ;;  %v951_v62 = vadd.f32 %v950_v12, %v10361_v36  ;;  %v10474_v2 = vpop.f32.mrf.mxu3  ;;  %v825_v35 = vadd.f32 %v10349_v25, %v696_v39  ;;  %v9303_v25 = vld [vmem:[%s15030_s0 + $0xf4] sm:$0xf]  ;;  %v7045_v39 = vld [vmem:[%s15030_s0 + $0xf8] sm:$0xf0] }
  0xf1   :  { %v10484_v59 = vpop.f32.mrf.mxu1 }
  0xf2   :  { %v1080_v45 = vadd.f32 %v10345_v19, %v951_v62 }
  0xf3   :  { %v705_v17 = vpop.f32.mrf.mxu0 }
  0xf4   :  { %v1724_v33 = vmax.f32 %v1080_v45, 0.0  ;;  %7319 = vmatmul.msk.bf16.gmra.mxu1 %vm598_vm0, %v10476_v55  ;;  %992 = vmatmul.bf16.gmra.mxu2 %v10407_v13  ;;  %v1727_v45 = vmax.f32 %v825_v35, 0.0 }
  0xf5   :  { %7343 = vmatmul.msk.bf16.gmra.mxu3 %vm598_vm0, %v10476_v55 }
  0xf6   :  { %v1905_v19 = vpack.c.bf16 %v1724_v33, %v1723_v11  ;;  %744 = vmatmul.bf16.gmra.mxu0 %v10497_v43 }
  0xf7   :  { %v953_v12 = vpop.f32.mrf.mxu2 }
  0xf8   :  { %2001 = vst [vmem:[#allocation2 + $0x70] sm:$0xff] %v1905_v19  ;;  %v954_v62 = vadd.f32 %v953_v12, %v10361_v36  ;;  %v10504_v1 = vpop.f32.mrf.mxu3  ;;  %v827_v19 = vadd.f32 %v10378_v9, %v698_v50  ;;  %v7035_v9 = vld [vmem:[%s15030_s0 + $0xe0] sm:$0xf] }
  0xf9   :  { %v10506_v6 = vpop.f32.mrf.mxu1 }
  0xfa   :  { %v1083_v28 = vadd.f32 %v10370_v57, %v954_v62  ;;  %v10521_v62 = vor.u32 %v9303_v25, %v7045_v39  ;;  %v1731_v55 = vmax.f32 %v827_v19, 0.0 }
  0xfb   :  { %v707_v24 = vpop.f32.mrf.mxu0 }
  0xfc   :  { %v1728_v11 = vmax.f32 %v1083_v28, 0.0  ;;  %15134 = vst [vmem:[#allocation15_spill] sm:$0xff] %v10521_v62 }
  0xfe   :  { %v1907_v33 = vpack.c.bf16 %v1728_v11, %v1727_v45  ;;  %v9302_v45 = vld [vmem:[%s15030_s0 + $0xe4] sm:$0xf0] }
  0xff   :  { %v955_v12 = vpop.f32.mrf.mxu2  ;;  %v10536_v11 = vor.u32 %v9302_v45, %v7035_v9  ;;  %v703_v9 = vadd.f32 %v702_v54, %v10343_v18 }
 0x100   :  { %2003 = vst [vmem:[#allocation2 + $0x80] sm:$0xff] %v1907_v33  ;;  %v956_v35 = vadd.f32 %v955_v12, %v10361_v36  ;;  %v10519_v57 = vpop.f32.mrf.mxu3  ;;  %v1735_v12 = vmax.f32 %v830_v31, 0.0 }
 0x101   :  { %v10523_v28 = vpop.f32.mrf.mxu1  ;;  %15135 = vst [vmem:[#allocation16_spill] sm:$0xff] %v10536_v11 }
 0x102   :  { %v1085_v13 = vadd.f32 %v10390_v26, %v956_v35 }
 0x103   :  { %v10545_v33 = vpop.f32.mrf.mxu0 }
 0x104   :  { %v1732_v50 = vmax.f32 %v1085_v13, 0.0  ;;  %7320 = vmatmul.msk.bf16.gmra.mxu1 %vm598_vm0, %v10521_v62  ;;  %997 = vmatmul.bf16.gmra.mxu2 %v10447_v15  ;;  %v706_v15 = vadd.f32 %v705_v17, %v10343_v18 }
 0x105   :  { %7344 = vmatmul.msk.bf16.gmra.mxu3 %vm598_vm0, %v10521_v62 }
 0x106   :  { %v1909_v26 = vpack.c.bf16 %v1732_v50, %v1731_v55  ;;  %749 = vmatmul.bf16.gmra.mxu0 %v10536_v11  ;;  %v832_v50 = vadd.f32 %v10416_v48, %v703_v9  ;;  %v7043_v48 = vld [vmem:[%s15030_s0 + $0xf0] sm:$0xf]  ;;  %v835_v17 = vadd.f32 %v10434_v29, %v706_v15  ;;  %v7155_v15 = vld [vmem:[%s15029_s1 + $0x48] sm:$0xf] }
 0x107   :  { %v958_v25 = vpop.f32.mrf.mxu2 }
 0x108   :  { %2005 = vst [vmem:[#allocation2 + $0x90] sm:$0xff] %v1909_v26  ;;  %v959_v39 = vadd.f32 %v958_v25, %v10361_v36  ;;  %v10543_v13 = vpop.f32.mrf.mxu3 }
 0x109   :  { %v10547_v19 = vpop.f32.mrf.mxu1 }
 0x10a   :  { %v1088_v35 = vadd.f32 %v10414_v30, %v959_v39  ;;  %v10561_v30 = vor.u32 %v9305_v23, %v7053_v63 }
 0x10b   :  { %v10563_v54 = vpop.f32.mrf.mxu0 }
 0x10c   :  { %v1736_v55 = vmax.f32 %v1088_v35, 0.0  ;;  %15136 = vst [vmem:[#allocation17_spill] sm:$0xff] %v10561_v30  ;;  %v1739_v35 = vmax.f32 %v832_v50, 0.0  ;;  %v9360_v50 = vld [vmem:[%s15029_s1 + $0x134] sm:$0xf0] }
 0x10e   :  { %v1911_v45 = vpack.c.bf16 %v1736_v55, %v1735_v12  ;;  %v9304_v12 = vld [vmem:[%s15030_s0 + $0xf4] sm:$0xf0] }
 0x10f   :  { %v960_v26 = vpop.f32.mrf.mxu2  ;;  %v10578_v55 = vor.u32 %v9304_v12, %v7043_v48  ;;  %v1743_v48 = vmax.f32 %v835_v17, 0.0 }
 0x110   :  { %2007 = vst [vmem:[#allocation2 + $0xa0] sm:$0xff] %v1911_v45  ;;  %v961_v31 = vadd.f32 %v960_v26, %v10361_v36  ;;  %v10559_v25 = vpop.f32.mrf.mxu3  ;;  %v7267_v45 = vld [vmem:[%s15029_s1 + $0x128] sm:$0xf] }
 0x111   :  { %v10565_v39 = vpop.f32.mrf.mxu1  ;;  %15137 = vst [vmem:[#allocation18_spill] sm:$0xff] %v10578_v55  ;;  %v10597_v29 = vor.u32 %v9360_v50, %v7267_v45  ;;  %v9307_v45 = vld [vmem:[%s15030_s0 + $0x114] sm:$0xf]  ;;  %v7061_v50 = vld [vmem:[%s15030_s0 + $0x118] sm:$0xf0] }
 0x112   :  { %v1090_v62 = vadd.f32 %v10428_v14, %v961_v31 }
 0x113   :  { %v10593_v26 = vpop.f32.mrf.mxu0  ;;  %9807 = vmatpush.bf16.msrb.mxu3 %v10597_v29 }
 0x114   :  { %v1740_v9 = vmax.f32 %v1090_v62, 0.0  ;;  %7321 = vmatmul.msk.bf16.gmra.mxu1 %vm598_vm0, %v10561_v30  ;;  %1002 = vmatmul.bf16.gmra.mxu2 %v10497_v43  ;;  %v716_v46 = vadd.f32 %v10593_v26, %v10343_v18 }
 0x115   :  { %7345 = vmatmul.msk.bf16.gmra.mxu3 %vm598_vm0, %v10561_v30 }
 0x116   :  { %v1913_v14 = vpack.c.bf16 %v1740_v9, %v1739_v35  ;;  %754 = vmatmul.bf16.gmra.mxu0 %v10578_v55  ;;  %v9332_v35 = vld [vmem:[%s15029_s1 + $0x54] sm:$0xf0]  ;;  %v708_v9 = vadd.f32 %v707_v24, %v10343_v18  ;;  %v845_v26 = vadd.f32 %v10523_v28, %v716_v46  ;;  %v9311_v46 = vld [vmem:[%s15030_s0 + $0x134] sm:$0xf]  ;;  %v7077_v28 = vld [vmem:[%s15030_s0 + $0x138] sm:$0xf0] }
 0x117   :  { %v963_v23 = vpop.f32.mrf.mxu2 }
 0x118   :  { %2009 = vst [vmem:[#allocation2 + $0xb0] sm:$0xff] %v1913_v14  ;;  %v964_v63 = vadd.f32 %v963_v23, %v10361_v36  ;;  %v10585_v62 = vpop.f32.mrf.mxu3  ;;  %v7156_v14 = vor.u32 %v9332_v35, %v7155_v15  ;;  %v837_v17 = vadd.f32 %v10462_v5, %v708_v9  ;;  %v10618_v15 = vor.u32 %v9307_v45, %v7061_v50  ;;  %v9334_v35 = vld [vmem:[%s15029_s1 + $0x6c] sm:$0xf]  ;;  %v7051_v45 = vld [vmem:[%s15030_s0 + $0x100] sm:$0xf] }
 0x119   :  { %v10595_v31 = vpop.f32.mrf.mxu1  ;;  %v9306_v50 = vld [vmem:[%s15030_s0 + $0x104] sm:$0xf0] }
 0x11a   :  { %v1093_v12 = vadd.f32 %v10454_v52, %v964_v63  ;;  %9802 = vmatpush.bf16.msra.mxu2 %v7156_v14  ;;  %1192 = vmatpush.bf16.msrb.mxu1 %v7156_v14  ;;  %15138 = vst [vmem:[#allocation19_spill] sm:$0xff] %v10618_v15  ;;  %v1747_v9 = vmax.f32 %v837_v17, 0.0  ;;  %v10640_v17 = vor.u32 %v9306_v50, %v7051_v45 }
 0x11b   :  { %v717_v14 = vpop.f32.mrf.mxu0  ;;  %v713_v50 = vadd.f32 %v10563_v54, %v10343_v18 }
 0x11c   :  { %v1744_v23 = vmax.f32 %v1093_v12, 0.0  ;;  %v7173_v12 = vld [vmem:[%s15029_s1 + $0x78] sm:$0xf0]  ;;  %15139 = vst [vmem:[#allocation20_spill] sm:$0xff] %v10640_v17 }
 0x11d   :  { %v7176_v5 = vor.u32 %v9334_v35, %v7173_v12 }
 0x11e   :  { %v1915_v30 = vpack.c.bf16 %v1744_v23, %v1743_v48  ;;  %v711_v23 = vadd.f32 %v10545_v33, %v10343_v18 }
 0x11f   :  { %v965_v52 = vpop.f32.mrf.mxu2  ;;  %1449 = vmatpush.bf16.msrb.mxu0 %v7176_v5 }
 0x120   :  { %2011 = vst [vmem:[#allocation2 + $0xc0] sm:$0xff] %v1915_v30  ;;  %v966_v24 = vadd.f32 %v965_v52, %v10361_v36  ;;  %v10616_v63 = vpop.f32.mrf.mxu3  ;;  %v840_v33 = vadd.f32 %v10484_v59, %v711_v23  ;;  %v9309_v59 = vld [vmem:[%s15030_s0 + $0x124] sm:$0xf]  ;;  %v7069_v23 = vld [vmem:[%s15030_s0 + $0x128] sm:$0xf0] }
 0x121   :  { %v10626_v48 = vpop.f32.mrf.mxu1 }
 0x122   :  { %v1095_v30 = vadd.f32 %v10474_v2, %v966_v24 }
 0x123   :  { %v720_v5 = vpop.f32.mrf.mxu0 }
 0x124   :  { %v1748_v52 = vmax.f32 %v1095_v30, 0.0  ;;  %7322 = vmatmul.msk.bf16.gmra.mxu1 %vm598_vm0, %v10618_v15  ;;  %1007 = vmatmul.bf16.gmra.mxu2 %v10536_v11  ;;  %v1751_v11 = vmax.f32 %v840_v33, 0.0 }
 0x125   :  { %7346 = vmatmul.msk.bf16.gmra.mxu3 %vm598_vm0, %v10618_v15 }
 0x126   :  { %v1917_v2 = vpack.c.bf16 %v1748_v52, %v1747_v9  ;;  %759 = vmatmul.bf16.gmra.mxu0 %v10640_v17 }
 0x127   :  { %v968_v24 = vpop.f32.mrf.mxu2 }
 0x128   :  { %2013 = vst [vmem:[#allocation2 + $0xd0] sm:$0xff] %v1917_v2  ;;  %v969_v35 = vadd.f32 %v968_v24, %v10361_v36  ;;  %v10647_v12 = vpop.f32.mrf.mxu3  ;;  %v842_v2 = vadd.f32 %v10506_v6, %v713_v50  ;;  %v7059_v6 = vld [vmem:[%s15030_s0 + $0x110] sm:$0xf] }
 0x129   :  { %v10649_v30 = vpop.f32.mrf.mxu1 }
 0x12a   :  { %v1098_v45 = vadd.f32 %v10504_v1, %v969_v35  ;;  %v10664_v35 = vor.u32 %v9309_v59, %v7069_v23  ;;  %v1755_v15 = vmax.f32 %v842_v2, 0.0 }
 0x12b   :  { %v722_v54 = vpop.f32.mrf.mxu0 }
 0x12c   :  { %v1752_v9 = vmax.f32 %v1098_v45, 0.0  ;;  %15140 = vst [vmem:[#allocation21_spill] sm:$0xff] %v10664_v35 }
 0x12e   :  { %v1919_v52 = vpack.c.bf16 %v1752_v9, %v1751_v11  ;;  %v9308_v11 = vld [vmem:[%s15030_s0 + $0x114] sm:$0xf0] }
 0x12f   :  { %v970_v24 = vpop.f32.mrf.mxu2  ;;  %v10680_v9 = vor.u32 %v9308_v11, %v7059_v6  ;;  %v718_v6 = vadd.f32 %v717_v14, %v10343_v18 }
 0x130   :  { %2015 = vst [vmem:[#allocation2 + $0xe0] sm:$0xff] %v1919_v52  ;;  %v971_v33 = vadd.f32 %v970_v24, %v10361_v36  ;;  %v10662_v1 = vpop.f32.mrf.mxu3  ;;  %v1759_v24 = vmax.f32 %v845_v26, 0.0 }
 0x131   :  { %v10666_v45 = vpop.f32.mrf.mxu1  ;;  %15141 = vst [vmem:[#allocation22_spill] sm:$0xff] %v10680_v9 }
 0x132   :  { %v1100_v43 = vadd.f32 %v10519_v57, %v971_v33 }
 0x133   :  { %v725_v52 = vpop.f32.mrf.mxu0 }
 0x134   :  { %v1756_v50 = vmax.f32 %v1100_v43, 0.0  ;;  %7323 = vmatmul.msk.bf16.gmra.mxu1 %vm598_vm0, %v10664_v35  ;;  %1012 = vmatmul.bf16.gmra.mxu2 %v10578_v55  ;;  %v721_v55 = vadd.f32 %v720_v5, %v10343_v18 }
 0x135   :  { %7347 = vmatmul.msk.bf16.gmra.mxu3 %vm598_vm0, %v10664_v35 }
 0x136   :  { %v1921_v57 = vpack.c.bf16 %v1756_v50, %v1755_v15  ;;  %764 = vmatmul.bf16.gmra.mxu0 %v10680_v9  ;;  %v847_v50 = vadd.f32 %v10547_v19, %v718_v6  ;;  %v7067_v19 = vld [vmem:[%s15030_s0 + $0x120] sm:$0xf]  ;;  %v850_v5 = vadd.f32 %v10565_v39, %v721_v55  ;;  %v9330_v55 = vld [vmem:[%s15029_s1 + $0x4c] sm:$0xf] }
 0x137   :  { %v973_v59 = vpop.f32.mrf.mxu2 }
 0x138   :  { %2017 = vst [vmem:[#allocation2 + $0xf0] sm:$0xff] %v1921_v57  ;;  %v974_v23 = vadd.f32 %v973_v59, %v10361_v36  ;;  %v10687_v43 = vpop.f32.mrf.mxu3 }
 0x139   :  { %v10689_v2 = vpop.f32.mrf.mxu1 }
 0x13a   :  { %v1103_v33 = vadd.f32 %v10543_v13, %v974_v23  ;;  %v10703_v13 = vor.u32 %v9311_v46, %v7077_v28 }
 0x13b   :  { %v10705_v14 = vpop.f32.mrf.mxu0 }
 0x13c   :  { %v1760_v11 = vmax.f32 %v1103_v33, 0.0  ;;  %15142 = vst [vmem:[#allocation23_spill] sm:$0xff] %v10703_v13  ;;  %v1763_v33 = vmax.f32 %v847_v50, 0.0  ;;  %v9328_v50 = vld [vmem:[%s15029_s1 + $0x34] sm:$0xf0] }
 0x13e   :  { %v1923_v15 = vpack.c.bf16 %v1760_v11, %v1759_v24  ;;  %v9310_v24 = vld [vmem:[%s15030_s0 + $0x124] sm:$0xf0] }
 0x13f   :  { %v975_v57 = vpop.f32.mrf.mxu2  ;;  %v10720_v11 = vor.u32 %v9310_v24, %v7067_v19  ;;  %v1767_v19 = vmax.f32 %v850_v5, 0.0 }
 0x140   :  { %2019 = vst [vmem:[#allocation2 + $0x100] sm:$0xff] %v1923_v15  ;;  %v976_v26 = vadd.f32 %v975_v57, %v10361_v36  ;;  %v10701_v59 = vpop.f32.mrf.mxu3  ;;  %v7139_v15 = vld [vmem:[%s15029_s1 + $0x28] sm:$0xf] }
 0x141   :  { %v10707_v23 = vpop.f32.mrf.mxu1  ;;  %15143 = vst [vmem:[#allocation24_spill] sm:$0xff] %v10720_v11  ;;  %v7140_v39 = vor.u32 %v9328_v50, %v7139_v15  ;;  %v9313_v15 = vld [vmem:[%s15030_s0 + $0x144] sm:$0xf]  ;;  %v7085_v50 = vld [vmem:[%s15030_s0 + $0x148] sm:$0xf0] }
 0x142   :  { %v1105_v35 = vadd.f32 %v10559_v25, %v976_v26 }
 0x143   :  { %v730_v57 = vpop.f32.mrf.mxu0  ;;  %9803 = vmatpush.bf16.msra.mxu2 %v7140_v39  ;;  %1193 = vmatpush.bf16.msrb.mxu1 %v7140_v39 }
 0x144   :  { %v1764_v6 = vmax.f32 %v1105_v35, 0.0  ;;  %7324 = vmatmul.msk.bf16.gmra.mxu1 %vm598_vm0, %v10703_v13  ;;  %1017 = vmatmul.bf16.gmra.mxu2 %v10640_v17 }
 0x145   :  { %7348 = vmatmul.msk.bf16.gmra.mxu3 %vm598_vm0, %v10703_v13 }
 0x146   :  { %v1925_v25 = vpack.c.bf16 %v1764_v6, %v1763_v33  ;;  %769 = vmatmul.bf16.gmra.mxu0 %v10720_v11  ;;  %v7157_v33 = vld [vmem:[%s15029_s1 + $0x58] sm:$0xf0]  ;;  %v723_v6 = vadd.f32 %v722_v54, %v10343_v18 }
 0x147   :  { %v978_v46 = vpop.f32.mrf.mxu2 }
 0x148   :  { %2021 = vst [vmem:[#allocation2 + $0x110] sm:$0xff] %v1925_v25  ;;  %v979_v28 = vadd.f32 %v978_v46, %v10361_v36  ;;  %v10727_v35 = vpop.f32.mrf.mxu3  ;;  %v7160_v25 = vor.u32 %v9330_v55, %v7157_v33  ;;  %v852_v5 = vadd.f32 %v10595_v31, %v723_v6  ;;  %v7075_v31 = vld [vmem:[%s15030_s0 + $0x130] sm:$0xf] }
 0x149   :  { %v10735_v26 = vpop.f32.mrf.mxu1 }
 0x14a   :  { %v1108_v24 = vadd.f32 %v10585_v62, %v979_v28  ;;  %1450 = vmatpush.bf16.msrb.mxu0 %v7160_v25  ;;  %v10755_v28 = vor.u32 %v9313_v15, %v7085_v50  ;;  %v1771_v33 = vmax.f32 %v852_v5, 0.0  ;;  %v726_v25 = vadd.f32 %v725_v52, %v10343_v18 }
 0x14b   :  { %v732_v39 = vpop.f32.mrf.mxu0 }
 0x14c   :  { %v1768_v46 = vmax.f32 %v1108_v24, 0.0  ;;  %15144 = vst [vmem:[#allocation25_spill] sm:$0xff] %v10755_v28  ;;  %v855_v52 = vadd.f32 %v10626_v48, %v726_v25  ;;  %v9315_v48 = vld [vmem:[%s15030_s0 + $0x154] sm:$0xf]  ;;  %v7093_v25 = vld [vmem:[%s15030_s0 + $0x158] sm:$0xf0] }
 0x14e   :  { %v1927_v13 = vpack.c.bf16 %v1768_v46, %v1767_v19 }
 0x14f   :  { %v980_v17 = vpop.f32.mrf.mxu2 }
 0x150   :  { %2023 = vst [vmem:[#allocation2 + $0x120] sm:$0xff] %v1927_v13  ;;  %v981_v62 = vadd.f32 %v980_v17, %v10361_v36  ;;  %v10753_v54 = vpop.f32.mrf.mxu3  ;;  %v9312_v17 = vld [vmem:[%s15030_s0 + $0x134] sm:$0xf0] }
 0x151   :  { %v10757_v55 = vpop.f32.mrf.mxu1  ;;  %v10770_v19 = vor.u32 %v9312_v17, %v7075_v31  ;;  %v728_v31 = vadd.f32 %v10705_v14, %v10343_v18 }
 0x152   :  { %v1110_v24 = vadd.f32 %v10616_v63, %v981_v62  ;;  %v1775_v62 = vmax.f32 %v855_v52, 0.0 }
 0x153   :  { %v735_v50 = vpop.f32.mrf.mxu0 }
 0x154   :  { %v1772_v13 = vmax.f32 %v1110_v24, 0.0  ;;  %7325 = vmatmul.msk.bf16.gmra.mxu1 %vm598_vm0, %v10755_v28  ;;  %1022 = vmatmul.bf16.gmra.mxu2 %v10680_v9  ;;  %v731_v9 = vadd.f32 %v730_v57, %v10343_v18 }
 0x155   :  { %7349 = vmatmul.msk.bf16.gmra.mxu3 %vm598_vm0, %v10755_v28 }
 0x156   :  { %v1929_v63 = vpack.c.bf16 %v1772_v13, %v1771_v33  ;;  %774 = vmatmul.bf16.gmra.mxu0 %v10770_v19  ;;  %v857_v13 = vadd.f32 %v10649_v30, %v728_v31  ;;  %v7083_v30 = vld [vmem:[%s15030_s0 + $0x140] sm:$0xf]  ;;  %v860_v57 = vadd.f32 %v10666_v45, %v731_v9  ;;  %v9317_v45 = vld [vmem:[%s15030_s0 + $0x164] sm:$0xf]  ;;  %v7101_v9 = vld [vmem:[%s15030_s0 + $0x168] sm:$0xf0] }
 0x157   :  { %v983_v6 = vpop.f32.mrf.mxu2 }
 0x158   :  { %2025 = vst [vmem:[#allocation2 + $0x130] sm:$0xff] %v1929_v63  ;;  %v984_v46 = vadd.f32 %v983_v6, %v10361_v36  ;;  %v10777_v15 = vpop.f32.mrf.mxu3  ;;  %v10794_v6 = vor.u32 %v9315_v48, %v7093_v25 }
 0x159   :  { %v10779_v5 = vpop.f32.mrf.mxu1 }
 0x15a   :  { %v1113_v24 = vadd.f32 %v10647_v12, %v984_v46  ;;  %15145 = vst [vmem:[#allocation26_spill] sm:$0xff] %v10794_v6 }
 0x15b   :  { %v10796_v14 = vpop.f32.mrf.mxu0 }
 0x15c   :  { %v1776_v33 = vmax.f32 %v1113_v24, 0.0  ;;  %v1779_v24 = vmax.f32 %v857_v13, 0.0 }
 0x15e   :  { %v1931_v17 = vpack.c.bf16 %v1776_v33, %v1775_v62  ;;  %v9314_v62 = vld [vmem:[%s15030_s0 + $0x144] sm:$0xf0] }
 0x15f   :  { %v985_v63 = vpop.f32.mrf.mxu2  ;;  %v10811_v33 = vor.u32 %v9314_v62, %v7083_v30  ;;  %v733_v30 = vadd.f32 %v732_v39, %v10343_v18  ;;  %v7123_v39 = vld [vmem:[%s15029_s1 + $0x8] sm:$0xf] }
 0x160   :  { %2027 = vst [vmem:[#allocation2 + $0x140] sm:$0xff] %v1931_v17  ;;  %v986_v52 = vadd.f32 %v985_v63, %v10361_v36  ;;  %v10792_v12 = vpop.f32.mrf.mxu3  ;;  %v1783_v63 = vmax.f32 %v860_v57, 0.0  ;;  %v7251_v57 = vld [vmem:[%s15029_s1 + $0x108] sm:$0xf] }
 0x161   :  { %v10798_v46 = vpop.f32.mrf.mxu1 }
 0x162   :  { %v1115_v28 = vadd.f32 %v10662_v1, %v986_v52 }
 0x163   :  { %v10820_v17 = vpop.f32.mrf.mxu0 }
 0x164   :  { %v1780_v31 = vmax.f32 %v1115_v28, 0.0  ;;  %7326 = vmatmul.msk.bf16.gmra.mxu1 %vm598_vm0, %v10794_v6  ;;  %1027 = vmatmul.bf16.gmra.mxu2 %v10720_v11 }
 0x165   :  { %7350 = vmatmul.msk.bf16.gmra.mxu3 %vm598_vm0, %v10794_v6 }
 0x166   :  { %v1933_v1 = vpack.c.bf16 %v1780_v31, %v1779_v24  ;;  %779 = vmatmul.bf16.gmra.mxu0 %v10811_v33  ;;  %v862_v31 = vadd.f32 %v10689_v2, %v733_v30  ;;  %v9324_v30 = vld [vmem:[%s15029_s1 + $0x14] sm:$0xf0] }
 0x167   :  { %v988_v48 = vpop.f32.mrf.mxu2  ;;  %v7124_v6 = vor.u32 %v9324_v30, %v7123_v39  ;;  %v7141_v39 = vld [vmem:[%s15029_s1 + $0x38] sm:$0xf0] }
 0x168   :  { %2029 = vst [vmem:[#allocation2 + $0x150] sm:$0xff] %v1933_v1  ;;  %v989_v25 = vadd.f32 %v988_v48, %v10361_v36  ;;  %v10818_v28 = vpop.f32.mrf.mxu3  ;;  %v1787_v11 = vmax.f32 %v862_v31, 0.0 }
 0x169   :  { %v10822_v13 = vpop.f32.mrf.mxu1  ;;  %1194 = vmatpush.bf16.msrb.mxu1 %v7124_v6  ;;  %9804 = vmatpush.bf16.msra.mxu2 %v7124_v6 }
 0x16a   :  { %v1118_v52 = vadd.f32 %v10687_v43, %v989_v25  ;;  %v9356_v43 = vld [vmem:[%s15029_s1 + $0x114] sm:$0xf0] }
 0x16b   :  { %v10847_v2 = vpop.f32.mrf.mxu0 }
 0x16c   :  { %v1784_v24 = vmax.f32 %v1118_v52, 0.0  ;;  %v7252_v52 = vor.u32 %v9356_v43, %v7251_v57  ;;  %v9326_v43 = vld [vmem:[%s15029_s1 + $0x2c] sm:$0xf] }
 0x16d   :  { %1320 = vmatpush.bf16.msrb.mxu2 %v10108_v41 }
 0x16e   :  { %v1935_v62 = vpack.c.bf16 %v1784_v24, %v1783_v63  ;;  %v10845_v63 = vor.u32 %v9317_v45, %v7101_v9  ;;  %9808 = vmatpush.bf16.msrb.mxu3 %v7252_v52  ;;  %v7091_v45 = vld [vmem:[%s15030_s0 + $0x150] sm:$0xf]  ;;  %v9316_v9 = vld [vmem:[%s15030_s0 + $0x154] sm:$0xf0] }
 0x16f   :  { %v990_v1 = vpop.f32.mrf.mxu2 }
 0x170   :  { %2031 = vst [vmem:[#allocation2 + $0x160] sm:$0xff] %v1935_v62  ;;  %v991_v48 = vadd.f32 %v990_v1, %v10361_v36  ;;  %v10843_v25 = vpop.f32.mrf.mxu3  ;;  %v736_v62 = vadd.f32 %v735_v50, %v10343_v18 }
 0x171   :  { %v10852_v24 = vpop.f32.mrf.mxu1  ;;  %1321 = vmatpush.bf16.msrb.mxu2 %v10326_v8 }
 0x172   :  { %v1120_v49 = vadd.f32 %v10701_v59, %v991_v48  ;;  %v10865_v59 = vor.u32 %v9316_v9, %v7091_v45  ;;  %v865_v31 = vadd.f32 %v10707_v23, %v736_v62  ;;  %v7144_v23 = vor.u32 %v9326_v43, %v7141_v39  ;;  %v9319_v9 = vld [vmem:[%s15030_s0 + $0x174] sm:$0xf] }
 0x173   :  { %v745_v41 = vpop.f32.mrf.mxu0  ;;  %v738_v62 = vadd.f32 %v10796_v14, %v10343_v18 }
 0x174   :  { %v1788_v1 = vmax.f32 %v1120_v49, 0.0  ;;  %7327 = vmatmul.msk.bf16.gmra.mxu1 %vm598_vm0, %v10845_v63  ;;  %1032 = vmatmul.bf16.gmra.mxu2 %v10770_v19  ;;  %v1791_v48 = vmax.f32 %v865_v31, 0.0 }
 0x175   :  { %7351 = vmatmul.msk.bf16.gmra.mxu3 %vm598_vm0, %v10845_v63  ;;  %1451 = vmatpush.bf16.msrb.mxu0 %v7144_v23  ;;  %v867_v8 = vadd.f32 %v10735_v26, %v738_v62 }
 0x176   :  { %v1937_v50 = vpack.c.bf16 %v1788_v1, %v1787_v11  ;;  %784 = vmatmul.bf16.gmra.mxu0 %v10865_v59  ;;  %v7109_v1 = vld [vmem:[%s15030_s0 + $0x178] sm:$0xf0]  ;;  %1322 = vmatpush.bf16.msrb.mxu2 %v10597_v29  ;;  %v741_v29 = vadd.f32 %v10820_v17, %v10343_v18 }
 0x177   :  { %v993_v57 = vpop.f32.mrf.mxu2  ;;  %v1795_v39 = vmax.f32 %v867_v8, 0.0 }
 0x178   :  { %2033 = vst [vmem:[#allocation2 + $0x170] sm:$0xff] %v1937_v50  ;;  %v994_v49 = vadd.f32 %v993_v57, %v10361_v36  ;;  %v10873_v6 = vpop.f32.mrf.mxu3  ;;  %v10898_v57 = vor.u32 %v9319_v9, %v7109_v1 }
 0x179   :  { %v10881_v11 = vpop.f32.mrf.mxu1 }
 0x17a   :  { %v1123_v30 = vadd.f32 %v10727_v35, %v994_v49  ;;  %1323 = vmatpush.bf16.msrb.mxu2 %v7252_v52 }
 0x17b   :  { %v747_v49 = vpop.f32.mrf.mxu0 }
 0x17c   :  { %v1792_v45 = vmax.f32 %v1123_v30, 0.0  ;;  %v870_v30 = vadd.f32 %v10757_v55, %v741_v29 }
 0x17e   :  { %v1939_v50 = vpack.c.bf16 %v1792_v45, %v1791_v48  ;;  %v1799_v9 = vmax.f32 %v870_v30, 0.0 }
 0x17f   :  { %v995_v31 = vpop.f32.mrf.mxu2 }
 0x180   :  { %2035 = vst [vmem:[#allocation2 + $0x180] sm:$0xff] %v1939_v50  ;;  %v996_v35 = vadd.f32 %v995_v31, %v10361_v36  ;;  %v10896_v14 = vpop.f32.mrf.mxu3  ;;  %v743_v50 = vadd.f32 %v10847_v2, %v10343_v18 }
 0x181   :  { %v10900_v43 = vpop.f32.mrf.mxu1 }
 0x182   :  { %v1125_v23 = vadd.f32 %v10753_v54, %v996_v35  ;;  %v872_v35 = vadd.f32 %v10779_v5, %v743_v50 }
 0x183   :  { %v750_v45 = vpop.f32.mrf.mxu0 }
 0x184   :  { %v1796_v48 = vmax.f32 %v1125_v23, 0.0  ;;  %7328 = vmatmul.msk.bf16.gmra.mxu1 %vm598_vm0, %v10898_v57  ;;  %1037 = vmatmul.bf16.gmra.mxu2 %v10811_v33 }
 0x185   :  { %7352 = vmatmul.msk.bf16.gmra.mxu3 %vm598_vm0, %v10898_v57 }
 0x186   :  { %v1941_v26 = vpack.c.bf16 %v1796_v48, %v1795_v39 }
 0x187   :  { %v998_v62 = vpop.f32.mrf.mxu2 }
 0x188   :  { %2037 = vst [vmem:[#allocation2 + $0x190] sm:$0xff] %v1941_v26  ;;  %v999_v52 = vadd.f32 %v998_v62, %v10361_v36  ;;  %v10912_v54 = vpop.f32.mrf.mxu3  ;;  %v1803_v26 = vmax.f32 %v872_v35, 0.0  ;;  %v9322_v35 = vld [vmem:[%s15029_s1 + $0xc] sm:$0xf] }
 0x189   :  { %v10914_v17 = vpop.f32.mrf.mxu1 }
 0x18a   :  { %v1128_v1 = vadd.f32 %v10777_v15, %v999_v52  ;;  %v746_v15 = vadd.f32 %v745_v41, %v10343_v18 }
 0x18b   :  { %v752_v29 = vpop.f32.mrf.mxu0 }
 0x18c   :  { %v1800_v8 = vmax.f32 %v1128_v1, 0.0  ;;  %v875_v2 = vadd.f32 %v10798_v46, %v746_v15  ;;  %v7125_v46 = vld [vmem:[%s15029_s1 + $0x18] sm:$0xf0] }
 0x18e   :  { %v1943_v31 = vpack.c.bf16 %v1800_v8, %v1799_v9  ;;  %v1807_v41 = vmax.f32 %v875_v2, 0.0 }
 0x18f   :  { %v1000_v55 = vpop.f32.mrf.mxu2 }
 0x190   :  { %2039 = vst [vmem:[#allocation2 + $0x1a0] sm:$0xff] %v1943_v31  ;;  %v1001_v39 = vadd.f32 %v1000_v55, %v10361_v36  ;;  %v10921_v23 = vpop.f32.mrf.mxu3  ;;  %v748_v31 = vadd.f32 %v747_v49, %v10343_v18 }
 0x191   :  { %v10923_v48 = vpop.f32.mrf.mxu1 }
 0x192   :  { %v1130_v30 = vadd.f32 %v10792_v12, %v1001_v39  ;;  %v7128_v39 = vor.u32 %v9322_v35, %v7125_v46 }
 0x193   :  { %v755_v12 = vpop.f32.mrf.mxu0 }
 0x194   :  { %v1804_v62 = vmax.f32 %v1130_v30, 0.0  ;;  %1042 = vmatmul.bf16.gmra.mxu2 %v10865_v59  ;;  %1195 = vmatmul.bf16.vlgmr.msrb.gmra.mxu1 %v10006_v3  ;;  %v877_v30 = vadd.f32 %v10822_v13, %v748_v31 }
 0x195   :  { %7354 = vmatmul.msk.bf16.vlgmr.msrb.gmra.mxu3 %vm598_vm0, %v9992_v61  ;;  %1452 = vmatpush.bf16.msrb.mxu0 %v7128_v39  ;;  %v753_v39 = vadd.f32 %v752_v29, %v10343_v18 }
 0x196   :  { %v1945_v5 = vpack.c.bf16 %v1804_v62, %v1803_v26  ;;  %v1811_v2 = vmax.f32 %v877_v30, 0.0 }
 0x197   :  { %v1003_v52 = vpop.f32.mrf.mxu2 }
 0x198   :  { %2041 = vst [vmem:[#allocation2 + $0x1b0] sm:$0xff] %v1945_v5  ;;  %v1004_v9 = vadd.f32 %v1003_v52, %v10361_v36  ;;  %v10933_v1 = vpop.f32.mrf.mxu3  ;;  %1453 = vmatmul.bf16.vlgmr.msrb.gmra.mxu0 %v10006_v3 }
 0x199   :  { %v10935_v50 = vpop.f32.mrf.mxu1 }
 0x19a   :  { %v1133_v8 = vadd.f32 %v10818_v28, %v1004_v9  ;;  %v751_v9 = vadd.f32 %v750_v45, %v10343_v18 }
 0x19b   :  { %v757_v49 = vpop.f32.mrf.mxu0 }
 0x19c   :  { %v1808_v55 = vmax.f32 %v1133_v8, 0.0  ;;  %v880_v8 = vadd.f32 %v10852_v24, %v751_v9 }
 0x19e   :  { %v1947_v26 = vpack.c.bf16 %v1808_v55, %v1807_v41  ;;  %v1815_v45 = vmax.f32 %v880_v8, 0.0 }
 0x19f   :  { %v1005_v15 = vpop.f32.mrf.mxu2 }
 0x1a0   :  { %2043 = vst [vmem:[#allocation2 + $0x1c0] sm:$0xff] %v1947_v26  ;;  %v1006_v28 = vadd.f32 %v1005_v15, %v10361_v36  ;;  %v10947_v62 = vpop.f32.mrf.mxu3  ;;  %v882_v15 = vadd.f32 %v10881_v11, %v753_v39 }
 0x1a1   :  { %v10949_v5 = vpop.f32.mrf.mxu1 }
 0x1a2   :  { %v1135_v52 = vadd.f32 %v10843_v25, %v1006_v28  ;;  %v1819_v9 = vmax.f32 %v882_v15, 0.0 }
 0x1a3   :  { %v760_v25 = vpop.f32.mrf.mxu0 }
 0x1a4   :  { %v1812_v41 = vmax.f32 %v1135_v52, 0.0  ;;  %1047 = vmatmul.bf16.gmra.mxu2 %v9990_v60  ;;  %1200 = vmatmul.bf16.gmra.mxu1 %v10066_v27 }
 0x1a5   :  { %7355 = vmatmul.msk.bf16.gmra.mxu3 %vm598_vm0, %v10052_v21 }
 0x1a6   :  { %v1949_v13 = vpack.c.bf16 %v1812_v41, %v1811_v2 }
 0x1a7   :  { %v1008_v31 = vpop.f32.mrf.mxu2 }
 0x1a8   :  { %2045 = vst [vmem:[#allocation2 + $0x1d0] sm:$0xff] %v1949_v13  ;;  %v1009_v3 = vadd.f32 %v1008_v31, %v10361_v36  ;;  %v10960_v35 = vpop.f32.mrf.mxu3  ;;  %1458 = vmatmul.bf16.gmra.mxu0 %v10066_v27 }
 0x1a9   :  { %v10962_v46 = vpop.f32.mrf.mxu1 }
 0x1aa   :  { %v1138_v55 = vadd.f32 %v10873_v6, %v1009_v3  ;;  %v756_v6 = vadd.f32 %v755_v12, %v10343_v18 }
 0x1ab   :  { %v762_v29 = vpop.f32.mrf.mxu0 }
 0x1ac   :  { %v1816_v26 = vmax.f32 %v1138_v55, 0.0  ;;  %v885_v8 = vadd.f32 %v10900_v43, %v756_v6  ;;  %v758_v55 = vadd.f32 %v757_v49, %v10343_v18  ;;  %v9366_v43 = vld [vmem:[%s15029_s1 + $0x16c] sm:$0xf] }
 0x1ae   :  { %v1951_v30 = vpack.c.bf16 %v1816_v26, %v1815_v45  ;;  %v1823_v12 = vmax.f32 %v885_v8, 0.0  ;;  %v887_v15 = vadd.f32 %v10914_v17, %v758_v55  ;;  %v7285_v8 = vld [vmem:[%s15029_s1 + $0x158] sm:$0xf0] }
 0x1af   :  { %v1010_v28 = vpop.f32.mrf.mxu2 }
 0x1b0   :  { %2047 = vst [vmem:[#allocation2 + $0x1e0] sm:$0xff] %v1951_v30  ;;  %v1011_v24 = vadd.f32 %v1010_v28, %v10361_v36  ;;  %v10968_v2 = vpop.f32.mrf.mxu3  ;;  %v7301_v28 = vld [vmem:[%s15029_s1 + $0x178] sm:$0xf0]  ;;  %v1827_v17 = vmax.f32 %v887_v15, 0.0 }
 0x1b1   :  { %v10970_v52 = vpop.f32.mrf.mxu1 }
 0x1b2   :  { %v1140_v41 = vadd.f32 %v10896_v14, %v1011_v24 }
 0x1b3   :  { %v765_v26 = vpop.f32.mrf.mxu0 }
 0x1b4   :  { %v1820_v13 = vmax.f32 %v1140_v41, 0.0  ;;  %1052 = vmatmul.bf16.gmra.mxu2 %v10050_v20  ;;  %1205 = vmatmul.bf16.gmra.mxu1 %v10094_v37  ;;  %v7304_v41 = vor.u32 %v9366_v43, %v7301_v28 }
 0x1b5   :  { %7356 = vmatmul.msk.bf16.gmra.mxu3 %vm598_vm0, %v10086_v34 }
 0x1b6   :  { %v1953_v11 = vpack.c.bf16 %v1820_v13, %v1819_v9  ;;  %v761_v13 = vadd.f32 %v760_v25, %v10343_v18 }
 0x1b7   :  { %v1013_v31 = vpop.f32.mrf.mxu2 }
 0x1b8   :  { %2049 = vst [vmem:[#allocation2 + $0x1f0] sm:$0xff] %v1953_v11  ;;  %v1014_v27 = vadd.f32 %v1013_v31, %v10361_v36  ;;  %v10981_v3 = vpop.f32.mrf.mxu3  ;;  %1463 = vmatmul.bf16.gmra.mxu0 %v10094_v37  ;;  %v9362_v11 = vld [vmem:[%s15029_s1 + $0x14c] sm:$0xf]  ;;  %v890_v25 = vadd.f32 %v10923_v48, %v761_v13 }
 0x1b9   :  { %v10983_v14 = vpop.f32.mrf.mxu1  ;;  %v7288_v37 = vor.u32 %v9362_v11, %v7285_v8 }
 0x1ba   :  { %v1143_v45 = vadd.f32 %v10912_v54, %v1014_v27  ;;  %v9358_v27 = vld [vmem:[%s15029_s1 + $0x12c] sm:$0xf]  ;;  %v1831_v48 = vmax.f32 %v890_v25, 0.0  ;;  %v7843_v25 = vld [vmem:[%s15032_s3 + $0x370] sm:$0xf] }
 0x1bc   :  { %v1824_v39 = vmax.f32 %v1143_v45, 0.0  ;;  %v767_v45 = vpop.f32.mrf.mxu0 }
 0x1be   :  { %v1955_v30 = vpack.c.bf16 %v1824_v39, %v1823_v12  ;;  %v7269_v12 = vld [vmem:[%s15029_s1 + $0x138] sm:$0xf0] }
 0x1bf   :  { %v1015_v24 = vpop.f32.mrf.mxu2  ;;  %v7272_v43 = vor.u32 %v9358_v27, %v7269_v12 }
 0x1c0   :  { %2051 = vst [vmem:[#allocation2 + $0x200] sm:$0xff] %v1955_v30  ;;  %v1016_v9 = vadd.f32 %v1015_v24, %v10361_v36  ;;  %v10995_v54 = vpop.f32.mrf.mxu3  ;;  %v763_v24 = vadd.f32 %v762_v29, %v10343_v18  ;;  %v9592_v29 = vld [vmem:[%s15032_s3 + $0x3f4] sm:$0xf0] }
 0x1c1   :  { %v10997_v49 = vpop.f32.mrf.mxu1 }
 0x1c2   :  { %v1145_v6 = vadd.f32 %v10921_v23, %v1016_v9  ;;  %v9354_v9 = vld [vmem:[%s15029_s1 + $0x10c] sm:$0xf]  ;;  %v892_v11 = vadd.f32 %v10935_v50, %v763_v24  ;;  %v9576_v50 = vld [vmem:[%s15032_s3 + $0x374] sm:$0xf0] }
 0x1c4   :  { %v1828_v31 = vmax.f32 %v1145_v6, 0.0  ;;  %1210 = vmatmul.bf16.gmra.mxu1 %v10125_v47  ;;  %1310 = vmatmul.bf16.vlgmr.msra.gmra.mxu2 %v10050_v20 }
 0x1c5   :  { %7357 = vmatmul.msk.bf16.gmra.mxu3 %vm598_vm0, %v10117_v44  ;;  %1578 = vmatpush.bf16.msra.mxu2 %v7304_v41  ;;  %v7253_v41 = vld [vmem:[%s15029_s1 + $0x118] sm:$0xf0] }
 0x1c6   :  { %v1957_v23 = vpack.c.bf16 %v1828_v31, %v1827_v17  ;;  %v7256_v6 = vor.u32 %v9354_v9, %v7253_v41 }
 0x1c7   :  { %v1018_v55 = vpop.f32.mrf.mxu2 }
 0x1c8   :  { %2053 = vst [vmem:[#allocation2 + $0x210] sm:$0xff] %v1957_v23  ;;  %v1019_v39 = vadd.f32 %v1018_v55, %v10361_v36  ;;  %v11020_v30 = vpop.f32.mrf.mxu3  ;;  %v770_v23 = vpop.f32.mrf.mxu0  ;;  %v7844_v55 = vor.u32 %v9576_v50, %v7843_v25  ;;  %1468 = vmatmul.bf16.gmra.mxu0 %v10125_v47 }
 0x1c9   :  { %v11022_v15 = vpop.f32.mrf.mxu1  ;;  %1579 = vmatpush.bf16.msra.mxu2 %v7288_v37 }
 0x1ca   :  { %v1148_v28 = vadd.f32 %v10933_v1, %v1019_v39  ;;  %v7907_v1 = vld [vmem:[%s15032_s3 + $0x3f0] sm:$0xf]  ;;  %v1835_v39 = vmax.f32 %v892_v11, 0.0  ;;  %3010 = vmatpush.bf16.msra.mxu0 %v7844_v55  ;;  %v9544_v11 = vld [vmem:[%s15032_s3 + $0x274] sm:$0xf0] }
 0x1cb   :  { %v7908_v12 = vor.u32 %v9592_v29, %v7907_v1 }
 0x1cc   :  { %v1832_v17 = vmax.f32 %v1148_v28, 0.0 }
 0x1cd   :  { %1580 = vmatpush.bf16.msra.mxu2 %v7272_v43 }
 0x1ce   :  { %v1959_v13 = vpack.c.bf16 %v1832_v17, %v1831_v48  ;;  %v766_v48 = vadd.f32 %v765_v26, %v10343_v18  ;;  %v7779_v26 = vld [vmem:[%s15032_s3 + $0x2f0] sm:$0xf]  ;;  %v9560_v17 = vld [vmem:[%s15032_s3 + $0x2f4] sm:$0xf0] }
 0x1cf   :  { %v1020_v8 = vpop.f32.mrf.mxu2 }
 0x1d0   :  { %2055 = vst [vmem:[#allocation2 + $0x220] sm:$0xff] %v1959_v13  ;;  %v1021_v31 = vadd.f32 %v1020_v8, %v10361_v36  ;;  %v11040_v37 = vpop.f32.mrf.mxu3  ;;  %v895_v9 = vadd.f32 %v10949_v5, %v766_v48  ;;  %v7780_v13 = vor.u32 %v9560_v17, %v7779_v26  ;;  %v7715_v5 = vld [vmem:[%s15032_s3 + $0x270] sm:$0xf]  ;;  %v768_v8 = vadd.f32 %v767_v45, %v10343_v18 }
 0x1d1   :  { %v11048_v27 = vpop.f32.mrf.mxu1  ;;  %1581 = vmatpush.bf16.msra.mxu2 %v7256_v6  ;;  %v7716_v25 = vor.u32 %v9544_v11, %v7715_v5 }
 0x1d2   :  { %v1150_v43 = vadd.f32 %v10947_v62, %v1021_v31  ;;  %v1839_v1 = vmax.f32 %v895_v9, 0.0  ;;  %v772_v31 = vpop.f32.mrf.mxu0  ;;  %2941 = vmatpush.bf16.msra.mxu3 %v7780_v13  ;;  %v897_v55 = vadd.f32 %v10962_v46, %v768_v8 }
 0x1d3   :  { %2872 = vmatpush.bf16.msra.mxu1 %v7716_v25 }
 0x1d4   :  { %v1836_v28 = vmax.f32 %v1150_v43, 0.0  ;;  %1215 = vmatmul.bf16.gmra.mxu1 %v10153_v56  ;;  %7353 = vmatmul.msk.bf16.vlgmr.msrb.gmra.mxu2 %vm598_vm0, %v9942_v40 }
 0x1d5   :  { %7358 = vmatmul.msk.bf16.gmra.mxu3 %vm598_vm0, %v10145_v53  ;;  %3079 = vmatpush.bf16.msrb.mxu2 %v7908_v12 }
 0x1d6   :  { %v1961_v24 = vpack.c.bf16 %v1836_v28, %v1835_v39 }
 0x1d7   :  { %v1023_v47 = vpop.f32.mrf.mxu2 }
 0x1d8   :  { %2057 = vst [vmem:[#allocation2 + $0x230] sm:$0xff] %v1961_v24  ;;  %v1024_v62 = vadd.f32 %v1023_v47, %v10361_v36  ;;  %v11060_v41 = vpop.f32.mrf.mxu3  ;;  %1473 = vmatmul.bf16.gmra.mxu0 %v10153_v56  ;;  %v771_v24 = vadd.f32 %v770_v23, %v10343_v18 }
 0x1d9   :  { %v11068_v6 = vpop.f32.mrf.mxu1 }
 0x1da   :  { %v1153_v29 = vadd.f32 %v10960_v35, %v1024_v62  ;;  %v1843_v35 = vmax.f32 %v897_v55, 0.0  ;;  %v775_v46 = vpop.f32.mrf.mxu0  ;;  %v900_v62 = vadd.f32 %v10970_v52, %v771_v24 }
 0x1dc   :  { %v1840_v50 = vmax.f32 %v1153_v29, 0.0  ;;  %v1847_v17 = vmax.f32 %v900_v62, 0.0 }
 0x1de   :  { %v1963_v12 = vpack.c.bf16 %v1840_v50, %v1839_v1 }
 0x1df   :  { %v1025_v39 = vpop.f32.mrf.mxu2 }
 0x1e0   :  { %2059 = vst [vmem:[#allocation2 + $0x240] sm:$0xff] %v1963_v12  ;;  %v1026_v43 = vadd.f32 %v1025_v39, %v10361_v36  ;;  %v11080_v48 = vpop.f32.mrf.mxu3 }
 0x1e1   :  { %v11082_v28 = vpop.f32.mrf.mxu1 }
 0x1e2   :  { %v1155_v45 = vadd.f32 %v10968_v2, %v1026_v43  ;;  %v777_v29 = vpop.f32.mrf.mxu0 }
 0x1e4   :  { %v1844_v9 = vmax.f32 %v1155_v45, 0.0  ;;  %1220 = vmatmul.bf16.gmra.mxu1 %v10181_v4  ;;  %7377 = vmatmul.msk.bf16.vlgmr.msra.gmra.mxu2 %vm598_vm0, %v9942_v40  ;;  %v773_v40 = vadd.f32 %v772_v31, %v10343_v18  ;;  %v776_v31 = vadd.f32 %v775_v46, %v10343_v18  ;;  %v7899_v45 = vld [vmem:[%s15032_s3 + $0x3e0] sm:$0xf] }
 0x1e5   :  { %7359 = vmatmul.msk.bf16.gmra.mxu3 %vm598_vm0, %v10173_v0 }
 0x1e6   :  { %v1965_v47 = vpack.c.bf16 %v1844_v9, %v1843_v35  ;;  %v902_v1 = vadd.f32 %v10983_v14, %v773_v40  ;;  %v905_v39 = vadd.f32 %v10997_v49, %v776_v31 }
 0x1e7   :  { %v1028_v26 = vpop.f32.mrf.mxu2 }
 0x1e8   :  { %2061 = vst [vmem:[#allocation2 + $0x250] sm:$0xff] %v1965_v47  ;;  %v1029_v56 = vadd.f32 %v1028_v26, %v10361_v36  ;;  %v11094_v2 = vpop.f32.mrf.mxu3  ;;  %1478 = vmatmul.bf16.gmra.mxu0 %v10181_v4  ;;  %v1851_v12 = vmax.f32 %v902_v1, 0.0  ;;  %v1855_v46 = vmax.f32 %v905_v39, 0.0  ;;  %v778_v47 = vadd.f32 %v777_v29, %v10343_v18  ;;  %v9558_v29 = vld [vmem:[%s15032_s3 + $0x2e4] sm:$0xf0] }
 0x1e9   :  { %v11096_v23 = vpop.f32.mrf.mxu1 }
 0x1ea   :  { %v1158_v13 = vadd.f32 %v10981_v3, %v1029_v56  ;;  %v907_v56 = vadd.f32 %v11022_v15, %v778_v47  ;;  %v7771_v15 = vld [vmem:[%s15032_s3 + $0x2e0] sm:$0xf] }
 0x1eb   :  { %v7772_v31 = vor.u32 %v9558_v29, %v7771_v15 }
 0x1ec   :  { %v1848_v5 = vmax.f32 %v1158_v13, 0.0 }
 0x1ed   :  { %2942 = vmatpush.bf16.msra.mxu3 %v7772_v31 }
 0x1ee   :  { %v1967_v11 = vpack.c.bf16 %v1848_v5, %v1847_v17  ;;  %v7835_v5 = vld [vmem:[%s15032_s3 + $0x360] sm:$0xf] }
 0x1ef   :  { %v1030_v8 = vpop.f32.mrf.mxu2 }
 0x1f0   :  { %2063 = vst [vmem:[#allocation2 + $0x260] sm:$0xff] %v1967_v11  ;;  %v1031_v52 = vadd.f32 %v1030_v8, %v10361_v36  ;;  %v11102_v25 = vpop.f32.mrf.mxu3  ;;  %v1859_v8 = vmax.f32 %v907_v56, 0.0 }
 0x1f1   :  { %v11104_v50 = vpop.f32.mrf.mxu1 }
 0x1f2   :  { %v1160_v3 = vadd.f32 %v10995_v54, %v1031_v52  ;;  %v780_v54 = vpop.f32.mrf.mxu0 }
 0x1f4   :  { %v1852_v55 = vmax.f32 %v1160_v3, 0.0  ;;  %1225 = vmatmul.bf16.gmra.mxu1 %v10203_v10  ;;  %7378 = vmatmul.msk.bf16.gmra.mxu2 %vm598_vm0, %v9992_v61  ;;  %v9590_v61 = vld [vmem:[%s15032_s3 + $0x3e4] sm:$0xf0] }
 0x1f5   :  { %7360 = vmatmul.msk.bf16.gmra.mxu3 %vm598_vm0, %v10195_v7  ;;  %v7900_v9 = vor.u32 %v9590_v61, %v7899_v45 }
 0x1f6   :  { %v1969_v14 = vpack.c.bf16 %v1852_v55, %v1851_v12  ;;  %v781_v12 = vadd.f32 %v780_v54, %v10343_v18 }
 0x1f7   :  { %v1033_v43 = vpop.f32.mrf.mxu2  ;;  %3080 = vmatpush.bf16.msrb.mxu2 %v7900_v9 }
 0x1f8   :  { %2065 = vst [vmem:[#allocation2 + $0x270] sm:$0xff] %v1969_v14  ;;  %v1034_v4 = vadd.f32 %v1033_v43, %v10361_v36  ;;  %v11116_v35 = vpop.f32.mrf.mxu3  ;;  %1483 = vmatmul.bf16.gmra.mxu0 %v10203_v10  ;;  %v910_v10 = vadd.f32 %v11048_v27, %v781_v12 }
 0x1f9   :  { %v11124_v24 = vpop.f32.mrf.mxu1 }
 0x1fa   :  { %v1163_v49 = vadd.f32 %v11020_v30, %v1034_v4  ;;  %v9574_v30 = vld [vmem:[%s15032_s3 + $0x364] sm:$0xf0]  ;;  %v782_v3 = vpop.f32.mrf.mxu0  ;;  %v7707_v4 = vld [vmem:[%s15032_s3 + $0x260] sm:$0xf]  ;;  %v1863_v61 = vmax.f32 %v910_v10, 0.0 }
 0x1fb   :  { %v7836_v1 = vor.u32 %v9574_v30, %v7835_v5  ;;  %v783_v9 = vadd.f32 %v782_v3, %v10343_v18 }
 0x1fc   :  { %v1856_v62 = vmax.f32 %v1163_v49, 0.0 }
 0x1fd   :  { %3011 = vmatpush.bf16.msra.mxu0 %v7836_v1 }
 0x1fe   :  { %v1971_v26 = vpack.c.bf16 %v1856_v62, %v1855_v46  ;;  %v912_v62 = vadd.f32 %v11068_v6, %v783_v9 }
 0x1ff   :  { %v1035_v17 = vpop.f32.mrf.mxu2 }
 0x200   :  { %2067 = vst [vmem:[#allocation2 + $0x280] sm:$0xff] %v1971_v26  ;;  %v1036_v13 = vadd.f32 %v1035_v17, %v10361_v36  ;;  %v11130_v40 = vpop.f32.mrf.mxu3  ;;  %v1867_v5 = vmax.f32 %v912_v62, 0.0  ;;  %v9572_v62 = vld [vmem:[%s15032_s3 + $0x354] sm:$0xf0] }
 0x201   :  { %v11138_v11 = vpop.f32.mrf.mxu1 }
 0x202   :  { %v1165_v52 = vadd.f32 %v11040_v37, %v1036_v13  ;;  %v785_v49 = vpop.f32.mrf.mxu0 }
 0x203   :  { %v786_v30 = vadd.f32 %v785_v49, %v10343_v18  ;;  %v9588_v49 = vld [vmem:[%s15032_s3 + $0x3d4] sm:$0xf0] }
 0x204   :  { %v1860_v55 = vmax.f32 %v1165_v52, 0.0  ;;  %1230 = vmatmul.bf16.gmra.mxu1 %v10233_v22  ;;  %7379 = vmatmul.msk.bf16.gmra.mxu2 %vm598_vm0, %v10052_v21  ;;  %v9542_v21 = vld [vmem:[%s15032_s3 + $0x264] sm:$0xf0] }
 0x205   :  { %7361 = vmatmul.msk.bf16.gmra.mxu3 %vm598_vm0, %v10223_v16  ;;  %v7708_v45 = vor.u32 %v9542_v21, %v7707_v4  ;;  %v915_v15 = vadd.f32 %v11082_v28, %v786_v30  ;;  %v15146_v30 = vld [vmem:[#allocation4_spill] sm:$0xff] }
 0x206   :  { %v1973_v14 = vpack.c.bf16 %v1860_v55, %v1859_v8 }
 0x207   :  { %v1038_v39 = vpop.f32.mrf.mxu2  ;;  %2873 = vmatpush.bf16.msra.mxu1 %v7708_v45  ;;  %v1871_v12 = vmax.f32 %v915_v15, 0.0  ;;  %v7763_v15 = vld [vmem:[%s15032_s3 + $0x2d0] sm:$0xf] }
 0x208   :  { %2069 = vst [vmem:[#allocation2 + $0x290] sm:$0xff] %v1973_v14  ;;  %v1039_v37 = vadd.f32 %v1038_v39, %v10361_v36  ;;  %v11156_v43 = vpop.f32.mrf.mxu3  ;;  %1488 = vmatmul.bf16.gmra.mxu0 %v10233_v22 }
 0x209   :  { %v11164_v54 = vpop.f32.mrf.mxu1 }
 0x20a   :  { %v1168_v27 = vadd.f32 %v11060_v41, %v1039_v37  ;;  %v787_v29 = vpop.f32.mrf.mxu0 }
 0x20c   :  { %v1864_v46 = vmax.f32 %v1168_v27, 0.0 }
 0x20e   :  { %v1975_v47 = vpack.c.bf16 %v1864_v46, %v1863_v61 }
 0x20f   :  { %v1040_v26 = vpop.f32.mrf.mxu2 }
 0x210   :  { %2071 = vst [vmem:[#allocation2 + $0x2a0] sm:$0xff] %v1975_v47  ;;  %v1041_v56 = vadd.f32 %v1040_v26, %v10361_v36  ;;  %v11170_v17 = vpop.f32.mrf.mxu3 }
 0x211   :  { %v11172_v13 = vpop.f32.mrf.mxu1 }
 0x212   :  { %v1170_v41 = vadd.f32 %v11080_v48, %v1041_v56 }
 0x214   :  { %v1868_v1 = vmax.f32 %v1170_v41, 0.0  ;;  %1235 = vmatmul.bf16.gmra.mxu1 %v10269_v38  ;;  %7380 = vmatmul.msk.bf16.gmra.mxu2 %vm598_vm0, %v10086_v34  ;;  %v788_v34 = vadd.f32 %v787_v29, %v10343_v18  ;;  %v9556_v29 = vld [vmem:[%s15032_s3 + $0x2d4] sm:$0xf0] }
 0x215   :  { %7362 = vmatmul.msk.bf16.gmra.mxu3 %vm598_vm0, %v10259_v32  ;;  %v11191_v10 = vpop.f32.mrf.mxu0 }
 0x216   :  { %v1977_v6 = vpack.c.bf16 %v1868_v1, %v1867_v5  ;;  %v917_v14 = vadd.f32 %v11096_v23, %v788_v34  ;;  %v791_v23 = vadd.f32 %v10277_v42, %v10343_v18  ;;  %v793_v1 = vadd.f32 %v15146_v30, %v10343_v18 }
 0x217   :  { %v1043_v8 = vpop.f32.mrf.mxu2 }
 0x218   :  { %2073 = vst [vmem:[#allocation2 + $0x2b0] sm:$0xff] %v1977_v6  ;;  %v1044_v22 = vadd.f32 %v1043_v8, %v10361_v36  ;;  %v11184_v48 = vpop.f32.mrf.mxu3  ;;  %1493 = vmatmul.bf16.gmra.mxu0 %v10269_v38  ;;  %v1875_v21 = vmax.f32 %v917_v14, 0.0  ;;  %v920_v38 = vadd.f32 %v11104_v50, %v791_v23  ;;  %v7827_v50 = vld [vmem:[%s15032_s3 + $0x350] sm:$0xf] }
 0x219   :  { %v11186_v52 = vpop.f32.mrf.mxu1  ;;  %v7828_v56 = vor.u32 %v9572_v62, %v7827_v50  ;;  %v15150_v62 = vld [vmem:[#allocation6_spill] sm:$0xff] }
 0x21a   :  { %v1173_v3 = vadd.f32 %v11094_v2, %v1044_v22  ;;  %v1879_v5 = vmax.f32 %v920_v38, 0.0  ;;  %v7764_v22 = vor.u32 %v9556_v29, %v7763_v15 }
 0x21b   :  { %3012 = vmatpush.bf16.msra.mxu0 %v7828_v56 }
 0x21c   :  { %v1872_v31 = vmax.f32 %v1173_v3, 0.0  ;;  %2943 = vmatpush.bf16.msra.mxu3 %v7764_v22 }
 0x21d   :  { %v11207_v27 = vpop.f32.mrf.mxu0 }
 0x21e   :  { %v1979_v55 = vpack.c.bf16 %v1872_v31, %v1871_v12  ;;  %v922_v12 = vadd.f32 %v11124_v24, %v793_v1  ;;  %v15148_v24 = vld [vmem:[#allocation7_spill] sm:$0xff] }
 0x21f   :  { %v1045_v28 = vpop.f32.mrf.mxu2 }
 0x220   :  { %2075 = vst [vmem:[#allocation2 + $0x2c0] sm:$0xff] %v1979_v55  ;;  %v1046_v39 = vadd.f32 %v1045_v28, %v10361_v36  ;;  %v11194_v37 = vpop.f32.mrf.mxu3  ;;  %v1883_v14 = vmax.f32 %v922_v12, 0.0 }
 0x221   :  { %v11196_v4 = vpop.f32.mrf.mxu1 }
 0x222   :  { %v1175_v2 = vadd.f32 %v11102_v25, %v1046_v39  ;;  %v15147_v39 = vld [vmem:[#allocation8_spill] sm:$0xff] }
 0x224   :  { %v1876_v45 = vmax.f32 %v1175_v2, 0.0  ;;  %1240 = vmatmul.bf16.gmra.mxu1 %v10306_v58  ;;  %7381 = vmatmul.msk.bf16.gmra.mxu2 %vm598_vm0, %v10117_v44  ;;  %v7891_v44 = vld [vmem:[%s15032_s3 + $0x3d0] sm:$0xf] }
 0x225   :  { %7363 = vmatmul.msk.bf16.gmra.mxu3 %vm598_vm0, %v10293_v51  ;;  %v7892_v47 = vor.u32 %v9588_v49, %v7891_v44  ;;  %v11236_v8 = vpop.f32.mrf.mxu0 }
 0x226   :  { %v1981_v61 = vpack.c.bf16 %v1876_v45, %v1875_v21  ;;  %v15149_v21 = vld [vmem:[#allocation5_spill] sm:$0xff] }
 0x227   :  { %v1048_v9 = vpop.f32.mrf.mxu2  ;;  %3081 = vmatpush.bf16.msrb.mxu2 %v7892_v47  ;;  %v796_v2 = vadd.f32 %v15149_v21, %v10343_v18  ;;  %v7883_v21 = vld [vmem:[%s15032_s3 + $0x3c0] sm:$0xf] }
 0x228   :  { %2077 = vst [vmem:[#allocation2 + $0x2d0] sm:$0xff] %v1981_v61  ;;  %v1049_v25 = vadd.f32 %v1048_v9, %v10361_v36  ;;  %v11211_v46 = vpop.f32.mrf.mxu3  ;;  %1498 = vmatmul.bf16.gmra.mxu0 %v10306_v58  ;;  %v7699_v58 = vld [vmem:[%s15032_s3 + $0x250] sm:$0xf] }
 0x229   :  { %v11219_v42 = vpop.f32.mrf.mxu1 }
 0x22a   :  { %v1178_v26 = vadd.f32 %v11116_v35, %v1049_v25 }
 0x22c   :  { %v1880_v41 = vmax.f32 %v1178_v26, 0.0  ;;  %v798_v26 = vadd.f32 %v15150_v62, %v10343_v18  ;;  %v15151_v18 = vld [vmem:[#allocation10_spill] sm:$0xff]  ;;  %v9554_v62 = vld [vmem:[%s15032_s3 + $0x2c4] sm:$0xf0] }
 0x22d   :  { %v11259_v23 = vpop.f32.mrf.mxu0 }
 0x22e   :  { %v1983_v6 = vpack.c.bf16 %v1880_v41, %v1879_v5 }
 0x22f   :  { %v1050_v35 = vpop.f32.mrf.mxu2 }
 0x230   :  { %2079 = vst [vmem:[#allocation2 + $0x2e0] sm:$0xff] %v1983_v6  ;;  %v1051_v3 = vadd.f32 %v1050_v35, %v10361_v36  ;;  %v11240_v34 = vpop.f32.mrf.mxu3  ;;  %v15152_v35 = vld [vmem:[#allocation9_spill] sm:$0xff] }
 0x231   :  { %v11242_v31 = vpop.f32.mrf.mxu1 }
 0x232   :  { %v1180_v55 = vadd.f32 %v11130_v40, %v1051_v3  ;;  %v9540_v40 = vld [vmem:[%s15032_s3 + $0x254] sm:$0xf0] }
 0x233   :  { %v7700_v9 = vor.u32 %v9540_v40, %v7699_v58 }
 0x234   :  { %v1884_v28 = vmax.f32 %v1180_v55, 0.0  ;;  %1245 = vmatmul.bf16.gmra.mxu1 %v15147_v39  ;;  %7382 = vmatmul.msk.bf16.gmra.mxu2 %vm598_vm0, %v10145_v53  ;;  %v925_v53 = vadd.f32 %v11138_v11, %v796_v2  ;;  %v927_v11 = vadd.f32 %v11164_v54, %v798_v26  ;;  %v9586_v2 = vld [vmem:[%s15032_s3 + $0x3c4] sm:$0xf0]  ;;  %v9811_v26 = vld [vmem:[%s15031_s2] sm:$0xf] }
 0x235   :  { %7364 = vmatmul.msk.bf16.gmra.mxu3 %vm598_vm0, %v15148_v24  ;;  %2874 = vmatpush.bf16.msra.mxu1 %v7700_v9  ;;  %v11270_v5 = vpop.f32.mrf.mxu0  ;;  %v7884_v40 = vor.u32 %v9586_v2, %v7883_v21  ;;  %v7691_v2 = vld [vmem:[%s15032_s3 + $0x240] sm:$0xf] }
 0x236   :  { %v1985_v45 = vpack.c.bf16 %v1884_v28, %v1883_v14  ;;  %v1887_v47 = vmax.f32 %v925_v53, 0.0  ;;  %v1891_v15 = vmax.f32 %v927_v11, 0.0  ;;  %v15153_v28 = vld [vmem:[#allocation12_spill] sm:$0xff]  ;;  %v9570_v53 = vld [vmem:[%s15032_s3 + $0x344] sm:$0xf0] }
 0x237   :  { %v1053_v61 = vpop.f32.mrf.mxu2  ;;  %3082 = vmatpush.bf16.msrb.mxu2 %v7884_v40 }
 0x238   :  { %2081 = vst [vmem:[#allocation2 + $0x2f0] sm:$0xff] %v1985_v45  ;;  %v1054_v38 = vadd.f32 %v1053_v61, %v10361_v36  ;;  %v11263_v25 = vpop.f32.mrf.mxu3  ;;  %1503 = vmatmul.bf16.gmra.mxu0 %v15147_v39  ;;  %v15154_v39 = vld [vmem:[#allocation11_spill] sm:$0xff] }
 0x239   :  { %v11265_v44 = vpop.f32.mrf.mxu1 }
 0x23a   :  { %v1183_v49 = vadd.f32 %v11156_v43, %v1054_v38 }
 0x23c   :  { %v1888_v50 = vmax.f32 %v1183_v49, 0.0 }
 0x23e   :  { %v1987_v56 = vpack.c.bf16 %v1888_v50, %v1887_v47  ;;  %v7755_v50 = vld [vmem:[%s15032_s3 + $0x2c0] sm:$0xf] }
 0x23f   :  { %v1055_v41 = vpop.f32.mrf.mxu2 }
 0x240   :  { %2083 = vst [vmem:[#allocation2 + $0x300] sm:$0xff] %v1987_v56  ;;  %v1056_v30 = vadd.f32 %v1055_v41, %v10361_v36  ;;  %v11274_v1 = vpop.f32.mrf.mxu3  ;;  %v11285_v36 = vpop.f32.mrf.mxu0  ;;  %v11336_v56 = vperm.slane %v9811_v26, 2  ;;  %v11338_v41 = vperm.slane %v9811_v26, 3 }
 0x241   :  { %v11276_v6 = vpop.f32.mrf.mxu1 }
 0x242   :  { %v1185_v43 = vadd.f32 %v11170_v17, %v1056_v30  ;;  %v7756_v30 = vor.u32 %v9554_v62, %v7755_v50  ;;  %v1457_v26 = vadd.f32 %v11207_v27, %v11338_v41  ;;  %v1460_v27 = vadd.f32 %v11236_v8, %v11338_v41 }
 0x244   :  { %v1892_v29 = vmax.f32 %v1185_v43, 0.0  ;;  %1250 = vmatmul.bf16.gmra.mxu1 %v15151_v18  ;;  %7383 = vmatmul.msk.bf16.gmra.mxu2 %vm598_vm0, %v10173_v0 }
 0x245   :  { %7365 = vmatmul.msk.bf16.gmra.mxu3 %vm598_vm0, %v15152_v35 }
 0x246   :  { %v1989_v54 = vpack.c.bf16 %v1892_v29, %v1891_v15  ;;  %v1197_v15 = vadd.f32 %v11172_v13, %v11336_v56  ;;  %2944 = vmatpush.bf16.msra.mxu3 %v7756_v30  ;;  %v1455_v29 = vadd.f32 %v11191_v10, %v11338_v41  ;;  %v9538_v13 = vld [vmem:[%s15032_s3 + $0x244] sm:$0xf0] }
 0x247   :  { %v11287_v22 = vpop.f32.mrf.mxu2  ;;  %v7692_v40 = vor.u32 %v9538_v13, %v7691_v2 }
 0x248   :  { %2085 = vst [vmem:[#allocation2 + $0x310] sm:$0xff] %v1989_v54  ;;  %v11289_v12 = vpop.f32.mrf.mxu3  ;;  %v11293_v17 = vpop.f32.mrf.mxu0  ;;  %1508 = vmatmul.bf16.gmra.mxu0 %v15151_v18  ;;  %v15155_v18 = vld [vmem:[#allocation14_spill] sm:$0xff]  ;;  %v15156_v54 = vld [vmem:[#allocation13_spill] sm:$0xff] }
 0x249   :  { %v11291_v3 = vpop.f32.mrf.mxu1  ;;  %2875 = vmatpush.bf16.msra.mxu1 %v7692_v40  ;;  %v1202_v40 = vadd.f32 %v11196_v4, %v11336_v56 }
 0x24f   :  { %v11295_v55 = vpop.f32.mrf.mxu2 }
 0x250   :  { %v11297_v14 = vpop.f32.mrf.mxu3  ;;  %v11313_v45 = vpop.f32.mrf.mxu0 }
 0x251   :  { %v11299_v0 = vpop.f32.mrf.mxu1 }
 0x254   :  { %1255 = vmatmul.bf16.gmra.mxu1 %v15153_v28  ;;  %7384 = vmatmul.msk.bf16.gmra.mxu2 %vm598_vm0, %v10195_v7  ;;  %v7819_v7 = vld [vmem:[%s15032_s3 + $0x340] sm:$0xf] }
 0x255   :  { %7366 = vmatmul.msk.bf16.gmra.mxu3 %vm598_vm0, %v15154_v39  ;;  %v7820_v47 = vor.u32 %v9570_v53, %v7819_v7 }
 0x257   :  { %v1325_v58 = vpop.f32.mrf.mxu2  ;;  %3013 = vmatpush.bf16.msra.mxu0 %v7820_v47 }
 0x258   :  { %v11315_v61 = vpop.f32.mrf.mxu3  ;;  %v11325_v38 = vpop.f32.mrf.mxu0  ;;  %1513 = vmatmul.bf16.gmra.mxu0 %v15153_v28  ;;  %v1326_v21 = vadd.f32 %v1325_v58, %v1197_v15  ;;  %v1199_v58 = vadd.f32 %v11186_v52, %v11336_v56 }
 0x259   :  { %v11317_v9 = vpop.f32.mrf.mxu1 }
 0x25a   :  { %v1705_v47 = vmax.f32 %v1326_v21, 0.0 }
 0x25f   :  { %v1327_v49 = vpop.f32.mrf.mxu2 }
 0x260   :  { %v11340_v11 = vpop.f32.mrf.mxu3  ;;  %v11360_v28 = vpop.f32.mrf.mxu0  ;;  %v1328_v30 = vadd.f32 %v1327_v49, %v1199_v58  ;;  %v15158_v58 = vld [vmem:[#allocation15_spill] sm:$0xff] }
 0x261   :  { %v11342_v43 = vpop.f32.mrf.mxu1 }
 0x262   :  { %v1709_v52 = vmax.f32 %v1328_v30, 0.0  ;;  %v1204_v30 = vadd.f32 %v11219_v42, %v11336_v56  ;;  %v1207_v42 = vadd.f32 %v11242_v31, %v11336_v56  ;;  %v7875_v31 = vld [vmem:[%s15032_s3 + $0x3b0] sm:$0xf] }
 0x264   :  { %1260 = vmatmul.bf16.gmra.mxu1 %v15155_v18  ;;  %7385 = vmatmul.msk.bf16.gmra.mxu2 %vm598_vm0, %v10223_v16 }
 0x265   :  { %7367 = vmatmul.msk.bf16.gmra.mxu3 %vm598_vm0, %v15156_v54 }
 0x267   :  { %v1583_v10 = vpop.f32.mrf.mxu2 }
 0x268   :  { %v11362_v7 = vpop.f32.mrf.mxu3  ;;  %v1584_v53 = vadd.f32 %v1583_v10, %v1455_v29  ;;  %v11370_v15 = vpop.f32.mrf.mxu0  ;;  %1518 = vmatmul.bf16.gmra.mxu0 %v15155_v18 }
 0x269   :  { %v11364_v16 = vpop.f32.mrf.mxu1 }
 0x26a   :  { %v1706_v50 = vmax.f32 %v1584_v53, 0.0  ;;  %v15157_v53 = vld [vmem:[#allocation16_spill] sm:$0xff] }
 0x26c   :  { %v1896_v62 = vpack.c.bf16 %v1706_v50, %v1705_v47  ;;  %v1331_v47 = vadd.f32 %v11184_v48, %v1202_v40  ;;  %v1462_v48 = vadd.f32 %v11259_v23, %v11338_v41 }
 0x26e   :  { %1992 = vst [vmem:[#allocation2 + $0x28] sm:$0xff] %v1896_v62  ;;  %v1713_v8 = vmax.f32 %v1331_v47, 0.0 }
 0x26f   :  { %v1585_v2 = vpop.f32.mrf.mxu2 }
 0x270   :  { %v11372_v13 = vpop.f32.mrf.mxu3  ;;  %v1586_v29 = vadd.f32 %v1585_v2, %v1457_v26  ;;  %v11387_v4 = vpop.f32.mrf.mxu0 }
 0x271   :  { %v11374_v10 = vpop.f32.mrf.mxu1 }
 0x272   :  { %v1710_v21 = vmax.f32 %v1586_v29, 0.0  ;;  %v1333_v29 = vadd.f32 %v11194_v37, %v1204_v30  ;;  %v1465_v37 = vadd.f32 %v11270_v5, %v11338_v41  ;;  %v1336_v30 = vadd.f32 %v11211_v46, %v1207_v42  ;;  %v9584_v5 = vld [vmem:[%s15032_s3 + $0x3b4] sm:$0xf0] }
 0x274   :  { %v1898_v49 = vpack.c.bf16 %v1710_v21, %v1709_v52  ;;  %1265 = vmatmul.bf16.gmra.mxu1 %v15157_v53  ;;  %7386 = vmatmul.msk.bf16.gmra.mxu2 %vm598_vm0, %v10259_v32  ;;  %v1717_v47 = vmax.f32 %v1333_v29, 0.0  ;;  %v1721_v46 = vmax.f32 %v1336_v30, 0.0 }
 0x275   :  { %7368 = vmatmul.msk.bf16.gmra.mxu3 %vm598_vm0, %v15158_v58 }
 0x276   :  { %1994 = vst [vmem:[#allocation2 + $0x38] sm:$0xff] %v1898_v49 }
 0x277   :  { %v1588_v50 = vpop.f32.mrf.mxu2 }
 0x278   :  { %v11389_v62 = vpop.f32.mrf.mxu3  ;;  %v1589_v18 = vadd.f32 %v1588_v50, %v1460_v27  ;;  %v11398_v40 = vpop.f32.mrf.mxu0  ;;  %1523 = vmatmul.bf16.gmra.mxu0 %v15157_v53 }
 0x279   :  { %v11391_v26 = vpop.f32.mrf.mxu1 }
 0x27a   :  { %v1714_v2 = vmax.f32 %v1589_v18, 0.0  ;;  %v15159_v18 = vld [vmem:[#allocation18_spill] sm:$0xff] }
 0x27c   :  { %v1900_v32 = vpack.c.bf16 %v1714_v2, %v1713_v8  ;;  %v15160_v8 = vld [vmem:[#allocation17_spill] sm:$0xff] }
 0x27e   :  { %1996 = vst [vmem:[#allocation2 + $0x48] sm:$0xff] %v1900_v32  ;;  %v7876_v32 = vor.u32 %v9584_v5, %v7875_v31  ;;  %v7683_v5 = vld [vmem:[%s15032_s3 + $0x230] sm:$0xf] }
 0x27f   :  { %v1590_v52 = vpop.f32.mrf.mxu2 }
 0x280   :  { %v11400_v21 = vpop.f32.mrf.mxu3  ;;  %v1591_v27 = vadd.f32 %v1590_v52, %v1462_v48  ;;  %v11421_v53 = vpop.f32.mrf.mxu0  ;;  %3083 = vmatpush.bf16.msrb.mxu2 %v7876_v32  ;;  %v1209_v52 = vadd.f32 %v11265_v44, %v11336_v56 }
 0x281   :  { %v11402_v49 = vpop.f32.mrf.mxu1 }
 0x282   :  { %v1718_v50 = vmax.f32 %v1591_v27, 0.0  ;;  %v1338_v42 = vadd.f32 %v11240_v34, %v1209_v52  ;;  %v7811_v34 = vld [vmem:[%s15032_s3 + $0x330] sm:$0xf] }
 0x284   :  { %v1902_v23 = vpack.c.bf16 %v1718_v50, %v1717_v47  ;;  %1270 = vmatmul.bf16.gmra.mxu1 %v15159_v18  ;;  %7387 = vmatmul.msk.bf16.gmra.mxu2 %vm598_vm0, %v10293_v51  ;;  %v1467_v50 = vadd.f32 %v11285_v36, %v11338_v41  ;;  %v9568_v36 = vld [vmem:[%s15032_s3 + $0x334] sm:$0xf0] }
 0x285   :  { %7369 = vmatmul.msk.bf16.gmra.mxu3 %vm598_vm0, %v15160_v8 }
 0x286   :  { %1998 = vst [vmem:[#allocation2 + $0x58] sm:$0xff] %v1902_v23  ;;  %v7747_v23 = vld [vmem:[%s15032_s3 + $0x2b0] sm:$0xf] }
 0x287   :  { %v1593_v2 = vpop.f32.mrf.mxu2 }
 0x288   :  { %v11423_v29 = vpop.f32.mrf.mxu3  ;;  %v1594_v51 = vadd.f32 %v1593_v2, %v1465_v37  ;;  %v9552_v37 = vld [vmem:[%s15032_s3 + $0x2b4] sm:$0xf0]  ;;  %v11438_v30 = vpop.f32.mrf.mxu0  ;;  %1528 = vmatmul.bf16.gmra.mxu0 %v15159_v18 }
 0x289   :  { %v11425_v48 = vpop.f32.mrf.mxu1  ;;  %v7748_v44 = vor.u32 %v9552_v37, %v7747_v23  ;;  %v1212_v23 = vadd.f32 %v11276_v6, %v11336_v56 }
 0x28a   :  { %v1722_v27 = vmax.f32 %v1594_v51, 0.0  ;;  %v7812_v51 = vor.u32 %v9568_v36, %v7811_v34  ;;  %v15161_v34 = vld [vmem:[#allocation20_spill] sm:$0xff] }
 0x28b   :  { %2945 = vmatpush.bf16.msra.mxu3 %v7748_v44  ;;  %v15162_v44 = vld [vmem:[#allocation19_spill] sm:$0xff] }
 0x28c   :  { %v1904_v47 = vpack.c.bf16 %v1722_v27, %v1721_v46  ;;  %v9536_v46 = vld [vmem:[%s15032_s3 + $0x234] sm:$0xf0]  ;;  %3014 = vmatpush.bf16.msra.mxu0 %v7812_v51  ;;  %v1214_v51 = vadd.f32 %v11291_v3, %v11336_v56  ;;  %v1217_v3 = vadd.f32 %v11299_v0, %v11336_v56 }
 0x28d   :  { %v7684_v27 = vor.u32 %v9536_v46, %v7683_v5 }
 0x28e   :  { %2000 = vst [vmem:[#allocation2 + $0x68] sm:$0xff] %v1904_v47  ;;  %v1725_v47 = vmax.f32 %v1338_v42, 0.0  ;;  %v1341_v42 = vadd.f32 %v11263_v25, %v1212_v23  ;;  %v1472_v25 = vadd.f32 %v11313_v45, %v11338_v41 }
 0x28f   :  { %v1595_v31 = vpop.f32.mrf.mxu2  ;;  %2876 = vmatpush.bf16.msra.mxu1 %v7684_v27  ;;  %v1343_v27 = vadd.f32 %v11274_v1, %v1214_v51  ;;  %v1475_v1 = vadd.f32 %v11325_v38, %v11338_v41  ;;  %v1346_v51 = vadd.f32 %v11289_v12, %v1217_v3  ;;  %v1477_v12 = vadd.f32 %v11360_v28, %v11338_v41 }
 0x290   :  { %v11449_v2 = vpop.f32.mrf.mxu3  ;;  %v1596_v32 = vadd.f32 %v1595_v31, %v1467_v50  ;;  %v1470_v50 = vadd.f32 %v11293_v17, %v11338_v41  ;;  %v11467_v6 = vpop.f32.mrf.mxu0  ;;  %v1729_v17 = vmax.f32 %v1341_v42, 0.0 }
 0x291   :  { %v11454_v52 = vpop.f32.mrf.mxu1  ;;  %v1733_v42 = vmax.f32 %v1343_v27, 0.0  ;;  %v1737_v38 = vmax.f32 %v1346_v51, 0.0 }
 0x292   :  { %v1726_v37 = vmax.f32 %v1596_v32, 0.0 }
 0x294   :  { %v1906_v31 = vpack.c.bf16 %v1726_v37, %v1725_v47  ;;  %1275 = vmatmul.bf16.gmra.mxu1 %v15161_v34  ;;  %7388 = vmatmul.msk.bf16.gmra.mxu2 %vm598_vm0, %v15148_v24 }
 0x295   :  { %7370 = vmatmul.msk.bf16.gmra.mxu3 %vm598_vm0, %v15162_v44 }
 0x296   :  { %2002 = vst [vmem:[#allocation2 + $0x78] sm:$0xff] %v1906_v31 }
 0x297   :  { %v1598_v36 = vpop.f32.mrf.mxu2 }
 0x298   :  { %v11469_v5 = vpop.f32.mrf.mxu3  ;;  %v1599_v18 = vadd.f32 %v1598_v36, %v1470_v50  ;;  %v11478_v47 = vpop.f32.mrf.mxu0  ;;  %1533 = vmatmul.bf16.gmra.mxu0 %v15161_v34 }
 0x299   :  { %v11471_v32 = vpop.f32.mrf.mxu1 }
 0x29a   :  { %v1730_v46 = vmax.f32 %v1599_v18, 0.0  ;;  %v15163_v18 = vld [vmem:[#allocation22_spill] sm:$0xff] }
 0x29c   :  { %v1908_v24 = vpack.c.bf16 %v1730_v46, %v1729_v17  ;;  %v15164_v17 = vld [vmem:[#allocation21_spill] sm:$0xff] }
 0x29e   :  { %2004 = vst [vmem:[#allocation2 + $0x88] sm:$0xff] %v1908_v24 }
 0x29f   :  { %v1600_v23 = vpop.f32.mrf.mxu2 }
 0x2a0   :  { %v11480_v37 = vpop.f32.mrf.mxu3  ;;  %v1601_v50 = vadd.f32 %v1600_v23, %v1472_v25  ;;  %v11495_v46 = vpop.f32.mrf.mxu0  ;;  %v1219_v25 = vadd.f32 %v11317_v9, %v11336_v56  ;;  %v1222_v9 = vadd.f32 %v11342_v43, %v11336_v56  ;;  %v7867_v43 = vld [vmem:[%s15032_s3 + $0x3a0] sm:$0xf] }
 0x2a1   :  { %v11482_v31 = vpop.f32.mrf.mxu1 }
 0x2a2   :  { %v1734_v36 = vmax.f32 %v1601_v50, 0.0  ;;  %v1348_v50 = vadd.f32 %v11297_v14, %v1219_v25  ;;  %v1480_v14 = vadd.f32 %v11370_v15, %v11338_v41  ;;  %v1351_v25 = vadd.f32 %v11315_v61, %v1222_v9  ;;  %v9582_v15 = vld [vmem:[%s15032_s3 + $0x3a4] sm:$0xf0] }
 0x2a3   :  { %v9550_v61 = vld [vmem:[%s15032_s3 + $0x2a4] sm:$0xf0]  ;;  %v1224_v9 = vadd.f32 %v11364_v16, %v11336_v56 }
 0x2a4   :  { %v1910_v45 = vpack.c.bf16 %v1734_v36, %v1733_v42  ;;  %1280 = vmatmul.bf16.gmra.mxu1 %v15163_v18  ;;  %7389 = vmatmul.msk.bf16.gmra.mxu2 %vm598_vm0, %v15152_v35  ;;  %v1741_v51 = vmax.f32 %v1348_v50, 0.0 }
 0x2a5   :  { %7371 = vmatmul.msk.bf16.gmra.mxu3 %vm598_vm0, %v15164_v17 }
 0x2a6   :  { %2006 = vst [vmem:[#allocation2 + $0x98] sm:$0xff] %v1910_v45 }
 0x2a7   :  { %v1603_v0 = vpop.f32.mrf.mxu2 }
 0x2a8   :  { %v11497_v24 = vpop.f32.mrf.mxu3  ;;  %v1604_v34 = vadd.f32 %v1603_v0, %v1475_v1  ;;  %v11506_v42 = vpop.f32.mrf.mxu0  ;;  %1538 = vmatmul.bf16.gmra.mxu0 %v15163_v18 }
 0x2a9   :  { %v11499_v27 = vpop.f32.mrf.mxu1 }
 0x2aa   :  { %v1738_v23 = vmax.f32 %v1604_v34, 0.0  ;;  %v15165_v34 = vld [vmem:[#allocation24_spill] sm:$0xff] }
 0x2ac   :  { %v1912_v35 = vpack.c.bf16 %v1738_v23, %v1737_v38  ;;  %v15166_v38 = vld [vmem:[#allocation23_spill] sm:$0xff] }
 0x2ae   :  { %2008 = vst [vmem:[#allocation2 + $0xa8] sm:$0xff] %v1912_v35  ;;  %v7868_v35 = vor.u32 %v9582_v15, %v7867_v43  ;;  %v1353_v43 = vadd.f32 %v11340_v11, %v1224_v9  ;;  %v1482_v15 = vadd.f32 %v11387_v4, %v11338_v41  ;;  %v7675_v11 = vld [vmem:[%s15032_s3 + $0x220] sm:$0xf]  ;;  %v9534_v4 = vld [vmem:[%s15032_s3 + $0x224] sm:$0xf0]  ;;  %v1227_v9 = vadd.f32 %v11374_v10, %v11336_v56 }
 0x2af   :  { %v1605_v3 = vpop.f32.mrf.mxu2 }
 0x2b0   :  { %v11508_v36 = vpop.f32.mrf.mxu3  ;;  %v1606_v1 = vadd.f32 %v1605_v3, %v1477_v12  ;;  %v11529_v18 = vpop.f32.mrf.mxu0  ;;  %3084 = vmatpush.bf16.msrb.mxu2 %v7868_v35 }
 0x2b1   :  { %v11510_v45 = vpop.f32.mrf.mxu1 }
 0x2b2   :  { %v1742_v0 = vmax.f32 %v1606_v1, 0.0 }
 0x2b4   :  { %v1914_v28 = vpack.c.bf16 %v1742_v0, %v1741_v51  ;;  %1285 = vmatmul.bf16.gmra.mxu1 %v15165_v34  ;;  %7390 = vmatmul.msk.bf16.gmra.mxu2 %vm598_vm0, %v15154_v39  ;;  %v7739_v39 = vld [vmem:[%s15032_s3 + $0x2a0] sm:$0xf]  ;;  %v1745_v51 = vmax.f32 %v1351_v25, 0.0  ;;  %v9566_v25 = vld [vmem:[%s15032_s3 + $0x324] sm:$0xf0] }
 0x2b5   :  { %7372 = vmatmul.msk.bf16.gmra.mxu3 %vm598_vm0, %v15166_v38  ;;  %v7740_v3 = vor.u32 %v9550_v61, %v7739_v39 }
 0x2b6   :  { %2010 = vst [vmem:[#allocation2 + $0xb8] sm:$0xff] %v1914_v28 }
 0x2b7   :  { %v1608_v23 = vpop.f32.mrf.mxu2  ;;  %2946 = vmatpush.bf16.msra.mxu3 %v7740_v3 }
 0x2b8   :  { %v11537_v50 = vpop.f32.mrf.mxu3  ;;  %v1609_v12 = vadd.f32 %v1608_v23, %v1480_v14  ;;  %v7803_v14 = vld [vmem:[%s15032_s3 + $0x320] sm:$0xf]  ;;  %v11552_v23 = vpop.f32.mrf.mxu0  ;;  %1543 = vmatmul.bf16.gmra.mxu0 %v15165_v34 }
 0x2b9   :  { %v11539_v1 = vpop.f32.mrf.mxu1  ;;  %v7804_v35 = vor.u32 %v9566_v25, %v7803_v14 }
 0x2ba   :  { %v1746_v0 = vmax.f32 %v1609_v12, 0.0  ;;  %v7676_v12 = vor.u32 %v9534_v4, %v7675_v11  ;;  %v1229_v11 = vadd.f32 %v11391_v26, %v11336_v56  ;;  %v1232_v26 = vadd.f32 %v11402_v49, %v11336_v56 }
 0x2bb   :  { %3015 = vmatpush.bf16.msra.mxu0 %v7804_v35 }
 0x2bc   :  { %v1916_v28 = vpack.c.bf16 %v1746_v0, %v1745_v51  ;;  %v1749_v51 = vmax.f32 %v1353_v43, 0.0  ;;  %2877 = vmatpush.bf16.msra.mxu1 %v7676_v12  ;;  %v1356_v43 = vadd.f32 %v11362_v7, %v1227_v9  ;;  %v1487_v7 = vadd.f32 %v11421_v53, %v11338_v41 }
 0x2be   :  { %2012 = vst [vmem:[#allocation2 + $0xc8] sm:$0xff] %v1916_v28  ;;  %v1485_v28 = vadd.f32 %v11398_v40, %v11338_v41  ;;  %v1753_v40 = vmax.f32 %v1356_v43, 0.0 }
 0x2bf   :  { %v1610_v16 = vpop.f32.mrf.mxu2 }
 0x2c0   :  { %v11560_v39 = vpop.f32.mrf.mxu3  ;;  %v1611_v61 = vadd.f32 %v1610_v16, %v1482_v15  ;;  %v15167_v15 = vld [vmem:[#allocation25_spill] sm:$0xff]  ;;  %v11575_v10 = vpop.f32.mrf.mxu0 }
 0x2c1   :  { %v11562_v3 = vpop.f32.mrf.mxu1 }
 0x2c2   :  { %v1750_v0 = vmax.f32 %v1611_v61, 0.0  ;;  %v1358_v61 = vadd.f32 %v11372_v13, %v1229_v11  ;;  %v1490_v13 = vadd.f32 %v11438_v30, %v11338_v41 }
 0x2c4   :  { %v1918_v14 = vpack.c.bf16 %v1750_v0, %v1749_v51  ;;  %1290 = vmatmul.bf16.gmra.mxu1 %v10770_v19  ;;  %7391 = vmatmul.msk.bf16.gmra.mxu2 %vm598_vm0, %v15156_v54 }
 0x2c5   :  { %7373 = vmatmul.msk.bf16.gmra.mxu3 %vm598_vm0, %v15167_v15 }
 0x2c6   :  { %2014 = vst [vmem:[#allocation2 + $0xd8] sm:$0xff] %v1918_v14  ;;  %v1757_v14 = vmax.f32 %v1358_v61, 0.0 }
 0x2c7   :  { %v1613_v25 = vpop.f32.mrf.mxu2 }
 0x2c8   :  { %v11577_v16 = vpop.f32.mrf.mxu3  ;;  %v1614_v34 = vadd.f32 %v1613_v25, %v1485_v28  ;;  %v11586_v12 = vpop.f32.mrf.mxu0  ;;  %1548 = vmatmul.bf16.gmra.mxu0 %v10770_v19  ;;  %v15168_v25 = vld [vmem:[#allocation26_spill] sm:$0xff] }
 0x2c9   :  { %v11579_v35 = vpop.f32.mrf.mxu1 }
 0x2ca   :  { %v1754_v4 = vmax.f32 %v1614_v34, 0.0  ;;  %v1361_v34 = vadd.f32 %v11389_v62, %v1232_v26  ;;  %v9532_v62 = vld [vmem:[%s15032_s3 + $0x214] sm:$0xf0] }
 0x2cc   :  { %v1920_v54 = vpack.c.bf16 %v1754_v4, %v1753_v40  ;;  %v1761_v30 = vmax.f32 %v1361_v34, 0.0  ;;  %v7659_v34 = vld [vmem:[%s15032_s3 + $0x200] sm:$0xf] }
 0x2ce   :  { %2016 = vst [vmem:[#allocation2 + $0xe8] sm:$0xff] %v1920_v54  ;;  %v1234_v54 = vadd.f32 %v11425_v48, %v11336_v56 }
 0x2cf   :  { %v1615_v51 = vpop.f32.mrf.mxu2 }
 0x2d0   :  { %v11588_v9 = vpop.f32.mrf.mxu3  ;;  %v1616_v0 = vadd.f32 %v1615_v51, %v1487_v7  ;;  %v11603_v40 = vpop.f32.mrf.mxu0  ;;  %v7731_v7 = vld [vmem:[%s15032_s3 + $0x290] sm:$0xf]  ;;  %v1363_v26 = vadd.f32 %v11400_v21, %v1234_v54  ;;  %v7723_v21 = vld [vmem:[%s15032_s3 + $0x280] sm:$0xf]  ;;  %v9546_v54 = vld [vmem:[%s15032_s3 + $0x284] sm:$0xf0] }
 0x2d1   :  { %v11590_v28 = vpop.f32.mrf.mxu1 }
 0x2d2   :  { %v1758_v43 = vmax.f32 %v1616_v0, 0.0 }
 0x2d4   :  { %v1922_v53 = vpack.c.bf16 %v1758_v43, %v1757_v14  ;;  %1295 = vmatmul.bf16.gmra.mxu1 %v10811_v33  ;;  %7392 = vmatmul.msk.bf16.gmra.mxu2 %vm598_vm0, %v15158_v58  ;;  %v7667_v58 = vld [vmem:[%s15032_s3 + $0x210] sm:$0xf]  ;;  %v9548_v14 = vld [vmem:[%s15032_s3 + $0x294] sm:$0xf0]  ;;  %v1492_v43 = vadd.f32 %v11467_v6, %v11338_v41 }
 0x2d5   :  { %7374 = vmatmul.msk.bf16.gmra.mxu3 %vm598_vm0, %v15168_v25  ;;  %v7668_v0 = vor.u32 %v9532_v62, %v7667_v58  ;;  %v7732_v48 = vor.u32 %v9548_v14, %v7731_v7  ;;  %v7724_v58 = vor.u32 %v9546_v54, %v7723_v21  ;;  %v1765_v62 = vmax.f32 %v1363_v26, 0.0 }
 0x2d6   :  { %2018 = vst [vmem:[#allocation2 + $0xf8] sm:$0xff] %v1922_v53  ;;  %v1237_v7 = vadd.f32 %v11454_v52, %v11336_v56  ;;  %v9580_v52 = vld [vmem:[%s15032_s3 + $0x394] sm:$0xf0]  ;;  %v1497_v54 = vadd.f32 %v11495_v46, %v11338_v41 }
 0x2d7   :  { %v1618_v49 = vpop.f32.mrf.mxu2  ;;  %2878 = vmatpush.bf16.msra.mxu1 %v7668_v0  ;;  %2947 = vmatpush.bf16.msra.mxu3 %v7732_v48  ;;  %v1495_v0 = vadd.f32 %v11478_v47, %v11338_v41 }
 0x2d8   :  { %v11605_v11 = vpop.f32.mrf.mxu3  ;;  %v1619_v19 = vadd.f32 %v1618_v49, %v1490_v13  ;;  %v11626_v53 = vpop.f32.mrf.mxu0  ;;  %v9530_v49 = vld [vmem:[%s15032_s3 + $0x204] sm:$0xf0]  ;;  %1553 = vmatmul.bf16.gmra.mxu0 %v10811_v33  ;;  %v1366_v48 = vadd.f32 %v11423_v29, %v1237_v7  ;;  %v7859_v33 = vld [vmem:[%s15032_s3 + $0x390] sm:$0xf] }
 0x2d9   :  { %v11607_v4 = vpop.f32.mrf.mxu1  ;;  %v7860_v26 = vor.u32 %v9580_v52, %v7859_v33  ;;  %v1500_v52 = vadd.f32 %v11506_v42, %v11338_v41 }
 0x2da   :  { %v1762_v61 = vmax.f32 %v1619_v19, 0.0  ;;  %v1769_v29 = vmax.f32 %v1366_v48, 0.0  ;;  %v1242_v48 = vadd.f32 %v11482_v31, %v11336_v56 }
 0x2db   :  { %2948 = vmatpush.bf16.msra.mxu3 %v7724_v58  ;;  %3085 = vmatpush.bf16.msrb.mxu2 %v7860_v26  ;;  %v7795_v58 = vld [vmem:[%s15032_s3 + $0x310] sm:$0xf] }
 0x2dc   :  { %v1924_v51 = vpack.c.bf16 %v1762_v61, %v1761_v30  ;;  %v7660_v30 = vor.u32 %v9530_v49, %v7659_v34  ;;  %v1239_v49 = vadd.f32 %v11471_v32, %v11336_v56  ;;  %v1371_v26 = vadd.f32 %v11469_v5, %v1242_v48  ;;  %v7467_v48 = vld [vmem:[#allocation2 + $0x1a0] sm:$0xf] }
 0x2dd   :  { %v1502_v5 = vadd.f32 %v11529_v18, %v11338_v41  ;;  %v9481_v18 = vld [vmem:[#allocation2 + $0x1a4] sm:$0xf] }
 0x2de   :  { %2020 = vst [vmem:[#allocation2 + $0x108] sm:$0xff] %v1924_v51  ;;  %2879 = vmatpush.bf16.msra.mxu1 %v7660_v30  ;;  %v1368_v30 = vadd.f32 %v11449_v2, %v1239_v49  ;;  %v1777_v42 = vmax.f32 %v1371_v26, 0.0  ;;  %v1505_v26 = vadd.f32 %v11552_v23, %v11338_v41 }
 0x2df   :  { %v1620_v13 = vpop.f32.mrf.mxu2 }
 0x2e0   :  { %v11637_v19 = vpop.f32.mrf.mxu3  ;;  %v1621_v6 = vadd.f32 %v1620_v13, %v1492_v43  ;;  %v11661_v43 = vpop.f32.mrf.mxu0  ;;  %v1773_v46 = vmax.f32 %v1368_v30, 0.0 }
 0x2e1   :  { %v11642_v61 = vpop.f32.mrf.mxu1 }
 0x2e2   :  { %v1766_v51 = vmax.f32 %v1621_v6, 0.0 }
 0x2e4   :  { %v1926_v14 = vpack.c.bf16 %v1766_v51, %v1765_v62  ;;  %1300 = vmatmul.bf16.gmra.mxu1 %v10865_v59  ;;  %7393 = vmatmul.msk.bf16.gmra.mxu2 %vm598_vm0, %v15160_v8  ;;  %v9564_v62 = vld [vmem:[%s15032_s3 + $0x314] sm:$0xf0] }
 0x2e5   :  { %7375 = vmatmul.msk.bf16.gmra.mxu3 %vm598_vm0, %v10845_v63  ;;  %v7796_v51 = vor.u32 %v9564_v62, %v7795_v58  ;;  %v9483_v58 = vld [vmem:[#allocation2 + $0x1ac] sm:$0xf0] }
 0x2e6   :  { %2022 = vst [vmem:[#allocation2 + $0x118] sm:$0xff] %v1926_v14 }
 0x2e7   :  { %v1623_v47 = vpop.f32.mrf.mxu2  ;;  %3016 = vmatpush.bf16.msra.mxu0 %v7796_v51 }
 0x2e8   :  { %v11663_v13 = vpop.f32.mrf.mxu3  ;;  %v1624_v8 = vadd.f32 %v1623_v47, %v1495_v0  ;;  %v11678_v0 = vpop.f32.mrf.mxu0  ;;  %1558 = vmatmul.bf16.gmra.mxu0 %v10865_v59 }
 0x2e9   :  { %v11665_v34 = vpop.f32.mrf.mxu1 }
 0x2ea   :  { %v1770_v21 = vmax.f32 %v1624_v8, 0.0 }
 0x2ec   :  { %v1928_v6 = vpack.c.bf16 %v1770_v21, %v1769_v29  ;;  %v1244_v21 = vadd.f32 %v11499_v27, %v11336_v56 }
 0x2ee   :  { %2024 = vst [vmem:[#allocation2 + $0x128] sm:$0xff] %v1928_v6  ;;  %v1373_v30 = vadd.f32 %v11480_v37, %v1244_v21 }
 0x2ef   :  { %v1625_v7 = vpop.f32.mrf.mxu2 }
 0x2f0   :  { %v11680_v32 = vpop.f32.mrf.mxu3  ;;  %v1626_v14 = vadd.f32 %v1625_v7, %v1497_v54  ;;  %v11695_v31 = vpop.f32.mrf.mxu0  ;;  %v1781_v27 = vmax.f32 %v1373_v30, 0.0 }
 0x2f1   :  { %v11682_v2 = vpop.f32.mrf.mxu1 }
 0x2f2   :  { %v1774_v33 = vmax.f32 %v1626_v14, 0.0  ;;  %v7469_v14 = vld [vmem:[#allocation2 + $0x1b0] sm:$0xf0] }
 0x2f4   :  { %v1930_v47 = vpack.c.bf16 %v1774_v33, %v1773_v46  ;;  %1305 = vmatmul.bf16.gmra.mxu1 %v9990_v60  ;;  %7394 = vmatmul.msk.bf16.gmra.mxu2 %vm598_vm0, %v15162_v44  ;;  %v1247_v33 = vadd.f32 %v11510_v45, %v11336_v56 }
 0x2f5   :  { %7376 = vmatmul.msk.bf16.gmra.mxu3 %vm598_vm0, %v10898_v57 }
 0x2f6   :  { %2026 = vst [vmem:[#allocation2 + $0x138] sm:$0xff] %v1930_v47  ;;  %v11716_v47 = vor.u32 %v9481_v18, %v7469_v14  ;;  %v1376_v45 = vadd.f32 %v11497_v24, %v1247_v33  ;;  %v1507_v24 = vadd.f32 %v11575_v10, %v11338_v41  ;;  %v1252_v18 = vadd.f32 %v11562_v3, %v11336_v56  ;;  %v9485_v10 = vld [vmem:[#allocation2 + $0x1c4] sm:$0xf] }
 0x2f7   :  { %v1628_v8 = vpop.f32.mrf.mxu2 }
 0x2f8   :  { %v11697_v29 = vpop.f32.mrf.mxu3  ;;  %v1629_v59 = vadd.f32 %v1628_v8, %v1500_v52  ;;  %v11706_v62 = vpop.f32.mrf.mxu0  ;;  %v11714_v52 = vor.u32 %v9483_v58, %v7467_v48  ;;  %1563 = vmatmul.bf16.gmra.mxu0 %v9990_v60  ;;  %v1785_v23 = vmax.f32 %v1376_v45, 0.0  ;;  %v9487_v58 = vld [vmem:[#allocation2 + $0x1cc] sm:$0xf0]  ;;  %v7485_v48 = vld [vmem:[#allocation2 + $0x1d0] sm:$0xf0]  ;;  %v1510_v45 = vadd.f32 %v11586_v12, %v11338_v41 }
 0x2f9   :  { %v11699_v49 = vpop.f32.mrf.mxu1  ;;  %v1381_v3 = vadd.f32 %v11537_v50, %v1252_v18 }
 0x2fa   :  { %v1778_v6 = vmax.f32 %v1629_v59, 0.0 }
 0x2fb   :  { %v1793_v50 = vmax.f32 %v1381_v3, 0.0 }
 0x2fc   :  { %v1932_v44 = vpack.c.bf16 %v1778_v6, %v1777_v42 }
 0x2fe   :  { %2028 = vst [vmem:[#allocation2 + $0x148] sm:$0xff] %v1932_v44  ;;  %v1249_v44 = vadd.f32 %v11539_v1, %v11336_v56 }
 0x2ff   :  { %v1630_v54 = vpop.f32.mrf.mxu2 }
 0x300   :  { %v11708_v7 = vpop.f32.mrf.mxu3  ;;  %v1631_v51 = vadd.f32 %v1630_v54, %v1502_v5  ;;  %v11726_v42 = vpop.f32.mrf.mxu0  ;;  %v1378_v5 = vadd.f32 %v11508_v36, %v1249_v44 }
 0x301   :  { %v11710_v46 = vpop.f32.mrf.mxu1 }
 0x302   :  { %v1782_v37 = vmax.f32 %v1631_v51, 0.0  ;;  %v1789_v1 = vmax.f32 %v1378_v5, 0.0  ;;  %v1254_v5 = vadd.f32 %v11579_v35, %v11336_v56  ;;  %v9491_v35 = vld [vmem:[#allocation2 + $0x1ec] sm:$0xf0] }
 0x304   :  { %v1934_v8 = vpack.c.bf16 %v1782_v37, %v1781_v27  ;;  %7395 = vmatmul.msk.bf16.gmra.mxu2 %vm598_vm0, %v15164_v17  ;;  %2880 = vmatmul.bf16.vlgmr.msra.gmra.mxu1 %v11714_v52  ;;  %v7483_v37 = vld [vmem:[#allocation2 + $0x1c0] sm:$0xf] }
 0x305   :  { %2949 = vmatmul.bf16.vlgmr.msra.gmra.mxu3 %v11716_v47 }
 0x306   :  { %2030 = vst [vmem:[#allocation2 + $0x158] sm:$0xff] %v1934_v8  ;;  %v11747_v8 = vor.u32 %v9485_v10, %v7485_v48 }
 0x307   :  { %v1633_v59 = vpop.f32.mrf.mxu2 }
 0x308   :  { %v11728_v21 = vpop.f32.mrf.mxu3  ;;  %v1634_v60 = vadd.f32 %v1633_v59, %v1505_v26  ;;  %v11739_v27 = vpop.f32.mrf.mxu0  ;;  %v11745_v26 = vor.u32 %v9487_v58, %v7483_v37  ;;  %1568 = vmatmul.bf16.gmra.mxu0 %v10050_v20  ;;  %v9578_v20 = vld [vmem:[%s15032_s3 + $0x384] sm:$0xf0]  ;;  %v1383_v37 = vadd.f32 %v11560_v39, %v1254_v5  ;;  %v1257_v39 = vadd.f32 %v11590_v28, %v11336_v56 }
 0x309   :  { %v11730_v6 = vpop.f32.mrf.mxu1  ;;  %v9562_v58 = vld [vmem:[%s15032_s3 + $0x304] sm:$0xf0] }
 0x30a   :  { %v1786_v17 = vmax.f32 %v1634_v60, 0.0  ;;  %v7851_v60 = vld [vmem:[%s15032_s3 + $0x380] sm:$0xf] }
 0x30c   :  { %v1936_v30 = vpack.c.bf16 %v1786_v17, %v1785_v23  ;;  %v7852_v23 = vor.u32 %v9578_v20, %v7851_v60  ;;  %v7499_v60 = vld [vmem:[#allocation2 + $0x1e0] sm:$0xf]  ;;  %v1797_v20 = vmax.f32 %v1383_v37, 0.0  ;;  %v1259_v37 = vadd.f32 %v11607_v4, %v11336_v56 }
 0x30e   :  { %2032 = vst [vmem:[#allocation2 + $0x168] sm:$0xff] %v1936_v30  ;;  %3086 = vmatpush.bf16.msrb.mxu2 %v7852_v23  ;;  %v11788_v23 = vor.u32 %v9491_v35, %v7499_v60 }
 0x30f   :  { %v1635_v54 = vpop.f32.mrf.mxu2 }
 0x310   :  { %v11737_v51 = vpop.f32.mrf.mxu3  ;;  %v1636_v14 = vadd.f32 %v1635_v54, %v1507_v24  ;;  %v11765_v17 = vpop.f32.mrf.mxu0  ;;  %v7787_v54 = vld [vmem:[%s15032_s3 + $0x300] sm:$0xf] }
 0x311   :  { %v11741_v33 = vpop.f32.mrf.mxu1  ;;  %v7788_v48 = vor.u32 %v9562_v58, %v7787_v54 }
 0x312   :  { %v1790_v36 = vmax.f32 %v1636_v14, 0.0 }
 0x313   :  { %3017 = vmatpush.bf16.msra.mxu0 %v7788_v48 }
 0x314   :  { %v1938_v59 = vpack.c.bf16 %v1790_v36, %v1789_v1  ;;  %7396 = vmatmul.msk.bf16.gmra.mxu2 %vm598_vm0, %v15166_v38  ;;  %2885 = vmatmul.bf16.gmra.mxu1 %v11745_v26  ;;  %v1512_v1 = vadd.f32 %v11603_v40, %v11338_v41  ;;  %v9489_v40 = vld [vmem:[#allocation2 + $0x1e4] sm:$0xf] }
 0x315   :  { %2954 = vmatmul.bf16.gmra.mxu3 %v11747_v8 }
 0x316   :  { %2034 = vst [vmem:[#allocation2 + $0x178] sm:$0xff] %v1938_v59 }
 0x317   :  { %v1638_v12 = vpop.f32.mrf.mxu2 }
 0x318   :  { %v11763_v44 = vpop.f32.mrf.mxu3  ;;  %v1639_v38 = vadd.f32 %v1638_v12, %v1510_v45  ;;  %v7501_v45 = vld [vmem:[#allocation2 + $0x1f0] sm:$0xf0]  ;;  %v11782_v59 = vpop.f32.mrf.mxu0 }
 0x319   :  { %v11767_v30 = vpop.f32.mrf.mxu1 }
 0x31a   :  { %v1794_v24 = vmax.f32 %v1639_v38, 0.0  ;;  %v11790_v38 = vor.u32 %v9489_v40, %v7501_v45 }
 0x31c   :  { %v1940_v14 = vpack.c.bf16 %v1794_v24, %v1793_v50  ;;  %v1515_v50 = vadd.f32 %v11626_v53, %v11338_v41  ;;  %v1386_v24 = vadd.f32 %v11577_v16, %v1257_v39  ;;  %v1517_v16 = vadd.f32 %v11661_v43, %v11338_v41  ;;  %v9493_v43 = vld [vmem:[#allocation2 + $0x204] sm:$0xf] }
 0x31e   :  { %2036 = vst [vmem:[#allocation2 + $0x188] sm:$0xff] %v1940_v14  ;;  %v1801_v53 = vmax.f32 %v1386_v24, 0.0 }
 0x31f   :  { %v1640_v18 = vpop.f32.mrf.mxu2 }
 0x320   :  { %v11780_v36 = vpop.f32.mrf.mxu3  ;;  %v1641_v10 = vadd.f32 %v1640_v18, %v1512_v1  ;;  %v11801_v14 = vpop.f32.mrf.mxu0  ;;  %v1388_v18 = vadd.f32 %v11588_v9, %v1259_v37 }
 0x321   :  { %v11784_v3 = vpop.f32.mrf.mxu1 }
 0x322   :  { %v1798_v12 = vmax.f32 %v1641_v10, 0.0  ;;  %v9495_v10 = vld [vmem:[#allocation2 + $0x20c] sm:$0xf0]  ;;  %v1805_v4 = vmax.f32 %v1388_v18, 0.0 }
 0x324   :  { %v1942_v5 = vpack.c.bf16 %v1798_v12, %v1797_v20  ;;  %7397 = vmatmul.msk.bf16.gmra.mxu2 %vm598_vm0, %v15167_v15  ;;  %2890 = vmatmul.bf16.gmra.mxu1 %v11788_v23  ;;  %v7517_v20 = vld [vmem:[#allocation2 + $0x210] sm:$0xf0]  ;;  %v7515_v12 = vld [vmem:[#allocation2 + $0x200] sm:$0xf] }
 0x325   :  { %2959 = vmatmul.bf16.gmra.mxu3 %v11790_v38  ;;  %v11820_v24 = vor.u32 %v9493_v43, %v7517_v20 }
 0x326   :  { %2038 = vst [vmem:[#allocation2 + $0x198] sm:$0xff] %v1942_v5  ;;  %v11818_v5 = vor.u32 %v9495_v10, %v7515_v12 }
 0x327   :  { %v1643_v28 = vpop.f32.mrf.mxu2 }
 0x328   :  { %v11799_v54 = vpop.f32.mrf.mxu3  ;;  %v1644_v58 = vadd.f32 %v1643_v28, %v1515_v50  ;;  %v11814_v40 = vpop.f32.mrf.mxu0  ;;  %v1262_v50 = vadd.f32 %v11642_v61, %v11336_v56  ;;  %v1520_v28 = vadd.f32 %v11678_v0, %v11338_v41  ;;  %v1264_v0 = vadd.f32 %v11665_v34, %v11336_v56  ;;  %v7533_v34 = vld [vmem:[#allocation2 + $0x230] sm:$0xf0] }
 0x329   :  { %v11803_v48 = vpop.f32.mrf.mxu1 }
 0x32a   :  { %v1802_v15 = vmax.f32 %v1644_v58, 0.0  ;;  %v1393_v20 = vadd.f32 %v11637_v19, %v1264_v0  ;;  %v1267_v19 = vadd.f32 %v11682_v2, %v11336_v56  ;;  %v1525_v0 = vadd.f32 %v11706_v62, %v11338_v41  ;;  %v7781_v62 = vld [vmem:[%s15032_s3 + $0x2f8] sm:$0xf0] }
 0x32c   :  { %v1944_v1 = vpack.c.bf16 %v1802_v15, %v1801_v53  ;;  %v1391_v53 = vadd.f32 %v11605_v11, %v1262_v50  ;;  %v1522_v11 = vadd.f32 %v11695_v31, %v11338_v41  ;;  %v9499_v50 = vld [vmem:[#allocation2 + $0x22c] sm:$0xf0]  ;;  %v1396_v2 = vadd.f32 %v11663_v13, %v1267_v19  ;;  %v9543_v13 = vld [vmem:[%s15032_s3 + $0x274] sm:$0xf] }
 0x32e   :  { %2040 = vst [vmem:[#allocation2 + $0x1a8] sm:$0xff] %v1944_v1  ;;  %v1809_v18 = vmax.f32 %v1391_v53, 0.0  ;;  %v1813_v53 = vmax.f32 %v1393_v20, 0.0  ;;  %v1817_v19 = vmax.f32 %v1396_v2, 0.0  ;;  %v9575_v2 = vld [vmem:[%s15032_s3 + $0x374] sm:$0xf] }
 0x32f   :  { %v1645_v35 = vpop.f32.mrf.mxu2 }
 0x330   :  { %v11810_v45 = vpop.f32.mrf.mxu3  ;;  %v1646_v60 = vadd.f32 %v1645_v35, %v1517_v16  ;;  %v11835_v35 = vpop.f32.mrf.mxu0 }
 0x331   :  { %v11812_v39 = vpop.f32.mrf.mxu1 }
 0x332   :  { %v1806_v9 = vmax.f32 %v1646_v60, 0.0 }
 0x334   :  { %v1946_v58 = vpack.c.bf16 %v1806_v9, %v1805_v4  ;;  %7398 = vmatmul.msk.bf16.gmra.mxu2 %vm598_vm0, %v15168_v25  ;;  %2895 = vmatmul.bf16.gmra.mxu1 %v11818_v5 }
 0x335   :  { %2964 = vmatmul.bf16.gmra.mxu3 %v11820_v24  ;;  %v7475_v10 = vld [vmem:[#allocation2 + $0x1a8] sm:$0xf] }
 0x336   :  { %2042 = vst [vmem:[#allocation2 + $0x1b8] sm:$0xff] %v1946_v58  ;;  %v7531_v58 = vld [vmem:[#allocation2 + $0x220] sm:$0xf] }
 0x337   :  { %v1648_v61 = vpop.f32.mrf.mxu2  ;;  %v11849_v31 = vor.u32 %v9499_v50, %v7531_v58 }
 0x338   :  { %v11829_v37 = vpop.f32.mrf.mxu3  ;;  %v1649_v15 = vadd.f32 %v1648_v61, %v1520_v28 }
 0x339   :  { %v11831_v1 = vpop.f32.mrf.mxu1 }
 0x33a   :  { %v1810_v16 = vmax.f32 %v1649_v15, 0.0  ;;  %v9497_v15 = vld [vmem:[#allocation2 + $0x224] sm:$0xf] }
 0x33c   :  { %v1948_v25 = vpack.c.bf16 %v1810_v16, %v1809_v18  ;;  %v11851_v18 = vor.u32 %v9497_v15, %v7533_v34  ;;  %v7717_v34 = vld [vmem:[%s15032_s3 + $0x278] sm:$0xf0] }
 0x33d   :  { %v9484_v60 = vld [vmem:[#allocation2 + $0x1b4] sm:$0xf0] }
 0x33e   :  { %2044 = vst [vmem:[#allocation2 + $0x1c8] sm:$0xff] %v1948_v25  ;;  %v11840_v12 = vor.u32 %v9484_v60, %v7475_v10  ;;  %v11859_v25 = vpop.f32.mrf.mxu0  ;;  %v9559_v10 = vld [vmem:[%s15032_s3 + $0x2f4] sm:$0xf] }
 0x33f   :  { %v1650_v4 = vpop.f32.mrf.mxu2  ;;  %15169 = vst [vmem:[#allocation4_spill] sm:$0xff] %v11851_v18  ;;  %v7784_v20 = vor.u32 %v9559_v10, %v7781_v62 }
 0x340   :  { %v11842_v9 = vpop.f32.mrf.mxu3  ;;  %v1651_v43 = vadd.f32 %v1650_v4, %v1522_v11  ;;  %3018 = vmatmul.bf16.vlgmr.msra.gmra.mxu0 %v11840_v12  ;;  %v7909_v11 = vld [vmem:[%s15032_s3 + $0x3f8] sm:$0xf0] }
 0x341   :  { %v11845_v28 = vpop.f32.mrf.mxu1  ;;  %3217 = vmatpush.bf16.msrb.mxu3 %v7784_v20 }
 0x342   :  { %v1814_v61 = vmax.f32 %v1651_v43, 0.0 }
 0x344   :  { %v1950_v16 = vpack.c.bf16 %v1814_v61, %v1813_v53  ;;  %7399 = vmatmul.msk.bf16.gmra.mxu2 %vm598_vm0, %v10845_v63  ;;  %2900 = vmatmul.bf16.gmra.mxu1 %v11849_v31  ;;  %v9591_v63 = vld [vmem:[%s15032_s3 + $0x3f4] sm:$0xf]  ;;  %v7720_v53 = vor.u32 %v9543_v13, %v7717_v34  ;;  %v1269_v61 = vadd.f32 %v11699_v49, %v11336_v56  ;;  %v7845_v49 = vld [vmem:[%s15032_s3 + $0x378] sm:$0xf0] }
 0x345   :  { %2969 = vmatmul.bf16.gmra.mxu3 %v11851_v18  ;;  %v7912_v43 = vor.u32 %v9591_v63, %v7909_v11  ;;  %v7491_v10 = vld [vmem:[#allocation2 + $0x1c8] sm:$0xf]  ;;  %v9503_v11 = vld [vmem:[#allocation2 + $0x24c] sm:$0xf0] }
 0x346   :  { %2046 = vst [vmem:[#allocation2 + $0x1d8] sm:$0xff] %v1950_v16  ;;  %3148 = vmatpush.bf16.msrb.mxu1 %v7720_v53  ;;  %v11897_v13 = vpop.f32.mrf.mxu0  ;;  %v7547_v53 = vld [vmem:[#allocation2 + $0x240] sm:$0xf] }
 0x347   :  { %v1653_v60 = vpop.f32.mrf.mxu2  ;;  %3355 = vmatpush.bf16.msra.mxu2 %v7912_v43 }
 0x348   :  { %v11877_v4 = vpop.f32.mrf.mxu3  ;;  %v1654_v50 = vadd.f32 %v1653_v60, %v1525_v0  ;;  %v1398_v0 = vadd.f32 %v11680_v32, %v1269_v61  ;;  %v1527_v60 = vadd.f32 %v11726_v42, %v11338_v41  ;;  %v7549_v42 = vld [vmem:[#allocation2 + $0x250] sm:$0xf0]  ;;  %v1272_v61 = vadd.f32 %v11710_v46, %v11336_v56 }
 0x349   :  { %v11882_v58 = vpop.f32.mrf.mxu1 }
 0x34a   :  { %v1818_v15 = vmax.f32 %v1654_v50, 0.0  ;;  %v7848_v50 = vor.u32 %v9575_v2, %v7845_v49 }
 0x34c   :  { %v1952_v16 = vpack.c.bf16 %v1818_v15, %v1817_v19  ;;  %3286 = vmatpush.bf16.msrb.mxu0 %v7848_v50  ;;  %v1821_v19 = vmax.f32 %v1398_v0, 0.0  ;;  %v1401_v0 = vadd.f32 %v11697_v29, %v1272_v61  ;;  %v1532_v61 = vadd.f32 %v11765_v17, %v11338_v41  ;;  %v7901_v17 = vld [vmem:[%s15032_s3 + $0x3e8] sm:$0xf0] }
 0x34d   :  { %v9488_v62 = vld [vmem:[#allocation2 + $0x1d4] sm:$0xf0] }
 0x34e   :  { %2048 = vst [vmem:[#allocation2 + $0x1e8] sm:$0xff] %v1952_v16  ;;  %v11889_v63 = vor.u32 %v9488_v62, %v7491_v10  ;;  %v11906_v16 = vor.u32 %v9503_v11, %v7547_v53  ;;  %v9501_v10 = vld [vmem:[#allocation2 + $0x244] sm:$0xf]  ;;  %v11921_v50 = vpop.f32.mrf.mxu0  ;;  %v9507_v53 = vld [vmem:[#allocation2 + $0x26c] sm:$0xf0] }
 0x34f   :  { %v1655_v20 = vpop.f32.mrf.mxu2  ;;  %v11908_v62 = vor.u32 %v9501_v10, %v7549_v42  ;;  %v7477_v10 = vld [vmem:[#allocation2 + $0x1b8] sm:$0xf0] }
 0x350   :  { %15170 = vst [vmem:[#allocation8_spill] sm:$0xff] %v11889_v63  ;;  %v11899_v32 = vpop.f32.mrf.mxu3  ;;  %v1656_v43 = vadd.f32 %v1655_v20, %v1527_v60  ;;  %3023 = vmatmul.bf16.gmra.mxu0 %v11889_v63  ;;  %v1530_v60 = vadd.f32 %v11739_v27, %v11338_v41  ;;  %v1825_v27 = vmax.f32 %v1401_v0, 0.0 }
 0x351   :  { %v11902_v34 = vpop.f32.mrf.mxu1  ;;  %15171 = vst [vmem:[#allocation7_spill] sm:$0xff] %v11906_v16 }
 0x352   :  { %v1822_v15 = vmax.f32 %v1656_v43, 0.0  ;;  %15172 = vst [vmem:[#allocation5_spill] sm:$0xff] %v11908_v62  ;;  %v1274_v43 = vadd.f32 %v11730_v6, %v11336_v56  ;;  %v7773_v6 = vld [vmem:[%s15032_s3 + $0x2e8] sm:$0xf0] }
 0x354   :  { %v1954_v2 = vpack.c.bf16 %v1822_v15, %v1821_v19  ;;  %7400 = vmatmul.msk.bf16.gmra.mxu2 %vm598_vm0, %v10898_v57  ;;  %2905 = vmatmul.bf16.gmra.mxu1 %v11906_v16  ;;  %v1403_v29 = vadd.f32 %v11708_v7, %v1274_v43  ;;  %v9589_v7 = vld [vmem:[%s15032_s3 + $0x3e4] sm:$0xf] }
 0x355   :  { %2974 = vmatmul.bf16.gmra.mxu3 %v11908_v62  ;;  %v7507_v19 = vld [vmem:[#allocation2 + $0x1e8] sm:$0xf]  ;;  %v9482_v62 = vld [vmem:[#allocation2 + $0x1ac] sm:$0xf] }
 0x356   :  { %2050 = vst [vmem:[#allocation2 + $0x1f8] sm:$0xff] %v1954_v2  ;;  %v9557_v2 = vld [vmem:[%s15032_s3 + $0x2e4] sm:$0xf]  ;;  %v1829_v63 = vmax.f32 %v1403_v29, 0.0  ;;  %v11957_v18 = vor.u32 %v9482_v62, %v7477_v10 }
 0x357   :  { %v1658_v46 = vpop.f32.mrf.mxu2  ;;  %v9573_v62 = vld [vmem:[%s15032_s3 + $0x364] sm:$0xf] }
 0x358   :  { %v11917_v49 = vpop.f32.mrf.mxu3  ;;  %v1659_v20 = vadd.f32 %v1658_v46, %v1530_v60  ;;  %v7776_v46 = vor.u32 %v9557_v2, %v7773_v6  ;;  %15174 = vst [vmem:[#allocation10_spill] sm:$0xff] %v11957_v18 }
 0x359   :  { %v11919_v11 = vpop.f32.mrf.mxu1 }
 0x35a   :  { %v1826_v57 = vmax.f32 %v1659_v20, 0.0  ;;  %v9541_v20 = vld [vmem:[%s15032_s3 + $0x264] sm:$0xf]  ;;  %3218 = vmatpush.bf16.msrb.mxu3 %v7776_v46 }
 0x35c   :  { %v1956_v42 = vpack.c.bf16 %v1826_v57, %v1825_v27  ;;  %v7563_v57 = vld [vmem:[#allocation2 + $0x260] sm:$0xf] }
 0x35d   :  { %v9492_v15 = vld [vmem:[#allocation2 + $0x1f4] sm:$0xf0]  ;;  %v11953_v6 = vor.u32 %v9507_v53, %v7563_v57  ;;  %v1535_v53 = vadd.f32 %v11782_v59, %v11338_v41 }
 0x35e   :  { %2052 = vst [vmem:[#allocation2 + $0x208] sm:$0xff] %v1956_v42  ;;  %v11928_v60 = vor.u32 %v9492_v15, %v7507_v19  ;;  %v7565_v42 = vld [vmem:[#allocation2 + $0x270] sm:$0xf0]  ;;  %v7904_v19 = vor.u32 %v9589_v7, %v7901_v17  ;;  %v7709_v15 = vld [vmem:[%s15032_s3 + $0x268] sm:$0xf0]  ;;  %v11961_v17 = vpop.f32.mrf.mxu0 }
 0x35f   :  { %v1660_v0 = vpop.f32.mrf.mxu2  ;;  %v7712_v16 = vor.u32 %v9541_v20, %v7709_v15 }
 0x360   :  { %15173 = vst [vmem:[#allocation6_spill] sm:$0xff] %v11928_v60  ;;  %v11945_v27 = vpop.f32.mrf.mxu3  ;;  %v1661_v43 = vadd.f32 %v1660_v0, %v1532_v61  ;;  %3028 = vmatmul.bf16.gmra.mxu0 %v11928_v60  ;;  %v1277_v61 = vadd.f32 %v11741_v33, %v11336_v56  ;;  %v9505_v60 = vld [vmem:[#allocation2 + $0x264] sm:$0xf]  ;;  %3356 = vmatpush.bf16.msra.mxu2 %v7904_v19 }
 0x361   :  { %v11951_v2 = vpop.f32.mrf.mxu1  ;;  %v11959_v7 = vor.u32 %v9505_v60, %v7565_v42  ;;  %3149 = vmatpush.bf16.msrb.mxu1 %v7712_v16  ;;  %v7837_v16 = vld [vmem:[%s15032_s3 + $0x368] sm:$0xf0] }
 0x362   :  { %v1830_v0 = vmax.f32 %v1661_v43, 0.0  ;;  %v1406_v33 = vadd.f32 %v11728_v21, %v1277_v61  ;;  %v7840_v59 = vor.u32 %v9573_v62, %v7837_v16  ;;  %v1279_v21 = vadd.f32 %v11767_v30, %v11336_v56 }
 0x363   :  { %15175 = vst [vmem:[#allocation9_spill] sm:$0xff] %v11959_v7 }
 0x364   :  { %v1958_v57 = vpack.c.bf16 %v1830_v0, %v1829_v63  ;;  %2910 = vmatmul.bf16.gmra.mxu1 %v11953_v6  ;;  %3087 = vmatmul.bf16.vlgmr.msrb.gmra.mxu2 %v11957_v18  ;;  %v1833_v46 = vmax.f32 %v1406_v33, 0.0  ;;  %v1408_v61 = vadd.f32 %v11737_v51, %v1279_v21  ;;  %v1537_v0 = vadd.f32 %v11801_v14, %v11338_v41  ;;  %v7493_v33 = vld [vmem:[#allocation2 + $0x1d8] sm:$0xf0]  ;;  %v9486_v51 = vld [vmem:[#allocation2 + $0x1cc] sm:$0xf] }
 0x365   :  { %2979 = vmatmul.bf16.gmra.mxu3 %v11959_v7  ;;  %3287 = vmatpush.bf16.msrb.mxu0 %v7840_v59  ;;  %v7523_v42 = vld [vmem:[#allocation2 + $0x208] sm:$0xf]  ;;  %v7581_v59 = vld [vmem:[#allocation2 + $0x290] sm:$0xf0]  ;;  %v1282_v14 = vadd.f32 %v11784_v3, %v11336_v56 }
 0x366   :  { %2054 = vst [vmem:[#allocation2 + $0x218] sm:$0xff] %v1958_v57  ;;  %v11981_v15 = vpop.f32.mrf.mxu0  ;;  %v9511_v57 = vld [vmem:[#allocation2 + $0x28c] sm:$0xf0]  ;;  %v1837_v21 = vmax.f32 %v1408_v61, 0.0  ;;  %v9555_v3 = vld [vmem:[%s15032_s3 + $0x2d4] sm:$0xf] }
 0x367   :  { %v1663_v10 = vpop.f32.mrf.mxu2  ;;  %v1411_v61 = vadd.f32 %v11763_v44, %v1282_v14  ;;  %v7893_v44 = vld [vmem:[%s15032_s3 + $0x3d8] sm:$0xf0] }
 0x368   :  { %v11975_v63 = vpop.f32.mrf.mxu3  ;;  %v1664_v29 = vadd.f32 %v1663_v10, %v1535_v53  ;;  %v7579_v10 = vld [vmem:[#allocation2 + $0x280] sm:$0xf] }
 0x369   :  { %v11977_v60 = vpop.f32.mrf.mxu1 }
 0x36a   :  { %v1834_v20 = vmax.f32 %v1664_v29, 0.0 }
 0x36c   :  { %v1960_v43 = vpack.c.bf16 %v1834_v20, %v1833_v46  ;;  %v11993_v46 = vor.u32 %v9511_v57, %v7579_v10  ;;  %v7765_v57 = vld [vmem:[%s15032_s3 + $0x2d8] sm:$0xf0]  ;;  %v9587_v10 = vld [vmem:[%s15032_s3 + $0x3d4] sm:$0xf] }
 0x36d   :  { %v9496_v19 = vld [vmem:[#allocation2 + $0x214] sm:$0xf0]  ;;  %v7896_v14 = vor.u32 %v9587_v10, %v7893_v44  ;;  %v1542_v10 = vadd.f32 %v11835_v35, %v11338_v41  ;;  %v7595_v35 = vld [vmem:[#allocation2 + $0x2a0] sm:$0xf] }
 0x36e   :  { %2056 = vst [vmem:[#allocation2 + $0x228] sm:$0xff] %v1960_v43  ;;  %v11986_v53 = vor.u32 %v9496_v19, %v7523_v42  ;;  %v9509_v43 = vld [vmem:[#allocation2 + $0x284] sm:$0xf]  ;;  %v11997_v42 = vor.u32 %v9486_v51, %v7493_v33 }
 0x36f   :  { %v1665_v62 = vpop.f32.mrf.mxu2  ;;  %15177 = vst [vmem:[#allocation11_spill] sm:$0xff] %v11993_v46  ;;  %v11999_v19 = vor.u32 %v9509_v43, %v7581_v59  ;;  %v9539_v59 = vld [vmem:[%s15032_s3 + $0x254] sm:$0xf]  ;;  %3357 = vmatpush.bf16.msra.mxu2 %v7896_v14  ;;  %v9490_v14 = vld [vmem:[#allocation2 + $0x1ec] sm:$0xf] }
 0x370   :  { %15176 = vst [vmem:[#allocation12_spill] sm:$0xff] %v11986_v53  ;;  %v11988_v16 = vpop.f32.mrf.mxu3  ;;  %v1666_v30 = vadd.f32 %v1665_v62, %v1537_v0  ;;  %3033 = vmatmul.bf16.gmra.mxu0 %v11986_v53  ;;  %v1540_v0 = vadd.f32 %v11814_v40, %v11338_v41  ;;  %v12013_v40 = vpop.f32.mrf.mxu0 }
 0x371   :  { %v11991_v29 = vpop.f32.mrf.mxu1  ;;  %15178 = vst [vmem:[#allocation14_spill] sm:$0xff] %v11997_v42 }
 0x372   :  { %v1838_v20 = vmax.f32 %v1666_v30, 0.0  ;;  %15179 = vst [vmem:[#allocation13_spill] sm:$0xff] %v11999_v19  ;;  %v7768_v30 = vor.u32 %v9555_v3, %v7765_v57  ;;  %v1841_v3 = vmax.f32 %v1411_v61, 0.0  ;;  %v1284_v57 = vadd.f32 %v11803_v48, %v11336_v56  ;;  %v9571_v61 = vld [vmem:[%s15032_s3 + $0x354] sm:$0xf] }
 0x373   :  { %v7829_v48 = vld [vmem:[%s15032_s3 + $0x358] sm:$0xf0] }
 0x374   :  { %v1962_v62 = vpack.c.bf16 %v1838_v20, %v1837_v21  ;;  %2915 = vmatmul.bf16.gmra.mxu1 %v11993_v46  ;;  %3092 = vmatmul.bf16.gmra.mxu2 %v11997_v42  ;;  %v7701_v20 = vld [vmem:[%s15032_s3 + $0x258] sm:$0xf0] }
 0x375   :  { %2984 = vmatmul.bf16.gmra.mxu3 %v11999_v19  ;;  %v7539_v46 = vld [vmem:[#allocation2 + $0x228] sm:$0xf] }
 0x376   :  { %2058 = vst [vmem:[#allocation2 + $0x238] sm:$0xff] %v1962_v62  ;;  %3219 = vmatpush.bf16.msrb.mxu3 %v7768_v30  ;;  %v7704_v62 = vor.u32 %v9539_v59, %v7701_v20  ;;  %v7509_v30 = vld [vmem:[#allocation2 + $0x1f8] sm:$0xf0]  ;;  %v7832_v59 = vor.u32 %v9571_v61, %v7829_v48  ;;  %v9513_v61 = vld [vmem:[#allocation2 + $0x2a4] sm:$0xf] }
 0x377   :  { %v1668_v33 = vpop.f32.mrf.mxu2  ;;  %v12053_v48 = vor.u32 %v9490_v14, %v7509_v30 }
 0x378   :  { %v12024_v51 = vpop.f32.mrf.mxu3  ;;  %v1669_v21 = vadd.f32 %v1668_v33, %v1540_v0  ;;  %3150 = vmatpush.bf16.msrb.mxu1 %v7704_v62  ;;  %v9515_v0 = vld [vmem:[#allocation2 + $0x2ac] sm:$0xf0]  ;;  %v1413_v33 = vadd.f32 %v11780_v36, %v1284_v57  ;;  %v12049_v20 = vpop.f32.mrf.mxu0  ;;  %3288 = vmatpush.bf16.msrb.mxu0 %v7832_v59 }
 0x379   :  { %v12029_v43 = vpop.f32.mrf.mxu1  ;;  %15182 = vst [vmem:[#allocation18_spill] sm:$0xff] %v12053_v48 }
 0x37a   :  { %v1842_v19 = vmax.f32 %v1669_v21, 0.0  ;;  %v1845_v62 = vmax.f32 %v1413_v33, 0.0 }
 0x37c   :  { %v1964_v42 = vpack.c.bf16 %v1842_v19, %v1841_v3  ;;  %v1287_v3 = vadd.f32 %v11812_v39, %v11336_v56 }
 0x37d   :  { %v9500_v53 = vld [vmem:[#allocation2 + $0x234] sm:$0xf0] }
 0x37e   :  { %2060 = vst [vmem:[#allocation2 + $0x248] sm:$0xff] %v1964_v42  ;;  %v12036_v44 = vor.u32 %v9500_v53, %v7539_v46  ;;  %v7597_v42 = vld [vmem:[#allocation2 + $0x2b0] sm:$0xf0]  ;;  %v12047_v46 = vor.u32 %v9515_v0, %v7595_v35  ;;  %v1416_v0 = vadd.f32 %v11799_v54, %v1287_v3  ;;  %v7757_v3 = vld [vmem:[%s15032_s3 + $0x2c8] sm:$0xf0] }
 0x37f   :  { %v1670_v19 = vpop.f32.mrf.mxu2 }
 0x380   :  { %15180 = vst [vmem:[#allocation16_spill] sm:$0xff] %v12036_v44  ;;  %v12044_v21 = vpop.f32.mrf.mxu3  ;;  %v1671_v36 = vadd.f32 %v1670_v19, %v1542_v10  ;;  %3038 = vmatmul.bf16.gmra.mxu0 %v12036_v44  ;;  %v12055_v10 = vor.u32 %v9513_v61, %v7597_v42  ;;  %v1545_v19 = vadd.f32 %v11859_v25, %v11338_v41  ;;  %v1849_v35 = vmax.f32 %v1416_v0, 0.0  ;;  %v12067_v14 = vpop.f32.mrf.mxu0 }
 0x381   :  { %v2881_v53 = vpop.f32.mrf.mxu1  ;;  %15181 = vst [vmem:[#allocation15_spill] sm:$0xff] %v12047_v46  ;;  %v1289_v25 = vadd.f32 %v11831_v1, %v11336_v56  ;;  %v9553_v1 = vld [vmem:[%s15032_s3 + $0x2c4] sm:$0xf] }
 0x382   :  { %v1846_v57 = vmax.f32 %v1671_v36, 0.0  ;;  %15183 = vst [vmem:[#allocation17_spill] sm:$0xff] %v12055_v10  ;;  %v7760_v0 = vor.u32 %v9553_v1, %v7757_v3  ;;  %v9494_v3 = vld [vmem:[#allocation2 + $0x20c] sm:$0xf] }
 0x383   :  { %v1418_v54 = vadd.f32 %v11810_v45, %v1289_v25  ;;  %v9585_v45 = vld [vmem:[%s15032_s3 + $0x3c4] sm:$0xf] }
 0x384   :  { %v1966_v44 = vpack.c.bf16 %v1846_v57, %v1845_v62  ;;  %2920 = vmatmul.bf16.gmra.mxu1 %v12047_v46  ;;  %3097 = vmatmul.bf16.gmra.mxu2 %v12053_v48  ;;  %v9519_v57 = vld [vmem:[#allocation2 + $0x2cc] sm:$0xf0]  ;;  %v7525_v48 = vld [vmem:[#allocation2 + $0x218] sm:$0xf0] }
 0x385   :  { %2989 = vmatmul.bf16.gmra.mxu3 %v12055_v10  ;;  %v7555_v61 = vld [vmem:[#allocation2 + $0x248] sm:$0xf]  ;;  %v1853_v7 = vmax.f32 %v1418_v54, 0.0  ;;  %v12099_v18 = vor.u32 %v9494_v3, %v7525_v48  ;;  %v1550_v48 = vadd.f32 %v11921_v50, %v11338_v41  ;;  %v9569_v50 = vld [vmem:[%s15032_s3 + $0x344] sm:$0xf] }
 0x386   :  { %2062 = vst [vmem:[#allocation2 + $0x258] sm:$0xff] %v1966_v44  ;;  %v1547_v44 = vadd.f32 %v11897_v13, %v11338_v41  ;;  %v7885_v13 = vld [vmem:[%s15032_s3 + $0x3c8] sm:$0xf0]  ;;  %3220 = vmatpush.bf16.msrb.mxu3 %v7760_v0 }
 0x387   :  { %v1673_v39 = vpop.f32.mrf.mxu2  ;;  %v7888_v25 = vor.u32 %v9585_v45, %v7885_v13 }
 0x388   :  { %v1674_v33 = vadd.f32 %v1673_v39, %v1545_v19  ;;  %v2950_v59 = vpop.f32.mrf.mxu3  ;;  %v12120_v0 = vpop.f32.mrf.mxu0 }
 0x389   :  { %v12063_v30 = vadd.f32 %v2950_v59, %v2881_v53  ;;  %v2883_v36 = vpop.f32.mrf.mxu1  ;;  %v7611_v59 = vld [vmem:[#allocation2 + $0x2c0] sm:$0xf]  ;;  %3358 = vmatpush.bf16.msra.mxu2 %v7888_v25 }
 0x38a   :  { %v1850_v42 = vmax.f32 %v1674_v33, 0.0  ;;  %v12095_v1 = vor.u32 %v9519_v57, %v7611_v59  ;;  %v7685_v57 = vld [vmem:[%s15032_s3 + $0x238] sm:$0xf0]  ;;  %v9533_v59 = vld [vmem:[%s15032_s3 + $0x224] sm:$0xf] }
 0x38c   :  { %v1968_v62 = vpack.c.bf16 %v1850_v42, %v1849_v35  ;;  %v7613_v35 = vld [vmem:[#allocation2 + $0x2d0] sm:$0xf0]  ;;  %v7693_v42 = vld [vmem:[%s15032_s3 + $0x248] sm:$0xf0] }
 0x38d   :  { %v9504_v10 = vld [vmem:[#allocation2 + $0x254] sm:$0xf0] }
 0x38e   :  { %2064 = vst [vmem:[#allocation2 + $0x268] sm:$0xff] %v1968_v62  ;;  %v12072_v53 = vor.u32 %v9504_v10, %v7555_v61  ;;  %v9537_v10 = vld [vmem:[%s15032_s3 + $0x244] sm:$0xf] }
 0x38f   :  { %v1675_v19 = vpop.f32.mrf.mxu2  ;;  %v7696_v46 = vor.u32 %v9537_v10, %v7693_v42 }
 0x390   :  { %15184 = vst [vmem:[#allocation20_spill] sm:$0xff] %v12072_v53  ;;  %v1676_v39 = vadd.f32 %v1675_v19, %v1547_v44  ;;  %v2952_v33 = vpop.f32.mrf.mxu3  ;;  %3043 = vmatmul.bf16.gmra.mxu0 %v12072_v53  ;;  %v1292_v44 = vadd.f32 %v11845_v28, %v11336_v56  ;;  %v9517_v53 = vld [vmem:[#allocation2 + $0x2c4] sm:$0xf]  ;;  %v9551_v28 = vld [vmem:[%s15032_s3 + $0x2b4] sm:$0xf] }
 0x391   :  { %v12093_v62 = vadd.f32 %v2952_v33, %v2883_v36  ;;  %v2886_v61 = vpop.f32.mrf.mxu1  ;;  %v12101_v45 = vor.u32 %v9517_v53, %v7613_v35  ;;  %3151 = vmatpush.bf16.msrb.mxu1 %v7696_v46  ;;  %v9535_v36 = vld [vmem:[%s15032_s3 + $0x234] sm:$0xf]  ;;  %v7749_v53 = vld [vmem:[%s15032_s3 + $0x2b8] sm:$0xf0]  ;;  %v9549_v35 = vld [vmem:[%s15032_s3 + $0x2a4] sm:$0xf] }
 0x392   :  { %v1854_v19 = vmax.f32 %v1676_v39, 0.0  ;;  %v7688_v46 = vor.u32 %v9535_v36, %v7685_v57  ;;  %v7752_v13 = vor.u32 %v9551_v28, %v7749_v53  ;;  %v1421_v10 = vadd.f32 %v11829_v37, %v1292_v44  ;;  %v7677_v37 = vld [vmem:[%s15032_s3 + $0x228] sm:$0xf0]  ;;  %v7669_v53 = vld [vmem:[%s15032_s3 + $0x218] sm:$0xf0] }
 0x393   :  { %v7680_v3 = vor.u32 %v9533_v59, %v7677_v37  ;;  %v7741_v44 = vld [vmem:[%s15032_s3 + $0x2a8] sm:$0xf0]  ;;  %v1552_v59 = vadd.f32 %v11961_v17, %v11338_v41  ;;  %v9545_v17 = vld [vmem:[%s15032_s3 + $0x284] sm:$0xf] }
 0x394   :  { %v1970_v54 = vpack.c.bf16 %v1854_v19, %v1853_v7  ;;  %2925 = vmatmul.bf16.gmra.mxu1 %v12095_v1  ;;  %3102 = vmatmul.bf16.gmra.mxu2 %v12099_v18  ;;  %v7821_v7 = vld [vmem:[%s15032_s3 + $0x348] sm:$0xf0]  ;;  %v7744_v57 = vor.u32 %v9549_v35, %v7741_v44  ;;  %v1857_v28 = vmax.f32 %v1421_v10, 0.0  ;;  %v9523_v35 = vld [vmem:[#allocation2 + $0x2ec] sm:$0xf0] }
 0x395   :  { %2994 = vmatmul.bf16.gmra.mxu3 %v12101_v45  ;;  %v7824_v33 = vor.u32 %v9569_v50, %v7821_v7  ;;  %3152 = vmatpush.bf16.msrb.mxu1 %v7688_v46  ;;  %v7571_v50 = vld [vmem:[#allocation2 + $0x268] sm:$0xf]  ;;  %v9529_v44 = vld [vmem:[%s15032_s3 + $0x204] sm:$0xf] }
 0x396   :  { %2066 = vst [vmem:[#allocation2 + $0x278] sm:$0xff] %v1970_v54  ;;  %3221 = vmatpush.bf16.msrb.mxu3 %v7752_v13  ;;  %v1294_v54 = vadd.f32 %v11882_v58, %v11336_v56  ;;  %v7733_v58 = vld [vmem:[%s15032_s3 + $0x298] sm:$0xf0] }
 0x397   :  { %v1678_v39 = vpop.f32.mrf.mxu2  ;;  %3289 = vmatpush.bf16.msrb.mxu0 %v7824_v33 }
 0x398   :  { %v1679_v25 = vadd.f32 %v1678_v39, %v1550_v48  ;;  %v2955_v42 = vpop.f32.mrf.mxu3  ;;  %v9531_v48 = vld [vmem:[%s15032_s3 + $0x214] sm:$0xf]  ;;  %v1423_v33 = vadd.f32 %v11842_v9, %v1294_v54  ;;  %v7661_v9 = vld [vmem:[%s15032_s3 + $0x208] sm:$0xf0]  ;;  %v7627_v54 = vld [vmem:[#allocation2 + $0x2e0] sm:$0xf] }
 0x399   :  { %v12141_v19 = vadd.f32 %v2955_v42, %v2886_v61  ;;  %v2888_v36 = vpop.f32.mrf.mxu1  ;;  %3153 = vmatpush.bf16.msrb.mxu1 %v7680_v3  ;;  %v9547_v61 = vld [vmem:[%s15032_s3 + $0x294] sm:$0xf]  ;;  %v7672_v10 = vor.u32 %v9531_v48, %v7669_v53  ;;  %v12162_v3 = vpop.f32.mrf.mxu0  ;;  %v7664_v48 = vor.u32 %v9529_v44, %v7661_v9  ;;  %v7725_v53 = vld [vmem:[%s15032_s3 + $0x288] sm:$0xf0] }
 0x39a   :  { %v1858_v46 = vmax.f32 %v1679_v25, 0.0  ;;  %3222 = vmatpush.bf16.msrb.mxu3 %v7744_v57  ;;  %v7736_v39 = vor.u32 %v9547_v61, %v7733_v58  ;;  %v7541_v25 = vld [vmem:[#allocation2 + $0x238] sm:$0xf0]  ;;  %v9498_v58 = vld [vmem:[#allocation2 + $0x22c] sm:$0xf] }
 0x39c   :  { %v1972_v13 = vpack.c.bf16 %v1858_v46, %v1857_v28  ;;  %v7629_v46 = vld [vmem:[#allocation2 + $0x2f0] sm:$0xf0] }
 0x39d   :  { %v9508_v7 = vld [vmem:[#allocation2 + $0x274] sm:$0xf0]  ;;  %3154 = vmatpush.bf16.msrb.mxu1 %v7672_v10  ;;  %v12179_v10 = vor.u32 %v9523_v35, %v7627_v54  ;;  %v7877_v35 = vld [vmem:[%s15032_s3 + $0x3b8] sm:$0xf0] }
 0x39e   :  { %2068 = vst [vmem:[#allocation2 + $0x288] sm:$0xff] %v1972_v13  ;;  %v12160_v37 = vor.u32 %v9508_v7, %v7571_v50  ;;  %3223 = vmatpush.bf16.msrb.mxu3 %v7736_v39  ;;  %v7728_v50 = vor.u32 %v9545_v17, %v7725_v53  ;;  %v1861_v7 = vmax.f32 %v1423_v33, 0.0  ;;  %v1297_v39 = vadd.f32 %v11902_v34, %v11336_v56  ;;  %v9583_v33 = vld [vmem:[%s15032_s3 + $0x3b4] sm:$0xf] }
 0x39f   :  { %v1680_v42 = vpop.f32.mrf.mxu2 }
 0x3a0   :  { %15185 = vst [vmem:[#allocation19_spill] sm:$0xff] %v12160_v37  ;;  %v1681_v57 = vadd.f32 %v1680_v42, %v1552_v59  ;;  %v2957_v28 = vpop.f32.mrf.mxu3  ;;  %3048 = vmatmul.bf16.gmra.mxu0 %v12160_v37  ;;  %v9521_v42 = vld [vmem:[#allocation2 + $0x2e4] sm:$0xf]  ;;  %v12183_v37 = vor.u32 %v9498_v58, %v7541_v25  ;;  %v1426_v34 = vadd.f32 %v11877_v4, %v1297_v39  ;;  %v9527_v39 = vld [vmem:[#allocation2 + $0x30c] sm:$0xf0] }
 0x3a1   :  { %v12177_v61 = vadd.f32 %v2957_v28, %v2888_v36  ;;  %v2891_v13 = vpop.f32.mrf.mxu1  ;;  %v12185_v44 = vor.u32 %v9521_v42, %v7629_v46  ;;  %3155 = vmatpush.bf16.msrb.mxu1 %v7664_v48  ;;  %v1555_v36 = vadd.f32 %v11981_v15, %v11338_v41  ;;  %v7880_v15 = vor.u32 %v9583_v33, %v7877_v35  ;;  %v12201_v46 = vpop.f32.mrf.mxu0 }
 0x3a2   :  { %v1862_v59 = vmax.f32 %v1681_v57, 0.0  ;;  %3224 = vmatpush.bf16.msrb.mxu3 %v7728_v50  ;;  %v1865_v4 = vmax.f32 %v1426_v34, 0.0  ;;  %v1299_v48 = vadd.f32 %v11919_v11, %v11336_v56  ;;  %v1557_v42 = vadd.f32 %v12013_v40, %v11338_v41  ;;  %v7813_v11 = vld [vmem:[%s15032_s3 + $0x338] sm:$0xf0]  ;;  %v7645_v40 = vld [vmem:[#allocation2 + $0x310] sm:$0xf0] }
 0x3a3   :  { %3359 = vmatpush.bf16.msra.mxu2 %v7880_v15  ;;  %v7557_v34 = vld [vmem:[#allocation2 + $0x258] sm:$0xf0] }
 0x3a4   :  { %v1974_v9 = vpack.c.bf16 %v1862_v59, %v1861_v7  ;;  %2930 = vmatmul.bf16.gmra.mxu1 %v12179_v10  ;;  %3107 = vmatmul.bf16.gmra.mxu2 %v12183_v37  ;;  %v1428_v59 = vadd.f32 %v11899_v32, %v1299_v48  ;;  %v7643_v32 = vld [vmem:[#allocation2 + $0x300] sm:$0xf] }
 0x3a5   :  { %2999 = vmatmul.bf16.gmra.mxu3 %v12185_v44  ;;  %v7587_v50 = vld [vmem:[#allocation2 + $0x288] sm:$0xf] }
 0x3a6   :  { %2070 = vst [vmem:[#allocation2 + $0x298] sm:$0xff] %v1974_v9  ;;  %v1869_v48 = vmax.f32 %v1428_v59, 0.0 }
 0x3a7   :  { %v1683_v25 = vpop.f32.mrf.mxu2 }
 0x3a8   :  { %v1684_v17 = vadd.f32 %v1683_v25, %v1555_v36  ;;  %v2960_v57 = vpop.f32.mrf.mxu3  ;;  %v9567_v36 = vld [vmem:[%s15032_s3 + $0x334] sm:$0xf] }
 0x3a9   :  { %v12199_v28 = vadd.f32 %v2960_v57, %v2891_v13  ;;  %v2893_v54 = vpop.f32.mrf.mxu1  ;;  %v7816_v33 = vor.u32 %v9567_v36, %v7813_v11  ;;  %v12219_v57 = vor.u32 %v9527_v39, %v7643_v32  ;;  %v12227_v36 = vpop.f32.mrf.mxu0 }
 0x3aa   :  { %v1866_v53 = vmax.f32 %v1684_v17, 0.0 }
 0x3ab   :  { %3290 = vmatpush.bf16.msrb.mxu0 %v7816_v33 }
 0x3ac   :  { %v1976_v58 = vpack.c.bf16 %v1866_v53, %v1865_v4  ;;  %v9502_v4 = vld [vmem:[#allocation2 + $0x24c] sm:$0xf]  ;;  %v1302_v53 = vadd.f32 %v11951_v2, %v11336_v56 }
 0x3ad   :  { %v9512_v7 = vld [vmem:[#allocation2 + $0x294] sm:$0xf0] }
 0x3ae   :  { %2072 = vst [vmem:[#allocation2 + $0x2a8] sm:$0xff] %v1976_v58  ;;  %v12208_v13 = vor.u32 %v9512_v7, %v7587_v50  ;;  %v9525_v50 = vld [vmem:[#allocation2 + $0x304] sm:$0xf]  ;;  %v12223_v7 = vor.u32 %v9502_v4, %v7557_v34  ;;  %v1431_v2 = vadd.f32 %v11917_v49, %v1302_v53  ;;  %v1562_v49 = vadd.f32 %v12067_v14, %v11338_v41 }
 0x3af   :  { %v1685_v9 = vpop.f32.mrf.mxu2 }
 0x3b0   :  { %v1686_v35 = vadd.f32 %v1685_v9, %v1557_v42  ;;  %v2962_v25 = vpop.f32.mrf.mxu3  ;;  %3053 = vmatmul.bf16.gmra.mxu0 %v12208_v13  ;;  %v12225_v42 = vor.u32 %v9525_v50, %v7645_v40  ;;  %v7869_v50 = vld [vmem:[%s15032_s3 + $0x3a8] sm:$0xf0] }
 0x3b1   :  { %v12217_v15 = vadd.f32 %v2962_v25, %v2893_v54  ;;  %v2896_v17 = vpop.f32.mrf.mxu1  ;;  %v1560_v54 = vadd.f32 %v12049_v20, %v11338_v41  ;;  %v1304_v20 = vadd.f32 %v11977_v60, %v11336_v56  ;;  %v9581_v60 = vld [vmem:[%s15032_s3 + $0x3a4] sm:$0xf] }
 0x3b2   :  { %v1870_v58 = vmax.f32 %v1686_v35, 0.0  ;;  %v1873_v35 = vmax.f32 %v1431_v2, 0.0 }
 0x3b4   :  { %v1978_v11 = vpack.c.bf16 %v1870_v58, %v1869_v48  ;;  %2935 = vmatmul.bf16.gmra.mxu1 %v12219_v57  ;;  %3112 = vmatmul.bf16.gmra.mxu2 %v12223_v7  ;;  %v1433_v58 = vadd.f32 %v11945_v27, %v1304_v20  ;;  %v7872_v27 = vor.u32 %v9581_v60, %v7869_v50 }
 0x3b5   :  { %3004 = vmatmul.bf16.gmra.mxu3 %v12225_v42  ;;  %v7603_v4 = vld [vmem:[#allocation2 + $0x2a8] sm:$0xf] }
 0x3b6   :  { %2074 = vst [vmem:[#allocation2 + $0x2b8] sm:$0xff] %v1978_v11  ;;  %v7573_v11 = vld [vmem:[#allocation2 + $0x278] sm:$0xf0]  ;;  %3360 = vmatpush.bf16.msra.mxu2 %v7872_v27 }
 0x3b7   :  { %v1688_v39 = vpop.f32.mrf.mxu2 }
 0x3b8   :  { %v1689_v59 = vadd.f32 %v1688_v39, %v1560_v54  ;;  %v2965_v9 = vpop.f32.mrf.mxu3 }
 0x3b9   :  { %v12235_v34 = vadd.f32 %v2965_v9, %v2896_v17  ;;  %v2898_v33 = vpop.f32.mrf.mxu1  ;;  %v1877_v9 = vmax.f32 %v1433_v58, 0.0 }
 0x3ba   :  { %v1874_v25 = vmax.f32 %v1689_v59, 0.0  ;;  %v9506_v59 = vld [vmem:[#allocation2 + $0x26c] sm:$0xf] }
 0x3bc   :  { %v1980_v32 = vpack.c.bf16 %v1874_v25, %v1873_v35  ;;  %v1307_v35 = vadd.f32 %v11991_v29, %v11336_v56  ;;  %v12258_v25 = vor.u32 %v9506_v59, %v7573_v11  ;;  %v9565_v29 = vld [vmem:[%s15032_s3 + $0x324] sm:$0xf] }
 0x3bd   :  { %v3019_v40 = vpop.f32.mrf.mxu0  ;;  %v9516_v48 = vld [vmem:[#allocation2 + $0x2b4] sm:$0xf0] }
 0x3be   :  { %2076 = vst [vmem:[#allocation2 + $0x2c8] sm:$0xff] %v1980_v32  ;;  %v12243_v53 = vadd.f32 %v3019_v40, %v12063_v30  ;;  %v12245_v17 = vor.u32 %v9516_v48, %v7603_v4  ;;  %v1565_v32 = vadd.f32 %v12120_v0, %v11338_v41  ;;  %v1436_v4 = vadd.f32 %v11975_v63, %v1307_v35  ;;  %v7805_v0 = vld [vmem:[%s15032_s3 + $0x328] sm:$0xf0] }
 0x3bf   :  { %v1690_v54 = vpop.f32.mrf.mxu2 }
 0x3c0   :  { %v1691_v2 = vadd.f32 %v1690_v54, %v1562_v49  ;;  %v2967_v39 = vpop.f32.mrf.mxu3  ;;  %3058 = vmatmul.bf16.gmra.mxu0 %v12245_v17  ;;  %v7808_v49 = vor.u32 %v9565_v29, %v7805_v0  ;;  %v1881_v63 = vmax.f32 %v1436_v4, 0.0  ;;  %v9510_v29 = vld [vmem:[#allocation2 + $0x28c] sm:$0xf] }
 0x3c1   :  { %v12254_v14 = vadd.f32 %v2967_v39, %v2898_v33  ;;  %v2901_v30 = vpop.f32.mrf.mxu1 }
 0x3c2   :  { %v1878_v20 = vmax.f32 %v1691_v2, 0.0  ;;  %3291 = vmatpush.bf16.msrb.mxu0 %v7808_v49 }
 0x3c4   :  { %v1982_v40 = vpack.c.bf16 %v1878_v20, %v1877_v9  ;;  %3117 = vmatmul.bf16.gmra.mxu2 %v12258_v25  ;;  %3156 = vmatmul.bf16.vlgmr.msrb.gmra.mxu1 %v11714_v52  ;;  %v1567_v9 = vadd.f32 %v12162_v3, %v11338_v41  ;;  %v1570_v3 = vadd.f32 %v12201_v46, %v11338_v41 }
 0x3c5   :  { %3225 = vmatmul.bf16.vlgmr.msrb.gmra.mxu3 %v11716_v47  ;;  %v3021_v33 = vpop.f32.mrf.mxu0  ;;  %v7619_v2 = vld [vmem:[#allocation2 + $0x2c8] sm:$0xf] }
 0x3c6   :  { %2078 = vst [vmem:[#allocation2 + $0x2d8] sm:$0xff] %v1982_v40  ;;  %v12267_v48 = vadd.f32 %v3021_v33, %v12093_v62  ;;  %v1309_v62 = vadd.f32 %v12029_v43, %v11336_v56 }
 0x3c7   :  { %v1693_v58 = vpop.f32.mrf.mxu2 }
 0x3c8   :  { %v1694_v52 = vadd.f32 %v1693_v58, %v1565_v32  ;;  %v2970_v60 = vpop.f32.mrf.mxu3  ;;  %v1438_v59 = vadd.f32 %v11988_v16, %v1309_v62  ;;  %v7589_v32 = vld [vmem:[#allocation2 + $0x298] sm:$0xf0] }
 0x3c9   :  { %v12275_v47 = vadd.f32 %v2970_v60, %v2901_v30  ;;  %v2903_v50 = vpop.f32.mrf.mxu1  ;;  %v12290_v58 = vor.u32 %v9510_v29, %v7589_v32  ;;  %v9579_v60 = vld [vmem:[%s15032_s3 + $0x394] sm:$0xf] }
 0x3ca   :  { %v1882_v54 = vmax.f32 %v1694_v52, 0.0  ;;  %v1885_v16 = vmax.f32 %v1438_v59, 0.0  ;;  %v1314_v59 = vadd.f32 %v11295_v55, %v11336_v56 }
 0x3cc   :  { %v1984_v11 = vpack.c.bf16 %v1882_v54, %v1881_v63 }
 0x3cd   :  { %v3024_v27 = vpop.f32.mrf.mxu0  ;;  %v9520_v39 = vld [vmem:[#allocation2 + $0x2d4] sm:$0xf0] }
 0x3ce   :  { %2080 = vst [vmem:[#allocation2 + $0x2e8] sm:$0xff] %v1984_v11  ;;  %v12283_v30 = vadd.f32 %v3024_v27, %v12141_v19  ;;  %v12285_v35 = vor.u32 %v9520_v39, %v7619_v2  ;;  %v1312_v19 = vadd.f32 %v11287_v22, %v11336_v56 }
 0x3cf   :  { %v1695_v20 = vpop.f32.mrf.mxu2 }
 0x3d0   :  { %v1696_v40 = vadd.f32 %v1695_v20, %v1567_v9  ;;  %v2972_v43 = vpop.f32.mrf.mxu3  ;;  %3063 = vmatmul.bf16.gmra.mxu0 %v12285_v35  ;;  %v1441_v22 = vadd.f32 %v12024_v51, %v1312_v19  ;;  %v9561_v9 = vld [vmem:[%s15032_s3 + $0x304] sm:$0xf]  ;;  %v7789_v20 = vld [vmem:[%s15032_s3 + $0x308] sm:$0xf0] }
 0x3d1   :  { %v12288_v33 = vadd.f32 %v2972_v43, %v2903_v50  ;;  %v2906_v4 = vpop.f32.mrf.mxu1  ;;  %v7861_v50 = vld [vmem:[%s15032_s3 + $0x398] sm:$0xf0]  ;;  %v1443_v43 = vadd.f32 %v12044_v21, %v1314_v59 }
 0x3d2   :  { %v1886_v0 = vmax.f32 %v1696_v40, 0.0  ;;  %v7864_v63 = vor.u32 %v9579_v60, %v7861_v50  ;;  %v1889_v39 = vmax.f32 %v1441_v22, 0.0  ;;  %v7792_v40 = vor.u32 %v9561_v9, %v7789_v20  ;;  %v9514_v50 = vld [vmem:[#allocation2 + $0x2ac] sm:$0xf]  ;;  %v7621_v20 = vld [vmem:[#allocation2 + $0x2d8] sm:$0xf0] }
 0x3d3   :  { %v1893_v22 = vmax.f32 %v1443_v43, 0.0 }
 0x3d4   :  { %v1986_v49 = vpack.c.bf16 %v1886_v0, %v1885_v16  ;;  %3122 = vmatmul.bf16.gmra.mxu2 %v12290_v58  ;;  %3161 = vmatmul.bf16.gmra.mxu1 %v11745_v26  ;;  %v9563_v26 = vld [vmem:[%s15032_s3 + $0x314] sm:$0xf]  ;;  %v1572_v0 = vadd.f32 %v12227_v36, %v11338_v41 }
 0x3d5   :  { %3230 = vmatmul.bf16.gmra.mxu3 %v11747_v8  ;;  %v3026_v52 = vpop.f32.mrf.mxu0  ;;  %v7797_v8 = vld [vmem:[%s15032_s3 + $0x318] sm:$0xf0]  ;;  %3361 = vmatpush.bf16.msra.mxu2 %v7864_v63  ;;  %v7635_v29 = vld [vmem:[#allocation2 + $0x2e8] sm:$0xf] }
 0x3d6   :  { %2082 = vst [vmem:[#allocation2 + $0x2f8] sm:$0xff] %v1986_v49  ;;  %v12307_v46 = vadd.f32 %v3026_v52, %v12177_v61  ;;  %v7800_v27 = vor.u32 %v9563_v26, %v7797_v8 }
 0x3d7   :  { %v1698_v62 = vpop.f32.mrf.mxu2 }
 0x3d8   :  { %v1699_v54 = vadd.f32 %v1698_v62, %v1570_v3  ;;  %v2975_v11 = vpop.f32.mrf.mxu3  ;;  %3292 = vmatpush.bf16.msrb.mxu0 %v7800_v27  ;;  %v7605_v3 = vld [vmem:[#allocation2 + $0x2b8] sm:$0xf0] }
 0x3d9   :  { %v12315_v2 = vadd.f32 %v2975_v11, %v2906_v4  ;;  %v2908_v51 = vpop.f32.mrf.mxu1  ;;  %v12336_v41 = vor.u32 %v9514_v50, %v7605_v3 }
 0x3da   :  { %v1890_v61 = vmax.f32 %v1699_v54, 0.0 }
 0x3dc   :  { %v1988_v32 = vpack.c.bf16 %v1890_v61, %v1889_v39  ;;  %3293 = vmatpush.bf16.msrb.mxu0 %v7792_v40 }
 0x3dd   :  { %v3029_v4 = vpop.f32.mrf.mxu0  ;;  %v9524_v16 = vld [vmem:[#allocation2 + $0x2f4] sm:$0xf0] }
 0x3de   :  { %2084 = vst [vmem:[#allocation2 + $0x308] sm:$0xff] %v1988_v32  ;;  %v12329_v55 = vadd.f32 %v3029_v4, %v12199_v28  ;;  %v12331_v56 = vor.u32 %v9524_v16, %v7635_v29  ;;  %v9518_v29 = vld [vmem:[#allocation2 + $0x2cc] sm:$0xf] }
 0x3df   :  { %v1700_v19 = vpop.f32.mrf.mxu2  ;;  %v12366_v16 = vor.u32 %v9518_v29, %v7621_v20  ;;  %v9464_v29 = vld [vmem:[%s15032_s3 + $0x174] sm:$0xf0] }
 0x3e0   :  { %v1701_v49 = vadd.f32 %v1700_v19, %v1572_v0  ;;  %v2977_v52 = vpop.f32.mrf.mxu3  ;;  %3068 = vmatmul.bf16.gmra.mxu0 %v12331_v56 }
 0x3e1   :  { %v12334_v21 = vadd.f32 %v2977_v52, %v2908_v51  ;;  %v2911_v60 = vpop.f32.mrf.mxu1  ;;  %v9577_v51 = vld [vmem:[%s15032_s3 + $0x384] sm:$0xf] }
 0x3e2   :  { %v1894_v63 = vmax.f32 %v1701_v49, 0.0 }
 0x3e4   :  { %v1990_v36 = vpack.c.bf16 %v1894_v63, %v1893_v22  ;;  %3127 = vmatmul.bf16.gmra.mxu2 %v12336_v41  ;;  %3166 = vmatmul.bf16.gmra.mxu1 %v11788_v23  ;;  %v7853_v23 = vld [vmem:[%s15032_s3 + $0x388] sm:$0xf0] }
 0x3e5   :  { %3235 = vmatmul.bf16.gmra.mxu3 %v11790_v38  ;;  %v3031_v28 = vpop.f32.mrf.mxu0  ;;  %v7856_v38 = vor.u32 %v9577_v51, %v7853_v23  ;;  %v7651_v39 = vld [vmem:[#allocation2 + $0x308] sm:$0xf]  ;;  %v9480_v51 = vld [vmem:[%s15032_s3 + $0x1f4] sm:$0xf0] }
 0x3e6   :  { %2086 = vst [vmem:[#allocation2 + $0x318] sm:$0xff] %v1990_v36  ;;  %v12342_v62 = vadd.f32 %v3031_v28, %v12217_v15  ;;  %v8227_v28 = vld [vmem:[%s15032_s3 + $0xf0] sm:$0xf] }
 0x3e7   :  { %v3088_v26 = vpop.f32.mrf.mxu2  ;;  %3362 = vmatpush.bf16.msra.mxu2 %v7856_v38 }
 0x3e8   :  { %v2980_v8 = vpop.f32.mrf.mxu3  ;;  %v12345_v54 = vadd.f32 %v3088_v26, %v12243_v53 }
 0x3e9   :  { %v12347_v11 = vadd.f32 %v2980_v8, %v2911_v60  ;;  %v2913_v27 = vpop.f32.mrf.mxu1 }
 0x3ed   :  { %v3034_v15 = vpop.f32.mrf.mxu0  ;;  %v9528_v61 = vld [vmem:[#allocation2 + $0x314] sm:$0xf0] }
 0x3ee   :  { %v12356_v59 = vadd.f32 %v3034_v15, %v12235_v34  ;;  %v12358_v53 = vor.u32 %v9528_v61, %v7651_v39  ;;  %v9432_v15 = vld [vmem:[%s15032_s3 + $0x74] sm:$0xf0] }
 0x3ef   :  { %v3090_v9 = vpop.f32.mrf.mxu2 }
 0x3f0   :  { %v2982_v32 = vpop.f32.mrf.mxu3  ;;  %v12361_v40 = vadd.f32 %v3090_v9, %v12267_v48  ;;  %3073 = vmatmul.bf16.gmra.mxu0 %v12358_v53 }
 0x3f1   :  { %v12364_v43 = vadd.f32 %v2982_v32, %v2913_v27  ;;  %v2916_v4 = vpop.f32.mrf.mxu1  ;;  %v8355_v27 = vld [vmem:[%s15032_s3 + $0x1f0] sm:$0xf] }
 0x3f2   :  { %v8356_v38 = vor.u32 %v9480_v51, %v8355_v27 }
 0x3f4   :  { %3132 = vmatmul.bf16.gmra.mxu2 %v12366_v16  ;;  %3171 = vmatmul.bf16.gmra.mxu1 %v11818_v5  ;;  %v7637_v5 = vld [vmem:[#allocation2 + $0x2f8] sm:$0xf0] }
 0x3f5   :  { %3240 = vmatmul.bf16.gmra.mxu3 %v11820_v24  ;;  %v3036_v34 = vpop.f32.mrf.mxu0  ;;  %4191 = vmatpush.bf16.msrb.mxu2 %v8356_v38 }
 0x3f6   :  { %v12372_v0 = vadd.f32 %v3036_v34, %v12254_v14 }
 0x3f7   :  { %v3093_v48 = vpop.f32.mrf.mxu2 }
 0x3f8   :  { %v2985_v19 = vpop.f32.mrf.mxu3  ;;  %v12375_v3 = vadd.f32 %v3093_v48, %v12283_v30  ;;  %v9522_v30 = vld [vmem:[#allocation2 + $0x2ec] sm:$0xf] }
 0x3f9   :  { %v12377_v49 = vadd.f32 %v2985_v19, %v2916_v4  ;;  %v2918_v52 = vpop.f32.mrf.mxu1  ;;  %v12394_v26 = vor.u32 %v9522_v30, %v7637_v5  ;;  %v8291_v4 = vld [vmem:[%s15032_s3 + $0x170] sm:$0xf]  ;;  %v9526_v30 = vld [vmem:[#allocation2 + $0x30c] sm:$0xf] }
 0x3fa   :  { %v8292_v34 = vor.u32 %v9464_v29, %v8291_v4  ;;  %v15187_v5 = vld [vmem:[#allocation8_spill] sm:$0xff]  ;;  %v8155_v4 = vld [vmem:[%s15032_s3 + $0x60] sm:$0xf]  ;;  %v9430_v29 = vld [vmem:[%s15032_s3 + $0x64] sm:$0xf0] }
 0x3fc   :  { %4122 = vmatpush.bf16.msra.mxu0 %v8292_v34 }
 0x3fd   :  { %v3039_v60 = vpop.f32.mrf.mxu0 }
 0x3fe   :  { %v12380_v50 = vadd.f32 %v3039_v60, %v12275_v47  ;;  %v9448_v47 = vld [vmem:[%s15032_s3 + $0xf4] sm:$0xf0] }
 0x3ff   :  { %v3095_v22 = vpop.f32.mrf.mxu2  ;;  %v8228_v8 = vor.u32 %v9448_v47, %v8227_v28  ;;  %v15188_v47 = vld [vmem:[#allocation7_spill] sm:$0xff] }
 0x400   :  { %v2987_v63 = vpop.f32.mrf.mxu3  ;;  %v12383_v24 = vadd.f32 %v3095_v22, %v12307_v46  ;;  %3294 = vmatmul.bf16.vlgmr.msrb.gmra.mxu0 %v11840_v12  ;;  %v15186_v12 = vld [vmem:[#allocation4_spill] sm:$0xff] }
 0x401   :  { %v12386_v14 = vadd.f32 %v2987_v63, %v2918_v52  ;;  %v2921_v36 = vpop.f32.mrf.mxu1  ;;  %4053 = vmatpush.bf16.msra.mxu3 %v8228_v8  ;;  %v7653_v52 = vld [vmem:[#allocation2 + $0x318] sm:$0xf0] }
 0x402   :  { %v12434_v28 = vor.u32 %v9526_v30, %v7653_v52  ;;  %v9462_v30 = vld [vmem:[%s15032_s3 + $0x164] sm:$0xf0] }
 0x404   :  { %3137 = vmatmul.bf16.gmra.mxu2 %v12394_v26  ;;  %3176 = vmatmul.bf16.gmra.mxu1 %v11849_v31  ;;  %v8163_v31 = vld [vmem:[%s15032_s3 + $0x70] sm:$0xf] }
 0x405   :  { %3245 = vmatmul.bf16.gmra.mxu3 %v15186_v12  ;;  %v3041_v46 = vpop.f32.mrf.mxu0  ;;  %v8164_v61 = vor.u32 %v9432_v15, %v8163_v31  ;;  %v8219_v31 = vld [vmem:[%s15032_s3 + $0xe0] sm:$0xf]  ;;  %v9446_v15 = vld [vmem:[%s15032_s3 + $0xe4] sm:$0xf0] }
 0x406   :  { %v12406_v23 = vadd.f32 %v3041_v46, %v12288_v33 }
 0x407   :  { %v3098_v39 = vpop.f32.mrf.mxu2  ;;  %3984 = vmatpush.bf16.msra.mxu1 %v8164_v61 }
 0x408   :  { %v2990_v9 = vpop.f32.mrf.mxu3  ;;  %v12415_v20 = vadd.f32 %v3098_v39, %v12329_v55  ;;  %v8220_v39 = vor.u32 %v9446_v15, %v8219_v31 }
 0x409   :  { %v12417_v32 = vadd.f32 %v2990_v9, %v2921_v36  ;;  %v2923_v33 = vpop.f32.mrf.mxu1 }
 0x40a   :  { %4054 = vmatpush.bf16.msra.mxu3 %v8220_v39 }
 0x40d   :  { %v3044_v48 = vpop.f32.mrf.mxu0 }
 0x40e   :  { %v12426_v19 = vadd.f32 %v3044_v48, %v12315_v2  ;;  %v15189_v2 = vld [vmem:[#allocation5_spill] sm:$0xff]  ;;  %v8156_v48 = vor.u32 %v9430_v29, %v8155_v4  ;;  %v15193_v4 = vld [vmem:[#allocation12_spill] sm:$0xff] }
 0x40f   :  { %v3100_v55 = vpop.f32.mrf.mxu2 }
 0x410   :  { %v2992_v60 = vpop.f32.mrf.mxu3  ;;  %v12429_v22 = vadd.f32 %v3100_v55, %v12342_v62  ;;  %3299 = vmatmul.bf16.gmra.mxu0 %v15187_v5  ;;  %3985 = vmatpush.bf16.msra.mxu1 %v8156_v48  ;;  %v15194_v48 = vld [vmem:[#allocation11_spill] sm:$0xff] }
 0x411   :  { %v12432_v63 = vadd.f32 %v2992_v60, %v2923_v33  ;;  %v2926_v36 = vpop.f32.mrf.mxu1  ;;  %v15190_v60 = vld [vmem:[#allocation6_spill] sm:$0xff] }
 0x414   :  { %3142 = vmatmul.bf16.gmra.mxu2 %v12434_v28  ;;  %3181 = vmatmul.bf16.gmra.mxu1 %v15188_v47 }
 0x415   :  { %3250 = vmatmul.bf16.gmra.mxu3 %v15189_v2  ;;  %v3046_v8 = vpop.f32.mrf.mxu0  ;;  %v15191_v2 = vld [vmem:[#allocation10_spill] sm:$0xff] }
 0x416   :  { %v12440_v12 = vadd.f32 %v3046_v8, %v12334_v21  ;;  %v8347_v21 = vld [vmem:[%s15032_s3 + $0x1e0] sm:$0xf] }
 0x417   :  { %v3103_v62 = vpop.f32.mrf.mxu2 }
 0x418   :  { %v2995_v46 = vpop.f32.mrf.mxu3  ;;  %v12443_v27 = vadd.f32 %v3103_v62, %v12356_v59  ;;  %v9478_v59 = vld [vmem:[%s15032_s3 + $0x1e4] sm:$0xf0] }
 0x419   :  { %v12445_v51 = vadd.f32 %v2995_v46, %v2926_v36  ;;  %v2928_v38 = vpop.f32.mrf.mxu1  ;;  %v8348_v61 = vor.u32 %v9478_v59, %v8347_v21  ;;  %v8283_v36 = vld [vmem:[%s15032_s3 + $0x160] sm:$0xf] }
 0x41a   :  { %v8284_v47 = vor.u32 %v9462_v30, %v8283_v36  ;;  %v9476_v36 = vld [vmem:[%s15032_s3 + $0x1d4] sm:$0xf0] }
 0x41b   :  { %4192 = vmatpush.bf16.msrb.mxu2 %v8348_v61 }
 0x41c   :  { %4123 = vmatpush.bf16.msra.mxu0 %v8284_v47 }
 0x41d   :  { %v3049_v9 = vpop.f32.mrf.mxu0 }
 0x41e   :  { %v12460_v33 = vadd.f32 %v3049_v9, %v12347_v11 }
 0x41f   :  { %v3105_v34 = vpop.f32.mrf.mxu2 }
 0x420   :  { %v2997_v55 = vpop.f32.mrf.mxu3  ;;  %v12469_v52 = vadd.f32 %v3105_v34, %v12372_v0  ;;  %3304 = vmatmul.bf16.gmra.mxu0 %v15190_v60  ;;  %v15192_v0 = vld [vmem:[#allocation9_spill] sm:$0xff] }
 0x421   :  { %v12472_v5 = vadd.f32 %v2997_v55, %v2928_v38  ;;  %v2931_v11 = vpop.f32.mrf.mxu1  ;;  %v9444_v34 = vld [vmem:[%s15032_s3 + $0xd4] sm:$0xf0]  ;;  %v15195_v55 = vld [vmem:[#allocation14_spill] sm:$0xff] }
 0x424   :  { %3186 = vmatmul.bf16.gmra.mxu1 %v11953_v6  ;;  %3363 = vmatmul.bf16.vlgmr.msra.gmra.mxu2 %v15191_v2  ;;  %v8147_v2 = vld [vmem:[%s15032_s3 + $0x50] sm:$0xf] }
 0x425   :  { %3255 = vmatmul.bf16.gmra.mxu3 %v15192_v0  ;;  %v3051_v8 = vpop.f32.mrf.mxu0  ;;  %v9428_v0 = vld [vmem:[%s15032_s3 + $0x54] sm:$0xf0] }
 0x426   :  { %v12484_v62 = vadd.f32 %v3051_v8, %v12364_v43 }
 0x427   :  { %v3108_v46 = vpop.f32.mrf.mxu2 }
 0x428   :  { %v3000_v38 = vpop.f32.mrf.mxu3  ;;  %v12487_v31 = vadd.f32 %v3108_v46, %v12380_v50  ;;  %v8211_v50 = vld [vmem:[%s15032_s3 + $0xd0] sm:$0xf]  ;;  %v8148_v46 = vor.u32 %v9428_v0, %v8147_v2 }
 0x429   :  { %v12489_v15 = vadd.f32 %v3000_v38, %v2931_v11  ;;  %v2933_v21 = vpop.f32.mrf.mxu1  ;;  %v8339_v11 = vld [vmem:[%s15032_s3 + $0x1d0] sm:$0xf] }
 0x42a   :  { %v8340_v47 = vor.u32 %v9476_v36, %v8339_v11  ;;  %3986 = vmatpush.bf16.msra.mxu1 %v8148_v46  ;;  %v15199_v11 = vld [vmem:[#allocation18_spill] sm:$0xff]  ;;  %v15200_v36 = vld [vmem:[#allocation17_spill] sm:$0xff] }
 0x42c   :  { %4193 = vmatpush.bf16.msrb.mxu2 %v8340_v47 }
 0x42d   :  { %v3054_v39 = vpop.f32.mrf.mxu0 }
 0x42e   :  { %v12492_v6 = vadd.f32 %v3054_v39, %v12377_v49  ;;  %v8212_v49 = vor.u32 %v9444_v34, %v8211_v50 }
 0x42f   :  { %v3110_v59 = vpop.f32.mrf.mxu2 }
 0x430   :  { %v3002_v61 = vpop.f32.mrf.mxu3  ;;  %v12495_v9 = vadd.f32 %v3110_v59, %v12406_v23  ;;  %3309 = vmatmul.bf16.gmra.mxu0 %v15193_v4  ;;  %v15196_v23 = vld [vmem:[#allocation13_spill] sm:$0xff]  ;;  %4055 = vmatpush.bf16.msra.mxu3 %v8212_v49  ;;  %v8275_v59 = vld [vmem:[%s15032_s3 + $0x150] sm:$0xf] }
 0x431   :  { %v12498_v43 = vadd.f32 %v3002_v61, %v2933_v21  ;;  %v2936_v29 = vpop.f32.mrf.mxu1  ;;  %v9460_v61 = vld [vmem:[%s15032_s3 + $0x154] sm:$0xf0] }
 0x432   :  { %v8276_v4 = vor.u32 %v9460_v61, %v8275_v59 }
 0x434   :  { %3191 = vmatmul.bf16.gmra.mxu1 %v15194_v48  ;;  %3368 = vmatmul.bf16.gmra.mxu2 %v15195_v55  ;;  %v15197_v48 = vld [vmem:[#allocation16_spill] sm:$0xff] }
 0x435   :  { %3260 = vmatmul.bf16.gmra.mxu3 %v15196_v23  ;;  %v3056_v60 = vpop.f32.mrf.mxu0  ;;  %4124 = vmatpush.bf16.msra.mxu0 %v8276_v4 }
 0x436   :  { %v12516_v30 = vadd.f32 %v3056_v60, %v12386_v14  ;;  %v15198_v60 = vld [vmem:[#allocation15_spill] sm:$0xff] }
 0x437   :  { %v3113_v8 = vpop.f32.mrf.mxu2 }
 0x438   :  { %v3005_v38 = vpop.f32.mrf.mxu3  ;;  %v12525_v21 = vadd.f32 %v3113_v8, %v12426_v19 }
 0x439   :  { %v12527_v39 = vadd.f32 %v3005_v38, %v2936_v29  ;;  %v2938_v14 = vpop.f32.mrf.mxu1  ;;  %v8203_v38 = vld [vmem:[%s15032_s3 + $0xc0] sm:$0xf] }
 0x43d   :  { %v3059_v50 = vpop.f32.mrf.mxu0 }
 0x43e   :  { %v12536_v34 = vadd.f32 %v3059_v50, %v12417_v32 }
 0x43f   :  { %v3115_v19 = vpop.f32.mrf.mxu2 }
 0x440   :  { %v3007_v49 = vpop.f32.mrf.mxu3  ;;  %v12539_v29 = vadd.f32 %v3115_v19, %v12440_v12  ;;  %3314 = vmatmul.bf16.gmra.mxu0 %v15197_v48  ;;  %v8139_v19 = vld [vmem:[%s15032_s3 + $0x40] sm:$0xf] }
 0x441   :  { %v12542_v55 = vadd.f32 %v3007_v49, %v2938_v14  ;;  %v3157_v23 = vpop.f32.mrf.mxu1  ;;  %v9442_v14 = vld [vmem:[%s15032_s3 + $0xc4] sm:$0xf0] }
 0x442   :  { %v8204_v59 = vor.u32 %v9442_v14, %v8203_v38  ;;  %v9426_v49 = vld [vmem:[%s15032_s3 + $0x44] sm:$0xf0]  ;;  %v8195_v14 = vld [vmem:[%s15032_s3 + $0xb0] sm:$0xf] }
 0x444   :  { %3196 = vmatmul.bf16.gmra.mxu1 %v15198_v60  ;;  %3373 = vmatmul.bf16.gmra.mxu2 %v15199_v11 }
 0x445   :  { %3265 = vmatmul.bf16.gmra.mxu3 %v15200_v36  ;;  %v3061_v47 = vpop.f32.mrf.mxu0  ;;  %v15201_v36 = vld [vmem:[#allocation20_spill] sm:$0xff] }
 0x446   :  { %v12548_v32 = vadd.f32 %v3061_v47, %v12432_v63  ;;  %v8331_v63 = vld [vmem:[%s15032_s3 + $0x1c0] sm:$0xf]  ;;  %4056 = vmatpush.bf16.msra.mxu3 %v8204_v59  ;;  %v9440_v59 = vld [vmem:[%s15032_s3 + $0xb4] sm:$0xf0] }
 0x447   :  { %v3118_v2 = vpop.f32.mrf.mxu2 }
 0x448   :  { %v12551_v0 = vadd.f32 %v3118_v2, %v12460_v33  ;;  %v3226_v12 = vpop.f32.mrf.mxu3  ;;  %v9474_v33 = vld [vmem:[%s15032_s3 + $0x1c4] sm:$0xf0]  ;;  %v8267_v2 = vld [vmem:[%s15032_s3 + $0x140] sm:$0xf] }
 0x449   :  { %v12553_v8 = vadd.f32 %v3226_v12, %v3157_v23  ;;  %v3159_v46 = vpop.f32.mrf.mxu1  ;;  %v8332_v61 = vor.u32 %v9474_v33, %v8331_v63  ;;  %v8140_v23 = vor.u32 %v9426_v49, %v8139_v19  ;;  %v9458_v12 = vld [vmem:[%s15032_s3 + $0x144] sm:$0xf0] }
 0x44a   :  { %v8268_v38 = vor.u32 %v9458_v12, %v8267_v2  ;;  %v8115_v12 = vld [vmem:[%s15032_s3 + $0x10] sm:$0xf] }
 0x44b   :  { %4194 = vmatpush.bf16.msrb.mxu2 %v8332_v61  ;;  %3987 = vmatpush.bf16.msra.mxu1 %v8140_v23  ;;  %v8196_v61 = vor.u32 %v9440_v59, %v8195_v14  ;;  %v9438_v23 = vld [vmem:[%s15032_s3 + $0xa4] sm:$0xf0] }
 0x44c   :  { %4125 = vmatpush.bf16.msra.mxu0 %v8268_v38  ;;  %v8179_v38 = vld [vmem:[%s15032_s3 + $0x90] sm:$0xf] }
 0x44d   :  { %v3064_v4 = vpop.f32.mrf.mxu0  ;;  %4057 = vmatpush.bf16.msra.mxu3 %v8196_v61  ;;  %v8107_v61 = vld [vmem:[%s15032_s3] sm:$0xf] }
 0x44e   :  { %v12568_v50 = vadd.f32 %v3064_v4, %v12445_v51 }
 0x44f   :  { %v3120_v48 = vpop.f32.mrf.mxu2 }
 0x450   :  { %v12577_v60 = vadd.f32 %v3120_v48, %v12484_v62  ;;  %v3228_v11 = vpop.f32.mrf.mxu3  ;;  %3319 = vmatmul.bf16.gmra.mxu0 %v15201_v36  ;;  %v8131_v62 = vld [vmem:[%s15032_s3 + $0x30] sm:$0xf] }
 0x451   :  { %v12580_v47 = vadd.f32 %v3228_v11, %v3159_v46  ;;  %v3162_v51 = vpop.f32.mrf.mxu1  ;;  %v9424_v46 = vld [vmem:[%s15032_s3 + $0x34] sm:$0xf0] }
 0x452   :  { %v8132_v63 = vor.u32 %v9424_v46, %v8131_v62  ;;  %v9812_v46 = vmov 0  }
 0x453   :  { %30 = vst [vmem:[#allocation2] sm:$0xff] %v9812_v46 }
 0x454   :  { %3201 = vmatmul.bf16.gmra.mxu1 %v12095_v1  ;;  %3378 = vmatmul.bf16.gmra.mxu2 %v12099_v18  ;;  %v8123_v18 = vld [vmem:[%s15032_s3 + $0x20] sm:$0xf]  ;;  %v9422_v1 = vld [vmem:[%s15032_s3 + $0x24] sm:$0xf0]  ;;  %32 = vst [vmem:[#allocation2 + $0x10] sm:$0xff] %v9812_v46 }
 0x455   :  { %3270 = vmatmul.bf16.gmra.mxu3 %v12101_v45  ;;  %v3066_v33 = vpop.f32.mrf.mxu0  ;;  %3988 = vmatpush.bf16.msra.mxu1 %v8132_v63  ;;  %v8187_v45 = vld [vmem:[%s15032_s3 + $0xa0] sm:$0xf]  ;;  %v8124_v48 = vor.u32 %v9422_v1, %v8123_v18  ;;  %31 = vst [vmem:[#allocation2 + $0x8] sm:$0xff] %v9812_v46 }
 0x456   :  { %v12604_v4 = vadd.f32 %v3066_v33, %v12472_v5  ;;  %v8188_v2 = vor.u32 %v9438_v23, %v8187_v45  ;;  %v8171_v18 = vld [vmem:[%s15032_s3 + $0x80] sm:$0xf]  ;;  %v15202_v45 = vld [vmem:[#allocation19_spill] sm:$0xff]  ;;  %33 = vst [vmem:[#allocation2 + $0x18] sm:$0xff] %v9812_v46 }
 0x457   :  { %v3123_v19 = vpop.f32.mrf.mxu2  ;;  %34 = vst [vmem:[#allocation3] sm:$0xff] %v9812_v46 }
 0x458   :  { %v12616_v49 = vadd.f32 %v3123_v19, %v12492_v6  ;;  %v3231_v5 = vpop.f32.mrf.mxu3  ;;  %4058 = vmatpush.bf16.msra.mxu3 %v8188_v2  ;;  %v9420_v6 = vld [vmem:[%s15032_s3 + $0x14] sm:$0xf0]  ;;  %v9418_v19 = vld [vmem:[%s15032_s3 + $0x4] sm:$0xf0]  ;;  %35 = vst [vmem:[#allocation3 + $0x8] sm:$0xff] %v9812_v46 }
 0x459   :  { %v12621_v11 = vadd.f32 %v3231_v5, %v3162_v51  ;;  %v3164_v36 = vpop.f32.mrf.mxu1  ;;  %3989 = vmatpush.bf16.msra.mxu1 %v8124_v48  ;;  %v8116_v62 = vor.u32 %v9420_v6, %v8115_v12  ;;  %v9436_v51 = vld [vmem:[%s15032_s3 + $0x94] sm:$0xf0]  ;;  %v8108_v5 = vor.u32 %v9418_v19, %v8107_v61  ;;  %v9434_v48 = vld [vmem:[%s15032_s3 + $0x84] sm:$0xf0]  ;;  %v8323_v6 = vld [vmem:[%s15032_s3 + $0x1b0] sm:$0xf] }
 0x45a   :  { %v8180_v63 = vor.u32 %v9436_v51, %v8179_v38  ;;  %v8172_v12 = vor.u32 %v9434_v48, %v8171_v18 }
 0x45c   :  { %4059 = vmatpush.bf16.msra.mxu3 %v8180_v63  ;;  %v9456_v63 = vld [vmem:[%s15032_s3 + $0x134] sm:$0xf0] }
 0x45d   :  { %v3069_v14 = vpop.f32.mrf.mxu0  ;;  %3990 = vmatpush.bf16.msra.mxu1 %v8116_v62 }
 0x45e   :  { %v12636_v59 = vadd.f32 %v3069_v14, %v12489_v15  ;;  %v8259_v14 = vld [vmem:[%s15032_s3 + $0x130] sm:$0xf] }
 0x45f   :  { %v3125_v33 = vpop.f32.mrf.mxu2 }
 0x460   :  { %v12648_v1 = vadd.f32 %v3125_v33, %v12516_v30  ;;  %v3233_v15 = vpop.f32.mrf.mxu3  ;;  %3324 = vmatmul.bf16.gmra.mxu0 %v15202_v45  ;;  %4060 = vmatpush.bf16.msra.mxu3 %v8172_v12 }
 0x461   :  { %v12654_v23 = vadd.f32 %v3233_v15, %v3164_v36  ;;  %v3167_v2 = vpop.f32.mrf.mxu1  ;;  %3991 = vmatpush.bf16.msra.mxu1 %v8108_v5  ;;  %v9472_v36 = vld [vmem:[%s15032_s3 + $0x1b4] sm:$0xf0] }
 0x462   :  { %v8324_v62 = vor.u32 %v9472_v36, %v8323_v6  ;;  %v9371_v6 = vld [vmem:[#allocation2 + $0xc] sm:$0xf0]  ;;  %v9369_v36 = vld [vmem:[#allocation2 + $0x4] sm:$0xf] }
 0x464   :  { %3206 = vmatmul.bf16.gmra.mxu1 %v12179_v10  ;;  %3383 = vmatmul.bf16.gmra.mxu2 %v12183_v37 }
 0x465   :  { %3275 = vmatmul.bf16.gmra.mxu3 %v12185_v44  ;;  %v3071_v30 = vpop.f32.mrf.mxu0  ;;  %4195 = vmatpush.bf16.msrb.mxu2 %v8324_v62  ;;  %v7917_v62 = vld [vmem:[#allocation2 + $0x10] sm:$0xf0] }
 0x466   :  { %v12666_v38 = vadd.f32 %v3071_v30, %v12498_v43  ;;  %v8260_v43 = vor.u32 %v9456_v63, %v8259_v14  ;;  %v7915_v30 = vld [vmem:[#allocation2] sm:$0xf] }
 0x467   :  { %v3128_v51 = vpop.f32.mrf.mxu2  ;;  %v12712_v14 = vor.u32 %v9371_v6, %v7915_v30 }
 0x468   :  { %v12669_v10 = vadd.f32 %v3128_v51, %v12536_v34  ;;  %v3236_v37 = vpop.f32.mrf.mxu3  ;;  %4126 = vmatpush.bf16.msra.mxu0 %v8260_v43 }
 0x469   :  { %v12671_v44 = vadd.f32 %v3236_v37, %v3167_v2  ;;  %v3169_v46 = vpop.f32.mrf.mxu1 }
 0x46d   :  { %v3074_v33 = vpop.f32.mrf.mxu0 }
 0x46e   :  { %v12680_v61 = vadd.f32 %v3074_v33, %v12527_v39  ;;  %v12716_v33 = vor.u32 %v9369_v36, %v7917_v62  ;;  %v7931_v36 = vld [vmem:[#allocation2 + $0x20] sm:$0xf] }
 0x46f   :  { %v3130_v34 = vpop.f32.mrf.mxu2 }
 0x470   :  { %v12683_v19 = vadd.f32 %v3130_v34, %v12548_v32  ;;  %v3238_v18 = vpop.f32.mrf.mxu3  ;;  %3329 = vmatmul.bf16.gmra.mxu0 %v12208_v13  ;;  %v9454_v34 = vld [vmem:[%s15032_s3 + $0x124] sm:$0xf0] }
 0x471   :  { %v12686_v15 = vadd.f32 %v3238_v18, %v3169_v46  ;;  %v3172_v45 = vpop.f32.mrf.mxu1 }
 0x474   :  { %3211 = vmatmul.bf16.gmra.mxu1 %v12219_v57  ;;  %3388 = vmatmul.bf16.gmra.mxu2 %v12223_v7  ;;  %v8315_v57 = vld [vmem:[%s15032_s3 + $0x1a0] sm:$0xf]  ;;  %v9470_v7 = vld [vmem:[%s15032_s3 + $0x1a4] sm:$0xf0] }
 0x475   :  { %3280 = vmatmul.bf16.gmra.mxu3 %v12225_v42  ;;  %v3076_v5 = vpop.f32.mrf.mxu0  ;;  %v8316_v42 = vor.u32 %v9470_v7, %v8315_v57 }
 0x476   :  { %v12692_v39 = vadd.f32 %v3076_v5, %v12542_v55 }
 0x477   :  { %v3133_v48 = vpop.f32.mrf.mxu2  ;;  %4196 = vmatpush.bf16.msrb.mxu2 %v8316_v42  ;;  %v9375_v42 = vld [vmem:[#allocation2 + $0x2c] sm:$0xf0] }
 0x478   :  { %v12695_v32 = vadd.f32 %v3133_v48, %v12568_v50  ;;  %v3241_v2 = vpop.f32.mrf.mxu3  ;;  %v12744_v62 = vor.u32 %v9375_v42, %v7931_v36  ;;  %v9379_v36 = vld [vmem:[#allocation2 + $0x4c] sm:$0xf0] }
 0x479   :  { %v12697_v12 = vadd.f32 %v3241_v2, %v3172_v45  ;;  %v3174_v13 = vpop.f32.mrf.mxu1 }
 0x47d   :  { %v3295_v55 = vpop.f32.mrf.mxu0 }
 0x47e   :  { %v12706_v50 = vadd.f32 %v3295_v55, %v12553_v8  ;;  %v8251_v8 = vld [vmem:[%s15032_s3 + $0x120] sm:$0xf] }
 0x47f   :  { %v3135_v51 = vpop.f32.mrf.mxu2 }
 0x480   :  { %v12709_v37 = vadd.f32 %v3135_v51, %v12604_v4  ;;  %v3243_v46 = vpop.f32.mrf.mxu3  ;;  %3334 = vmatmul.bf16.gmra.mxu0 %v12245_v17  ;;  %v8252_v4 = vor.u32 %v9454_v34, %v8251_v8  ;;  %v9373_v51 = vld [vmem:[#allocation2 + $0x24] sm:$0xf] }
 0x481   :  { %v12714_v63 = vadd.f32 %v3243_v46, %v3174_v13  ;;  %v3177_v43 = vpop.f32.mrf.mxu1 }
 0x482   :  { %4127 = vmatpush.bf16.msra.mxu0 %v8252_v4  ;;  %v9452_v4 = vld [vmem:[%s15032_s3 + $0x114] sm:$0xf0] }
 0x484   :  { %3393 = vmatmul.bf16.gmra.mxu2 %v12258_v25  ;;  %3992 = vmatmul.bf16.vlgmr.msra.gmra.mxu1 %v12712_v14 }
 0x485   :  { %4061 = vmatmul.bf16.vlgmr.msra.gmra.mxu3 %v12716_v33  ;;  %v3297_v17 = vpop.f32.mrf.mxu0 }
 0x486   :  { %v12728_v18 = vadd.f32 %v3297_v17, %v12580_v47  ;;  %v7933_v47 = vld [vmem:[#allocation2 + $0x30] sm:$0xf0] }
 0x487   :  { %v3138_v45 = vpop.f32.mrf.mxu2  ;;  %v12746_v46 = vor.u32 %v9373_v51, %v7933_v47 }
 0x488   :  { %v12731_v5 = vadd.f32 %v3138_v45, %v12636_v59  ;;  %v3246_v48 = vpop.f32.mrf.mxu3 }
 0x489   :  { %v12733_v2 = vadd.f32 %v3246_v48, %v3177_v43  ;;  %v3179_v13 = vpop.f32.mrf.mxu1 }
 0x48a   :  { %15203 = vst [vmem:[#allocation22_spill] sm:$0xff] %v12731_v5 }
 0x48d   :  { %v3300_v57 = vpop.f32.mrf.mxu0 }
 0x48e   :  { %v12736_v25 = vadd.f32 %v3300_v57, %v12621_v11  ;;  %v8235_v57 = vld [vmem:[%s15032_s3 + $0x100] sm:$0xf] }
 0x48f   :  { %v3140_v7 = vpop.f32.mrf.mxu2 }
 0x490   :  { %v12739_v55 = vadd.f32 %v3140_v7, %v12666_v38  ;;  %v3248_v30 = vpop.f32.mrf.mxu3  ;;  %3339 = vmatmul.bf16.gmra.mxu0 %v12285_v35  ;;  %v8307_v35 = vld [vmem:[%s15032_s3 + $0x190] sm:$0xf]  ;;  %v9468_v38 = vld [vmem:[%s15032_s3 + $0x194] sm:$0xf0]  ;;  %v9450_v7 = vld [vmem:[%s15032_s3 + $0x104] sm:$0xf0] }
 0x491   :  { %v12742_v6 = vadd.f32 %v3248_v30, %v3179_v13  ;;  %v3182_v59 = vpop.f32.mrf.mxu1  ;;  %v8308_v8 = vor.u32 %v9468_v38, %v8307_v35  ;;  %v8236_v42 = vor.u32 %v9450_v7, %v8235_v57  ;;  %v9466_v7 = vld [vmem:[%s15032_s3 + $0x184] sm:$0xf0] }
 0x492   :  { %15204 = vst [vmem:[#allocation21_spill] sm:$0xff] %v12739_v55  ;;  %v9461_v55 = vld [vmem:[%s15032_s3 + $0x164] sm:$0xf] }
 0x493   :  { %4197 = vmatpush.bf16.msrb.mxu2 %v8308_v8  ;;  %v7947_v8 = vld [vmem:[#allocation2 + $0x40] sm:$0xf] }
 0x494   :  { %3398 = vmatmul.bf16.gmra.mxu2 %v12290_v58  ;;  %3997 = vmatmul.bf16.gmra.mxu1 %v12744_v62  ;;  %v8243_v58 = vld [vmem:[%s15032_s3 + $0x110] sm:$0xf] }
 0x495   :  { %4066 = vmatmul.bf16.gmra.mxu3 %v12746_v46  ;;  %v3302_v11 = vpop.f32.mrf.mxu0  ;;  %v8244_v48 = vor.u32 %v9452_v4, %v8243_v58  ;;  %v9377_v58 = vld [vmem:[#allocation2 + $0x44] sm:$0xf] }
 0x496   :  { %v12758_v43 = vadd.f32 %v3302_v11, %v12654_v23  ;;  %v7949_v11 = vld [vmem:[#allocation2 + $0x50] sm:$0xf0] }
 0x497   :  { %v3143_v34 = vpop.f32.mrf.mxu2  ;;  %4128 = vmatpush.bf16.msra.mxu0 %v8244_v48  ;;  %v12788_v4 = vor.u32 %v9377_v58, %v7949_v11  ;;  %v7965_v11 = vld [vmem:[#allocation2 + $0x70] sm:$0xf0]  ;;  %v7963_v58 = vld [vmem:[#allocation2 + $0x60] sm:$0xf] }
 0x498   :  { %v12767_v17 = vadd.f32 %v3143_v34, %v12680_v61  ;;  %v3251_v45 = vpop.f32.mrf.mxu3  ;;  %v12786_v34 = vor.u32 %v9379_v36, %v7947_v8 }
 0x499   :  { %v12769_v13 = vadd.f32 %v3251_v45, %v3182_v59  ;;  %v3184_v23 = vpop.f32.mrf.mxu1 }
 0x49a   :  { %15205 = vst [vmem:[#allocation24_spill] sm:$0xff] %v12767_v17 }
 0x49b   :  { %4129 = vmatpush.bf16.msra.mxu0 %v8236_v42 }
 0x49d   :  { %v3305_v30 = vpop.f32.mrf.mxu0 }
 0x49e   :  { %v12778_v61 = vadd.f32 %v3305_v30, %v12671_v44 }
 0x49f   :  { %v3145_v47 = vpop.f32.mrf.mxu2 }
 0x4a0   :  { %v12781_v59 = vadd.f32 %v3145_v47, %v12692_v39  ;;  %v3253_v51 = vpop.f32.mrf.mxu3  ;;  %3344 = vmatmul.bf16.gmra.mxu0 %v12331_v56 }
 0x4a1   :  { %v12784_v35 = vadd.f32 %v3253_v51, %v3184_v23  ;;  %v3187_v38 = vpop.f32.mrf.mxu1 }
 0x4a2   :  { %15206 = vst [vmem:[#allocation23_spill] sm:$0xff] %v12781_v59 }
 0x4a4   :  { %3403 = vmatmul.bf16.gmra.mxu2 %v12336_v41  ;;  %4002 = vmatmul.bf16.gmra.mxu1 %v12786_v34  ;;  %v8299_v41 = vld [vmem:[%s15032_s3 + $0x180] sm:$0xf] }
 0x4a5   :  { %4071 = vmatmul.bf16.gmra.mxu3 %v12788_v4  ;;  %v3307_v44 = vpop.f32.mrf.mxu0  ;;  %v8300_v42 = vor.u32 %v9466_v7, %v8299_v41 }
 0x4a6   :  { %v12794_v39 = vadd.f32 %v3307_v44, %v12686_v15 }
 0x4a7   :  { %v3364_v56 = vpop.f32.mrf.mxu2  ;;  %4198 = vmatpush.bf16.msrb.mxu2 %v8300_v42 }
 0x4a8   :  { %v3256_v45 = vpop.f32.mrf.mxu3  ;;  %v12797_v48 = vadd.f32 %v3364_v56, %v12706_v50  ;;  %v9383_v50 = vld [vmem:[#allocation2 + $0x6c] sm:$0xf0]  ;;  %v9381_v56 = vld [vmem:[#allocation2 + $0x64] sm:$0xf] }
 0x4a9   :  { %v12799_v23 = vadd.f32 %v3256_v45, %v3187_v38  ;;  %v3189_v57 = vpop.f32.mrf.mxu1  ;;  %v12816_v44 = vor.u32 %v9383_v50, %v7963_v58  ;;  %v12818_v45 = vor.u32 %v9381_v56, %v7965_v11  ;;  %v9387_v58 = vld [vmem:[#allocation2 + $0x8c] sm:$0xf0] }
 0x4aa   :  { %15207 = vst [vmem:[#allocation25_spill] sm:$0xff] %v12797_v48  ;;  %v9389_v48 = vld [vmem:[#allocation2 + $0xa4] sm:$0xf] }
 0x4ad   :  { %v3310_v15 = vpop.f32.mrf.mxu0 }
 0x4ae   :  { %v12808_v30 = vadd.f32 %v3310_v15, %v12697_v12  ;;  %v7923_v15 = vld [vmem:[#allocation2 + $0x8] sm:$0xf] }
 0x4af   :  { %v3366_v47 = vpop.f32.mrf.mxu2 }
 0x4b0   :  { %v3258_v36 = vpop.f32.mrf.mxu3  ;;  %v12811_v51 = vadd.f32 %v3366_v47, %v12728_v18  ;;  %3349 = vmatmul.bf16.gmra.mxu0 %v12358_v53  ;;  %v9372_v47 = vld [vmem:[#allocation2 + $0x14] sm:$0xf0] }
 0x4b1   :  { %v12814_v38 = vadd.f32 %v3258_v36, %v3189_v57  ;;  %v3192_v8 = vpop.f32.mrf.mxu1  ;;  %v12831_v50 = vor.u32 %v9372_v47, %v7923_v15  ;;  %v9385_v47 = vld [vmem:[#allocation2 + $0x84] sm:$0xf] }
 0x4b2   :  { %15208 = vst [vmem:[#allocation26_spill] sm:$0xff] %v12811_v51 }
 0x4b4   :  { %3408 = vmatmul.bf16.gmra.mxu2 %v12366_v16  ;;  %4007 = vmatmul.bf16.gmra.mxu1 %v12816_v44 }
 0x4b5   :  { %4076 = vmatmul.bf16.gmra.mxu3 %v12818_v45  ;;  %v3312_v12 = vpop.f32.mrf.mxu0 }
 0x4b6   :  { %v12824_v18 = vadd.f32 %v3312_v12, %v12714_v63 }
 0x4b7   :  { %v3369_v53 = vpop.f32.mrf.mxu2 }
 0x4b8   :  { %v3261_v57 = vpop.f32.mrf.mxu3  ;;  %v12827_v41 = vadd.f32 %v3369_v53, %v12736_v25  ;;  %v7981_v25 = vld [vmem:[#allocation2 + $0x90] sm:$0xf0]  ;;  %v7979_v53 = vld [vmem:[#allocation2 + $0x80] sm:$0xf] }
 0x4b9   :  { %v12829_v7 = vadd.f32 %v3261_v57, %v3192_v8  ;;  %v3194_v42 = vpop.f32.mrf.mxu1  ;;  %v9447_v57 = vld [vmem:[%s15032_s3 + $0xf4] sm:$0xf]  ;;  %v12848_v15 = vor.u32 %v9387_v58, %v7979_v53  ;;  %v8357_v58 = vld [vmem:[%s15032_s3 + $0x1f8] sm:$0xf0] }
 0x4ba   :  { %15209 = vst [vmem:[#allocation4_spill] sm:$0xff] %v12827_v41  ;;  %v8165_v53 = vld [vmem:[%s15032_s3 + $0x78] sm:$0xf0] }
 0x4bd   :  { %v3315_v16 = vpop.f32.mrf.mxu0 }
 0x4be   :  { %v12834_v36 = vadd.f32 %v3315_v16, %v12733_v2  ;;  %v8229_v2 = vld [vmem:[%s15032_s3 + $0xf8] sm:$0xf0]  ;;  %v12850_v16 = vor.u32 %v9385_v47, %v7981_v25 }
 0x4bf   :  { %v3371_v11 = vpop.f32.mrf.mxu2 }
 0x4c0   :  { %v3263_v63 = vpop.f32.mrf.mxu3  ;;  %v12837_v56 = vadd.f32 %v3371_v11, %v12758_v43  ;;  %4130 = vmatmul.bf16.vlgmr.msra.gmra.mxu0 %v12831_v50  ;;  %v8232_v43 = vor.u32 %v9447_v57, %v8229_v2  ;;  %v9479_v11 = vld [vmem:[%s15032_s3 + $0x1f4] sm:$0xf] }
 0x4c1   :  { %v12840_v8 = vadd.f32 %v3263_v63, %v3194_v42  ;;  %v3197_v12 = vpop.f32.mrf.mxu1  ;;  %v8360_v25 = vor.u32 %v9479_v11, %v8357_v58  ;;  %v9376_v58 = vld [vmem:[#allocation2 + $0x34] sm:$0xf0] }
 0x4c2   :  { %15210 = vst [vmem:[#allocation8_spill] sm:$0xff] %v12837_v56  ;;  %4329 = vmatpush.bf16.msrb.mxu3 %v8232_v43  ;;  %v9463_v43 = vld [vmem:[%s15032_s3 + $0x174] sm:$0xf] }
 0x4c3   :  { %4467 = vmatpush.bf16.msra.mxu2 %v8360_v25 }
 0x4c4   :  { %3413 = vmatmul.bf16.gmra.mxu2 %v12394_v26  ;;  %4012 = vmatmul.bf16.gmra.mxu1 %v12848_v15  ;;  %v9431_v26 = vld [vmem:[%s15032_s3 + $0x74] sm:$0xf] }
 0x4c5   :  { %4081 = vmatmul.bf16.gmra.mxu3 %v12850_v16  ;;  %v3317_v42 = vpop.f32.mrf.mxu0  ;;  %v8168_v2 = vor.u32 %v9431_v26, %v8165_v53  ;;  %v7939_v53 = vld [vmem:[#allocation2 + $0x28] sm:$0xf] }
 0x4c6   :  { %v12862_v63 = vadd.f32 %v3317_v42, %v12742_v6  ;;  %v8293_v42 = vld [vmem:[%s15032_s3 + $0x178] sm:$0xf0] }
 0x4c7   :  { %v3374_v57 = vpop.f32.mrf.mxu2  ;;  %4260 = vmatpush.bf16.msrb.mxu1 %v8168_v2  ;;  %v8296_v11 = vor.u32 %v9463_v43, %v8293_v42  ;;  %v7995_v42 = vld [vmem:[#allocation2 + $0xa0] sm:$0xf] }
 0x4c8   :  { %v3266_v47 = vpop.f32.mrf.mxu3  ;;  %v12871_v56 = vadd.f32 %v3374_v57, %v12778_v61  ;;  %v9391_v57 = vld [vmem:[#allocation2 + $0xac] sm:$0xf0] }
 0x4c9   :  { %v12873_v41 = vadd.f32 %v3266_v47, %v3197_v12  ;;  %v3199_v6 = vpop.f32.mrf.mxu1  ;;  %4398 = vmatpush.bf16.msrb.mxu0 %v8296_v11  ;;  %v12884_v12 = vor.u32 %v9376_v58, %v7939_v53  ;;  %v12892_v11 = vor.u32 %v9391_v57, %v7995_v42 }
 0x4ca   :  { %15211 = vst [vmem:[#allocation7_spill] sm:$0xff] %v12871_v56  ;;  %v7997_v56 = vld [vmem:[#allocation2 + $0xb0] sm:$0xf0] }
 0x4cd   :  { %v3320_v26 = vpop.f32.mrf.mxu0 }
 0x4ce   :  { %v12882_v61 = vadd.f32 %v3320_v26, %v12769_v13  ;;  %v12894_v13 = vor.u32 %v9389_v48, %v7997_v56  ;;  %v8221_v48 = vld [vmem:[%s15032_s3 + $0xe8] sm:$0xf0] }
 0x4cf   :  { %v3376_v25 = vpop.f32.mrf.mxu2 }
 0x4d0   :  { %v3268_v2 = vpop.f32.mrf.mxu3  ;;  %v12887_v47 = vadd.f32 %v3376_v25, %v12794_v39  ;;  %4135 = vmatmul.bf16.gmra.mxu0 %v12884_v12 }
 0x4d1   :  { %v12890_v51 = vadd.f32 %v3268_v2, %v3199_v6  ;;  %v3202_v43 = vpop.f32.mrf.mxu1  ;;  %v9380_v2 = vld [vmem:[#allocation2 + $0x54] sm:$0xf0] }
 0x4d2   :  { %15212 = vst [vmem:[#allocation5_spill] sm:$0xff] %v12887_v47 }
 0x4d4   :  { %3418 = vmatmul.bf16.gmra.mxu2 %v12434_v28  ;;  %4017 = vmatmul.bf16.gmra.mxu1 %v12892_v11  ;;  %v9445_v28 = vld [vmem:[%s15032_s3 + $0xe4] sm:$0xf] }
 0x4d5   :  { %4086 = vmatmul.bf16.gmra.mxu3 %v12894_v13  ;;  %v3322_v39 = vpop.f32.mrf.mxu0  ;;  %v8224_v56 = vor.u32 %v9445_v28, %v8221_v48  ;;  %v9429_v28 = vld [vmem:[%s15032_s3 + $0x64] sm:$0xf]  ;;  %v8157_v48 = vld [vmem:[%s15032_s3 + $0x68] sm:$0xf0] }
 0x4d6   :  { %v12900_v58 = vadd.f32 %v3322_v39, %v12784_v35  ;;  %v9477_v35 = vld [vmem:[%s15032_s3 + $0x1e4] sm:$0xf]  ;;  %v7955_v39 = vld [vmem:[#allocation2 + $0x48] sm:$0xf] }
 0x4d7   :  { %v3379_v26 = vpop.f32.mrf.mxu2  ;;  %4330 = vmatpush.bf16.msrb.mxu3 %v8224_v56  ;;  %v12922_v47 = vor.u32 %v9380_v2, %v7955_v39  ;;  %v9395_v56 = vld [vmem:[#allocation2 + $0xcc] sm:$0xf0]  ;;  %v8011_v39 = vld [vmem:[#allocation2 + $0xc0] sm:$0xf] }
 0x4d8   :  { %v3271_v6 = vpop.f32.mrf.mxu3  ;;  %v12903_v53 = vadd.f32 %v3379_v26, %v12808_v30  ;;  %v8349_v30 = vld [vmem:[%s15032_s3 + $0x1e8] sm:$0xf0] }
 0x4d9   :  { %v12905_v25 = vadd.f32 %v3271_v6, %v3202_v43  ;;  %v3204_v57 = vpop.f32.mrf.mxu1  ;;  %v8352_v43 = vor.u32 %v9477_v35, %v8349_v30  ;;  %v9370_v26 = vld [vmem:[#allocation2 + $0xc] sm:$0xf]  ;;  %v7925_v6 = vld [vmem:[#allocation2 + $0x18] sm:$0xf0]  ;;  %v8160_v30 = vor.u32 %v9429_v28, %v8157_v48  ;;  %v9393_v48 = vld [vmem:[#allocation2 + $0xc4] sm:$0xf] }
 0x4da   :  { %15213 = vst [vmem:[#allocation6_spill] sm:$0xff] %v12903_v53  ;;  %v12934_v2 = vor.u32 %v9370_v26, %v7925_v6  ;;  %v8285_v28 = vld [vmem:[%s15032_s3 + $0x168] sm:$0xf0] }
 0x4db   :  { %4468 = vmatpush.bf16.msra.mxu2 %v8352_v43  ;;  %4261 = vmatpush.bf16.msrb.mxu1 %v8160_v30 }
 0x4dc   :  { %15215 = vst [vmem:[#allocation9_spill] sm:$0xff] %v12934_v2 }
 0x4dd   :  { %v3325_v42 = vpop.f32.mrf.mxu0 }
 0x4de   :  { %v12920_v53 = vadd.f32 %v3325_v42, %v12799_v23  ;;  %v8013_v23 = vld [vmem:[#allocation2 + $0xd0] sm:$0xf0] }
 0x4df   :  { %v3381_v35 = vpop.f32.mrf.mxu2 }
 0x4e0   :  { %v3273_v59 = vpop.f32.mrf.mxu3  ;;  %v12931_v17 = vadd.f32 %v3381_v35, %v12824_v18  ;;  %4140 = vmatmul.bf16.gmra.mxu0 %v12922_v47  ;;  %v12944_v18 = vor.u32 %v9395_v56, %v8011_v39  ;;  %v8288_v35 = vor.u32 %v9461_v55, %v8285_v28  ;;  %v7971_v28 = vld [vmem:[#allocation2 + $0x68] sm:$0xf] }
 0x4e1   :  { %v12936_v43 = vadd.f32 %v3273_v59, %v3204_v57  ;;  %v3207_v42 = vpop.f32.mrf.mxu1 }
 0x4e2   :  { %15214 = vst [vmem:[#allocation10_spill] sm:$0xff] %v12931_v17  ;;  %v12946_v17 = vor.u32 %v9393_v48, %v8013_v23  ;;  %4399 = vmatpush.bf16.msrb.mxu0 %v8288_v35  ;;  %v9384_v23 = vld [vmem:[#allocation2 + $0x74] sm:$0xf0] }
 0x4e3   :  { %15216 = vst [vmem:[#allocation12_spill] sm:$0xff] %v12944_v18 }
 0x4e4   :  { %15217 = vst [vmem:[#allocation11_spill] sm:$0xff] %v12946_v17  ;;  %4022 = vmatmul.bf16.gmra.mxu1 %v12944_v18  ;;  %4199 = vmatmul.bf16.vlgmr.msrb.gmra.mxu2 %v12934_v2  ;;  %v9399_v2 = vld [vmem:[#allocation2 + $0xec] sm:$0xf0] }
 0x4e5   :  { %4091 = vmatmul.bf16.gmra.mxu3 %v12946_v17  ;;  %v3327_v59 = vpop.f32.mrf.mxu0  ;;  %v12962_v17 = vor.u32 %v9384_v23, %v7971_v28  ;;  %v8213_v23 = vld [vmem:[%s15032_s3 + $0xd8] sm:$0xf0] }
 0x4e6   :  { %v12952_v57 = vadd.f32 %v3327_v59, %v12814_v38  ;;  %v7941_v38 = vld [vmem:[#allocation2 + $0x38] sm:$0xf0] }
 0x4e7   :  { %v3384_v26 = vpop.f32.mrf.mxu2  ;;  %15219 = vst [vmem:[#allocation13_spill] sm:$0xff] %v12962_v17 }
 0x4e8   :  { %v3276_v6 = vpop.f32.mrf.mxu3  ;;  %v12955_v56 = vadd.f32 %v3384_v26, %v12834_v36  ;;  %v8027_v36 = vld [vmem:[#allocation2 + $0xe0] sm:$0xf] }
 0x4e9   :  { %v12957_v30 = vadd.f32 %v3276_v6, %v3207_v42  ;;  %v3209_v55 = vpop.f32.mrf.mxu1  ;;  %v8029_v42 = vld [vmem:[#allocation2 + $0xf0] sm:$0xf0] }
 0x4ea   :  { %15218 = vst [vmem:[#allocation14_spill] sm:$0xff] %v12955_v56  ;;  %v9374_v56 = vld [vmem:[#allocation2 + $0x2c] sm:$0xf] }
 0x4eb   :  { %v12978_v28 = vor.u32 %v9374_v56, %v7941_v38 }
 0x4ed   :  { %v3330_v39 = vpop.f32.mrf.mxu0  ;;  %15222 = vst [vmem:[#allocation18_spill] sm:$0xff] %v12978_v28 }
 0x4ee   :  { %v12960_v48 = vadd.f32 %v3330_v39, %v12829_v7  ;;  %v9443_v7 = vld [vmem:[%s15032_s3 + $0xd4] sm:$0xf]  ;;  %v12976_v39 = vor.u32 %v9399_v2, %v8027_v36  ;;  %v8341_v2 = vld [vmem:[%s15032_s3 + $0x1d8] sm:$0xf0] }
 0x4ef   :  { %v3386_v35 = vpop.f32.mrf.mxu2  ;;  %v9427_v36 = vld [vmem:[%s15032_s3 + $0x54] sm:$0xf] }
 0x4f0   :  { %v3278_v59 = vpop.f32.mrf.mxu3  ;;  %v12965_v18 = vadd.f32 %v3386_v35, %v12862_v63  ;;  %4145 = vmatmul.bf16.gmra.mxu0 %v12962_v17  ;;  %15221 = vst [vmem:[#allocation15_spill] sm:$0xff] %v12976_v39  ;;  %v9397_v63 = vld [vmem:[#allocation2 + $0xe4] sm:$0xf]  ;;  %v8216_v35 = vor.u32 %v9443_v7, %v8213_v23  ;;  %v9378_v17 = vld [vmem:[#allocation2 + $0x4c] sm:$0xf] }
 0x4f1   :  { %v12968_v26 = vadd.f32 %v3278_v59, %v3209_v55  ;;  %v3212_v6 = vpop.f32.mrf.mxu1  ;;  %v9475_v59 = vld [vmem:[%s15032_s3 + $0x1d4] sm:$0xf] }
 0x4f2   :  { %15220 = vst [vmem:[#allocation16_spill] sm:$0xff] %v12965_v18  ;;  %v12980_v18 = vor.u32 %v9397_v63, %v8029_v42  ;;  %4331 = vmatpush.bf16.msrb.mxu3 %v8216_v35  ;;  %v8344_v38 = vor.u32 %v9475_v59, %v8341_v2  ;;  %v8149_v42 = vld [vmem:[%s15032_s3 + $0x58] sm:$0xf0]  ;;  %v9459_v35 = vld [vmem:[%s15032_s3 + $0x154] sm:$0xf] }
 0x4f3   :  { %v8152_v23 = vor.u32 %v9427_v36, %v8149_v42  ;;  %v9388_v2 = vld [vmem:[#allocation2 + $0x94] sm:$0xf0]  ;;  %v7987_v42 = vld [vmem:[#allocation2 + $0x88] sm:$0xf] }
 0x4f4   :  { %15223 = vst [vmem:[#allocation17_spill] sm:$0xff] %v12980_v18  ;;  %4027 = vmatmul.bf16.gmra.mxu1 %v12976_v39  ;;  %4204 = vmatmul.bf16.gmra.mxu2 %v12978_v28  ;;  %v8045_v39 = vld [vmem:[#allocation2 + $0x110] sm:$0xf0] }
 0x4f5   :  { %4096 = vmatmul.bf16.gmra.mxu3 %v12980_v18  ;;  %v3332_v55 = vpop.f32.mrf.mxu0  ;;  %4469 = vmatpush.bf16.msra.mxu2 %v8344_v38 }
 0x4f6   :  { %v12992_v56 = vadd.f32 %v3332_v55, %v12840_v8  ;;  %4262 = vmatpush.bf16.msrb.mxu1 %v8152_v23  ;;  %v8277_v55 = vld [vmem:[%s15032_s3 + $0x158] sm:$0xf0] }
 0x4f7   :  { %v3389_v7 = vpop.f32.mrf.mxu2  ;;  %v8280_v59 = vor.u32 %v9459_v35, %v8277_v55  ;;  %v7957_v23 = vld [vmem:[#allocation2 + $0x58] sm:$0xf0] }
 0x4f8   :  { %v3281_v63 = vpop.f32.mrf.mxu3  ;;  %v13001_v18 = vadd.f32 %v3389_v7, %v12882_v61  ;;  %v9403_v7 = vld [vmem:[#allocation2 + $0x10c] sm:$0xf0] }
 0x4f9   :  { %v13003_v28 = vadd.f32 %v3281_v63, %v3212_v6  ;;  %v3214_v8 = vpop.f32.mrf.mxu1  ;;  %4400 = vmatpush.bf16.msrb.mxu0 %v8280_v59  ;;  %v13014_v6 = vor.u32 %v9388_v2, %v7987_v42  ;;  %v8043_v59 = vld [vmem:[#allocation2 + $0x100] sm:$0xf]  ;;  %v9401_v2 = vld [vmem:[#allocation2 + $0x104] sm:$0xf]  ;;  %v13025_v42 = vor.u32 %v9378_v17, %v7957_v23  ;;  %v8205_v23 = vld [vmem:[%s15032_s3 + $0xc8] sm:$0xf0] }
 0x4fa   :  { %15224 = vst [vmem:[#allocation20_spill] sm:$0xff] %v13001_v18  ;;  %v13027_v5 = vor.u32 %v9401_v2, %v8045_v39  ;;  %v9441_v39 = vld [vmem:[%s15032_s3 + $0xc4] sm:$0xf] }
 0x4fb   :  { %15226 = vst [vmem:[#allocation27_spill] sm:$0xff] %v13025_v42 }
 0x4fc   :  { %15227 = vst [vmem:[#allocation28_spill] sm:$0xff] %v13027_v5 }
 0x4fd   :  { %v3335_v36 = vpop.f32.mrf.mxu0 }
 0x4fe   :  { %v13012_v61 = vadd.f32 %v3335_v36, %v12873_v41  ;;  %v13023_v36 = vor.u32 %v9403_v7, %v8043_v59  ;;  %v8333_v59 = vld [vmem:[%s15032_s3 + $0x1c8] sm:$0xf0] }
 0x4ff   :  { %v3391_v38 = vpop.f32.mrf.mxu2 }
 0x500   :  { %v3283_v63 = vpop.f32.mrf.mxu3  ;;  %v13017_v18 = vadd.f32 %v3391_v38, %v12900_v58  ;;  %4150 = vmatmul.bf16.gmra.mxu0 %v13014_v6 }
 0x501   :  { %v13020_v35 = vadd.f32 %v3283_v63, %v3214_v8  ;;  %v3993_v55 = vpop.f32.mrf.mxu1 }
 0x502   :  { %15225 = vst [vmem:[#allocation19_spill] sm:$0xff] %v13017_v18  ;;  %v3994_v41 = vadd.f32 %v3993_v55, %v12345_v54  ;;  %v9382_v18 = vld [vmem:[#allocation2 + $0x6c] sm:$0xf] }
 0x504   :  { %4032 = vmatmul.bf16.gmra.mxu1 %v13023_v36  ;;  %4209 = vmatmul.bf16.gmra.mxu2 %v13025_v42 }
 0x505   :  { %4101 = vmatmul.bf16.gmra.mxu3 %v13027_v5  ;;  %v3337_v58 = vpop.f32.mrf.mxu0  ;;  %v9457_v5 = vld [vmem:[%s15032_s3 + $0x144] sm:$0xf] }
 0x506   :  { %v13033_v8 = vadd.f32 %v3337_v58, %v12890_v51  ;;  %v8208_v51 = vor.u32 %v9441_v39, %v8205_v23  ;;  %v9407_v23 = vld [vmem:[#allocation2 + $0x12c] sm:$0xf0] }
 0x507   :  { %v3394_v38 = vpop.f32.mrf.mxu2 }
 0x508   :  { %v13036_v54 = vadd.f32 %v3394_v38, %v12920_v53  ;;  %v4062_v7 = vpop.f32.mrf.mxu3  ;;  %v9473_v53 = vld [vmem:[%s15032_s3 + $0x1c4] sm:$0xf]  ;;  %4332 = vmatpush.bf16.msrb.mxu3 %v8208_v51  ;;  %v8003_v38 = vld [vmem:[#allocation2 + $0xa8] sm:$0xf] }
 0x509   :  { %v13038_v63 = vadd.f32 %v4062_v7, %v3994_v41  ;;  %v3995_v17 = vpop.f32.mrf.mxu1  ;;  %v9392_v41 = vld [vmem:[#allocation2 + $0xb4] sm:$0xf0]  ;;  %v8336_v2 = vor.u32 %v9473_v53, %v8333_v59  ;;  %v7973_v53 = vld [vmem:[#allocation2 + $0x78] sm:$0xf0] }
 0x50a   :  { %15228 = vst [vmem:[#allocation29_spill] sm:$0xff] %v13036_v54  ;;  %v3996_v55 = vadd.f32 %v3995_v17, %v12361_v40  ;;  %v13056_v54 = vor.u32 %v9392_v41, %v8003_v38  ;;  %v9425_v40 = vld [vmem:[%s15032_s3 + $0x44] sm:$0xf]  ;;  %v8141_v17 = vld [vmem:[%s15032_s3 + $0x48] sm:$0xf0] }
 0x50b   :  { %4470 = vmatpush.bf16.msra.mxu2 %v8336_v2  ;;  %v8144_v51 = vor.u32 %v9425_v40, %v8141_v17  ;;  %v8061_v41 = vld [vmem:[#allocation2 + $0x130] sm:$0xf0]  ;;  %v8269_v40 = vld [vmem:[%s15032_s3 + $0x148] sm:$0xf0] }
 0x50c   :  { %15229 = vst [vmem:[#allocation30_spill] sm:$0xff] %v13056_v54 }
 0x50d   :  { %v3340_v58 = vpop.f32.mrf.mxu0  ;;  %4263 = vmatpush.bf16.msrb.mxu1 %v8144_v51  ;;  %v9423_v51 = vld [vmem:[%s15032_s3 + $0x34] sm:$0xf] }
 0x50e   :  { %v13054_v7 = vadd.f32 %v3340_v58, %v12905_v25  ;;  %v8059_v25 = vld [vmem:[#allocation2 + $0x120] sm:$0xf] }
 0x50f   :  { %v3396_v39 = vpop.f32.mrf.mxu2  ;;  %v13077_v17 = vor.u32 %v9407_v23, %v8059_v25 }
 0x510   :  { %v13065_v59 = vadd.f32 %v3396_v39, %v12952_v57  ;;  %v4064_v2 = vpop.f32.mrf.mxu3  ;;  %4155 = vmatmul.bf16.gmra.mxu0 %v13056_v54  ;;  %v9405_v39 = vld [vmem:[#allocation2 + $0x124] sm:$0xf] }
 0x511   :  { %v13068_v58 = vadd.f32 %v4064_v2, %v3996_v55  ;;  %v3998_v38 = vpop.f32.mrf.mxu1  ;;  %15231 = vst [vmem:[#allocation32_spill] sm:$0xff] %v13077_v17  ;;  %v8272_v55 = vor.u32 %v9457_v5, %v8269_v40  ;;  %v13081_v2 = vor.u32 %v9405_v39, %v8061_v41 }
 0x512   :  { %15230 = vst [vmem:[#allocation31_spill] sm:$0xff] %v13065_v59  ;;  %v3999_v57 = vadd.f32 %v3998_v38, %v12375_v3  ;;  %v13079_v59 = vor.u32 %v9382_v18, %v7973_v53  ;;  %v8133_v3 = vld [vmem:[%s15032_s3 + $0x38] sm:$0xf0]  ;;  %v9439_v18 = vld [vmem:[%s15032_s3 + $0xb4] sm:$0xf] }
 0x513   :  { %15233 = vst [vmem:[#allocation34_spill] sm:$0xff] %v13081_v2  ;;  %4401 = vmatpush.bf16.msrb.mxu0 %v8272_v55  ;;  %v8136_v23 = vor.u32 %v9423_v51, %v8133_v3  ;;  %v8197_v53 = vld [vmem:[%s15032_s3 + $0xb8] sm:$0xf0]  ;;  %v9421_v55 = vld [vmem:[%s15032_s3 + $0x24] sm:$0xf] }
 0x514   :  { %15232 = vst [vmem:[#allocation33_spill] sm:$0xff] %v13079_v59  ;;  %4037 = vmatmul.bf16.gmra.mxu1 %v13077_v17  ;;  %4214 = vmatmul.bf16.gmra.mxu2 %v13079_v59  ;;  %v8200_v41 = vor.u32 %v9439_v18, %v8197_v53  ;;  %v8125_v51 = vld [vmem:[%s15032_s3 + $0x28] sm:$0xf0]  ;;  %v7989_v59 = vld [vmem:[#allocation2 + $0x98] sm:$0xf0] }
 0x515   :  { %4106 = vmatmul.bf16.gmra.mxu3 %v13081_v2  ;;  %v3342_v5 = vpop.f32.mrf.mxu0  ;;  %4264 = vmatpush.bf16.msrb.mxu1 %v8136_v23  ;;  %v8077_v2 = vld [vmem:[#allocation2 + $0x150] sm:$0xf0] }
 0x516   :  { %v13099_v25 = vadd.f32 %v3342_v5, %v12936_v43  ;;  %4333 = vmatpush.bf16.msrb.mxu3 %v8200_v41  ;;  %v9437_v43 = vld [vmem:[%s15032_s3 + $0xa4] sm:$0xf]  ;;  %v8128_v5 = vor.u32 %v9421_v55, %v8125_v51  ;;  %v9396_v41 = vld [vmem:[#allocation2 + $0xd4] sm:$0xf0]  ;;  %v8019_v51 = vld [vmem:[#allocation2 + $0xc8] sm:$0xf] }
 0x517   :  { %v3399_v38 = vpop.f32.mrf.mxu2 }
 0x518   :  { %v13102_v40 = vadd.f32 %v3399_v38, %v12960_v48  ;;  %v4067_v39 = vpop.f32.mrf.mxu3  ;;  %v8189_v48 = vld [vmem:[%s15032_s3 + $0xa8] sm:$0xf0]  ;;  %v9419_v38 = vld [vmem:[%s15032_s3 + $0x14] sm:$0xf] }
 0x519   :  { %v13113_v3 = vadd.f32 %v4067_v39, %v3999_v57  ;;  %v4000_v18 = vpop.f32.mrf.mxu1  ;;  %v8192_v53 = vor.u32 %v9437_v43, %v8189_v48  ;;  %4265 = vmatpush.bf16.msrb.mxu1 %v8128_v5  ;;  %v8117_v57 = vld [vmem:[%s15032_s3 + $0x18] sm:$0xf0]  ;;  %v9435_v39 = vld [vmem:[%s15032_s3 + $0x94] sm:$0xf] }
 0x51a   :  { %15234 = vst [vmem:[#allocation35_spill] sm:$0xff] %v13102_v40  ;;  %v4001_v23 = vadd.f32 %v4000_v18, %v12383_v24  ;;  %v8120_v40 = vor.u32 %v9419_v38, %v8117_v57  ;;  %v8181_v24 = vld [vmem:[%s15032_s3 + $0x98] sm:$0xf0]  ;;  %v13134_v18 = vor.u32 %v9396_v41, %v8019_v51  ;;  %v8109_v41 = vld [vmem:[%s15032_s3 + $0x8] sm:$0xf0] }
 0x51b   :  { %4334 = vmatpush.bf16.msrb.mxu3 %v8192_v53  ;;  %v8184_v5 = vor.u32 %v9435_v39, %v8181_v24  ;;  %v9411_v53 = vld [vmem:[#allocation2 + $0x14c] sm:$0xf0]  ;;  %v9433_v38 = vld [vmem:[%s15032_s3 + $0x84] sm:$0xf]  ;;  %v8075_v57 = vld [vmem:[#allocation2 + $0x140] sm:$0xf] }
 0x51c   :  { %15235 = vst [vmem:[#allocation36_spill] sm:$0xff] %v13134_v18  ;;  %v9386_v39 = vld [vmem:[#allocation2 + $0x8c] sm:$0xf] }
 0x51d   :  { %v3345_v55 = vpop.f32.mrf.mxu0  ;;  %4266 = vmatpush.bf16.msrb.mxu1 %v8120_v40  ;;  %v8173_v51 = vld [vmem:[%s15032_s3 + $0x88] sm:$0xf0] }
 0x51e   :  { %v13132_v43 = vadd.f32 %v3345_v55, %v12957_v30  ;;  %v9417_v30 = vld [vmem:[%s15032_s3 + $0x4] sm:$0xf] }
 0x51f   :  { %v3401_v48 = vpop.f32.mrf.mxu2  ;;  %4335 = vmatpush.bf16.msrb.mxu3 %v8184_v5  ;;  %v8112_v55 = vor.u32 %v9417_v30, %v8109_v41  ;;  %v13155_v5 = vor.u32 %v9411_v53, %v8075_v57  ;;  %v9455_v57 = vld [vmem:[%s15032_s3 + $0x134] sm:$0xf] }
 0x520   :  { %v13137_v17 = vadd.f32 %v3401_v48, %v12992_v56  ;;  %v4069_v54 = vpop.f32.mrf.mxu3  ;;  %4160 = vmatmul.bf16.gmra.mxu0 %v13134_v18  ;;  %v9409_v48 = vld [vmem:[#allocation2 + $0x144] sm:$0xf]  ;;  %v8176_v18 = vor.u32 %v9433_v38, %v8173_v51  ;;  %v8035_v51 = vld [vmem:[#allocation2 + $0xe8] sm:$0xf] }
 0x521   :  { %v13149_v40 = vadd.f32 %v4069_v54, %v4001_v23  ;;  %v4003_v56 = vpop.f32.mrf.mxu1  ;;  %v13159_v42 = vor.u32 %v9409_v48, %v8077_v2  ;;  %4267 = vmatpush.bf16.msrb.mxu1 %v8112_v55  ;;  %v9400_v55 = vld [vmem:[#allocation2 + $0xf4] sm:$0xf0] }
 0x522   :  { %15236 = vst [vmem:[#allocation37_spill] sm:$0xff] %v13137_v17  ;;  %v4004_v24 = vadd.f32 %v4003_v56, %v12415_v20  ;;  %v13157_v17 = vor.u32 %v9386_v39, %v7989_v59  ;;  %v9471_v20 = vld [vmem:[%s15032_s3 + $0x1b4] sm:$0xf]  ;;  %v8325_v59 = vld [vmem:[%s15032_s3 + $0x1b8] sm:$0xf0] }
 0x523   :  { %4336 = vmatpush.bf16.msrb.mxu3 %v8176_v18  ;;  %v8328_v2 = vor.u32 %v9471_v20, %v8325_v59  ;;  %v9415_v20 = vld [vmem:[#allocation2 + $0x16c] sm:$0xf0]  ;;  %v8005_v59 = vld [vmem:[#allocation2 + $0xb8] sm:$0xf0] }
 0x524   :  { %4042 = vmatmul.bf16.gmra.mxu1 %v13155_v5  ;;  %4219 = vmatmul.bf16.gmra.mxu2 %v13157_v17 }
 0x525   :  { %4111 = vmatmul.bf16.gmra.mxu3 %v13159_v42  ;;  %v3347_v54 = vpop.f32.mrf.mxu0  ;;  %4471 = vmatpush.bf16.msra.mxu2 %v8328_v2 }
 0x526   :  { %v13171_v23 = vadd.f32 %v3347_v54, %v12968_v26  ;;  %v8261_v26 = vld [vmem:[%s15032_s3 + $0x138] sm:$0xf0] }
 0x527   :  { %v3404_v53 = vpop.f32.mrf.mxu2  ;;  %v8264_v39 = vor.u32 %v9455_v57, %v8261_v26  ;;  %v8091_v57 = vld [vmem:[#allocation2 + $0x160] sm:$0xf]  ;;  %v9390_v26 = vld [vmem:[#allocation2 + $0xac] sm:$0xf] }
 0x528   :  { %v13174_v30 = vadd.f32 %v3404_v53, %v13012_v61  ;;  %v4072_v41 = vpop.f32.mrf.mxu3 }
 0x529   :  { %v13176_v38 = vadd.f32 %v4072_v41, %v4004_v24  ;;  %v4005_v56 = vpop.f32.mrf.mxu1  ;;  %4402 = vmatpush.bf16.msrb.mxu0 %v8264_v39  ;;  %v13188_v24 = vor.u32 %v9400_v55, %v8035_v51  ;;  %v13197_v39 = vor.u32 %v9415_v20, %v8091_v57  ;;  %v9413_v55 = vld [vmem:[#allocation2 + $0x164] sm:$0xf]  ;;  %v8317_v57 = vld [vmem:[%s15032_s3 + $0x1a8] sm:$0xf0] }
 0x52a   :  { %v4006_v18 = vadd.f32 %v4005_v56, %v12429_v22  ;;  %v8093_v22 = vld [vmem:[#allocation2 + $0x170] sm:$0xf0] }
 0x52b   :  { %v13201_v51 = vor.u32 %v9413_v55, %v8093_v22 }
 0x52d   :  { %v3350_v61 = vpop.f32.mrf.mxu0 }
 0x52e   :  { %v13186_v48 = vadd.f32 %v3350_v61, %v13003_v28  ;;  %v13199_v61 = vor.u32 %v9390_v26, %v8005_v59 }
 0x52f   :  { %v3406_v54 = vpop.f32.mrf.mxu2 }
 0x530   :  { %v13191_v2 = vadd.f32 %v3406_v54, %v13033_v8  ;;  %v4074_v53 = vpop.f32.mrf.mxu3  ;;  %4165 = vmatmul.bf16.gmra.mxu0 %v13188_v24 }
 0x531   :  { %v13194_v41 = vadd.f32 %v4074_v53, %v4006_v18  ;;  %v4008_v56 = vpop.f32.mrf.mxu1 }
 0x532   :  { %15237 = vst [vmem:[#allocation38_spill] sm:$0xff] %v13191_v2  ;;  %v4009_v28 = vadd.f32 %v4008_v56, %v12443_v27  ;;  %v9469_v56 = vld [vmem:[%s15032_s3 + $0x1a4] sm:$0xf] }
 0x533   :  { %v8320_v26 = vor.u32 %v9469_v56, %v8317_v57  ;;  %v9394_v56 = vld [vmem:[#allocation2 + $0xcc] sm:$0xf]  ;;  %v9453_v57 = vld [vmem:[%s15032_s3 + $0x124] sm:$0xf] }
 0x534   :  { %4047 = vmatmul.bf16.gmra.mxu1 %v13197_v39  ;;  %4224 = vmatmul.bf16.gmra.mxu2 %v13199_v61 }
 0x535   :  { %4116 = vmatmul.bf16.gmra.mxu3 %v13201_v51  ;;  %v3352_v8 = vpop.f32.mrf.mxu0  ;;  %4472 = vmatpush.bf16.msra.mxu2 %v8320_v26 }
 0x536   :  { %v13207_v18 = vadd.f32 %v3352_v8, %v13020_v35  ;;  %v9404_v35 = vld [vmem:[#allocation2 + $0x114] sm:$0xf0]  ;;  %v8051_v8 = vld [vmem:[#allocation2 + $0x108] sm:$0xf] }
 0x537   :  { %v3409_v54 = vpop.f32.mrf.mxu2 }
 0x538   :  { %v13210_v27 = vadd.f32 %v3409_v54, %v13054_v7  ;;  %v4077_v20 = vpop.f32.mrf.mxu3 }
 0x539   :  { %v13212_v53 = vadd.f32 %v4077_v20, %v4009_v28  ;;  %v4010_v59 = vpop.f32.mrf.mxu1  ;;  %v13224_v28 = vor.u32 %v9404_v35, %v8051_v8 }
 0x53a   :  { %15238 = vst [vmem:[#allocation39_spill] sm:$0xff] %v13210_v27  ;;  %v4011_v22 = vadd.f32 %v4010_v59, %v12469_v52  ;;  %v8021_v52 = vld [vmem:[#allocation2 + $0xd8] sm:$0xf0] }
 0x53b   :  { %v13239_v26 = vor.u32 %v9394_v56, %v8021_v52  ;;  %v9408_v56 = vld [vmem:[#allocation2 + $0x134] sm:$0xf0] }
 0x53d   :  { %v4131_v55 = vpop.f32.mrf.mxu0 }
 0x53e   :  { %v13222_v7 = vadd.f32 %v4131_v55, %v13038_v63  ;;  %v8253_v63 = vld [vmem:[%s15032_s3 + $0x128] sm:$0xf0] }
 0x53f   :  { %v3411_v54 = vpop.f32.mrf.mxu2 }
 0x540   :  { %v13227_v20 = vadd.f32 %v3411_v54, %v13099_v25  ;;  %v4079_v59 = vpop.f32.mrf.mxu3  ;;  %4170 = vmatmul.bf16.gmra.mxu0 %v13224_v28  ;;  %v8256_v25 = vor.u32 %v9453_v57, %v8253_v63 }
 0x541   :  { %v13230_v27 = vadd.f32 %v4079_v59, %v4011_v22  ;;  %v4013_v2 = vpop.f32.mrf.mxu1 }
 0x542   :  { %v4014_v35 = vadd.f32 %v4013_v2, %v12487_v31  ;;  %4403 = vmatpush.bf16.msrb.mxu0 %v8256_v25  ;;  %v8037_v25 = vld [vmem:[#allocation2 + $0xf8] sm:$0xf0] }
 0x544   :  { %4229 = vmatmul.bf16.gmra.mxu2 %v13239_v26  ;;  %4268 = vmatmul.bf16.vlgmr.msrb.gmra.mxu1 %v12712_v14  ;;  %v8067_v14 = vld [vmem:[#allocation2 + $0x128] sm:$0xf] }
 0x545   :  { %4337 = vmatmul.bf16.vlgmr.msrb.gmra.mxu3 %v12716_v33  ;;  %v4133_v22 = vpop.f32.mrf.mxu0  ;;  %v13256_v63 = vor.u32 %v9408_v56, %v8067_v14 }
 0x546   :  { %v13245_v55 = vadd.f32 %v4133_v22, %v13068_v58 }
 0x547   :  { %v3414_v8 = vpop.f32.mrf.mxu2 }
 0x548   :  { %v13248_v54 = vadd.f32 %v3414_v8, %v13132_v43  ;;  %v4082_v59 = vpop.f32.mrf.mxu3 }
 0x549   :  { %v13250_v31 = vadd.f32 %v4082_v59, %v4014_v35  ;;  %v4015_v2 = vpop.f32.mrf.mxu1 }
 0x54a   :  { %v4016_v52 = vadd.f32 %v4015_v2, %v12495_v9  ;;  %v9398_v9 = vld [vmem:[#allocation2 + $0xec] sm:$0xf] }
 0x54b   :  { %v13265_v2 = vor.u32 %v9398_v9, %v8037_v25  ;;  %v9412_v9 = vld [vmem:[#allocation2 + $0x154] sm:$0xf0] }
 0x54d   :  { %v4136_v57 = vpop.f32.mrf.mxu0 }
 0x54e   :  { %v13254_v33 = vadd.f32 %v4136_v57, %v13113_v3 }
 0x54f   :  { %v3416_v58 = vpop.f32.mrf.mxu2 }
 0x550   :  { %v13259_v22 = vadd.f32 %v3416_v58, %v13171_v23  ;;  %v4084_v43 = vpop.f32.mrf.mxu3  ;;  %4175 = vmatmul.bf16.gmra.mxu0 %v13256_v63  ;;  %v9467_v23 = vld [vmem:[%s15032_s3 + $0x194] sm:$0xf]  ;;  %v8245_v58 = vld [vmem:[%s15032_s3 + $0x118] sm:$0xf0] }
 0x551   :  { %v13262_v35 = vadd.f32 %v4084_v43, %v4016_v52  ;;  %v4018_v8 = vpop.f32.mrf.mxu1  ;;  %v8309_v52 = vld [vmem:[%s15032_s3 + $0x198] sm:$0xf0] }
 0x552   :  { %v4019_v59 = vadd.f32 %v4018_v8, %v12525_v21  ;;  %v8312_v21 = vor.u32 %v9467_v23, %v8309_v52  ;;  %v8083_v52 = vld [vmem:[#allocation2 + $0x148] sm:$0xf] }
 0x554   :  { %4234 = vmatmul.bf16.gmra.mxu2 %v13265_v2  ;;  %4273 = vmatmul.bf16.gmra.mxu1 %v12744_v62 }
 0x555   :  { %4342 = vmatmul.bf16.gmra.mxu3 %v12746_v46  ;;  %v4138_v3 = vpop.f32.mrf.mxu0  ;;  %4473 = vmatpush.bf16.msra.mxu2 %v8312_v21  ;;  %v9451_v46 = vld [vmem:[%s15032_s3 + $0x114] sm:$0xf] }
 0x556   :  { %v13277_v56 = vadd.f32 %v4138_v3, %v13149_v40  ;;  %v8248_v40 = vor.u32 %v9451_v46, %v8245_v58  ;;  %v8237_v3 = vld [vmem:[%s15032_s3 + $0x108] sm:$0xf0] }
 0x557   :  { %v3419_v57 = vpop.f32.mrf.mxu2 }
 0x558   :  { %v13280_v14 = vadd.f32 %v3419_v57, %v13186_v48  ;;  %v4087_v62 = vpop.f32.mrf.mxu3  ;;  %4404 = vmatpush.bf16.msrb.mxu0 %v8248_v40  ;;  %v9449_v48 = vld [vmem:[%s15032_s3 + $0x104] sm:$0xf]  ;;  %v13300_v57 = vor.u32 %v9412_v9, %v8083_v52 }
 0x559   :  { %v13288_v25 = vadd.f32 %v4087_v62, %v4019_v59  ;;  %v4020_v43 = vpop.f32.mrf.mxu1  ;;  %v8240_v21 = vor.u32 %v9449_v48, %v8237_v3 }
 0x55a   :  { %15239 = vst [vmem:[#allocation40_spill] sm:$0xff] %v13280_v14  ;;  %v4021_v8 = vadd.f32 %v4020_v43, %v12539_v29  ;;  %v8053_v29 = vld [vmem:[#allocation2 + $0x118] sm:$0xf0]  ;;  %v9402_v14 = vld [vmem:[#allocation2 + $0x10c] sm:$0xf] }
 0x55b   :  { %v13309_v3 = vor.u32 %v9402_v14, %v8053_v29  ;;  %v8099_v29 = vld [vmem:[#allocation2 + $0x168] sm:$0xf] }
 0x55c   :  { %4405 = vmatpush.bf16.msrb.mxu0 %v8240_v21 }
 0x55d   :  { %v4141_v23 = vpop.f32.mrf.mxu0 }
 0x55e   :  { %v13298_v59 = vadd.f32 %v4141_v23, %v13176_v38 }
 0x55f   :  { %v3421_v62 = vpop.f32.mrf.mxu2 }
 0x560   :  { %v13303_v46 = vadd.f32 %v3421_v62, %v13207_v18  ;;  %v4089_v58 = vpop.f32.mrf.mxu3  ;;  %4180 = vmatmul.bf16.gmra.mxu0 %v13300_v57 }
 0x561   :  { %v13306_v43 = vadd.f32 %v4089_v58, %v4021_v8  ;;  %v4023_v40 = vpop.f32.mrf.mxu1 }
 0x562   :  { %v4024_v48 = vadd.f32 %v4023_v40, %v12551_v0 }
 0x564   :  { %4239 = vmatmul.bf16.gmra.mxu2 %v13309_v3  ;;  %4278 = vmatmul.bf16.gmra.mxu1 %v12786_v34  ;;  %v9465_v34 = vld [vmem:[%s15032_s3 + $0x184] sm:$0xf] }
 0x565   :  { %4347 = vmatmul.bf16.gmra.mxu3 %v12788_v4  ;;  %v4143_v38 = vpop.f32.mrf.mxu0  ;;  %v8301_v4 = vld [vmem:[%s15032_s3 + $0x188] sm:$0xf0] }
 0x566   :  { %v13315_v18 = vadd.f32 %v4143_v38, %v13194_v41  ;;  %v9416_v41 = vld [vmem:[#allocation2 + $0x174] sm:$0xf0]  ;;  %v8304_v21 = vor.u32 %v9465_v34, %v8301_v4 }
 0x567   :  { %v4200_v9 = vpop.f32.mrf.mxu2  ;;  %v13332_v58 = vor.u32 %v9416_v41, %v8099_v29 }
 0x568   :  { %v4092_v23 = vpop.f32.mrf.mxu3  ;;  %v13318_v8 = vadd.f32 %v4200_v9, %v13222_v7  ;;  %4474 = vmatpush.bf16.msra.mxu2 %v8304_v21 }
 0x569   :  { %v13320_v52 = vadd.f32 %v4092_v23, %v4024_v48  ;;  %v4025_v0 = vpop.f32.mrf.mxu1 }
 0x56a   :  { %v4026_v14 = vadd.f32 %v4025_v0, %v12577_v60  ;;  %v8069_v60 = vld [vmem:[#allocation2 + $0x138] sm:$0xf0]  ;;  %v9406_v0 = vld [vmem:[#allocation2 + $0x12c] sm:$0xf] }
 0x56b   :  { %v13341_v4 = vor.u32 %v9406_v0, %v8069_v60  ;;  %v9410_v0 = vld [vmem:[#allocation2 + $0x14c] sm:$0xf] }
 0x56d   :  { %v4146_v62 = vpop.f32.mrf.mxu0 }
 0x56e   :  { %v13330_v7 = vadd.f32 %v4146_v62, %v13212_v53 }
 0x56f   :  { %v4202_v40 = vpop.f32.mrf.mxu2 }
 0x570   :  { %v4094_v48 = vpop.f32.mrf.mxu3  ;;  %v13335_v38 = vadd.f32 %v4202_v40, %v13245_v55  ;;  %4185 = vmatmul.bf16.gmra.mxu0 %v13332_v58 }
 0x571   :  { %v13338_v9 = vadd.f32 %v4094_v48, %v4026_v14  ;;  %v4028_v23 = vpop.f32.mrf.mxu1 }
 0x572   :  { %v4029_v34 = vadd.f32 %v4028_v23, %v12616_v49 }
 0x574   :  { %4244 = vmatmul.bf16.gmra.mxu2 %v13341_v4  ;;  %4283 = vmatmul.bf16.gmra.mxu1 %v12816_v44 }
 0x575   :  { %4352 = vmatmul.bf16.gmra.mxu3 %v12818_v45  ;;  %v4148_v53 = vpop.f32.mrf.mxu0  ;;  %v8085_v45 = vld [vmem:[#allocation2 + $0x158] sm:$0xf0] }
 0x576   :  { %v13347_v55 = vadd.f32 %v4148_v53, %v13230_v27  ;;  %v13371_v53 = vor.u32 %v9410_v0, %v8085_v45  ;;  %v9688_v0 = vld [vmem:[%s15032_s3 + $0x574] sm:$0xf0] }
 0x577   :  { %v4205_v41 = vpop.f32.mrf.mxu2 }
 0x578   :  { %v4097_v21 = vpop.f32.mrf.mxu3  ;;  %v13350_v14 = vadd.f32 %v4205_v41, %v13254_v33  ;;  %v8867_v41 = vld [vmem:[%s15032_s3 + $0x5f0] sm:$0xf] }
 0x579   :  { %v13352_v62 = vadd.f32 %v4097_v21, %v4029_v34  ;;  %v4030_v49 = vpop.f32.mrf.mxu1  ;;  %v9704_v21 = vld [vmem:[%s15032_s3 + $0x5f4] sm:$0xf0] }
 0x57a   :  { %v4031_v29 = vadd.f32 %v4030_v49, %v12648_v1  ;;  %v8739_v1 = vld [vmem:[%s15032_s3 + $0x4f0] sm:$0xf]  ;;  %v8868_v49 = vor.u32 %v9704_v21, %v8867_v41 }
 0x57c   :  { %5416 = vmatpush.bf16.msrb.mxu2 %v8868_v49 }
 0x57d   :  { %v4151_v40 = vpop.f32.mrf.mxu0 }
 0x57e   :  { %v13356_v60 = vadd.f32 %v4151_v40, %v13250_v31  ;;  %v9672_v31 = vld [vmem:[%s15032_s3 + $0x4f4] sm:$0xf0] }
 0x57f   :  { %v4207_v44 = vpop.f32.mrf.mxu2 }
 0x580   :  { %v4099_v48 = vpop.f32.mrf.mxu3  ;;  %v13359_v27 = vadd.f32 %v4207_v44, %v13277_v56  ;;  %4406 = vmatmul.bf16.vlgmr.msrb.gmra.mxu0 %v12831_v50  ;;  %v8740_v56 = vor.u32 %v9672_v31, %v8739_v1 }
 0x581   :  { %v13362_v23 = vadd.f32 %v4099_v48, %v4031_v29  ;;  %v4033_v33 = vpop.f32.mrf.mxu1 }
 0x582   :  { %v4034_v34 = vadd.f32 %v4033_v33, %v12669_v10  ;;  %5278 = vmatpush.bf16.msra.mxu3 %v8740_v56  ;;  %v8803_v33 = vld [vmem:[%s15032_s3 + $0x570] sm:$0xf] }
 0x583   :  { %v8804_v31 = vor.u32 %v9688_v0, %v8803_v33  ;;  %v8731_v33 = vld [vmem:[%s15032_s3 + $0x4e0] sm:$0xf] }
 0x584   :  { %4249 = vmatmul.bf16.gmra.mxu2 %v13371_v53  ;;  %4288 = vmatmul.bf16.gmra.mxu1 %v12848_v15  ;;  %v8675_v15 = vld [vmem:[%s15032_s3 + $0x470] sm:$0xf]  ;;  %v8859_v0 = vld [vmem:[%s15032_s3 + $0x5e0] sm:$0xf] }
 0x585   :  { %4357 = vmatmul.bf16.gmra.mxu3 %v12850_v16  ;;  %v4153_v50 = vpop.f32.mrf.mxu0  ;;  %v9656_v16 = vld [vmem:[%s15032_s3 + $0x474] sm:$0xf0]  ;;  %5347 = vmatpush.bf16.msra.mxu0 %v8804_v31 }
 0x586   :  { %v13383_v10 = vadd.f32 %v4153_v50, %v13262_v35  ;;  %v8676_v40 = vor.u32 %v9656_v16, %v8675_v15  ;;  %v8101_v50 = vld [vmem:[#allocation2 + $0x178] sm:$0xf0]  ;;  %v9414_v16 = vld [vmem:[#allocation2 + $0x16c] sm:$0xf] }
 0x587   :  { %v4210_v29 = vpop.f32.mrf.mxu2 }
 0x588   :  { %v4102_v44 = vpop.f32.mrf.mxu3  ;;  %v13392_v45 = vadd.f32 %v4210_v29, %v13298_v59  ;;  %5209 = vmatpush.bf16.msra.mxu1 %v8676_v40  ;;  %v13413_v29 = vor.u32 %v9414_v16, %v8101_v50 }
 0x589   :  { %v13394_v48 = vadd.f32 %v4102_v44, %v4034_v34  ;;  %v4035_v35 = vpop.f32.mrf.mxu1 }
 0x58a   :  { %v4036_v1 = vadd.f32 %v4035_v35, %v12683_v19 }
 0x58d   :  { %v4156_v56 = vpop.f32.mrf.mxu0 }
 0x58e   :  { %v13404_v59 = vadd.f32 %v4156_v56, %v13288_v25 }
 0x58f   :  { %v4212_v34 = vpop.f32.mrf.mxu2 }
 0x590   :  { %v4104_v41 = vpop.f32.mrf.mxu3  ;;  %v13407_v21 = vadd.f32 %v4212_v34, %v13315_v18  ;;  %4411 = vmatmul.bf16.gmra.mxu0 %v12884_v12  ;;  %v9654_v34 = vld [vmem:[%s15032_s3 + $0x464] sm:$0xf0] }
 0x591   :  { %v13410_v49 = vadd.f32 %v4104_v41, %v4036_v1  ;;  %v4038_v15 = vpop.f32.mrf.mxu1 }
 0x592   :  { %v4039_v19 = vadd.f32 %v4038_v15, %v12695_v32 }
 0x594   :  { %4254 = vmatmul.bf16.gmra.mxu2 %v13413_v29  ;;  %4293 = vmatmul.bf16.gmra.mxu1 %v12892_v11  ;;  %v9670_v11 = vld [vmem:[%s15032_s3 + $0x4e4] sm:$0xf0] }
 0x595   :  { %4362 = vmatmul.bf16.gmra.mxu3 %v12894_v13  ;;  %v4158_v25 = vpop.f32.mrf.mxu0 }
 0x596   :  { %v13419_v18 = vadd.f32 %v4158_v25, %v13306_v43  ;;  %v8732_v43 = vor.u32 %v9670_v11, %v8731_v33  ;;  %v8795_v25 = vld [vmem:[%s15032_s3 + $0x560] sm:$0xf]  ;;  %v15241_v11 = vld [vmem:[#allocation12_spill] sm:$0xff] }
 0x597   :  { %v4215_v40 = vpop.f32.mrf.mxu2 }
 0x598   :  { %v4107_v12 = vpop.f32.mrf.mxu3  ;;  %v13422_v44 = vadd.f32 %v4215_v40, %v13330_v7  ;;  %v9702_v7 = vld [vmem:[%s15032_s3 + $0x5e4] sm:$0xf0]  ;;  %5279 = vmatpush.bf16.msra.mxu3 %v8732_v43 }
 0x599   :  { %v13424_v35 = vadd.f32 %v4107_v12, %v4039_v19  ;;  %v4040_v32 = vpop.f32.mrf.mxu1  ;;  %v8860_v1 = vor.u32 %v9702_v7, %v8859_v0  ;;  %v9686_v40 = vld [vmem:[%s15032_s3 + $0x564] sm:$0xf0]  ;;  %v15240_v12 = vld [vmem:[#allocation22_spill] sm:$0xff] }
 0x59a   :  { %v4041_v13 = vadd.f32 %v4040_v32, %v12709_v37  ;;  %v8667_v37 = vld [vmem:[%s15032_s3 + $0x460] sm:$0xf]  ;;  %v8796_v33 = vor.u32 %v9686_v40, %v8795_v25 }
 0x59b   :  { %5417 = vmatpush.bf16.msrb.mxu2 %v8860_v1  ;;  %v8668_v41 = vor.u32 %v9654_v34, %v8667_v37  ;;  %v15244_v34 = vld [vmem:[#allocation21_spill] sm:$0xff] }
 0x59c   :  { %5348 = vmatpush.bf16.msra.mxu0 %v8796_v33  ;;  %v9668_v33 = vld [vmem:[%s15032_s3 + $0x4d4] sm:$0xf0] }
 0x59d   :  { %v4161_v31 = vpop.f32.mrf.mxu0  ;;  %5210 = vmatpush.bf16.msra.mxu1 %v8668_v41 }
 0x59e   :  { %v13440_v56 = vadd.f32 %v4161_v31, %v13320_v52 }
 0x59f   :  { %v4217_v50 = vpop.f32.mrf.mxu2 }
 0x5a0   :  { %v4109_v15 = vpop.f32.mrf.mxu3  ;;  %v13449_v16 = vadd.f32 %v4217_v50, %v13347_v55  ;;  %4416 = vmatmul.bf16.gmra.mxu0 %v12922_v47  ;;  %v15242_v55 = vld [vmem:[#allocation9_spill] sm:$0xff]  ;;  %v15243_v47 = vld [vmem:[#allocation11_spill] sm:$0xff] }
 0x5a1   :  { %v13452_v19 = vadd.f32 %v4109_v15, %v4041_v13  ;;  %v4043_v52 = vpop.f32.mrf.mxu1 }
 0x5a2   :  { %v4044_v32 = vadd.f32 %v4043_v52, %v15240_v12 }
 0x5a4   :  { %4298 = vmatmul.bf16.gmra.mxu1 %v15241_v11  ;;  %4475 = vmatmul.bf16.vlgmr.msra.gmra.mxu2 %v15242_v55 }
 0x5a5   :  { %4367 = vmatmul.bf16.gmra.mxu3 %v15243_v47  ;;  %v4163_v13 = vpop.f32.mrf.mxu0  ;;  %v15247_v47 = vld [vmem:[#allocation15_spill] sm:$0xff] }
 0x5a6   :  { %v13465_v43 = vadd.f32 %v4163_v13, %v13338_v9  ;;  %v15245_v9 = vld [vmem:[#allocation13_spill] sm:$0xff] }
 0x5a7   :  { %v4220_v0 = vpop.f32.mrf.mxu2  ;;  %v15249_v13 = vld [vmem:[#allocation17_spill] sm:$0xff] }
 0x5a8   :  { %v4112_v7 = vpop.f32.mrf.mxu3  ;;  %v13468_v1 = vadd.f32 %v4220_v0, %v13356_v60 }
 0x5a9   :  { %v13470_v31 = vadd.f32 %v4112_v7, %v4044_v32  ;;  %v4045_v37 = vpop.f32.mrf.mxu1  ;;  %v8723_v32 = vld [vmem:[%s15032_s3 + $0x4d0] sm:$0xf] }
 0x5aa   :  { %v4046_v50 = vadd.f32 %v4045_v37, %v15244_v34  ;;  %v8724_v55 = vor.u32 %v9668_v33, %v8723_v32  ;;  %v8851_v7 = vld [vmem:[%s15032_s3 + $0x5d0] sm:$0xf]  ;;  %v9700_v37 = vld [vmem:[%s15032_s3 + $0x5d4] sm:$0xf0] }
 0x5ac   :  { %5280 = vmatpush.bf16.msra.mxu3 %v8724_v55  ;;  %v9684_v55 = vld [vmem:[%s15032_s3 + $0x554] sm:$0xf0] }
 0x5ad   :  { %v4166_v41 = vpop.f32.mrf.mxu0 }
 0x5ae   :  { %v13474_v15 = vadd.f32 %v4166_v41, %v13352_v62  ;;  %v15246_v62 = vld [vmem:[#allocation24_spill] sm:$0xff] }
 0x5af   :  { %v4222_v52 = vpop.f32.mrf.mxu2  ;;  %v8659_v41 = vld [vmem:[%s15032_s3 + $0x450] sm:$0xf] }
 0x5b0   :  { %v4114_v25 = vpop.f32.mrf.mxu3  ;;  %v13477_v40 = vadd.f32 %v4222_v52, %v13383_v10  ;;  %4421 = vmatmul.bf16.gmra.mxu0 %v15245_v9  ;;  %v15248_v10 = vld [vmem:[#allocation18_spill] sm:$0xff]  ;;  %v9652_v52 = vld [vmem:[%s15032_s3 + $0x454] sm:$0xf0] }
 0x5b1   :  { %v13480_v12 = vadd.f32 %v4114_v25, %v4046_v50  ;;  %v4048_v60 = vpop.f32.mrf.mxu1  ;;  %v8852_v50 = vor.u32 %v9700_v37, %v8851_v7  ;;  %v8660_v9 = vor.u32 %v9652_v52, %v8659_v41  ;;  %v15252_v52 = vld [vmem:[#allocation25_spill] sm:$0xff] }
 0x5b2   :  { %v4049_v11 = vadd.f32 %v4048_v60, %v15246_v62  ;;  %v8787_v62 = vld [vmem:[%s15032_s3 + $0x550] sm:$0xf] }
 0x5b3   :  { %5418 = vmatpush.bf16.msrb.mxu2 %v8852_v50  ;;  %5211 = vmatpush.bf16.msra.mxu1 %v8660_v9  ;;  %v15253_v9 = vld [vmem:[#allocation27_spill] sm:$0xff] }
 0x5b4   :  { %4303 = vmatmul.bf16.gmra.mxu1 %v15247_v47  ;;  %4480 = vmatmul.bf16.gmra.mxu2 %v15248_v10  ;;  %v15250_v47 = vld [vmem:[#allocation23_spill] sm:$0xff] }
 0x5b5   :  { %4372 = vmatmul.bf16.gmra.mxu3 %v15249_v13  ;;  %v4168_v0 = vpop.f32.mrf.mxu0  ;;  %v8788_v13 = vor.u32 %v9684_v55, %v8787_v62 }
 0x5b6   :  { %v13499_v34 = vadd.f32 %v4168_v0, %v13362_v23 }
 0x5b7   :  { %v4225_v25 = vpop.f32.mrf.mxu2  ;;  %5349 = vmatpush.bf16.msra.mxu0 %v8788_v13  ;;  %v15256_v13 = vld [vmem:[#allocation26_spill] sm:$0xff] }
 0x5b8   :  { %v4117_v60 = vpop.f32.mrf.mxu3  ;;  %v13508_v32 = vadd.f32 %v4225_v25, %v13404_v59 }
 0x5b9   :  { %v13510_v33 = vadd.f32 %v4117_v60, %v4049_v11  ;;  %v4050_v23 = vpop.f32.mrf.mxu1  ;;  %v15254_v60 = vld [vmem:[#allocation28_spill] sm:$0xff] }
 0x5ba   :  { %v4051_v10 = vadd.f32 %v4050_v23, %v15250_v47 }
 0x5bd   :  { %v4171_v0 = vpop.f32.mrf.mxu0 }
 0x5be   :  { %v13520_v59 = vadd.f32 %v4171_v0, %v13394_v48 }
 0x5bf   :  { %v4227_v11 = vpop.f32.mrf.mxu2 }
 0x5c0   :  { %v4119_v7 = vpop.f32.mrf.mxu3  ;;  %v13523_v37 = vadd.f32 %v4227_v11, %v13419_v18  ;;  %4426 = vmatmul.bf16.gmra.mxu0 %v13014_v6  ;;  %v9698_v11 = vld [vmem:[%s15032_s3 + $0x5c4] sm:$0xf0] }
 0x5c1   :  { %v13526_v50 = vadd.f32 %v4119_v7, %v4051_v10  ;;  %v4269_v41 = vpop.f32.mrf.mxu1  ;;  %v9666_v10 = vld [vmem:[%s15032_s3 + $0x4c4] sm:$0xf0] }
 0x5c2   :  { %15251 = vst [vmem:[#allocation22_spill] sm:$0xff] %v13523_v37  ;;  %v4270_v25 = vadd.f32 %v4269_v41, %v15252_v52  ;;  %v8587_v37 = vld [vmem:[#allocation2 + $0x160] sm:$0xf] }
 0x5c4   :  { %4308 = vmatmul.bf16.gmra.mxu1 %v13023_v36  ;;  %4485 = vmatmul.bf16.gmra.mxu2 %v15253_v9  ;;  %v8715_v36 = vld [vmem:[%s15032_s3 + $0x4c0] sm:$0xf]  ;;  %v9650_v9 = vld [vmem:[%s15032_s3 + $0x444] sm:$0xf0] }
 0x5c5   :  { %4377 = vmatmul.bf16.gmra.mxu3 %v15254_v60  ;;  %v4173_v48 = vpop.f32.mrf.mxu0 }
 0x5c6   :  { %v13533_v23 = vadd.f32 %v4173_v48, %v13410_v49  ;;  %v8716_v49 = vor.u32 %v9666_v10, %v8715_v36  ;;  %v8779_v10 = vld [vmem:[%s15032_s3 + $0x540] sm:$0xf] }
 0x5c7   :  { %v4230_v62 = vpop.f32.mrf.mxu2 }
 0x5c8   :  { %v13536_v18 = vadd.f32 %v4230_v62, %v13440_v56  ;;  %v4338_v6 = vpop.f32.mrf.mxu3  ;;  %v8843_v56 = vld [vmem:[%s15032_s3 + $0x5c0] sm:$0xf]  ;;  %5281 = vmatpush.bf16.msra.mxu3 %v8716_v49  ;;  %v15259_v49 = vld [vmem:[#allocation4_spill] sm:$0xff] }
 0x5c9   :  { %v13538_v55 = vadd.f32 %v4338_v6, %v4270_v25  ;;  %v4271_v47 = vpop.f32.mrf.mxu1  ;;  %v8844_v7 = vor.u32 %v9698_v11, %v8843_v56  ;;  %v8651_v25 = vld [vmem:[%s15032_s3 + $0x440] sm:$0xf] }
 0x5ca   :  { %15255 = vst [vmem:[#allocation12_spill] sm:$0xff] %v13536_v18  ;;  %v4272_v0 = vadd.f32 %v4271_v47, %v15256_v13  ;;  %v8652_v48 = vor.u32 %v9650_v9, %v8651_v25  ;;  %v15258_v47 = vld [vmem:[#allocation30_spill] sm:$0xff]  ;;  %v9682_v13 = vld [vmem:[%s15032_s3 + $0x544] sm:$0xf0]  ;;  %v8707_v25 = vld [vmem:[%s15032_s3 + $0x4b0] sm:$0xf] }
 0x5cb   :  { %5419 = vmatpush.bf16.msrb.mxu2 %v8844_v7  ;;  %v8780_v11 = vor.u32 %v9682_v13, %v8779_v10  ;;  %v15261_v7 = vld [vmem:[#allocation33_spill] sm:$0xff]  ;;  %v15262_v9 = vld [vmem:[#allocation34_spill] sm:$0xff]  ;;  %v9631_v18 = vld [vmem:[#allocation2 + $0x14c] sm:$0xf0] }
 0x5cc   :  { %5212 = vmatpush.bf16.msra.mxu1 %v8652_v48 }
 0x5cd   :  { %v4176_v41 = vpop.f32.mrf.mxu0  ;;  %5350 = vmatpush.bf16.msra.mxu0 %v8780_v11  ;;  %v8635_v11 = vld [vmem:[%s15032_s3 + $0x420] sm:$0xf] }
 0x5ce   :  { %v13554_v52 = vadd.f32 %v4176_v41, %v13424_v35  ;;  %v9648_v41 = vld [vmem:[%s15032_s3 + $0x434] sm:$0xf0] }
 0x5cf   :  { %v4232_v60 = vpop.f32.mrf.mxu2 }
 0x5d0   :  { %v13563_v62 = vadd.f32 %v4232_v60, %v13465_v43  ;;  %v4340_v6 = vpop.f32.mrf.mxu3  ;;  %4431 = vmatmul.bf16.gmra.mxu0 %v15258_v47  ;;  %v15260_v43 = vld [vmem:[#allocation32_spill] sm:$0xff] }
 0x5d1   :  { %v13566_v36 = vadd.f32 %v4340_v6, %v4272_v0  ;;  %v4274_v35 = vpop.f32.mrf.mxu1  ;;  %v8643_v0 = vld [vmem:[%s15032_s3 + $0x430] sm:$0xf]  ;;  %v9664_v6 = vld [vmem:[%s15032_s3 + $0x4b4] sm:$0xf0] }
 0x5d2   :  { %15257 = vst [vmem:[#allocation9_spill] sm:$0xff] %v13563_v62  ;;  %v4275_v56 = vadd.f32 %v4274_v35, %v15259_v49  ;;  %v8644_v48 = vor.u32 %v9648_v41, %v8643_v0  ;;  %v8708_v35 = vor.u32 %v9664_v6, %v8707_v25  ;;  %v15264_v25 = vld [vmem:[#allocation8_spill] sm:$0xff] }
 0x5d3   :  { %v8691_v6 = vld [vmem:[%s15032_s3 + $0x490] sm:$0xf] }
 0x5d4   :  { %4313 = vmatmul.bf16.gmra.mxu1 %v15260_v43  ;;  %4490 = vmatmul.bf16.gmra.mxu2 %v15261_v7  ;;  %v9646_v43 = vld [vmem:[%s15032_s3 + $0x424] sm:$0xf0] }
 0x5d5   :  { %4382 = vmatmul.bf16.gmra.mxu3 %v15262_v9  ;;  %v4178_v60 = vpop.f32.mrf.mxu0  ;;  %5213 = vmatpush.bf16.msra.mxu1 %v8644_v48  ;;  %v8636_v41 = vor.u32 %v9646_v43, %v8635_v11  ;;  %v8627_v48 = vld [vmem:[%s15032_s3 + $0x410] sm:$0xf] }
 0x5d6   :  { %v13591_v47 = vadd.f32 %v4178_v60, %v13452_v19  ;;  %5282 = vmatpush.bf16.msra.mxu3 %v8708_v35  ;;  %v8699_v19 = vld [vmem:[%s15032_s3 + $0x4a0] sm:$0xf] }
 0x5d7   :  { %v4235_v10 = vpop.f32.mrf.mxu2 }
 0x5d8   :  { %v13594_v13 = vadd.f32 %v4235_v10, %v13474_v15  ;;  %v4343_v49 = vpop.f32.mrf.mxu3  ;;  %v9662_v15 = vld [vmem:[%s15032_s3 + $0x4a4] sm:$0xf0] }
 0x5d9   :  { %v13605_v7 = vadd.f32 %v4343_v49, %v4275_v56  ;;  %v4276_v0 = vpop.f32.mrf.mxu1  ;;  %v8700_v60 = vor.u32 %v9662_v15, %v8699_v19  ;;  %5214 = vmatpush.bf16.msra.mxu1 %v8636_v41  ;;  %v9644_v56 = vld [vmem:[%s15032_s3 + $0x414] sm:$0xf0]  ;;  %v15266_v15 = vld [vmem:[#allocation36_spill] sm:$0xff] }
 0x5da   :  { %15263 = vst [vmem:[#allocation11_spill] sm:$0xff] %v13594_v13  ;;  %v4277_v9 = vadd.f32 %v4276_v0, %v15264_v25  ;;  %v8628_v10 = vor.u32 %v9644_v56, %v8627_v48  ;;  %v9660_v49 = vld [vmem:[%s15032_s3 + $0x494] sm:$0xf0]  ;;  %v8619_v25 = vld [vmem:[%s15032_s3 + $0x400] sm:$0xf] }
 0x5db   :  { %5283 = vmatpush.bf16.msra.mxu3 %v8700_v60  ;;  %v8692_v43 = vor.u32 %v9660_v49, %v8691_v6  ;;  %v9642_v60 = vld [vmem:[%s15032_s3 + $0x404] sm:$0xf0] }
 0x5dc   :  { %v8620_v56 = vor.u32 %v9642_v60, %v8619_v25  ;;  %v9658_v6 = vld [vmem:[%s15032_s3 + $0x484] sm:$0xf0] }
 0x5dd   :  { %v4181_v35 = vpop.f32.mrf.mxu0  ;;  %5215 = vmatpush.bf16.msra.mxu1 %v8628_v10 }
 0x5de   :  { %v13624_v11 = vadd.f32 %v4181_v35, %v13470_v31  ;;  %v8683_v31 = vld [vmem:[%s15032_s3 + $0x480] sm:$0xf]  ;;  %v15267_v35 = vld [vmem:[#allocation7_spill] sm:$0xff] }
 0x5df   :  { %v4237_v19 = vpop.f32.mrf.mxu2  ;;  %5284 = vmatpush.bf16.msra.mxu3 %v8692_v43  ;;  %v8684_v49 = vor.u32 %v9658_v6, %v8683_v31  ;;  %v8771_v31 = vld [vmem:[%s15032_s3 + $0x530] sm:$0xf] }
 0x5e0   :  { %v13627_v0 = vadd.f32 %v4237_v19, %v13499_v34  ;;  %v4345_v41 = vpop.f32.mrf.mxu3  ;;  %4436 = vmatmul.bf16.gmra.mxu0 %v15266_v15  ;;  %v9696_v19 = vld [vmem:[%s15032_s3 + $0x5b4] sm:$0xf0] }
 0x5e1   :  { %v13639_v48 = vadd.f32 %v4345_v41, %v4277_v9  ;;  %v4279_v34 = vpop.f32.mrf.mxu1  ;;  %5216 = vmatpush.bf16.msra.mxu1 %v8620_v56  ;;  %v8835_v9 = vld [vmem:[%s15032_s3 + $0x5b0] sm:$0xf] }
 0x5e2   :  { %15265 = vst [vmem:[#allocation21_spill] sm:$0xff] %v13627_v0  ;;  %v4280_v10 = vadd.f32 %v4279_v34, %v15267_v35  ;;  %v8836_v15 = vor.u32 %v9696_v19, %v8835_v9  ;;  %v15269_v34 = vld [vmem:[#allocation5_spill] sm:$0xff]  ;;  %v9699_v0 = vld [vmem:[%s15032_s3 + $0x5d4] sm:$0xf] }
 0x5e3   :  { %5285 = vmatpush.bf16.msra.mxu3 %v8684_v49 }
 0x5e4   :  { %4318 = vmatmul.bf16.gmra.mxu1 %v13155_v5  ;;  %4495 = vmatmul.bf16.gmra.mxu2 %v13157_v17 }
 0x5e5   :  { %4387 = vmatmul.bf16.gmra.mxu3 %v13159_v42  ;;  %v4183_v43 = vpop.f32.mrf.mxu0  ;;  %5420 = vmatpush.bf16.msrb.mxu2 %v8836_v15  ;;  %v15271_v15 = vld [vmem:[#allocation6_spill] sm:$0xff] }
 0x5e6   :  { %v13655_v41 = vadd.f32 %v4183_v43, %v13480_v12  ;;  %v9680_v12 = vld [vmem:[%s15032_s3 + $0x534] sm:$0xf0] }
 0x5e7   :  { %v4240_v25 = vpop.f32.mrf.mxu2  ;;  %v8772_v6 = vor.u32 %v9680_v12, %v8771_v31 }
 0x5e8   :  { %v13658_v5 = vadd.f32 %v4240_v25, %v13520_v59  ;;  %v4348_v17 = vpop.f32.mrf.mxu3 }
 0x5e9   :  { %v13660_v42 = vadd.f32 %v4348_v17, %v4280_v10  ;;  %v4281_v60 = vpop.f32.mrf.mxu1  ;;  %5351 = vmatpush.bf16.msra.mxu0 %v8772_v6 }
 0x5ea   :  { %15268 = vst [vmem:[#allocation13_spill] sm:$0xff] %v13658_v5  ;;  %v4282_v56 = vadd.f32 %v4281_v60, %v15269_v34  ;;  %v15273_v34 = vld [vmem:[#allocation10_spill] sm:$0xff] }
 0x5ed   :  { %v4186_v35 = vpop.f32.mrf.mxu0 }
 0x5ee   :  { %v13670_v59 = vadd.f32 %v4186_v35, %v13510_v33  ;;  %v9595_v35 = vld [vmem:[#allocation2 + $0x2c] sm:$0xf0] }
 0x5ef   :  { %v4242_v49 = vpop.f32.mrf.mxu2 }
 0x5f0   :  { %v13673_v10 = vadd.f32 %v4242_v49, %v13533_v23  ;;  %v4350_v43 = vpop.f32.mrf.mxu3  ;;  %4441 = vmatmul.bf16.gmra.mxu0 %v13188_v24 }
 0x5f1   :  { %v13676_v9 = vadd.f32 %v4350_v43, %v4282_v56  ;;  %v4284_v19 = vpop.f32.mrf.mxu1 }
 0x5f2   :  { %15270 = vst [vmem:[#allocation24_spill] sm:$0xff] %v13673_v10  ;;  %v4285_v25 = vadd.f32 %v4284_v19, %v15271_v15  ;;  %v8429_v19 = vld [vmem:[#allocation2 + $0x30] sm:$0xf0]  ;;  %v8453_v10 = vld [vmem:[#allocation2 + $0x58] sm:$0xf0] }
 0x5f4   :  { %4323 = vmatmul.bf16.gmra.mxu1 %v13197_v39  ;;  %4500 = vmatmul.bf16.gmra.mxu2 %v13199_v61  ;;  %v8827_v39 = vld [vmem:[%s15032_s3 + $0x5a0] sm:$0xf]  ;;  %v9694_v61 = vld [vmem:[%s15032_s3 + $0x5a4] sm:$0xf0] }
 0x5f5   :  { %4392 = vmatmul.bf16.gmra.mxu3 %v13201_v51  ;;  %v4188_v33 = vpop.f32.mrf.mxu0  ;;  %v8828_v51 = vor.u32 %v9694_v61, %v8827_v39 }
 0x5f6   :  { %v13683_v17 = vadd.f32 %v4188_v33, %v13526_v50  ;;  %v8427_v33 = vld [vmem:[#allocation2 + $0x20] sm:$0xf] }
 0x5f7   :  { %v4245_v23 = vpop.f32.mrf.mxu2  ;;  %5421 = vmatpush.bf16.msrb.mxu2 %v8828_v51 }
 0x5f8   :  { %v13686_v60 = vadd.f32 %v4245_v23, %v13554_v52  ;;  %v4353_v24 = vpop.f32.mrf.mxu3  ;;  %v8763_v23 = vld [vmem:[%s15032_s3 + $0x520] sm:$0xf] }
 0x5f9   :  { %v13688_v31 = vadd.f32 %v4353_v24, %v4285_v25  ;;  %v4286_v12 = vpop.f32.mrf.mxu1  ;;  %v15275_v24 = vld [vmem:[#allocation14_spill] sm:$0xff] }
 0x5fa   :  { %15272 = vst [vmem:[#allocation15_spill] sm:$0xff] %v13686_v60  ;;  %v4287_v56 = vadd.f32 %v4286_v12, %v15273_v34  ;;  %v9593_v34 = vld [vmem:[#allocation2 + $0x24] sm:$0xf] }
 0x5fd   :  { %v4407_v50 = vpop.f32.mrf.mxu0 }
 0x5fe   :  { %v13698_v52 = vadd.f32 %v4407_v50, %v13538_v55  ;;  %v9678_v55 = vld [vmem:[%s15032_s3 + $0x524] sm:$0xf0] }
 0x5ff   :  { %v4247_v6 = vpop.f32.mrf.mxu2  ;;  %v8764_v39 = vor.u32 %v9678_v55, %v8763_v23  ;;  %v9599_v55 = vld [vmem:[#allocation2 + $0x4c] sm:$0xf0] }
 0x600   :  { %v13701_v49 = vadd.f32 %v4247_v6, %v13591_v47  ;;  %v4355_v43 = vpop.f32.mrf.mxu3  ;;  %4446 = vmatmul.bf16.gmra.mxu0 %v13224_v28  ;;  %v13713_v47 = vor.u32 %v9595_v35, %v8427_v33  ;;  %v13715_v28 = vor.u32 %v9593_v34, %v8429_v19  ;;  %v15277_v19 = vld [vmem:[#allocation16_spill] sm:$0xff] }
 0x601   :  { %v13704_v15 = vadd.f32 %v4355_v43, %v4287_v56  ;;  %v4289_v25 = vpop.f32.mrf.mxu1  ;;  %5352 = vmatpush.bf16.msra.mxu0 %v8764_v39  ;;  %v8443_v39 = vld [vmem:[#allocation2 + $0x40] sm:$0xf] }
 0x602   :  { %15274 = vst [vmem:[#allocation18_spill] sm:$0xff] %v13701_v49  ;;  %v4290_v12 = vadd.f32 %v4289_v25, %v15275_v24 }
 0x604   :  { %4505 = vmatmul.bf16.gmra.mxu2 %v13239_v26  ;;  %5217 = vmatmul.bf16.vlgmr.msra.gmra.mxu1 %v13713_v47 }
 0x605   :  { %5286 = vmatmul.bf16.vlgmr.msra.gmra.mxu3 %v13715_v28  ;;  %v4409_v56 = vpop.f32.mrf.mxu0 }
 0x606   :  { %v13721_v61 = vadd.f32 %v4409_v56, %v13566_v36  ;;  %v15279_v56 = vld [vmem:[#allocation20_spill] sm:$0xff] }
 0x607   :  { %v4250_v51 = vpop.f32.mrf.mxu2 }
 0x608   :  { %v13724_v50 = vadd.f32 %v4250_v51, %v13624_v11  ;;  %v4358_v6 = vpop.f32.mrf.mxu3  ;;  %v8445_v11 = vld [vmem:[#allocation2 + $0x50] sm:$0xf0] }
 0x609   :  { %v13726_v35 = vadd.f32 %v4358_v6, %v4290_v12  ;;  %v4291_v43 = vpop.f32.mrf.mxu1  ;;  %v13739_v6 = vor.u32 %v9599_v55, %v8443_v39 }
 0x60a   :  { %15276 = vst [vmem:[#allocation17_spill] sm:$0xff] %v13724_v50  ;;  %v4292_v25 = vadd.f32 %v4291_v43, %v15277_v19  ;;  %v9597_v43 = vld [vmem:[#allocation2 + $0x44] sm:$0xf]  ;;  %v9692_v19 = vld [vmem:[%s15032_s3 + $0x594] sm:$0xf0] }
 0x60d   :  { %v4412_v26 = vpop.f32.mrf.mxu0 }
 0x60e   :  { %v13730_v33 = vadd.f32 %v4412_v26, %v13605_v7  ;;  %v13741_v7 = vor.u32 %v9597_v43, %v8445_v11  ;;  %v9676_v11 = vld [vmem:[%s15032_s3 + $0x514] sm:$0xf0] }
 0x60f   :  { %v4252_v23 = vpop.f32.mrf.mxu2 }
 0x610   :  { %v13733_v24 = vadd.f32 %v4252_v23, %v13655_v41  ;;  %v4360_v36 = vpop.f32.mrf.mxu3  ;;  %4451 = vmatmul.bf16.gmra.mxu0 %v13256_v63  ;;  %v8819_v63 = vld [vmem:[%s15032_s3 + $0x590] sm:$0xf] }
 0x611   :  { %v13736_v34 = vadd.f32 %v4360_v36, %v4292_v25  ;;  %v4294_v12 = vpop.f32.mrf.mxu1  ;;  %v8820_v26 = vor.u32 %v9692_v19, %v8819_v63  ;;  %v8755_v36 = vld [vmem:[%s15032_s3 + $0x510] sm:$0xf] }
 0x612   :  { %15278 = vst [vmem:[#allocation23_spill] sm:$0xff] %v13733_v24  ;;  %v4295_v51 = vadd.f32 %v4294_v12, %v15279_v56  ;;  %v15281_v56 = vld [vmem:[#allocation19_spill] sm:$0xff] }
 0x613   :  { %5422 = vmatpush.bf16.msrb.mxu2 %v8820_v26 }
 0x614   :  { %4510 = vmatmul.bf16.gmra.mxu2 %v13265_v2  ;;  %5222 = vmatmul.bf16.gmra.mxu1 %v13739_v6 }
 0x615   :  { %5291 = vmatmul.bf16.gmra.mxu3 %v13741_v7  ;;  %v4414_v41 = vpop.f32.mrf.mxu0 }
 0x616   :  { %v13753_v25 = vadd.f32 %v4414_v41, %v13639_v48  ;;  %v8756_v48 = vor.u32 %v9676_v11, %v8755_v36  ;;  %v9674_v41 = vld [vmem:[%s15032_s3 + $0x504] sm:$0xf0]  ;;  %v8461_v11 = vld [vmem:[#allocation2 + $0x70] sm:$0xf0] }
 0x617   :  { %v4255_v23 = vpop.f32.mrf.mxu2 }
 0x618   :  { %v13756_v2 = vadd.f32 %v4255_v23, %v13670_v59  ;;  %v4363_v55 = vpop.f32.mrf.mxu3  ;;  %5353 = vmatpush.bf16.msra.mxu0 %v8756_v48  ;;  %v8747_v59 = vld [vmem:[%s15032_s3 + $0x500] sm:$0xf]  ;;  %v9603_v23 = vld [vmem:[#allocation2 + $0x6c] sm:$0xf0] }
 0x619   :  { %v13764_v12 = vadd.f32 %v4363_v55, %v4295_v51  ;;  %v4296_v39 = vpop.f32.mrf.mxu1  ;;  %v8748_v19 = vor.u32 %v9674_v41, %v8747_v59 }
 0x61a   :  { %15280 = vst [vmem:[#allocation25_spill] sm:$0xff] %v13756_v2  ;;  %v4297_v43 = vadd.f32 %v4296_v39, %v15281_v56  ;;  %v8459_v56 = vld [vmem:[#allocation2 + $0x60] sm:$0xf]  ;;  %v15283_v2 = vld [vmem:[#allocation29_spill] sm:$0xff] }
 0x61b   :  { %v13783_v59 = vor.u32 %v9603_v23, %v8459_v56  ;;  %v15285_v23 = vld [vmem:[#allocation31_spill] sm:$0xff] }
 0x61c   :  { %5354 = vmatpush.bf16.msra.mxu0 %v8748_v19 }
 0x61d   :  { %v4417_v63 = vpop.f32.mrf.mxu0 }
 0x61e   :  { %v13774_v26 = vadd.f32 %v4417_v63, %v13660_v42  ;;  %v9601_v42 = vld [vmem:[#allocation2 + $0x64] sm:$0xf] }
 0x61f   :  { %v4257_v51 = vpop.f32.mrf.mxu2  ;;  %v13785_v41 = vor.u32 %v9601_v42, %v8461_v11  ;;  %v9690_v11 = vld [vmem:[%s15032_s3 + $0x584] sm:$0xf0] }
 0x620   :  { %v13777_v55 = vadd.f32 %v4257_v51, %v13683_v17  ;;  %v4365_v36 = vpop.f32.mrf.mxu3  ;;  %4456 = vmatmul.bf16.gmra.mxu0 %v13300_v57 }
 0x621   :  { %v13780_v39 = vadd.f32 %v4365_v36, %v4297_v43  ;;  %v4299_v48 = vpop.f32.mrf.mxu1 }
 0x622   :  { %15282 = vst [vmem:[#allocation27_spill] sm:$0xff] %v13777_v55  ;;  %v4300_v24 = vadd.f32 %v4299_v48, %v15283_v2 }
 0x624   :  { %4515 = vmatmul.bf16.gmra.mxu2 %v13309_v3  ;;  %5227 = vmatmul.bf16.gmra.mxu1 %v13783_v59  ;;  %v8811_v3 = vld [vmem:[%s15032_s3 + $0x580] sm:$0xf] }
 0x625   :  { %5296 = vmatmul.bf16.gmra.mxu3 %v13785_v41  ;;  %v4419_v17 = vpop.f32.mrf.mxu0 }
 0x626   :  { %v13791_v57 = vadd.f32 %v4419_v17, %v13676_v9  ;;  %v8812_v9 = vor.u32 %v9690_v11, %v8811_v3 }
 0x627   :  { %v4476_v43 = vpop.f32.mrf.mxu2 }
 0x628   :  { %v4368_v63 = vpop.f32.mrf.mxu3  ;;  %v13794_v19 = vadd.f32 %v4476_v43, %v13698_v52  ;;  %5423 = vmatpush.bf16.msrb.mxu2 %v8812_v9  ;;  %v8477_v43 = vld [vmem:[#allocation2 + $0x90] sm:$0xf0]  ;;  %v9605_v9 = vld [vmem:[#allocation2 + $0x84] sm:$0xf] }
 0x629   :  { %v13796_v2 = vadd.f32 %v4368_v63, %v4300_v24  ;;  %v4301_v51 = vpop.f32.mrf.mxu1  ;;  %v9607_v24 = vld [vmem:[#allocation2 + $0x8c] sm:$0xf0] }
 0x62a   :  { %15284 = vst [vmem:[#allocation28_spill] sm:$0xff] %v13794_v19  ;;  %v4302_v36 = vadd.f32 %v4301_v51, %v15285_v23  ;;  %v8475_v23 = vld [vmem:[#allocation2 + $0x80] sm:$0xf]  ;;  %v15287_v19 = vld [vmem:[#allocation35_spill] sm:$0xff] }
 0x62b   :  { %v13815_v11 = vor.u32 %v9607_v24, %v8475_v23  ;;  %v8435_v23 = vld [vmem:[#allocation2 + $0x28] sm:$0xf] }
 0x62d   :  { %v4422_v48 = vpop.f32.mrf.mxu0 }
 0x62e   :  { %v13806_v56 = vadd.f32 %v4422_v48, %v13688_v31  ;;  %v13817_v31 = vor.u32 %v9605_v9, %v8477_v43 }
 0x62f   :  { %v4478_v52 = vpop.f32.mrf.mxu2 }
 0x630   :  { %v4370_v42 = vpop.f32.mrf.mxu3  ;;  %v13809_v17 = vadd.f32 %v4478_v52, %v13721_v61  ;;  %4461 = vmatmul.bf16.gmra.mxu0 %v13332_v58 }
 0x631   :  { %v13812_v63 = vadd.f32 %v4370_v42, %v4302_v36  ;;  %v4304_v51 = vpop.f32.mrf.mxu1  ;;  %v15289_v42 = vld [vmem:[#allocation37_spill] sm:$0xff] }
 0x632   :  { %15286 = vst [vmem:[#allocation26_spill] sm:$0xff] %v13809_v17  ;;  %v4305_v3 = vadd.f32 %v4304_v51, %v15287_v19  ;;  %v9596_v51 = vld [vmem:[#allocation2 + $0x34] sm:$0xf0] }
 0x633   :  { %v13834_v17 = vor.u32 %v9596_v51, %v8435_v23 }
 0x634   :  { %4520 = vmatmul.bf16.gmra.mxu2 %v13341_v4  ;;  %5232 = vmatmul.bf16.gmra.mxu1 %v13815_v11 }
 0x635   :  { %5301 = vmatmul.bf16.gmra.mxu3 %v13817_v31  ;;  %v4424_v61 = vpop.f32.mrf.mxu0 }
 0x636   :  { %v13823_v58 = vadd.f32 %v4424_v61, %v13704_v15  ;;  %v9611_v61 = vld [vmem:[#allocation2 + $0xac] sm:$0xf0] }
 0x637   :  { %v4481_v36 = vpop.f32.mrf.mxu2 }
 0x638   :  { %v4373_v48 = vpop.f32.mrf.mxu3  ;;  %v13826_v52 = vadd.f32 %v4481_v36, %v13730_v33  ;;  %v8493_v33 = vld [vmem:[#allocation2 + $0xb0] sm:$0xf0] }
 0x639   :  { %v13828_v19 = vadd.f32 %v4373_v48, %v4305_v3  ;;  %v4306_v24 = vpop.f32.mrf.mxu1  ;;  %v8491_v48 = vld [vmem:[#allocation2 + $0xa0] sm:$0xf] }
 0x63a   :  { %15288 = vst [vmem:[#allocation30_spill] sm:$0xff] %v13826_v52  ;;  %v4307_v43 = vadd.f32 %v4306_v24, %v15289_v42  ;;  %v8741_v24 = vld [vmem:[%s15032_s3 + $0x4f8] sm:$0xf0]  ;;  %v13849_v51 = vor.u32 %v9611_v61, %v8491_v48  ;;  %v8509_v52 = vld [vmem:[#allocation2 + $0xd0] sm:$0xf0] }
 0x63d   :  { %v4427_v4 = vpop.f32.mrf.mxu0 }
 0x63e   :  { %v13832_v9 = vadd.f32 %v4427_v4, %v13726_v35  ;;  %v9671_v35 = vld [vmem:[%s15032_s3 + $0x4f4] sm:$0xf] }
 0x63f   :  { %v4483_v15 = vpop.f32.mrf.mxu2  ;;  %v8744_v4 = vor.u32 %v9671_v35, %v8741_v24 }
 0x640   :  { %v4375_v55 = vpop.f32.mrf.mxu3  ;;  %v13837_v50 = vadd.f32 %v4483_v15, %v13753_v25  ;;  %5355 = vmatmul.bf16.vlgmr.msra.gmra.mxu0 %v13834_v17  ;;  %v9609_v25 = vld [vmem:[#allocation2 + $0xa4] sm:$0xf] }
 0x641   :  { %v13840_v3 = vadd.f32 %v4375_v55, %v4307_v43  ;;  %v4309_v36 = vpop.f32.mrf.mxu1  ;;  %v13851_v23 = vor.u32 %v9609_v25, %v8493_v33  ;;  %v9703_v43 = vld [vmem:[%s15032_s3 + $0x5f4] sm:$0xf]  ;;  %5554 = vmatpush.bf16.msrb.mxu3 %v8744_v4  ;;  %v8677_v33 = vld [vmem:[%s15032_s3 + $0x478] sm:$0xf0] }
 0x642   :  { %15290 = vst [vmem:[#allocation4_spill] sm:$0xff] %v13837_v50  ;;  %v4310_v42 = vadd.f32 %v4309_v36, %v13174_v30  ;;  %v8869_v30 = vld [vmem:[%s15032_s3 + $0x5f8] sm:$0xf0]  ;;  %v9687_v4 = vld [vmem:[%s15032_s3 + $0x574] sm:$0xf] }
 0x643   :  { %v8872_v61 = vor.u32 %v9703_v43, %v8869_v30  ;;  %v15292_v43 = vld [vmem:[#allocation38_spill] sm:$0xff] }
 0x644   :  { %4525 = vmatmul.bf16.gmra.mxu2 %v13371_v53  ;;  %5237 = vmatmul.bf16.gmra.mxu1 %v13849_v51  ;;  %v9655_v53 = vld [vmem:[%s15032_s3 + $0x474] sm:$0xf] }
 0x645   :  { %5306 = vmatmul.bf16.gmra.mxu3 %v13851_v23  ;;  %v4429_v55 = vpop.f32.mrf.mxu0  ;;  %v8680_v48 = vor.u32 %v9655_v53, %v8677_v33  ;;  %5692 = vmatpush.bf16.msra.mxu2 %v8872_v61  ;;  %v9600_v33 = vld [vmem:[#allocation2 + $0x54] sm:$0xf0] }
 0x646   :  { %v13863_v15 = vadd.f32 %v4429_v55, %v13736_v34  ;;  %v8805_v55 = vld [vmem:[%s15032_s3 + $0x578] sm:$0xf0] }
 0x647   :  { %v4486_v36 = vpop.f32.mrf.mxu2  ;;  %5485 = vmatpush.bf16.msrb.mxu1 %v8680_v48  ;;  %v8808_v53 = vor.u32 %v9687_v4, %v8805_v55  ;;  %v8507_v55 = vld [vmem:[#allocation2 + $0xc0] sm:$0xf] }
 0x648   :  { %v4378_v35 = vpop.f32.mrf.mxu3  ;;  %v13872_v24 = vadd.f32 %v4486_v36, %v13774_v26  ;;  %v8451_v36 = vld [vmem:[#allocation2 + $0x48] sm:$0xf] }
 0x649   :  { %v13874_v25 = vadd.f32 %v4378_v35, %v4310_v42  ;;  %v4311_v34 = vpop.f32.mrf.mxu1  ;;  %5623 = vmatpush.bf16.msrb.mxu0 %v8808_v53  ;;  %v13886_v61 = vor.u32 %v9600_v33, %v8451_v36  ;;  %v9615_v35 = vld [vmem:[#allocation2 + $0xcc] sm:$0xf0] }
 0x64a   :  { %15291 = vst [vmem:[#allocation32_spill] sm:$0xff] %v13872_v24  ;;  %v4312_v30 = vadd.f32 %v4311_v34, %v15292_v43  ;;  %v15294_v43 = vld [vmem:[#allocation39_spill] sm:$0xff]  ;;  %v13895_v49 = vor.u32 %v9615_v35, %v8507_v55  ;;  %v9701_v55 = vld [vmem:[%s15032_s3 + $0x5e4] sm:$0xf] }
 0x64d   :  { %v4432_v26 = vpop.f32.mrf.mxu0 }
 0x64e   :  { %v13884_v42 = vadd.f32 %v4432_v26, %v13764_v12  ;;  %v9613_v12 = vld [vmem:[#allocation2 + $0xc4] sm:$0xf] }
 0x64f   :  { %v4488_v48 = vpop.f32.mrf.mxu2  ;;  %v13897_v33 = vor.u32 %v9613_v12, %v8509_v52  ;;  %v8733_v52 = vld [vmem:[%s15032_s3 + $0x4e8] sm:$0xf0] }
 0x650   :  { %v4380_v24 = vpop.f32.mrf.mxu3  ;;  %v13889_v50 = vadd.f32 %v4488_v48, %v13791_v57  ;;  %5360 = vmatmul.bf16.gmra.mxu0 %v13886_v61 }
 0x651   :  { %v13892_v34 = vadd.f32 %v4380_v24, %v4312_v30  ;;  %v4314_v4 = vpop.f32.mrf.mxu1 }
 0x652   :  { %15293 = vst [vmem:[#allocation33_spill] sm:$0xff] %v13889_v50  ;;  %v4315_v53 = vadd.f32 %v4314_v4, %v15294_v43  ;;  %v9604_v43 = vld [vmem:[#allocation2 + $0x74] sm:$0xf0]  ;;  %v9685_v50 = vld [vmem:[%s15032_s3 + $0x564] sm:$0xf] }
 0x654   :  { %4530 = vmatmul.bf16.gmra.mxu2 %v13413_v29  ;;  %5242 = vmatmul.bf16.gmra.mxu1 %v13895_v49  ;;  %v9669_v29 = vld [vmem:[%s15032_s3 + $0x4e4] sm:$0xf] }
 0x655   :  { %5311 = vmatmul.bf16.gmra.mxu3 %v13897_v33  ;;  %v4434_v57 = vpop.f32.mrf.mxu0 }
 0x656   :  { %v13903_v26 = vadd.f32 %v4434_v57, %v13780_v39  ;;  %v8736_v39 = vor.u32 %v9669_v29, %v8733_v52  ;;  %v8467_v57 = vld [vmem:[#allocation2 + $0x68] sm:$0xf]  ;;  %v9619_v52 = vld [vmem:[#allocation2 + $0xec] sm:$0xf0] }
 0x657   :  { %v4491_v24 = vpop.f32.mrf.mxu2 }
 0x658   :  { %v4383_v30 = vpop.f32.mrf.mxu3  ;;  %v13906_v36 = vadd.f32 %v4491_v24, %v13806_v56  ;;  %v8861_v56 = vld [vmem:[%s15032_s3 + $0x5e8] sm:$0xf0]  ;;  %5555 = vmatpush.bf16.msrb.mxu3 %v8736_v39 }
 0x659   :  { %v13908_v48 = vadd.f32 %v4383_v30, %v4315_v53  ;;  %v4316_v35 = vpop.f32.mrf.mxu1  ;;  %v8864_v53 = vor.u32 %v9701_v55, %v8861_v56  ;;  %v13926_v30 = vor.u32 %v9604_v43, %v8467_v57  ;;  %v8437_v55 = vld [vmem:[#allocation2 + $0x38] sm:$0xf0]  ;;  %v8525_v43 = vld [vmem:[#allocation2 + $0xf0] sm:$0xf0] }
 0x65a   :  { %15295 = vst [vmem:[#allocation34_spill] sm:$0xff] %v13906_v36  ;;  %v4317_v4 = vadd.f32 %v4316_v35, %v13227_v20  ;;  %v9653_v20 = vld [vmem:[%s15032_s3 + $0x464] sm:$0xf]  ;;  %v8669_v35 = vld [vmem:[%s15032_s3 + $0x468] sm:$0xf0] }
 0x65b   :  { %5693 = vmatpush.bf16.msra.mxu2 %v8864_v53  ;;  %v8672_v39 = vor.u32 %v9653_v20, %v8669_v35  ;;  %v9594_v36 = vld [vmem:[#allocation2 + $0x2c] sm:$0xf] }
 0x65c   :  { %v8797_v20 = vld [vmem:[%s15032_s3 + $0x568] sm:$0xf0] }
 0x65d   :  { %v4437_v12 = vpop.f32.mrf.mxu0  ;;  %5486 = vmatpush.bf16.msrb.mxu1 %v8672_v39 }
 0x65e   :  { %v13924_v24 = vadd.f32 %v4437_v12, %v13796_v2  ;;  %v8523_v2 = vld [vmem:[#allocation2 + $0xe0] sm:$0xf] }
 0x65f   :  { %v4493_v29 = vpop.f32.mrf.mxu2  ;;  %v13947_v35 = vor.u32 %v9619_v52, %v8523_v2 }
 0x660   :  { %v4385_v56 = vpop.f32.mrf.mxu3  ;;  %v13935_v53 = vadd.f32 %v4493_v29, %v13823_v58  ;;  %5365 = vmatmul.bf16.gmra.mxu0 %v13926_v30  ;;  %v9617_v29 = vld [vmem:[#allocation2 + $0xe4] sm:$0xf] }
 0x661   :  { %v13938_v12 = vadd.f32 %v4385_v56, %v4317_v4  ;;  %v4319_v57 = vpop.f32.mrf.mxu1  ;;  %v8800_v4 = vor.u32 %v9685_v50, %v8797_v20  ;;  %v13951_v56 = vor.u32 %v9617_v29, %v8525_v43  ;;  %v9608_v43 = vld [vmem:[#allocation2 + $0x94] sm:$0xf0]  ;;  %v8483_v20 = vld [vmem:[#allocation2 + $0x88] sm:$0xf] }
 0x662   :  { %15296 = vst [vmem:[#allocation8_spill] sm:$0xff] %v13935_v53  ;;  %v4320_v58 = vadd.f32 %v4319_v57, %v13248_v54  ;;  %v13949_v53 = vor.u32 %v9594_v36, %v8437_v55 }
 0x663   :  { %5624 = vmatpush.bf16.msrb.mxu0 %v8800_v4  ;;  %v13968_v4 = vor.u32 %v9608_v43, %v8483_v20  ;;  %v8725_v43 = vld [vmem:[%s15032_s3 + $0x4d8] sm:$0xf0] }
 0x664   :  { %5247 = vmatmul.bf16.gmra.mxu1 %v13947_v35  ;;  %5424 = vmatmul.bf16.vlgmr.msrb.gmra.mxu2 %v13949_v53 }
 0x665   :  { %5316 = vmatmul.bf16.gmra.mxu3 %v13951_v56  ;;  %v4439_v39 = vpop.f32.mrf.mxu0 }
 0x666   :  { %v13957_v60 = vadd.f32 %v4439_v39, %v13812_v63  ;;  %v9623_v39 = vld [vmem:[#allocation2 + $0x10c] sm:$0xf0] }
 0x667   :  { %v4496_v54 = vpop.f32.mrf.mxu2 }
 0x668   :  { %v4388_v52 = vpop.f32.mrf.mxu3  ;;  %v13960_v2 = vadd.f32 %v4496_v54, %v13832_v9  ;;  %v8541_v54 = vld [vmem:[#allocation2 + $0x110] sm:$0xf0] }
 0x669   :  { %v13962_v36 = vadd.f32 %v4388_v52, %v4320_v58  ;;  %v4321_v50 = vpop.f32.mrf.mxu1  ;;  %v8539_v58 = vld [vmem:[#allocation2 + $0x100] sm:$0xf] }
 0x66a   :  { %15297 = vst [vmem:[#allocation36_spill] sm:$0xff] %v13960_v2  ;;  %v4322_v55 = vadd.f32 %v4321_v50, %v13259_v22  ;;  %v9598_v50 = vld [vmem:[#allocation2 + $0x4c] sm:$0xf] }
 0x66d   :  { %v4442_v57 = vpop.f32.mrf.mxu0 }
 0x66e   :  { %v13966_v29 = vadd.f32 %v4442_v57, %v13828_v19  ;;  %v9667_v19 = vld [vmem:[%s15032_s3 + $0x4d4] sm:$0xf] }
 0x66f   :  { %v4498_v63 = vpop.f32.mrf.mxu2  ;;  %v15299_v57 = vld [vmem:[#allocation40_spill] sm:$0xff]  ;;  %v8728_v2 = vor.u32 %v9667_v19, %v8725_v43 }
 0x670   :  { %v4390_v5 = vpop.f32.mrf.mxu3  ;;  %v13971_v9 = vadd.f32 %v4498_v63, %v13863_v15  ;;  %5370 = vmatmul.bf16.gmra.mxu0 %v13968_v4  ;;  %v13983_v15 = vor.u32 %v9623_v39, %v8539_v58  ;;  %v9621_v63 = vld [vmem:[#allocation2 + $0x104] sm:$0xf]  ;;  %v8853_v39 = vld [vmem:[%s15032_s3 + $0x5d8] sm:$0xf0] }
 0x671   :  { %v13974_v22 = vadd.f32 %v4390_v5, %v4322_v55  ;;  %v4324_v52 = vpop.f32.mrf.mxu1  ;;  %v13987_v5 = vor.u32 %v9621_v63, %v8541_v54  ;;  %5556 = vmatpush.bf16.msrb.mxu3 %v8728_v2  ;;  %v8856_v58 = vor.u32 %v9699_v0, %v8853_v39  ;;  %v9651_v54 = vld [vmem:[%s15032_s3 + $0x454] sm:$0xf]  ;;  %v8789_v2 = vld [vmem:[%s15032_s3 + $0x558] sm:$0xf0] }
 0x672   :  { %15298 = vst [vmem:[#allocation7_spill] sm:$0xff] %v13971_v9  ;;  %v4325_v20 = vadd.f32 %v4324_v52, %v15299_v57  ;;  %v13985_v9 = vor.u32 %v9598_v50, %v8453_v10  ;;  %v8661_v52 = vld [vmem:[%s15032_s3 + $0x458] sm:$0xf0]  ;;  %v9683_v0 = vld [vmem:[%s15032_s3 + $0x554] sm:$0xf] }
 0x673   :  { %v8664_v19 = vor.u32 %v9651_v54, %v8661_v52  ;;  %5694 = vmatpush.bf16.msra.mxu2 %v8856_v58  ;;  %v8792_v39 = vor.u32 %v9683_v0, %v8789_v2  ;;  %v9612_v54 = vld [vmem:[#allocation2 + $0xb4] sm:$0xf0]  ;;  %v8499_v52 = vld [vmem:[#allocation2 + $0xa8] sm:$0xf]  ;;  %v8555_v2 = vld [vmem:[#allocation2 + $0x120] sm:$0xf] }
 0x674   :  { %5252 = vmatmul.bf16.gmra.mxu1 %v13983_v15  ;;  %5429 = vmatmul.bf16.gmra.mxu2 %v13985_v9  ;;  %v14022_v58 = vor.u32 %v9612_v54, %v8499_v52 }
 0x675   :  { %5321 = vmatmul.bf16.gmra.mxu3 %v13987_v5  ;;  %v4444_v55 = vpop.f32.mrf.mxu0  ;;  %5487 = vmatpush.bf16.msrb.mxu1 %v8664_v19  ;;  %v9627_v19 = vld [vmem:[#allocation2 + $0x12c] sm:$0xf0] }
 0x676   :  { %v13999_v10 = vadd.f32 %v4444_v55, %v13840_v3  ;;  %5625 = vmatpush.bf16.msrb.mxu0 %v8792_v39  ;;  %v9602_v39 = vld [vmem:[#allocation2 + $0x6c] sm:$0xf]  ;;  %v14030_v62 = vor.u32 %v9627_v19, %v8555_v2 }
 0x677   :  { %v4501_v50 = vpop.f32.mrf.mxu2  ;;  %v8717_v2 = vld [vmem:[%s15032_s3 + $0x4c8] sm:$0xf0] }
 0x678   :  { %v4393_v43 = vpop.f32.mrf.mxu3  ;;  %v14008_v57 = vadd.f32 %v4501_v50, %v13884_v42  ;;  %15302 = vst [vmem:[#allocation10_spill] sm:$0xff] %v14030_v62 }
 0x679   :  { %v14010_v63 = vadd.f32 %v4393_v43, %v4325_v20  ;;  %v4326_v3 = vpop.f32.mrf.mxu1  ;;  %v8469_v43 = vld [vmem:[#allocation2 + $0x78] sm:$0xf0] }
 0x67a   :  { %15300 = vst [vmem:[#allocation5_spill] sm:$0xff] %v14008_v57  ;;  %v4327_v55 = vadd.f32 %v4326_v3, %v13303_v46  ;;  %v8557_v46 = vld [vmem:[#allocation2 + $0x130] sm:$0xf0]  ;;  %v14032_v54 = vor.u32 %v9602_v39, %v8469_v43 }
 0x67c   :  { %15303 = vst [vmem:[#allocation14_spill] sm:$0xff] %v14032_v54 }
 0x67d   :  { %v4447_v42 = vpop.f32.mrf.mxu0 }
 0x67e   :  { %v14020_v20 = vadd.f32 %v4447_v42, %v13874_v25  ;;  %v9625_v25 = vld [vmem:[#allocation2 + $0x124] sm:$0xf] }
 0x67f   :  { %v4503_v50 = vpop.f32.mrf.mxu2  ;;  %v14034_v42 = vor.u32 %v9625_v25, %v8557_v46  ;;  %v9665_v46 = vld [vmem:[%s15032_s3 + $0x4c4] sm:$0xf] }
 0x680   :  { %v4395_v57 = vpop.f32.mrf.mxu3  ;;  %v14025_v13 = vadd.f32 %v4503_v50, %v13903_v26  ;;  %5375 = vmatmul.bf16.gmra.mxu0 %v14022_v58  ;;  %v8720_v39 = vor.u32 %v9665_v46, %v8717_v2  ;;  %v8653_v46 = vld [vmem:[%s15032_s3 + $0x448] sm:$0xf0] }
 0x681   :  { %v14028_v3 = vadd.f32 %v4395_v57, %v4327_v55  ;;  %v5218_v0 = vpop.f32.mrf.mxu1  ;;  %15304 = vst [vmem:[#allocation16_spill] sm:$0xff] %v14034_v42 }
 0x682   :  { %15301 = vst [vmem:[#allocation6_spill] sm:$0xff] %v14025_v13  ;;  %5557 = vmatpush.bf16.msrb.mxu3 %v8720_v39  ;;  %v9649_v13 = vld [vmem:[%s15032_s3 + $0x444] sm:$0xf] }
 0x683   :  { %v8656_v39 = vor.u32 %v9649_v13, %v8653_v46  ;;  %v8781_v13 = vld [vmem:[%s15032_s3 + $0x548] sm:$0xf0]  ;;  %v9629_v46 = vld [vmem:[#allocation2 + $0x144] sm:$0xf] }
 0x684   :  { %5257 = vmatmul.bf16.gmra.mxu1 %v14030_v62  ;;  %5434 = vmatmul.bf16.gmra.mxu2 %v14032_v54  ;;  %v9681_v54 = vld [vmem:[%s15032_s3 + $0x544] sm:$0xf] }
 0x685   :  { %5326 = vmatmul.bf16.gmra.mxu3 %v14034_v42  ;;  %v4449_v26 = vpop.f32.mrf.mxu0  ;;  %v9606_v42 = vld [vmem:[#allocation2 + $0x8c] sm:$0xf]  ;;  %5488 = vmatpush.bf16.msrb.mxu1 %v8656_v39  ;;  %v9647_v39 = vld [vmem:[%s15032_s3 + $0x434] sm:$0xf] }
 0x686   :  { %v14040_v57 = vadd.f32 %v4449_v26, %v13892_v34  ;;  %v9697_v34 = vld [vmem:[%s15032_s3 + $0x5c4] sm:$0xf] }
 0x687   :  { %v4506_v55 = vpop.f32.mrf.mxu2 }
 0x688   :  { %v14043_v52 = vadd.f32 %v4506_v55, %v13924_v24  ;;  %v5287_v50 = vpop.f32.mrf.mxu3  ;;  %v8845_v24 = vld [vmem:[%s15032_s3 + $0x5c8] sm:$0xf0]  ;;  %v8515_v55 = vld [vmem:[#allocation2 + $0xc8] sm:$0xf] }
 0x689   :  { %v14045_v19 = vadd.f32 %v5287_v50, %v5218_v0  ;;  %v5220_v43 = vpop.f32.mrf.mxu1  ;;  %v9616_v0 = vld [vmem:[#allocation2 + $0xd4] sm:$0xf0]  ;;  %v8848_v25 = vor.u32 %v9697_v34, %v8845_v24  ;;  %v8485_v34 = vld [vmem:[#allocation2 + $0x98] sm:$0xf0] }
 0x68a   :  { %15305 = vst [vmem:[#allocation20_spill] sm:$0xff] %v14043_v52  ;;  %v14062_v52 = vor.u32 %v9616_v0, %v8515_v55  ;;  %v8573_v0 = vld [vmem:[#allocation2 + $0x150] sm:$0xf0] }
 0x68b   :  { %5695 = vmatpush.bf16.msra.mxu2 %v8848_v25 }
 0x68c   :  { %15306 = vst [vmem:[#allocation19_spill] sm:$0xff] %v14062_v52 }
 0x68d   :  { %v4452_v26 = vpop.f32.mrf.mxu0 }
 0x68e   :  { %v14060_v50 = vadd.f32 %v4452_v26, %v13908_v48  ;;  %v8571_v48 = vld [vmem:[#allocation2 + $0x140] sm:$0xf] }
 0x68f   :  { %v4508_v2 = vpop.f32.mrf.mxu2 }
 0x690   :  { %v14071_v24 = vadd.f32 %v4508_v2, %v13957_v60  ;;  %v5289_v25 = vpop.f32.mrf.mxu3  ;;  %5380 = vmatmul.bf16.gmra.mxu0 %v14062_v52  ;;  %v14082_v60 = vor.u32 %v9631_v18, %v8571_v48  ;;  %v14084_v2 = vor.u32 %v9606_v42, %v8485_v34  ;;  %v14086_v52 = vor.u32 %v9629_v46, %v8573_v0  ;;  %v8645_v18 = vld [vmem:[%s15032_s3 + $0x438] sm:$0xf0] }
 0x691   :  { %v14074_v26 = vadd.f32 %v5289_v25, %v5220_v43  ;;  %v5223_v55 = vpop.f32.mrf.mxu1  ;;  %v8648_v34 = vor.u32 %v9647_v39, %v8645_v18  ;;  %v9661_v39 = vld [vmem:[%s15032_s3 + $0x4a4] sm:$0xf]  ;;  %v9620_v18 = vld [vmem:[#allocation2 + $0xf4] sm:$0xf0] }
 0x692   :  { %15307 = vst [vmem:[#allocation29_spill] sm:$0xff] %v14071_v24  ;;  %v8784_v24 = vor.u32 %v9681_v54, %v8781_v13  ;;  %v9663_v54 = vld [vmem:[%s15032_s3 + $0x4b4] sm:$0xf] }
 0x693   :  { %15308 = vst [vmem:[#allocation31_spill] sm:$0xff] %v14082_v60  ;;  %5489 = vmatpush.bf16.msrb.mxu1 %v8648_v34  ;;  %v8531_v34 = vld [vmem:[#allocation2 + $0xe8] sm:$0xf] }
 0x694   :  { %15309 = vst [vmem:[#allocation35_spill] sm:$0xff] %v14084_v2  ;;  %5262 = vmatmul.bf16.gmra.mxu1 %v14082_v60  ;;  %5439 = vmatmul.bf16.gmra.mxu2 %v14084_v2 }
 0x695   :  { %15310 = vst [vmem:[#allocation37_spill] sm:$0xff] %v14086_v52  ;;  %5331 = vmatmul.bf16.gmra.mxu3 %v14086_v52  ;;  %v4454_v43 = vpop.f32.mrf.mxu0  ;;  %5626 = vmatpush.bf16.msrb.mxu0 %v8784_v24  ;;  %v8709_v24 = vld [vmem:[%s15032_s3 + $0x4b8] sm:$0xf0] }
 0x696   :  { %v14101_v42 = vadd.f32 %v4454_v43, %v13938_v12  ;;  %v8712_v48 = vor.u32 %v9663_v54, %v8709_v24  ;;  %v9645_v12 = vld [vmem:[%s15032_s3 + $0x424] sm:$0xf]  ;;  %v8637_v43 = vld [vmem:[%s15032_s3 + $0x428] sm:$0xf0] }
 0x697   :  { %v4511_v25 = vpop.f32.mrf.mxu2 }
 0x698   :  { %v14107_v0 = vadd.f32 %v4511_v25, %v13966_v29  ;;  %v5292_v13 = vpop.f32.mrf.mxu3  ;;  %5558 = vmatpush.bf16.msrb.mxu3 %v8712_v48  ;;  %v8640_v29 = vor.u32 %v9645_v12, %v8637_v43  ;;  %v9643_v25 = vld [vmem:[%s15032_s3 + $0x414] sm:$0xf]  ;;  %v8629_v48 = vld [vmem:[%s15032_s3 + $0x418] sm:$0xf0]  ;;  %v14135_v43 = vor.u32 %v9620_v18, %v8531_v34 }
 0x699   :  { %v14109_v46 = vadd.f32 %v5292_v13, %v5223_v55  ;;  %v5225_v52 = vpop.f32.mrf.mxu1  ;;  %v8701_v55 = vld [vmem:[%s15032_s3 + $0x4a8] sm:$0xf0]  ;;  %v9659_v13 = vld [vmem:[%s15032_s3 + $0x494] sm:$0xf] }
 0x69a   :  { %15311 = vst [vmem:[#allocation38_spill] sm:$0xff] %v14107_v0  ;;  %v8704_v54 = vor.u32 %v9661_v39, %v8701_v55  ;;  %5490 = vmatpush.bf16.msrb.mxu1 %v8640_v29  ;;  %v8632_v39 = vor.u32 %v9643_v25, %v8629_v48  ;;  %v8693_v29 = vld [vmem:[%s15032_s3 + $0x498] sm:$0xf0]  ;;  %v9641_v25 = vld [vmem:[%s15032_s3 + $0x404] sm:$0xf] }
 0x69b   :  { %v8501_v0 = vld [vmem:[#allocation2 + $0xb8] sm:$0xf0]  ;;  %v8696_v2 = vor.u32 %v9659_v13, %v8693_v29  ;;  %v9657_v48 = vld [vmem:[%s15032_s3 + $0x484] sm:$0xf] }
 0x69c   :  { %5559 = vmatpush.bf16.msrb.mxu3 %v8704_v54  ;;  %v9635_v54 = vld [vmem:[#allocation2 + $0x16c] sm:$0xf0]  ;;  %v9633_v29 = vld [vmem:[#allocation2 + $0x164] sm:$0xf] }
 0x69d   :  { %v4457_v24 = vpop.f32.mrf.mxu0  ;;  %v14155_v13 = vor.u32 %v9635_v54, %v8587_v37  ;;  %v9695_v37 = vld [vmem:[%s15032_s3 + $0x5b4] sm:$0xf] }
 0x69e   :  { %v14133_v12 = vadd.f32 %v4457_v24, %v13962_v36  ;;  %v8589_v36 = vld [vmem:[#allocation2 + $0x170] sm:$0xf0]  ;;  %v9610_v24 = vld [vmem:[#allocation2 + $0xac] sm:$0xf]  ;;  %5491 = vmatpush.bf16.msrb.mxu1 %v8632_v39 }
 0x69f   :  { %v4513_v55 = vpop.f32.mrf.mxu2  ;;  %15313 = vst [vmem:[#allocation40_spill] sm:$0xff] %v14155_v13  ;;  %v14157_v39 = vor.u32 %v9610_v24, %v8501_v0  ;;  %v8837_v0 = vld [vmem:[%s15032_s3 + $0x5b8] sm:$0xf0] }
 0x6a0   :  { %v14141_v60 = vadd.f32 %v4513_v55, %v13999_v10  ;;  %v5294_v62 = vpop.f32.mrf.mxu3  ;;  %5385 = vmatmul.bf16.gmra.mxu0 %v14135_v43  ;;  %5560 = vmatpush.bf16.msrb.mxu3 %v8696_v2  ;;  %v8621_v10 = vld [vmem:[%s15032_s3 + $0x408] sm:$0xf0]  ;;  %v14162_v2 = vor.u32 %v9633_v29, %v8589_v36  ;;  %v8840_v36 = vor.u32 %v9695_v37, %v8837_v0  ;;  %v8547_v37 = vld [vmem:[#allocation2 + $0x108] sm:$0xf] }
 0x6a1   :  { %v14144_v18 = vadd.f32 %v5294_v62, %v5225_v52  ;;  %v5228_v34 = vpop.f32.mrf.mxu1  ;;  %15314 = vst [vmem:[#allocation41_spill] sm:$0xff] %v14157_v39  ;;  %v8624_v62 = vor.u32 %v9641_v25, %v8621_v10  ;;  %v8685_v52 = vld [vmem:[%s15032_s3 + $0x488] sm:$0xf0] }
 0x6a2   :  { %15312 = vst [vmem:[#allocation39_spill] sm:$0xff] %v14141_v60  ;;  %v8688_v55 = vor.u32 %v9657_v48, %v8685_v52  ;;  %5696 = vmatpush.bf16.msra.mxu2 %v8840_v36  ;;  %v9624_v52 = vld [vmem:[#allocation2 + $0x114] sm:$0xf0]  ;;  %v9639_v36 = vld [vmem:[#allocation2 + $0x18c] sm:$0xf0] }
 0x6a3   :  { %15315 = vst [vmem:[#allocation42_spill] sm:$0xff] %v14162_v2  ;;  %5492 = vmatpush.bf16.msrb.mxu1 %v8624_v62  ;;  %v9679_v62 = vld [vmem:[%s15032_s3 + $0x534] sm:$0xf]  ;;  %v14190_v0 = vor.u32 %v9624_v52, %v8547_v37 }
 0x6a4   :  { %5267 = vmatmul.bf16.gmra.mxu1 %v14155_v13  ;;  %5444 = vmatmul.bf16.gmra.mxu2 %v14157_v39  ;;  %v9614_v39 = vld [vmem:[#allocation2 + $0xcc] sm:$0xf] }
 0x6a5   :  { %5336 = vmatmul.bf16.gmra.mxu3 %v14162_v2  ;;  %v4459_v60 = vpop.f32.mrf.mxu0  ;;  %v8605_v2 = vld [vmem:[#allocation2 + $0x190] sm:$0xf0] }
 0x6a6   :  { %v14174_v54 = vadd.f32 %v4459_v60, %v13974_v22  ;;  %5561 = vmatpush.bf16.msrb.mxu3 %v8688_v55  ;;  %v8773_v22 = vld [vmem:[%s15032_s3 + $0x538] sm:$0xf0] }
 0x6a7   :  { %v4516_v24 = vpop.f32.mrf.mxu2  ;;  %v8776_v60 = vor.u32 %v9679_v62, %v8773_v22 }
 0x6a8   :  { %v14177_v25 = vadd.f32 %v4516_v24, %v14020_v20  ;;  %v5297_v10 = vpop.f32.mrf.mxu3  ;;  %v8517_v24 = vld [vmem:[#allocation2 + $0xd8] sm:$0xf0] }
 0x6a9   :  { %v14179_v48 = vadd.f32 %v5297_v10, %v5228_v34  ;;  %v5230_v29 = vpop.f32.mrf.mxu1  ;;  %5627 = vmatpush.bf16.msrb.mxu0 %v8776_v60  ;;  %v8603_v60 = vld [vmem:[#allocation2 + $0x180] sm:$0xf]  ;;  %v14200_v52 = vor.u32 %v9614_v39, %v8517_v24  ;;  %v8829_v24 = vld [vmem:[%s15032_s3 + $0x5a8] sm:$0xf0] }
 0x6aa   :  { %15316 = vst [vmem:[#allocation43_spill] sm:$0xff] %v14177_v25  ;;  %v14198_v13 = vor.u32 %v9639_v36, %v8603_v60 }
 0x6ad   :  { %v4462_v55 = vpop.f32.mrf.mxu0 }
 0x6ae   :  { %v14188_v20 = vadd.f32 %v4462_v55, %v14010_v63  ;;  %v9637_v63 = vld [vmem:[#allocation2 + $0x184] sm:$0xf] }
 0x6af   :  { %v4518_v34 = vpop.f32.mrf.mxu2  ;;  %v14202_v55 = vor.u32 %v9637_v63, %v8605_v2  ;;  %v9693_v2 = vld [vmem:[%s15032_s3 + $0x5a4] sm:$0xf]  ;;  %v9628_v63 = vld [vmem:[#allocation2 + $0x134] sm:$0xf0] }
 0x6b0   :  { %v14193_v10 = vadd.f32 %v4518_v34, %v14040_v57  ;;  %v5299_v25 = vpop.f32.mrf.mxu3  ;;  %5390 = vmatmul.bf16.gmra.mxu0 %v14190_v0  ;;  %v8832_v60 = vor.u32 %v9693_v2, %v8829_v24  ;;  %v9618_v24 = vld [vmem:[#allocation2 + $0xec] sm:$0xf] }
 0x6b1   :  { %v14196_v62 = vadd.f32 %v5299_v25, %v5230_v29  ;;  %v5233_v22 = vpop.f32.mrf.mxu1  ;;  %15318 = vst [vmem:[#allocation45_spill] sm:$0xff] %v14202_v55 }
 0x6b2   :  { %15317 = vst [vmem:[#allocation44_spill] sm:$0xff] %v14193_v10  ;;  %5697 = vmatpush.bf16.msra.mxu2 %v8832_v60  ;;  %v9677_v60 = vld [vmem:[%s15032_s3 + $0x524] sm:$0xf] }
 0x6b4   :  { %5272 = vmatmul.bf16.gmra.mxu1 %v14198_v13  ;;  %5449 = vmatmul.bf16.gmra.mxu2 %v14200_v52 }
 0x6b5   :  { %5341 = vmatmul.bf16.gmra.mxu3 %v14202_v55  ;;  %v4464_v57 = vpop.f32.mrf.mxu0 }
 0x6b6   :  { %v14208_v25 = vadd.f32 %v4464_v57, %v14028_v3  ;;  %v8563_v57 = vld [vmem:[#allocation2 + $0x128] sm:$0xf] }
 0x6b7   :  { %v4521_v29 = vpop.f32.mrf.mxu2 }
 0x6b8   :  { %v14211_v37 = vadd.f32 %v4521_v29, %v14060_v50  ;;  %v5302_v34 = vpop.f32.mrf.mxu3  ;;  %v14224_v29 = vor.u32 %v9628_v63, %v8563_v57 }
 0x6b9   :  { %v14213_v36 = vadd.f32 %v5302_v34, %v5233_v22  ;;  %v5235_v39 = vpop.f32.mrf.mxu1  ;;  %v8533_v34 = vld [vmem:[#allocation2 + $0xf8] sm:$0xf0] }
 0x6ba   :  { %15319 = vst [vmem:[#allocation46_spill] sm:$0xff] %v14211_v37  ;;  %v14238_v63 = vor.u32 %v9618_v24, %v8533_v34  ;;  %v9632_v24 = vld [vmem:[#allocation2 + $0x154] sm:$0xf0] }
 0x6bc   :  { %15321 = vst [vmem:[#allocation48_spill] sm:$0xff] %v14238_v63 }
 0x6bd   :  { %v5356_v3 = vpop.f32.mrf.mxu0 }
 0x6be   :  { %v14222_v50 = vadd.f32 %v5356_v3, %v14045_v19  ;;  %v8765_v19 = vld [vmem:[%s15032_s3 + $0x528] sm:$0xf0] }
 0x6bf   :  { %v4523_v22 = vpop.f32.mrf.mxu2  ;;  %v8768_v3 = vor.u32 %v9677_v60, %v8765_v19  ;;  %v8579_v19 = vld [vmem:[#allocation2 + $0x148] sm:$0xf] }
 0x6c0   :  { %v14227_v37 = vadd.f32 %v4523_v22, %v14101_v42  ;;  %v5304_v10 = vpop.f32.mrf.mxu3  ;;  %5395 = vmatmul.bf16.gmra.mxu0 %v14224_v29 }
 0x6c1   :  { %v14230_v55 = vadd.f32 %v5304_v10, %v5235_v39  ;;  %v5238_v2 = vpop.f32.mrf.mxu1  ;;  %5628 = vmatpush.bf16.msrb.mxu0 %v8768_v3 }
 0x6c2   :  { %15320 = vst [vmem:[#allocation47_spill] sm:$0xff] %v14227_v37 }
 0x6c4   :  { %5454 = vmatmul.bf16.gmra.mxu2 %v14238_v63  ;;  %5493 = vmatmul.bf16.vlgmr.msrb.gmra.mxu1 %v13713_v47  ;;  %v8549_v63 = vld [vmem:[#allocation2 + $0x118] sm:$0xf0] }
 0x6c5   :  { %5562 = vmatmul.bf16.vlgmr.msrb.gmra.mxu3 %v13715_v28  ;;  %v5358_v42 = vpop.f32.mrf.mxu0  ;;  %v14254_v28 = vor.u32 %v9632_v24, %v8579_v19 }
 0x6c6   :  { %v14244_v10 = vadd.f32 %v5358_v42, %v14074_v26 }
 0x6c7   :  { %v4526_v39 = vpop.f32.mrf.mxu2  ;;  %15323 = vst [vmem:[#allocation50_spill] sm:$0xff] %v14254_v28 }
 0x6c8   :  { %v14247_v57 = vadd.f32 %v4526_v39, %v14133_v12  ;;  %v5307_v22 = vpop.f32.mrf.mxu3  ;;  %v9622_v39 = vld [vmem:[#allocation2 + $0x10c] sm:$0xf] }
 0x6c9   :  { %v14249_v37 = vadd.f32 %v5307_v22, %v5238_v2  ;;  %v5240_v34 = vpop.f32.mrf.mxu1  ;;  %v14262_v22 = vor.u32 %v9622_v39, %v8549_v63 }
 0x6ca   :  { %15322 = vst [vmem:[#allocation49_spill] sm:$0xff] %v14247_v57 }
 0x6cb   :  { %15325 = vst [vmem:[#allocation52_spill] sm:$0xff] %v14262_v22 }
 0x6cd   :  { %v5361_v60 = vpop.f32.mrf.mxu0 }
 0x6ce   :  { %v14252_v47 = vadd.f32 %v5361_v60, %v14109_v46 }
 0x6cf   :  { %v4528_v3 = vpop.f32.mrf.mxu2 }
 0x6d0   :  { %v14257_v26 = vadd.f32 %v4528_v3, %v14174_v54  ;;  %v5309_v42 = vpop.f32.mrf.mxu3  ;;  %5400 = vmatmul.bf16.gmra.mxu0 %v14254_v28  ;;  %v9691_v54 = vld [vmem:[%s15032_s3 + $0x594] sm:$0xf] }
 0x6d1   :  { %v14260_v12 = vadd.f32 %v5309_v42, %v5240_v34  ;;  %v5243_v2 = vpop.f32.mrf.mxu1  ;;  %v8821_v34 = vld [vmem:[%s15032_s3 + $0x598] sm:$0xf0] }
 0x6d2   :  { %15324 = vst [vmem:[#allocation51_spill] sm:$0xff] %v14257_v26  ;;  %v8824_v60 = vor.u32 %v9691_v54, %v8821_v34  ;;  %v8757_v42 = vld [vmem:[%s15032_s3 + $0x518] sm:$0xf0]  ;;  %v8595_v34 = vld [vmem:[#allocation2 + $0x168] sm:$0xf] }
 0x6d4   :  { %5459 = vmatmul.bf16.gmra.mxu2 %v14262_v22  ;;  %5498 = vmatmul.bf16.gmra.mxu1 %v13739_v6  ;;  %v9626_v22 = vld [vmem:[#allocation2 + $0x12c] sm:$0xf] }
 0x6d5   :  { %5567 = vmatmul.bf16.gmra.mxu3 %v13741_v7  ;;  %v5363_v46 = vpop.f32.mrf.mxu0  ;;  %5698 = vmatpush.bf16.msra.mxu2 %v8824_v60 }
 0x6d6   :  { %v14268_v24 = vadd.f32 %v5363_v46, %v14144_v18  ;;  %v9675_v18 = vld [vmem:[%s15032_s3 + $0x514] sm:$0xf]  ;;  %v9636_v46 = vld [vmem:[#allocation2 + $0x174] sm:$0xf0] }
 0x6d7   :  { %v4531_v63 = vpop.f32.mrf.mxu2  ;;  %v8760_v39 = vor.u32 %v9675_v18, %v8757_v42  ;;  %v14296_v60 = vor.u32 %v9636_v46, %v8595_v34  ;;  %v8565_v18 = vld [vmem:[#allocation2 + $0x138] sm:$0xf0] }
 0x6d8   :  { %v14277_v19 = vadd.f32 %v4531_v63, %v14188_v20  ;;  %v5312_v6 = vpop.f32.mrf.mxu3  ;;  %v9673_v20 = vld [vmem:[%s15032_s3 + $0x504] sm:$0xf]  ;;  %v14304_v28 = vor.u32 %v9626_v22, %v8565_v18  ;;  %v8581_v18 = vld [vmem:[#allocation2 + $0x158] sm:$0xf0] }
 0x6d9   :  { %v14279_v3 = vadd.f32 %v5312_v6, %v5243_v2  ;;  %v5245_v7 = vpop.f32.mrf.mxu1  ;;  %5629 = vmatpush.bf16.msrb.mxu0 %v8760_v39  ;;  %v8749_v2 = vld [vmem:[%s15032_s3 + $0x508] sm:$0xf0] }
 0x6da   :  { %15326 = vst [vmem:[#allocation53_spill] sm:$0xff] %v14277_v19  ;;  %v8752_v6 = vor.u32 %v9673_v20, %v8749_v2  ;;  %v9640_v20 = vld [vmem:[#allocation2 + $0x194] sm:$0xf0] }
 0x6dd   :  { %v5366_v54 = vpop.f32.mrf.mxu0  ;;  %5630 = vmatpush.bf16.msrb.mxu0 %v8752_v6  ;;  %v8611_v6 = vld [vmem:[#allocation2 + $0x188] sm:$0xf] }
 0x6de   :  { %v14294_v63 = vadd.f32 %v5366_v54, %v14179_v48 }
 0x6df   :  { %v4533_v19 = vpop.f32.mrf.mxu2 }
 0x6e0   :  { %v14299_v42 = vadd.f32 %v4533_v19, %v14208_v25  ;;  %v5314_v39 = vpop.f32.mrf.mxu3  ;;  %5405 = vmatmul.bf16.gmra.mxu0 %v14296_v60 }
 0x6e1   :  { %v14302_v26 = vadd.f32 %v5314_v39, %v5245_v7  ;;  %v5248_v57 = vpop.f32.mrf.mxu1 }
 0x6e4   :  { %5464 = vmatmul.bf16.gmra.mxu2 %v14304_v28  ;;  %5503 = vmatmul.bf16.gmra.mxu1 %v13783_v59 }
 0x6e5   :  { %5572 = vmatmul.bf16.gmra.mxu3 %v13785_v41  ;;  %v5368_v48 = vpop.f32.mrf.mxu0  ;;  %v14321_v41 = vor.u32 %v9640_v20, %v8611_v6 }
 0x6e6   :  { %v14310_v25 = vadd.f32 %v5368_v48, %v14196_v62  ;;  %v9689_v62 = vld [vmem:[%s15032_s3 + $0x584] sm:$0xf] }
 0x6e7   :  { %v5425_v19 = vpop.f32.mrf.mxu2 }
 0x6e8   :  { %v5317_v46 = vpop.f32.mrf.mxu3  ;;  %v5426_v7 = vadd.f32 %v5425_v19, %v14222_v50  ;;  %v8813_v50 = vld [vmem:[%s15032_s3 + $0x588] sm:$0xf0] }
 0x6e9   :  { %v14313_v54 = vadd.f32 %v5317_v46, %v5248_v57  ;;  %v5250_v34 = vpop.f32.mrf.mxu1  ;;  %v9630_v46 = vld [vmem:[#allocation2 + $0x14c] sm:$0xf] }
 0x6ea   :  { %v14316_v22 = vadd.f32 %v5426_v7, %v13318_v8  ;;  %v8816_v8 = vor.u32 %v9689_v62, %v8813_v50  ;;  %v14336_v20 = vor.u32 %v9630_v46, %v8581_v18 }
 0x6ec   :  { %5699 = vmatpush.bf16.msra.mxu2 %v8816_v8 }
 0x6ed   :  { %v5371_v2 = vpop.f32.mrf.mxu0 }
 0x6ee   :  { %v14319_v59 = vadd.f32 %v5371_v2, %v14213_v36 }
 0x6ef   :  { %v5427_v57 = vpop.f32.mrf.mxu2 }
 0x6f0   :  { %v5319_v39 = vpop.f32.mrf.mxu3  ;;  %v5428_v48 = vadd.f32 %v5427_v57, %v14244_v10  ;;  %5410 = vmatmul.bf16.gmra.mxu0 %v14321_v41 }
 0x6f1   :  { %v14331_v36 = vadd.f32 %v5319_v39, %v5250_v34  ;;  %v5253_v19 = vpop.f32.mrf.mxu1 }
 0x6f2   :  { %v14334_v7 = vadd.f32 %v5428_v48, %v13335_v38 }
 0x6f4   :  { %5469 = vmatmul.bf16.gmra.mxu2 %v14336_v20  ;;  %5508 = vmatmul.bf16.gmra.mxu1 %v13815_v11  ;;  %v8597_v11 = vld [vmem:[#allocation2 + $0x178] sm:$0xf0] }
 0x6f5   :  { %5577 = vmatmul.bf16.gmra.mxu3 %v13817_v31  ;;  %v5373_v2 = vpop.f32.mrf.mxu0 }
 0x6f6   :  { %v5374_v10 = vadd.f32 %v5373_v2, %v14230_v55 }
 0x6f7   :  { %v5430_v6 = vpop.f32.mrf.mxu2 }
 0x6f8   :  { %v5322_v34 = vpop.f32.mrf.mxu3  ;;  %v5431_v62 = vadd.f32 %v5430_v6, %v14252_v47  ;;  %v9634_v47 = vld [vmem:[#allocation2 + $0x16c] sm:$0xf] }
 0x6f9   :  { %v14343_v50 = vadd.f32 %v5322_v34, %v5253_v19  ;;  %v5255_v57 = vpop.f32.mrf.mxu1  ;;  %v14356_v2 = vor.u32 %v9634_v47, %v8597_v11 }
 0x6fa   :  { %v14346_v38 = vadd.f32 %v5431_v62, %v13350_v14 }
 0x6fd   :  { %v5376_v18 = vpop.f32.mrf.mxu0 }
 0x6fe   :  { %v5377_v8 = vadd.f32 %v5376_v18, %v14249_v37 }
 0x6ff   :  { %v5432_v39 = vpop.f32.mrf.mxu2 }
 0x700   :  { %v5324_v48 = vpop.f32.mrf.mxu3  ;;  %v5433_v31 = vadd.f32 %v5432_v39, %v14268_v24  ;;  %5631 = vmatmul.bf16.vlgmr.msrb.gmra.mxu0 %v13834_v17 }
 0x701   :  { %v14351_v55 = vadd.f32 %v5324_v48, %v5255_v57  ;;  %v5258_v46 = vpop.f32.mrf.mxu1 }
 0x702   :  { %v14354_v19 = vadd.f32 %v5433_v31, %v13359_v27 }
 0x704   :  { %5474 = vmatmul.bf16.gmra.mxu2 %v14356_v2  ;;  %5513 = vmatmul.bf16.gmra.mxu1 %v13849_v51  ;;  %v8613_v51 = vld [vmem:[#allocation2 + $0x198] sm:$0xf0] }
 0x705   :  { %5582 = vmatmul.bf16.gmra.mxu3 %v13851_v23  ;;  %v5378_v14 = vpop.f32.mrf.mxu0 }
 0x706   :  { %v5379_v37 = vadd.f32 %v5378_v14, %v14260_v12 }
 0x707   :  { %v5435_v24 = vpop.f32.mrf.mxu2 }
 0x708   :  { %v5327_v17 = vpop.f32.mrf.mxu3  ;;  %v5436_v6 = vadd.f32 %v5435_v24, %v14294_v63  ;;  %v9638_v63 = vld [vmem:[#allocation2 + $0x18c] sm:$0xf] }
 0x709   :  { %v14363_v34 = vadd.f32 %v5327_v17, %v5258_v46  ;;  %v5260_v62 = vpop.f32.mrf.mxu1  ;;  %v14376_v46 = vor.u32 %v9638_v63, %v8613_v51 }
 0x70a   :  { %v14366_v27 = vadd.f32 %v5436_v6, %v13392_v45 }
 0x70d   :  { %v5381_v57 = vpop.f32.mrf.mxu0 }
 0x70e   :  { %v5382_v18 = vadd.f32 %v5381_v57, %v14279_v3 }
 0x70f   :  { %v5437_v39 = vpop.f32.mrf.mxu2 }
 0x710   :  { %v5329_v11 = vpop.f32.mrf.mxu3  ;;  %v5438_v23 = vadd.f32 %v5437_v39, %v14310_v25  ;;  %5636 = vmatmul.bf16.gmra.mxu0 %v13886_v61 }
 0x711   :  { %v14371_v12 = vadd.f32 %v5329_v11, %v5260_v62  ;;  %v5263_v48 = vpop.f32.mrf.mxu1 }
 0x712   :  { %v14374_v31 = vadd.f32 %v5438_v23, %v13407_v21 }
 0x714   :  { %5479 = vmatmul.bf16.gmra.mxu2 %v14376_v46  ;;  %5518 = vmatmul.bf16.gmra.mxu1 %v13895_v49 }
 0x715   :  { %5587 = vmatmul.bf16.gmra.mxu3 %v13897_v33  ;;  %v5383_v45 = vpop.f32.mrf.mxu0 }
 0x716   :  { %v5384_v3 = vadd.f32 %v5383_v45, %v14302_v26 }
 0x717   :  { %v5440_v25 = vpop.f32.mrf.mxu2 }
 0x718   :  { %v5332_v61 = vpop.f32.mrf.mxu3  ;;  %v5441_v47 = vadd.f32 %v5440_v25, %v14319_v59 }
 0x719   :  { %v14383_v14 = vadd.f32 %v5332_v61, %v5263_v48  ;;  %v5265_v24 = vpop.f32.mrf.mxu1 }
 0x71a   :  { %v14386_v21 = vadd.f32 %v5441_v47, %v13422_v44 }
 0x71d   :  { %v5386_v17 = vpop.f32.mrf.mxu0 }
 0x71e   :  { %v5387_v6 = vadd.f32 %v5386_v17, %v14313_v54 }
 0x71f   :  { %v5442_v62 = vpop.f32.mrf.mxu2 }
 0x720   :  { %v5334_v49 = vpop.f32.mrf.mxu3  ;;  %v5443_v57 = vadd.f32 %v5442_v62, %v5374_v10  ;;  %5641 = vmatmul.bf16.gmra.mxu0 %v13926_v30  ;;  %v15327_v62 = vld [vmem:[#allocation22_spill] sm:$0xff] }
 0x721   :  { %v14390_v33 = vadd.f32 %v5334_v49, %v5265_v24  ;;  %v5268_v59 = vpop.f32.mrf.mxu1 }
 0x722   :  { %v14393_v26 = vadd.f32 %v5443_v57, %v13449_v16  ;;  %v15329_v57 = vld [vmem:[#allocation14_spill] sm:$0xff] }
 0x724   :  { %5523 = vmatmul.bf16.gmra.mxu1 %v13947_v35  ;;  %5700 = vmatmul.bf16.vlgmr.msra.gmra.mxu2 %v13949_v53 }
 0x725   :  { %5592 = vmatmul.bf16.gmra.mxu3 %v13951_v56  ;;  %v5388_v44 = vpop.f32.mrf.mxu0 }
 0x726   :  { %v5389_v54 = vadd.f32 %v5388_v44, %v14331_v36 }
 0x727   :  { %v5445_v39 = vpop.f32.mrf.mxu2 }
 0x728   :  { %v5337_v51 = vpop.f32.mrf.mxu3  ;;  %v5446_v10 = vadd.f32 %v5445_v39, %v5377_v8 }
 0x729   :  { %v14399_v11 = vadd.f32 %v5337_v51, %v5268_v59  ;;  %v5270_v16 = vpop.f32.mrf.mxu1 }
 0x72a   :  { %v14402_v30 = vadd.f32 %v5446_v10, %v13468_v1 }
 0x72d   :  { %v5391_v23 = vpop.f32.mrf.mxu0 }
 0x72e   :  { %v5392_v48 = vadd.f32 %v5391_v23, %v14343_v50  ;;  %v9759_v23 = vld [vmem:[%s15033_s5 + $0xf0] sm:$0xff] }
 0x72f   :  { %v5447_v35 = vpop.f32.mrf.mxu2 }
 0x730   :  { %v5339_v63 = vpop.f32.mrf.mxu3  ;;  %v5448_v53 = vadd.f32 %v5447_v35, %v5379_v37  ;;  %5646 = vmatmul.bf16.gmra.mxu0 %v13968_v4  ;;  %v9760_v37 = vld [vmem:[%s15033_s5 + $0xf8] sm:$0xff] }
 0x731   :  { %v14406_v56 = vadd.f32 %v5339_v63, %v5270_v16  ;;  %v5273_v8 = vpop.f32.mrf.mxu1  ;;  %6243 = vmatpush.bf16.msra.mxu3 %v9760_v37  ;;  %v15336_v37 = vld [vmem:[#allocation37_spill] sm:$0xff] }
 0x732   :  { %v14409_v36 = vadd.f32 %v5448_v53, %v13477_v40  ;;  %v15332_v53 = vld [vmem:[#allocation19_spill] sm:$0xff] }
 0x734   :  { %5528 = vmatmul.bf16.gmra.mxu1 %v13983_v15  ;;  %5705 = vmatmul.bf16.gmra.mxu2 %v13985_v9 }
 0x735   :  { %5597 = vmatmul.bf16.gmra.mxu3 %v13987_v5  ;;  %v5393_v1 = vpop.f32.mrf.mxu0  ;;  %v9752_v5 = vld [vmem:[%s15033_s5 + $0xb8] sm:$0xff] }
 0x736   :  { %v5394_v50 = vadd.f32 %v5393_v1, %v14351_v55  ;;  %6204 = vmatpush.bf16.msra.mxu1 %v9752_v5  ;;  %6244 = vmatpush.bf16.msra.mxu3 %v9759_v23  ;;  %v15333_v1 = vld [vmem:[#allocation9_spill] sm:$0xff] }
 0x737   :  { %v5450_v4 = vpop.f32.mrf.mxu2  ;;  %v15342_v23 = vld [vmem:[#allocation13_spill] sm:$0xff] }
 0x738   :  { %v5342_v45 = vpop.f32.mrf.mxu3  ;;  %v5451_v25 = vadd.f32 %v5450_v4, %v5382_v18 }
 0x739   :  { %v5343_v40 = vadd.f32 %v5342_v45, %v5273_v8  ;;  %v5275_v47 = vpop.f32.mrf.mxu1  ;;  %v9751_v45 = vld [vmem:[%s15033_s5 + $0xb0] sm:$0xff] }
 0x73a   :  { %v14419_v61 = vadd.f32 %v5451_v25, %v13508_v32  ;;  %v15328_v32 = vld [vmem:[#allocation10_spill] sm:$0xff]  ;;  %6205 = vmatpush.bf16.msra.mxu1 %v9751_v45  ;;  %v15344_v45 = vld [vmem:[#allocation45_spill] sm:$0xff] }
 0x73d   :  { %v5396_v15 = vpop.f32.mrf.mxu0 }
 0x73e   :  { %v5397_v9 = vadd.f32 %v5396_v15, %v14363_v34  ;;  %v15330_v34 = vld [vmem:[#allocation16_spill] sm:$0xff] }
 0x73f   :  { %v5452_v55 = vpop.f32.mrf.mxu2 }
 0x740   :  { %v5344_v24 = vpop.f32.mrf.mxu3  ;;  %v5453_v17 = vadd.f32 %v5452_v55, %v5384_v3  ;;  %5651 = vmatmul.bf16.gmra.mxu0 %v14022_v58  ;;  %v15331_v3 = vld [vmem:[#allocation12_spill] sm:$0xff]  ;;  %v15337_v55 = vld [vmem:[#allocation11_spill] sm:$0xff] }
 0x741   :  { %v14426_v18 = vadd.f32 %v5344_v24, %v5275_v47  ;;  %v14453_v25 = vpop.f32.mrf.mxu1 }
 0x742   :  { %v14429_v49 = vadd.f32 %v5453_v17, %v15327_v62 }
 0x744   :  { %5533 = vmatmul.bf16.gmra.mxu1 %v15328_v32  ;;  %5710 = vmatmul.bf16.gmra.mxu2 %v15329_v57  ;;  %v15338_v57 = vld [vmem:[#allocation21_spill] sm:$0xff] }
 0x745   :  { %5602 = vmatmul.bf16.gmra.mxu3 %v15330_v34  ;;  %v5398_v59 = vpop.f32.mrf.mxu0 }
 0x746   :  { %v5399_v44 = vadd.f32 %v5398_v59, %v14371_v12  ;;  %v15334_v12 = vld [vmem:[#allocation31_spill] sm:$0xff] }
 0x747   :  { %v5455_v39 = vpop.f32.mrf.mxu2 }
 0x748   :  { %v5456_v51 = vadd.f32 %v5455_v39, %v5387_v6  ;;  %v15335_v6 = vld [vmem:[#allocation35_spill] sm:$0xff]  ;;  %v14455_v5 = vpop.f32.mrf.mxu3  ;;  %v15340_v39 = vld [vmem:[#allocation41_spill] sm:$0xff] }
 0x74a   :  { %v14436_v10 = vadd.f32 %v5456_v51, %v15331_v3  ;;  %v15341_v51 = vld [vmem:[#allocation42_spill] sm:$0xff] }
 0x74d   :  { %v5401_v58 = vpop.f32.mrf.mxu0 }
 0x74e   :  { %v5402_v16 = vadd.f32 %v5401_v58, %v14383_v14 }
 0x74f   :  { %v5457_v35 = vpop.f32.mrf.mxu2 }
 0x750   :  { %v5458_v63 = vadd.f32 %v5457_v35, %v5389_v54  ;;  %5656 = vmatmul.bf16.gmra.mxu0 %v15332_v53  ;;  %v14467_v59 = vpop.f32.mrf.mxu3 }
 0x752   :  { %v14444_v8 = vadd.f32 %v5458_v63, %v15333_v1 }
 0x754   :  { %5538 = vmatmul.bf16.gmra.mxu1 %v15334_v12  ;;  %5715 = vmatmul.bf16.gmra.mxu2 %v15335_v6 }
 0x755   :  { %5607 = vmatmul.bf16.gmra.mxu3 %v15336_v37  ;;  %v5403_v4 = vpop.f32.mrf.mxu0 }
 0x756   :  { %v5404_v14 = vadd.f32 %v5403_v4, %v14390_v33  ;;  %v14462_v33 = vpop.f32.mrf.mxu1 }
 0x757   :  { %v5460_v54 = vpop.f32.mrf.mxu2 }
 0x758   :  { %v5461_v15 = vadd.f32 %v5460_v54, %v5392_v48  ;;  %v15339_v48 = vld [vmem:[#allocation40_spill] sm:$0xff]  ;;  %v14481_v1 = vpop.f32.mrf.mxu3 }
 0x75a   :  { %v14458_v47 = vadd.f32 %v5461_v15, %v15337_v55 }
 0x75d   :  { %v5406_v24 = vpop.f32.mrf.mxu0 }
 0x75e   :  { %v5407_v17 = vadd.f32 %v5406_v24, %v14399_v11  ;;  %v14479_v63 = vpop.f32.mrf.mxu1  ;;  %v15345_v24 = vld [vmem:[#allocation15_spill] sm:$0xff] }
 0x75f   :  { %v5462_v62 = vpop.f32.mrf.mxu2 }
 0x760   :  { %v5463_v32 = vadd.f32 %v5462_v62, %v5394_v50  ;;  %5661 = vmatmul.bf16.gmra.mxu0 %v14135_v43  ;;  %v9758_v43 = vld [vmem:[%s15033_s5 + $0xe8] sm:$0xff] }
 0x761   :  { %6245 = vmatpush.bf16.msra.mxu3 %v9758_v43  ;;  %v9749_v43 = vld [vmem:[%s15033_s5 + $0xa0] sm:$0xff] }
 0x762   :  { %v14465_v34 = vadd.f32 %v5463_v32, %v15338_v57 }
 0x764   :  { %5543 = vmatmul.bf16.gmra.mxu1 %v15339_v48  ;;  %5720 = vmatmul.bf16.gmra.mxu2 %v15340_v39  ;;  %v15346_v39 = vld [vmem:[#allocation18_spill] sm:$0xff] }
 0x765   :  { %5612 = vmatmul.bf16.gmra.mxu3 %v15341_v51  ;;  %v5408_v3 = vpop.f32.mrf.mxu0  ;;  %v15347_v51 = vld [vmem:[#allocation48_spill] sm:$0xff] }
 0x766   :  { %v5409_v11 = vadd.f32 %v5408_v3, %v14406_v56  ;;  %v9750_v56 = vld [vmem:[%s15033_s5 + $0xa8] sm:$0xff] }
 0x767   :  { %v5465_v50 = vpop.f32.mrf.mxu2  ;;  %6206 = vmatpush.bf16.msra.mxu1 %v9750_v56  ;;  %v9723_v56 = vld [vmem:[%s15033_s5 + $0x30] sm:$0xff] }
 0x768   :  { %v5466_v58 = vadd.f32 %v5465_v50, %v5397_v9  ;;  %v15343_v9 = vld [vmem:[#allocation24_spill] sm:$0xff] }
 0x76a   :  { %v14477_v35 = vadd.f32 %v5466_v58, %v15342_v23  ;;  %v15348_v23 = vld [vmem:[#allocation17_spill] sm:$0xff] }
 0x76b   :  { %6207 = vmatpush.bf16.msra.mxu1 %v9749_v43  ;;  %v9720_v43 = vld [vmem:[%s15033_s5 + $0x18] sm:$0xff] }
 0x76d   :  { %v5411_v53 = vpop.f32.mrf.mxu0 }
 0x76e   :  { %v5412_v12 = vadd.f32 %v5411_v53, %v5343_v40  ;;  %v14493_v40 = vpop.f32.mrf.mxu1 }
 0x76f   :  { %v5467_v6 = vpop.f32.mrf.mxu2 }
 0x770   :  { %v5468_v37 = vadd.f32 %v5467_v6, %v5399_v44  ;;  %5666 = vmatmul.bf16.gmra.mxu0 %v14190_v0  ;;  %v14498_v44 = vpop.f32.mrf.mxu3 }
 0x772   :  { %v14488_v4 = vadd.f32 %v5468_v37, %v15343_v9 }
 0x774   :  { %5548 = vmatmul.bf16.gmra.mxu1 %v14198_v13  ;;  %5725 = vmatmul.bf16.gmra.mxu2 %v14200_v52  ;;  %v9757_v13 = vld [vmem:[%s15033_s5 + $0xe0] sm:$0xff] }
 0x775   :  { %5617 = vmatmul.bf16.gmra.mxu3 %v15344_v45  ;;  %v5413_v54 = vpop.f32.mrf.mxu0 }
 0x776   :  { %v14496_v15 = vadd.f32 %v5413_v54, %v14426_v18  ;;  %v14508_v57 = vpop.f32.mrf.mxu1  ;;  %6246 = vmatpush.bf16.msra.mxu3 %v9757_v13  ;;  %v15349_v54 = vld [vmem:[#allocation50_spill] sm:$0xff] }
 0x777   :  { %v5470_v55 = vpop.f32.mrf.mxu2 }
 0x778   :  { %v5471_v0 = vadd.f32 %v5470_v55, %v5402_v16  ;;  %v14511_v18 = vpop.f32.mrf.mxu3  ;;  %v15350_v55 = vld [vmem:[#allocation23_spill] sm:$0xff] }
 0x77a   :  { %v14501_v62 = vadd.f32 %v5471_v0, %v15345_v24  ;;  %v9721_v24 = vld [vmem:[%s15033_s5 + $0x20] sm:$0xff] }
 0x77d   :  { %v14503_v32 = vpop.f32.mrf.mxu0 }
 0x77e   :  { %v14525_v58 = vpop.f32.mrf.mxu1 }
 0x77f   :  { %v5472_v52 = vpop.f32.mrf.mxu2 }
 0x780   :  { %v5473_v48 = vadd.f32 %v5472_v52, %v5404_v14  ;;  %5671 = vmatmul.bf16.gmra.mxu0 %v14224_v29  ;;  %v9724_v14 = vld [vmem:[%s15033_s5 + $0x38] sm:$0xff]  ;;  %v14533_v6 = vpop.f32.mrf.mxu3  ;;  %v15351_v52 = vld [vmem:[#allocation52_spill] sm:$0xff] }
 0x781   :  { %6438 = vmatpush.bf16.msra.mxu0 %v9724_v14 }
 0x782   :  { %v14514_v16 = vadd.f32 %v5473_v48, %v15346_v39 }
 0x784   :  { %5730 = vmatmul.bf16.gmra.mxu2 %v15347_v51  ;;  %v9748_v51 = vld [vmem:[%s15033_s5 + $0x98] sm:$0xff] }
 0x785   :  { %v14517_v3 = vpop.f32.mrf.mxu0  ;;  %6439 = vmatpush.bf16.msra.mxu0 %v9723_v56  ;;  %6208 = vmatpush.bf16.msra.mxu1 %v9748_v51  ;;  %v9732_v56 = vld [vmem:[%s15033_s5 + $0x78] sm:$0xff] }
 0x786   :  { %v14547_v13 = vpop.f32.mrf.mxu1  ;;  %6477 = vmatpush.bf16.msrb.mxu2 %v9732_v56  ;;  %v9753_v56 = vld [vmem:[%s15033_s5 + $0xc0] sm:$0xff] }
 0x787   :  { %v5475_v50 = vpop.f32.mrf.mxu2 }
 0x788   :  { %v5476_v29 = vadd.f32 %v5475_v50, %v5407_v17  ;;  %v9722_v17 = vld [vmem:[%s15033_s5 + $0x28] sm:$0xff]  ;;  %v14552_v39 = vpop.f32.mrf.mxu3 }
 0x789   :  { %6440 = vmatpush.bf16.msra.mxu0 %v9722_v17  ;;  %v9747_v17 = vld [vmem:[%s15033_s5 + $0x90] sm:$0xff] }
 0x78a   :  { %v14528_v53 = vadd.f32 %v5476_v29, %v15348_v23  ;;  %v15352_v29 = vld [vmem:[#allocation25_spill] sm:$0xff]  ;;  %6209 = vmatpush.bf16.msra.mxu1 %v9747_v17  ;;  %v5564_v17 = vadd.f32 %v14455_v5, %v14453_v25 }
 0x78d   :  { %v14535_v37 = vpop.f32.mrf.mxu0  ;;  %6441 = vmatpush.bf16.msra.mxu0 %v9721_v24  ;;  %v9754_v24 = vld [vmem:[%s15033_s5 + $0xc8] sm:$0xff] }
 0x78f   :  { %v5477_v9 = vpop.f32.mrf.mxu2 }
 0x790   :  { %v5478_v45 = vadd.f32 %v5477_v9, %v5409_v11  ;;  %5676 = vmatmul.bf16.gmra.mxu0 %v15349_v54  ;;  %v9756_v11 = vld [vmem:[%s15033_s5 + $0xd8] sm:$0xff]  ;;  %v9755_v9 = vld [vmem:[%s15033_s5 + $0xd0] sm:$0xff]  ;;  %v14580_v54 = vpop.f32.mrf.mxu1  ;;  %v14591_v51 = vpop.f32.mrf.mxu3 }
 0x791   :  { %6247 = vmatpush.bf16.msra.mxu3 %v9756_v11  ;;  %6442 = vmatpush.bf16.msra.mxu0 %v9720_v43 }
 0x792   :  { %v14542_v0 = vadd.f32 %v5478_v45, %v15350_v55  ;;  %v9746_v55 = vld [vmem:[%s15033_s5 + $0x88] sm:$0xff] }
 0x793   :  { %6210 = vmatpush.bf16.msra.mxu1 %v9746_v55 }
 0x794   :  { %5735 = vmatmul.bf16.gmra.mxu2 %v15351_v52  ;;  %v9718_v52 = vld [vmem:[%s15033_s5 + $0x8] sm:$0xff] }
 0x795   :  { %v14550_v48 = vpop.f32.mrf.mxu0  ;;  %6248 = vmatpush.bf16.msra.mxu3 %v9755_v9 }
 0x797   :  { %v5480_v14 = vpop.f32.mrf.mxu2 }
 0x798   :  { %v5481_v50 = vadd.f32 %v5480_v14, %v5412_v12  ;;  %v9719_v12 = vld [vmem:[%s15033_s5 + $0x10] sm:$0xff]  ;;  %v15353_v14 = vld [vmem:[#allocation27_spill] sm:$0xff]  ;;  %v14624_v5 = vpop.f32.mrf.mxu3 }
 0x799   :  { %6443 = vmatpush.bf16.msra.mxu0 %v9719_v12  ;;  %6249 = vmatpush.bf16.msra.mxu3 %v9754_v24  ;;  %v5633_v12 = vadd.f32 %v14503_v32, %v5564_v17  ;;  %v5566_v32 = vadd.f32 %v14467_v59, %v14462_v33 }
 0x79a   :  { %v14564_v23 = vadd.f32 %v5481_v50, %v15352_v29  ;;  %v9745_v29 = vld [vmem:[%s15033_s5 + $0x80] sm:$0xff] }
 0x79b   :  { %6211 = vmatpush.bf16.msra.mxu1 %v9745_v29  ;;  %v9731_v29 = vld [vmem:[%s15033_s5 + $0x70] sm:$0xff] }
 0x79c   :  { %6478 = vmatpush.bf16.msrb.mxu2 %v9731_v29  ;;  %v5569_v29 = vadd.f32 %v14481_v1, %v14479_v63  ;;  %v9706_v63 = vld [vmem:[#allocation3 + $0x4] sm:$0xf0] }
 0x79d   :  { %v14578_v45 = vpop.f32.mrf.mxu0  ;;  %6444 = vmatpush.bf16.msra.mxu0 %v9718_v52  ;;  %6250 = vmatpush.bf16.msra.mxu3 %v9753_v56  ;;  %v14618_v52 = vpop.f32.mrf.mxu1 }
 0x79f   :  { %v5482_v11 = vpop.f32.mrf.mxu2 }
 0x7a0   :  { %v5483_v43 = vadd.f32 %v5482_v11, %v14496_v15  ;;  %5681 = vmatmul.bf16.gmra.mxu0 %v14296_v60  ;;  %v9717_v15 = vld [vmem:[%s15033_s5] sm:$0xff] }
 0x7a1   :  { %v5809_v60 = vld [vmem:[%s15034_s4] sm:$0x3]  ;;  %6445 = vmatpush.bf16.msra.mxu0 %v9717_v15 }
 0x7a2   :  { %v14596_v50 = vadd.f32 %v5483_v43, %v15353_v14  ;;  %v14613_v9 = vperm.slane %v5809_v60, 0  ;;  %v14620_v43 = vperm.slane %v5809_v60, 1  ;;  %v5635_v60 = vadd.f32 %v14517_v3, %v5566_v32  ;;  %v15355_v3 = vld [vmem:[#allocation26_spill] sm:$0xff]  ;;  %v14650_v32 = vpop.f32.mrf.mxu3 }
 0x7a4   :  { %5740 = vmatmul.bf16.gmra.mxu2 %v14304_v28  ;;  %v5815_v25 = vadd.f32 %v14613_v9, %v14316_v22  ;;  %v15354_v28 = vld [vmem:[#allocation28_spill] sm:$0xff]  ;;  %v9730_v22 = vld [vmem:[%s15033_s5 + $0x68] sm:$0xff]  ;;  %v5817_v33 = vadd.f32 %v14613_v9, %v14334_v7  ;;  %v5819_v1 = vadd.f32 %v14613_v9, %v14346_v38 }
 0x7a5   :  { %v14616_v55 = vpop.f32.mrf.mxu0  ;;  %6479 = vmatpush.bf16.msrb.mxu2 %v9730_v22  ;;  %v14642_v59 = vpop.f32.mrf.mxu1 }
 0x7a6   :  { %v5863_v15 = vmax.f32 %v5815_v25, 0.0  ;;  %v5865_v7 = vmax.f32 %v5817_v33, 0.0 }
 0x7a7   :  { %v5701_v24 = vpop.f32.mrf.mxu2 }
 0x7a8   :  { %v5702_v11 = vadd.f32 %v5701_v24, %v5633_v12 }
 0x7aa   :  { %v5762_v14 = vadd.f32 %v5702_v11, %v15354_v28 }
 0x7ac   :  { %v5816_v56 = vadd.f32 %v14620_v43, %v5762_v14  ;;  %v9729_v14 = vld [vmem:[%s15033_s5 + $0x60] sm:$0xff] }
 0x7ad   :  { %v14638_v28 = vpop.f32.mrf.mxu0  ;;  %6480 = vmatpush.bf16.msrb.mxu2 %v9729_v14 }
 0x7ae   :  { %v5864_v17 = vmax.f32 %v5816_v56, 0.0  ;;  %v5638_v56 = vadd.f32 %v14535_v37, %v5569_v29  ;;  %v9727_v37 = vld [vmem:[%s15033_s5 + $0x50] sm:$0xff] }
 0x7af   :  { %v5703_v12 = vpop.f32.mrf.mxu2 }
 0x7b0   :  { %v5911_v24 = vpack.c.bf16 %v5864_v17, %v5863_v15  ;;  %v5704_v11 = vadd.f32 %v5703_v12, %v5635_v60  ;;  %5686 = vmatmul.bf16.gmra.mxu0 %v14321_v41  ;;  %v9728_v60 = vld [vmem:[%s15033_s5 + $0x58] sm:$0xff] }
 0x7b1   :  { %6481 = vmatpush.bf16.msrb.mxu2 %v9728_v60 }
 0x7b2   :  { %5935 = vst [vmem:[#allocation3 + $0x70] sm:$0xff] %v5911_v24  ;;  %v5764_v25 = vadd.f32 %v5704_v11, %v15355_v3  ;;  %v9019_v24 = vld [vmem:[#allocation3] sm:$0xf]  ;;  %v5571_v3 = vadd.f32 %v14498_v44, %v14493_v40 }
 0x7b3   :  { %v9020_v29 = vor.u32 %v9706_v63, %v9019_v24  ;;  %v5821_v24 = vadd.f32 %v14613_v9, %v14354_v19 }
 0x7b4   :  { %v5818_v41 = vadd.f32 %v14620_v43, %v5764_v25  ;;  %5745 = vmatmul.bf16.gmra.mxu2 %v14336_v20  ;;  %v15356_v20 = vld [vmem:[#allocation30_spill] sm:$0xff]  ;;  %v14668_v25 = vpop.f32.mrf.mxu1  ;;  %v5640_v38 = vadd.f32 %v14550_v48, %v5571_v3  ;;  %v15357_v48 = vld [vmem:[#allocation4_spill] sm:$0xff]  ;;  %v5574_v3 = vadd.f32 %v14511_v18, %v14508_v57  ;;  %v5823_v18 = vadd.f32 %v14613_v9, %v14366_v27 }
 0x7b5   :  { %v14664_v33 = vpop.f32.mrf.mxu0  ;;  %6482 = vmatpush.bf16.msrb.mxu2 %v9727_v37  ;;  %v9725_v37 = vld [vmem:[%s15033_s5 + $0x40] sm:$0xff]  ;;  %v5869_v19 = vmax.f32 %v5821_v24, 0.0 }
 0x7b6   :  { %v5866_v15 = vmax.f32 %v5818_v41, 0.0  ;;  %v5867_v41 = vmax.f32 %v5819_v1, 0.0 }
 0x7b7   :  { %v5706_v17 = vpop.f32.mrf.mxu2 }
 0x7b8   :  { %v5912_v22 = vpack.c.bf16 %v5866_v15, %v5865_v7  ;;  %v5707_v12 = vadd.f32 %v5706_v17, %v5638_v56  ;;  %v14672_v7 = vpop.f32.mrf.mxu3  ;;  %v9726_v15 = vld [vmem:[%s15033_s5 + $0x48] sm:$0xff] }
 0x7b9   :  { %v8907_v40 = vld [vmem:[#allocation3 + $0x70] sm:$0xf]  ;;  %6483 = vmatpush.bf16.msrb.mxu2 %v9726_v15 }
 0x7ba   :  { %5936 = vst [vmem:[#allocation3 + $0x78] sm:$0xff] %v5912_v22  ;;  %v5766_v11 = vadd.f32 %v5707_v12, %v15356_v20  ;;  %v9733_v12 = vld [vmem:[#allocation3 + $0x74] sm:$0xf] }
 0x7bc   :  { %v5820_v14 = vadd.f32 %v14620_v43, %v5766_v11 }
 0x7bd   :  { %6484 = vmatpush.bf16.msrb.mxu2 %v9725_v37 }
 0x7be   :  { %v5868_v56 = vmax.f32 %v5820_v14, 0.0 }
 0x7bf   :  { %v5708_v60 = vpop.f32.mrf.mxu2 }
 0x7c0   :  { %v5913_v17 = vpack.c.bf16 %v5868_v56, %v5867_v41  ;;  %v5709_v22 = vadd.f32 %v5708_v60, %v5640_v38  ;;  %6446 = vmatmul.bf16.vlgmr.msra.gmra.mxu0 %v9020_v29  ;;  %v14687_v29 = vpop.f32.mrf.mxu0  ;;  %v14689_v41 = vpop.f32.mrf.mxu1  ;;  %v5643_v38 = vadd.f32 %v14578_v45, %v5574_v3  ;;  %v5825_v3 = vadd.f32 %v14613_v9, %v14374_v31 }
 0x7c1   :  { %v9734_v44 = vld [vmem:[#allocation3 + $0x74] sm:$0xf0]  ;;  %v8909_v20 = vld [vmem:[#allocation3 + $0x78] sm:$0xf0]  ;;  %v14692_v60 = vpop.f32.mrf.mxu3 }
 0x7c2   :  { %5937 = vst [vmem:[#allocation3 + $0x10] sm:$0xff] %v5913_v17  ;;  %v5768_v63 = vadd.f32 %v5709_v22, %v15357_v48  ;;  %v8908_v1 = vor.u32 %v9734_v44, %v8907_v40  ;;  %v8912_v11 = vor.u32 %v9733_v12, %v8909_v20  ;;  %v5576_v40 = vadd.f32 %v14533_v6, %v14525_v58  ;;  %v15359_v58 = vld [vmem:[#allocation33_spill] sm:$0xff] }
 0x7c3   :  { %v5871_v12 = vmax.f32 %v5823_v18, 0.0 }
 0x7c4   :  { %v5822_v14 = vadd.f32 %v14620_v43, %v5768_v63  ;;  %5750 = vmatmul.bf16.gmra.mxu2 %v14356_v2  ;;  %6212 = vmatmul.bf16.vlgmr.msra.gmra.mxu1 %v8908_v1  ;;  %v15358_v2 = vld [vmem:[#allocation32_spill] sm:$0xff]  ;;  %v5645_v45 = vadd.f32 %v14616_v55, %v5576_v40  ;;  %v5579_v55 = vadd.f32 %v14552_v39, %v14547_v13  ;;  %v15360_v13 = vld [vmem:[#allocation34_spill] sm:$0xff] }
 0x7c5   :  { %6251 = vmatmul.bf16.vlgmr.msra.gmra.mxu3 %v8912_v11 }
 0x7c6   :  { %v5870_v56 = vmax.f32 %v5822_v14, 0.0 }
 0x7c7   :  { %v5711_v15 = vpop.f32.mrf.mxu2 }
 0x7c8   :  { %v5914_v17 = vpack.c.bf16 %v5870_v56, %v5869_v19  ;;  %v5712_v57 = vadd.f32 %v5711_v15, %v5643_v38  ;;  %v14701_v24 = vpop.f32.mrf.mxu0  ;;  %v14703_v63 = vpop.f32.mrf.mxu1  ;;  %v5873_v56 = vmax.f32 %v5825_v3, 0.0  ;;  %v5648_v15 = vadd.f32 %v14638_v28, %v5579_v55 }
 0x7c9   :  { %v9027_v27 = vld [vmem:[#allocation3 + $0x10] sm:$0xf]  ;;  %v14707_v14 = vpop.f32.mrf.mxu3 }
 0x7ca   :  { %5938 = vst [vmem:[#allocation3 + $0x18] sm:$0xff] %v5914_v17  ;;  %v5770_v22 = vadd.f32 %v5712_v57, %v15358_v2 }
 0x7cc   :  { %v5824_v44 = vadd.f32 %v14620_v43, %v5770_v22  ;;  %v5827_v22 = vadd.f32 %v14613_v9, %v14386_v21 }
 0x7ce   :  { %v5872_v20 = vmax.f32 %v5824_v44, 0.0 }
 0x7cf   :  { %v5713_v48 = vpop.f32.mrf.mxu2 }
 0x7d0   :  { %v5915_v1 = vpack.c.bf16 %v5872_v20, %v5871_v12  ;;  %v5714_v11 = vadd.f32 %v5713_v48, %v5645_v45  ;;  %v14715_v2 = vpop.f32.mrf.mxu0  ;;  %v14719_v40 = vpop.f32.mrf.mxu1  ;;  %v5875_v12 = vmax.f32 %v5827_v22, 0.0  ;;  %v9705_v48 = vld [vmem:[#allocation3 + $0x4] sm:$0xf] }
 0x7d1   :  { %v9708_v37 = vld [vmem:[#allocation3 + $0x14] sm:$0xf0]  ;;  %v14724_v44 = vpop.f32.mrf.mxu3 }
 0x7d2   :  { %5939 = vst [vmem:[#allocation3 + $0x80] sm:$0xff] %v5915_v1  ;;  %v5772_v6 = vadd.f32 %v5714_v11, %v15359_v58  ;;  %v9028_v19 = vor.u32 %v9708_v37, %v9027_v27  ;;  %v9021_v1 = vld [vmem:[#allocation3 + $0x8] sm:$0xf0] }
 0x7d4   :  { %v5826_v38 = vadd.f32 %v14620_v43, %v5772_v6  ;;  %5755 = vmatmul.bf16.gmra.mxu2 %v14376_v46  ;;  %6451 = vmatmul.bf16.gmra.mxu0 %v9028_v19  ;;  %v5581_v46 = vadd.f32 %v14591_v51, %v14580_v54  ;;  %v9024_v19 = vor.u32 %v9705_v48, %v9021_v1  ;;  %v15361_v51 = vld [vmem:[#allocation8_spill] sm:$0xff] }
 0x7d5   :  { %v5829_v54 = vadd.f32 %v14613_v9, %v14393_v26 }
 0x7d6   :  { %v5874_v17 = vmax.f32 %v5826_v38, 0.0  ;;  %v5650_v45 = vadd.f32 %v14664_v33, %v5581_v46 }
 0x7d7   :  { %v5716_v57 = vpop.f32.mrf.mxu2 }
 0x7d8   :  { %v5916_v31 = vpack.c.bf16 %v5874_v17, %v5873_v56  ;;  %v5717_v18 = vadd.f32 %v5716_v57, %v5648_v15  ;;  %v5659_v33 = vpop.f32.mrf.mxu0  ;;  %v5584_v15 = vadd.f32 %v14624_v5, %v14618_v52  ;;  %v14733_v17 = vpop.f32.mrf.mxu1  ;;  %v15362_v52 = vld [vmem:[#allocation36_spill] sm:$0xff] }
 0x7d9   :  { %v8915_v37 = vld [vmem:[#allocation3 + $0x80] sm:$0xf]  ;;  %v9735_v58 = vld [vmem:[#allocation3 + $0x84] sm:$0xf] }
 0x7da   :  { %5940 = vst [vmem:[#allocation3 + $0x88] sm:$0xff] %v5916_v31  ;;  %v5774_v39 = vadd.f32 %v5717_v18, %v15360_v13  ;;  %v5877_v31 = vmax.f32 %v5829_v54, 0.0  ;;  %v14736_v18 = vpop.f32.mrf.mxu3  ;;  %v5653_v26 = vadd.f32 %v14687_v29, %v5584_v15 }
 0x7dc   :  { %v5828_v28 = vadd.f32 %v14620_v43, %v5774_v39 }
 0x7de   :  { %v5876_v20 = vmax.f32 %v5828_v28, 0.0  ;;  %v5831_v28 = vadd.f32 %v14613_v9, %v14402_v30 }
 0x7df   :  { %v5718_v11 = vpop.f32.mrf.mxu2 }
 0x7e0   :  { %v5917_v21 = vpack.c.bf16 %v5876_v20, %v5875_v12  ;;  %v5719_v27 = vadd.f32 %v5718_v11, %v5650_v45  ;;  %v5586_v12 = vadd.f32 %v14650_v32, %v14642_v59  ;;  %v14745_v20 = vpop.f32.mrf.mxu0  ;;  %v5879_v48 = vmax.f32 %v5831_v28, 0.0  ;;  %v14747_v1 = vpop.f32.mrf.mxu1  ;;  %v15363_v32 = vld [vmem:[#allocation7_spill] sm:$0xff]  ;;  %v9788_v28 = vld [vmem:[%s15033_s5 + $0x178] sm:$0xff] }
 0x7e1   :  { %v9736_v3 = vld [vmem:[#allocation3 + $0x84] sm:$0xf0]  ;;  %v8917_v6 = vld [vmem:[#allocation3 + $0x88] sm:$0xf0]  ;;  %v5833_v59 = vadd.f32 %v14613_v9, %v14409_v36  ;;  %6756 = vmatpush.bf16.msrb.mxu3 %v9788_v28 }
 0x7e2   :  { %5941 = vst [vmem:[#allocation3 + $0x20] sm:$0xff] %v5917_v21  ;;  %v5776_v55 = vadd.f32 %v5719_v27, %v15361_v51  ;;  %v8916_v38 = vor.u32 %v9736_v3, %v8915_v37  ;;  %v8920_v56 = vor.u32 %v9735_v58, %v8917_v6  ;;  %v5655_v29 = vadd.f32 %v14701_v24, %v5586_v12  ;;  %v14750_v27 = vpop.f32.mrf.mxu3  ;;  %v9029_v3 = vld [vmem:[#allocation3 + $0x18] sm:$0xf0]  ;;  %v9707_v51 = vld [vmem:[#allocation3 + $0x14] sm:$0xf] }
 0x7e3   :  { %v5589_v24 = vadd.f32 %v14672_v7, %v14668_v25  ;;  %v15364_v25 = vld [vmem:[#allocation5_spill] sm:$0xff] }
 0x7e4   :  { %v5830_v57 = vadd.f32 %v14620_v43, %v5776_v55  ;;  %6217 = vmatmul.bf16.gmra.mxu1 %v8916_v38  ;;  %6256 = vmatmul.bf16.gmra.mxu3 %v8920_v56  ;;  %v9032_v55 = vor.u32 %v9707_v51, %v9029_v3  ;;  %v5881_v56 = vmax.f32 %v5833_v59, 0.0 }
 0x7e5   :  { %6485 = vmatmul.bf16.vlgmr.msrb.gmra.mxu2 %v9024_v19  ;;  %v5658_v15 = vadd.f32 %v14715_v2, %v5589_v24  ;;  %v5591_v2 = vadd.f32 %v14692_v60, %v14689_v41  ;;  %v15365_v41 = vld [vmem:[#allocation6_spill] sm:$0xff] }
 0x7e6   :  { %v5878_v22 = vmax.f32 %v5830_v57, 0.0 }
 0x7e7   :  { %v5721_v13 = vpop.f32.mrf.mxu2  ;;  %v5660_v12 = vadd.f32 %v5659_v33, %v5591_v2 }
 0x7e8   :  { %v5918_v39 = vpack.c.bf16 %v5878_v22, %v5877_v31  ;;  %v5722_v46 = vadd.f32 %v5721_v13, %v5653_v26  ;;  %v5664_v31 = vpop.f32.mrf.mxu0  ;;  %v14759_v36 = vpop.f32.mrf.mxu1 }
 0x7e9   :  { %v9035_v58 = vld [vmem:[#allocation3 + $0x20] sm:$0xf] }
 0x7ea   :  { %5942 = vst [vmem:[#allocation3 + $0x28] sm:$0xff] %v5918_v39  ;;  %v5778_v5 = vadd.f32 %v5722_v46, %v15362_v52  ;;  %v5835_v39 = vadd.f32 %v14613_v9, %v14419_v61  ;;  %v14763_v46 = vpop.f32.mrf.mxu3 }
 0x7ec   :  { %v5832_v45 = vadd.f32 %v14620_v43, %v5778_v5  ;;  %v5883_v5 = vmax.f32 %v5835_v39, 0.0  ;;  %v9787_v39 = vld [vmem:[%s15033_s5 + $0x170] sm:$0xff] }
 0x7ed   :  { %6757 = vmatpush.bf16.msrb.mxu3 %v9787_v39 }
 0x7ee   :  { %v5880_v11 = vmax.f32 %v5832_v45, 0.0 }
 0x7ef   :  { %v5723_v21 = vpop.f32.mrf.mxu2 }
 0x7f0   :  { %v5919_v30 = vpack.c.bf16 %v5880_v11, %v5879_v48  ;;  %v5724_v37 = vadd.f32 %v5723_v21, %v5655_v29  ;;  %v14774_v59 = vpop.f32.mrf.mxu1 }
 0x7f1   :  { %v9710_v6 = vld [vmem:[#allocation3 + $0x24] sm:$0xf0]  ;;  %v9037_v21 = vld [vmem:[#allocation3 + $0x28] sm:$0xf0] }
 0x7f2   :  { %5943 = vst [vmem:[#allocation3 + $0x90] sm:$0xff] %v5919_v30  ;;  %v5780_v19 = vadd.f32 %v5724_v37, %v15363_v32  ;;  %v9036_v54 = vor.u32 %v9710_v6, %v9035_v58  ;;  %v5667_v30 = vpop.f32.mrf.mxu0  ;;  %v5837_v6 = vadd.f32 %v14613_v9, %v14429_v49  ;;  %v14782_v24 = vpop.f32.mrf.mxu3 }
 0x7f4   :  { %v5834_v38 = vadd.f32 %v14620_v43, %v5780_v19  ;;  %6456 = vmatmul.bf16.gmra.mxu0 %v9036_v54  ;;  %v9709_v19 = vld [vmem:[#allocation3 + $0x24] sm:$0xf]  ;;  %v9780_v54 = vld [vmem:[%s15033_s5 + $0x138] sm:$0xff] }
 0x7f5   :  { %6490 = vmatmul.bf16.gmra.mxu2 %v9032_v55  ;;  %v9040_v51 = vor.u32 %v9709_v19, %v9037_v21  ;;  %v5594_v55 = vadd.f32 %v14707_v14, %v14703_v63  ;;  %6717 = vmatpush.bf16.msrb.mxu1 %v9780_v54  ;;  %v15366_v63 = vld [vmem:[#allocation20_spill] sm:$0xff] }
 0x7f6   :  { %v5882_v57 = vmax.f32 %v5834_v38, 0.0  ;;  %v5885_v38 = vmax.f32 %v5837_v6, 0.0 }
 0x7f7   :  { %v5726_v26 = vpop.f32.mrf.mxu2 }
 0x7f8   :  { %v5920_v22 = vpack.c.bf16 %v5882_v57, %v5881_v56  ;;  %v5727_v13 = vadd.f32 %v5726_v26, %v5658_v15  ;;  %v5663_v56 = vadd.f32 %v14745_v20, %v5594_v55  ;;  %v5596_v20 = vadd.f32 %v14724_v44, %v14719_v40  ;;  %v14797_v28 = vpop.f32.mrf.mxu1  ;;  %v15367_v44 = vld [vmem:[#allocation29_spill] sm:$0xff] }
 0x7f9   :  { %v8923_v11 = vld [vmem:[#allocation3 + $0x90] sm:$0xf]  ;;  %v9737_v3 = vld [vmem:[#allocation3 + $0x94] sm:$0xf]  ;;  %v5841_v40 = vadd.f32 %v14613_v9, %v14444_v8 }
 0x7fa   :  { %5944 = vst [vmem:[#allocation3 + $0x98] sm:$0xff] %v5920_v22  ;;  %v5782_v7 = vadd.f32 %v5727_v13, %v15364_v25  ;;  %v5839_v13 = vadd.f32 %v14613_v9, %v14436_v10  ;;  %v9779_v25 = vld [vmem:[%s15033_s5 + $0x130] sm:$0xff] }
 0x7fb   :  { %6718 = vmatpush.bf16.msrb.mxu1 %v9779_v25 }
 0x7fc   :  { %v5836_v52 = vadd.f32 %v14620_v43, %v5782_v7  ;;  %v5669_v7 = vpop.f32.mrf.mxu0  ;;  %v5887_v10 = vmax.f32 %v5839_v13, 0.0 }
 0x7fe   :  { %v5884_v45 = vmax.f32 %v5836_v52, 0.0  ;;  %v14800_v52 = vpop.f32.mrf.mxu3 }
 0x7ff   :  { %v5728_v48 = vpop.f32.mrf.mxu2 }
 0x800   :  { %v5921_v61 = vpack.c.bf16 %v5884_v45, %v5883_v5  ;;  %v5729_v29 = vadd.f32 %v5728_v48, %v5660_v12  ;;  %v5665_v5 = vadd.f32 %v5664_v31, %v5596_v20  ;;  %v9786_v31 = vld [vmem:[%s15033_s5 + $0x168] sm:$0xff]  ;;  %v14811_v8 = vpop.f32.mrf.mxu1 }
 0x801   :  { %v9738_v37 = vld [vmem:[#allocation3 + $0x94] sm:$0xf0]  ;;  %v8925_v58 = vld [vmem:[#allocation3 + $0x98] sm:$0xf0]  ;;  %6758 = vmatpush.bf16.msrb.mxu3 %v9786_v31  ;;  %v5847_v31 = vadd.f32 %v14613_v9, %v14477_v35 }
 0x802   :  { %5945 = vst [vmem:[#allocation3 + $0x30] sm:$0xff] %v5921_v61  ;;  %v5784_v60 = vadd.f32 %v5729_v29, %v15365_v41  ;;  %v8924_v32 = vor.u32 %v9738_v37, %v8923_v11  ;;  %v8928_v33 = vor.u32 %v9737_v3, %v8925_v58  ;;  %v5599_v41 = vadd.f32 %v14736_v18, %v14733_v17  ;;  %v15368_v17 = vld [vmem:[#allocation38_spill] sm:$0xff] }
 0x804   :  { %v5838_v49 = vadd.f32 %v14620_v43, %v5784_v60  ;;  %6222 = vmatmul.bf16.gmra.mxu1 %v8924_v32  ;;  %6261 = vmatmul.bf16.gmra.mxu3 %v8928_v33  ;;  %v5672_v32 = vpop.f32.mrf.mxu0  ;;  %v5889_v33 = vmax.f32 %v5841_v40, 0.0  ;;  %v5668_v19 = vadd.f32 %v5667_v30, %v5599_v41 }
 0x805   :  { %6495 = vmatmul.bf16.gmra.mxu2 %v9040_v51 }
 0x806   :  { %v5886_v15 = vmax.f32 %v5838_v49, 0.0  ;;  %v14813_v55 = vpop.f32.mrf.mxu3 }
 0x807   :  { %v5731_v57 = vpop.f32.mrf.mxu2 }
 0x808   :  { %v5922_v26 = vpack.c.bf16 %v5886_v15, %v5885_v38  ;;  %v5732_v22 = vadd.f32 %v5731_v57, %v5663_v56  ;;  %v5843_v56 = vadd.f32 %v14613_v9, %v14458_v47  ;;  %v9778_v15 = vld [vmem:[%s15033_s5 + $0x128] sm:$0xff]  ;;  %v5601_v57 = vadd.f32 %v14750_v27, %v14747_v1  ;;  %v14824_v39 = vpop.f32.mrf.mxu1 }
 0x809   :  { %v9043_v29 = vld [vmem:[#allocation3 + $0x30] sm:$0xf]  ;;  %v9711_v21 = vld [vmem:[#allocation3 + $0x34] sm:$0xf]  ;;  %6719 = vmatpush.bf16.msrb.mxu1 %v9778_v15  ;;  %v15369_v27 = vld [vmem:[#allocation39_spill] sm:$0xff] }
 0x80a   :  { %5946 = vst [vmem:[#allocation3 + $0x38] sm:$0xff] %v5922_v26  ;;  %v5786_v14 = vadd.f32 %v5732_v22, %v15366_v63  ;;  %v5891_v26 = vmax.f32 %v5843_v56, 0.0  ;;  %v5670_v22 = vadd.f32 %v5669_v7, %v5601_v57 }
 0x80c   :  { %v5840_v2 = vadd.f32 %v14620_v43, %v5786_v14  ;;  %v5674_v63 = vpop.f32.mrf.mxu0 }
 0x80e   :  { %v5888_v12 = vmax.f32 %v5840_v2, 0.0  ;;  %v14828_v1 = vpop.f32.mrf.mxu3 }
 0x80f   :  { %v5733_v45 = vpop.f32.mrf.mxu2 }
 0x810   :  { %v5923_v48 = vpack.c.bf16 %v5888_v12, %v5887_v10  ;;  %v5734_v61 = vadd.f32 %v5733_v45, %v5665_v5  ;;  %v5845_v12 = vadd.f32 %v14613_v9, %v14465_v34  ;;  %v14842_v41 = vpop.f32.mrf.mxu1 }
 0x811   :  { %v9712_v11 = vld [vmem:[#allocation3 + $0x34] sm:$0xf0]  ;;  %v9045_v37 = vld [vmem:[#allocation3 + $0x38] sm:$0xf0] }
 0x812   :  { %5947 = vst [vmem:[#allocation3 + $0xa0] sm:$0xff] %v5923_v48  ;;  %v5788_v3 = vadd.f32 %v5734_v61, %v15367_v44  ;;  %v9044_v58 = vor.u32 %v9712_v11, %v9043_v29  ;;  %v9048_v6 = vor.u32 %v9711_v21, %v9045_v37  ;;  %v9785_v61 = vld [vmem:[%s15033_s5 + $0x160] sm:$0xff]  ;;  %v5604_v11 = vadd.f32 %v14763_v46, %v14759_v36  ;;  %v15370_v36 = vld [vmem:[#allocation43_spill] sm:$0xff] }
 0x813   :  { %v9777_v29 = vld [vmem:[%s15033_s5 + $0x120] sm:$0xff]  ;;  %6759 = vmatpush.bf16.msrb.mxu3 %v9785_v61  ;;  %v5893_v21 = vmax.f32 %v5845_v12, 0.0  ;;  %v5611_v61 = vadd.f32 %v14813_v55, %v14811_v8  ;;  %v5853_v8 = vadd.f32 %v14613_v9, %v14514_v16  ;;  %v15373_v55 = vld [vmem:[#allocation47_spill] sm:$0xff] }
 0x814   :  { %v5842_v60 = vadd.f32 %v14620_v43, %v5788_v3  ;;  %6461 = vmatmul.bf16.gmra.mxu0 %v9044_v58  ;;  %6720 = vmatpush.bf16.msrb.mxu1 %v9777_v29  ;;  %v5673_v37 = vadd.f32 %v5672_v32, %v5604_v11  ;;  %v5606_v32 = vadd.f32 %v14782_v24, %v14774_v59  ;;  %v15371_v59 = vld [vmem:[#allocation44_spill] sm:$0xff] }
 0x815   :  { %6500 = vmatmul.bf16.gmra.mxu2 %v9048_v6  ;;  %v5677_v6 = vpop.f32.mrf.mxu0 }
 0x816   :  { %v5890_v54 = vmax.f32 %v5842_v60, 0.0  ;;  %v9784_v60 = vld [vmem:[%s15033_s5 + $0x158] sm:$0xff] }
 0x817   :  { %v5736_v51 = vpop.f32.mrf.mxu2  ;;  %6760 = vmatpush.bf16.msrb.mxu3 %v9784_v60 }
 0x818   :  { %v5924_v49 = vpack.c.bf16 %v5890_v54, %v5889_v33  ;;  %v5737_v38 = vadd.f32 %v5736_v51, %v5668_v19  ;;  %v14850_v33 = vpop.f32.mrf.mxu3  ;;  %v5895_v54 = vmax.f32 %v5847_v31, 0.0  ;;  %v5675_v51 = vadd.f32 %v5674_v63, %v5606_v32 }
 0x819   :  { %v8931_v20 = vld [vmem:[#allocation3 + $0xa0] sm:$0xf]  ;;  %v9739_v10 = vld [vmem:[#allocation3 + $0xa4] sm:$0xf] }
 0x81a   :  { %5948 = vst [vmem:[#allocation3 + $0xa8] sm:$0xff] %v5924_v49  ;;  %v5790_v18 = vadd.f32 %v5737_v38, %v15368_v17 }
 0x81c   :  { %v5844_v30 = vadd.f32 %v14620_v43, %v5790_v18 }
 0x81d   :  { %v5679_v63 = vpop.f32.mrf.mxu0 }
 0x81e   :  { %v5892_v13 = vmax.f32 %v5844_v30, 0.0  ;;  %v5849_v30 = vadd.f32 %v14613_v9, %v14488_v4 }
 0x81f   :  { %v5738_v14 = vpop.f32.mrf.mxu2 }
 0x820   :  { %v5925_v47 = vpack.c.bf16 %v5892_v13, %v5891_v26  ;;  %v5739_v25 = vadd.f32 %v5738_v14, %v5670_v22  ;;  %v9776_v13 = vld [vmem:[%s15033_s5 + $0x118] sm:$0xff]  ;;  %v5609_v14 = vadd.f32 %v14800_v52, %v14797_v28  ;;  %v5897_v4 = vmax.f32 %v5849_v30, 0.0  ;;  %v15372_v28 = vld [vmem:[#allocation46_spill] sm:$0xff] }
 0x821   :  { %v9740_v2 = vld [vmem:[#allocation3 + $0xa4] sm:$0xf0]  ;;  %v8933_v5 = vld [vmem:[#allocation3 + $0xa8] sm:$0xf0]  ;;  %6721 = vmatpush.bf16.msrb.mxu1 %v9776_v13  ;;  %v5616_v13 = vadd.f32 %v14850_v33, %v14842_v41 }
 0x822   :  { %5949 = vst [vmem:[#allocation3 + $0x40] sm:$0xff] %v5925_v47  ;;  %v5792_v45 = vadd.f32 %v5739_v25, %v15369_v27  ;;  %v8932_v7 = vor.u32 %v9740_v2, %v8931_v20  ;;  %v8936_v48 = vor.u32 %v9739_v10, %v8933_v5  ;;  %v14861_v47 = vpop.f32.mrf.mxu1  ;;  %v14864_v20 = vpop.f32.mrf.mxu3  ;;  %v5678_v2 = vadd.f32 %v5677_v6, %v5609_v14 }
 0x824   :  { %v5846_v34 = vadd.f32 %v14620_v43, %v5792_v45  ;;  %6227 = vmatmul.bf16.gmra.mxu1 %v8932_v7  ;;  %6266 = vmatmul.bf16.gmra.mxu3 %v8936_v48  ;;  %v5851_v45 = vadd.f32 %v14613_v9, %v14501_v62  ;;  %v9783_v7 = vld [vmem:[%s15033_s5 + $0x150] sm:$0xff] }
 0x825   :  { %v9775_v48 = vld [vmem:[%s15033_s5 + $0x110] sm:$0xff]  ;;  %6761 = vmatpush.bf16.msrb.mxu3 %v9783_v7  ;;  %v5682_v11 = vpop.f32.mrf.mxu0 }
 0x826   :  { %v5894_v40 = vmax.f32 %v5846_v34, 0.0  ;;  %6722 = vmatpush.bf16.msrb.mxu1 %v9775_v48  ;;  %v5899_v62 = vmax.f32 %v5851_v45, 0.0  ;;  %v5857_v48 = vadd.f32 %v14613_v9, %v14542_v0  ;;  %v5859_v0 = vadd.f32 %v14613_v9, %v14564_v23 }
 0x827   :  { %v5741_v44 = vpop.f32.mrf.mxu2  ;;  %v5861_v23 = vadd.f32 %v14613_v9, %v14596_v50  ;;  %v9762_v50 = vld [vmem:[#allocation3 + $0x14] sm:$0xf0] }
 0x828   :  { %v5926_v3 = vpack.c.bf16 %v5894_v40, %v5893_v21  ;;  %v5742_v58 = vadd.f32 %v5741_v44, %v5673_v37  ;;  %v5680_v21 = vadd.f32 %v5679_v63, %v5611_v61  ;;  %v15375_v61 = vld [vmem:[#allocation51_spill] sm:$0xff] }
 0x829   :  { %v9051_v17 = vld [vmem:[#allocation3 + $0x40] sm:$0xf]  ;;  %v9713_v15 = vld [vmem:[#allocation3 + $0x44] sm:$0xf] }
 0x82a   :  { %5950 = vst [vmem:[#allocation3 + $0x48] sm:$0xff] %v5926_v3  ;;  %v5794_v46 = vadd.f32 %v5742_v58, %v15370_v36  ;;  %v14878_v34 = vpop.f32.mrf.mxu1  ;;  %v14880_v44 = vpop.f32.mrf.mxu3 }
 0x82c   :  { %v5848_v19 = vadd.f32 %v14620_v43, %v5794_v46 }
 0x82e   :  { %v5896_v35 = vmax.f32 %v5848_v19, 0.0 }
 0x82f   :  { %v5743_v49 = vpop.f32.mrf.mxu2 }
 0x830   :  { %v5927_v38 = vpack.c.bf16 %v5896_v35, %v5895_v54  ;;  %v5744_v56 = vadd.f32 %v5743_v49, %v5675_v51  ;;  %v9782_v54 = vld [vmem:[%s15033_s5 + $0x148] sm:$0xff]  ;;  %v5614_v51 = vadd.f32 %v14828_v1, %v14824_v39  ;;  %v5901_v49 = vmax.f32 %v5853_v8, 0.0  ;;  %v15374_v39 = vld [vmem:[#allocation49_spill] sm:$0xff] }
 0x831   :  { %v9714_v18 = vld [vmem:[#allocation3 + $0x44] sm:$0xf0]  ;;  %v9053_v57 = vld [vmem:[#allocation3 + $0x48] sm:$0xf0]  ;;  %6762 = vmatpush.bf16.msrb.mxu3 %v9782_v54 }
 0x832   :  { %5951 = vst [vmem:[#allocation3 + $0xb0] sm:$0xff] %v5927_v38  ;;  %v5796_v24 = vadd.f32 %v5744_v56, %v15371_v59  ;;  %v9052_v26 = vor.u32 %v9714_v18, %v9051_v17  ;;  %v9056_v22 = vor.u32 %v9713_v15, %v9053_v57  ;;  %v5683_v38 = vadd.f32 %v5682_v11, %v5614_v51  ;;  %v5684_v17 = vpop.f32.mrf.mxu0 }
 0x834   :  { %v5850_v25 = vadd.f32 %v14620_v43, %v5796_v24  ;;  %6466 = vmatmul.bf16.gmra.mxu0 %v9052_v26  ;;  %6505 = vmatmul.bf16.gmra.mxu2 %v9056_v22  ;;  %v5855_v24 = vadd.f32 %v14613_v9, %v14528_v53  ;;  %v9774_v26 = vld [vmem:[%s15033_s5 + $0x108] sm:$0xff]  ;;  %v9781_v22 = vld [vmem:[%s15033_s5 + $0x140] sm:$0xff]  ;;  %v9165_v9 = vld [vmem:[#allocation3 + $0x18] sm:$0xf0] }
 0x835   :  { %6723 = vmatpush.bf16.msrb.mxu1 %v9774_v26  ;;  %6763 = vmatpush.bf16.msrb.mxu3 %v9781_v22  ;;  %v9773_v53 = vld [vmem:[%s15033_s5 + $0x100] sm:$0xff] }
 0x836   :  { %v5898_v10 = vmax.f32 %v5850_v25, 0.0  ;;  %v5903_v14 = vmax.f32 %v5855_v24, 0.0  ;;  %v5685_v25 = vadd.f32 %v5684_v17, %v5616_v13 }
 0x837   :  { %v5746_v5 = vpop.f32.mrf.mxu2 }
 0x838   :  { %v5928_v12 = vpack.c.bf16 %v5898_v10, %v5897_v4  ;;  %v5747_v27 = vadd.f32 %v5746_v5, %v5678_v2 }
 0x839   :  { %v8939_v6 = vld [vmem:[#allocation3 + $0xb0] sm:$0xf]  ;;  %v9741_v36 = vld [vmem:[#allocation3 + $0xb4] sm:$0xf]  ;;  %6724 = vmatpush.bf16.msrb.mxu1 %v9773_v53 }
 0x83a   :  { %5952 = vst [vmem:[#allocation3 + $0xb8] sm:$0xff] %v5928_v12  ;;  %v5798_v52 = vadd.f32 %v5747_v27, %v15372_v28  ;;  %v5687_v28 = vpop.f32.mrf.mxu0 }
 0x83c   :  { %v5852_v29 = vadd.f32 %v14620_v43, %v5798_v52 }
 0x83e   :  { %v5900_v37 = vmax.f32 %v5852_v29, 0.0 }
 0x83f   :  { %v5748_v40 = vpop.f32.mrf.mxu2 }
 0x840   :  { %v5929_v3 = vpack.c.bf16 %v5900_v37, %v5899_v62  ;;  %v5749_v58 = vadd.f32 %v5748_v40, %v5680_v21  ;;  %v5619_v21 = vadd.f32 %v14864_v20, %v14861_v47  ;;  %v5905_v40 = vmax.f32 %v5857_v48, 0.0 }
 0x841   :  { %v9742_v31 = vld [vmem:[#allocation3 + $0xb4] sm:$0xf0]  ;;  %v8941_v46 = vld [vmem:[#allocation3 + $0xb8] sm:$0xf0]  ;;  %v6213_v56 = vpop.f32.mrf.mxu1  ;;  %v5621_v47 = vadd.f32 %v14880_v44, %v14878_v34 }
 0x842   :  { %5953 = vst [vmem:[#allocation3 + $0x50] sm:$0xff] %v5929_v3  ;;  %v5800_v60 = vadd.f32 %v5749_v58, %v15373_v55  ;;  %v8940_v32 = vor.u32 %v9742_v31, %v8939_v6  ;;  %v8944_v19 = vor.u32 %v9741_v36, %v8941_v46  ;;  %v5688_v3 = vadd.f32 %v5687_v28, %v5619_v21  ;;  %v15376_v46 = vld [vmem:[#allocation53_spill] sm:$0xff]  ;;  %v5689_v55 = vpop.f32.mrf.mxu0  ;;  %v9765_v21 = vld [vmem:[#allocation3 + $0x34] sm:$0xf] }
 0x844   :  { %v5854_v35 = vadd.f32 %v14620_v43, %v5800_v60  ;;  %6232 = vmatmul.bf16.gmra.mxu1 %v8940_v32  ;;  %6271 = vmatmul.bf16.gmra.mxu3 %v8944_v19  ;;  %v5907_v60 = vmax.f32 %v5859_v0, 0.0  ;;  %v5690_v32 = vadd.f32 %v5689_v55, %v5621_v47  ;;  %v9187_v0 = vld [vmem:[#allocation3 + $0x40] sm:$0xf]  ;;  %v6844_v47 = vld [vmem:[%s15036_s7 + $0x48] sm:$0xff] }
 0x846   :  { %v5902_v16 = vmax.f32 %v5854_v35, 0.0 }
 0x847   :  { %v5751_v18 = vpop.f32.mrf.mxu2 }
 0x848   :  { %v5930_v15 = vpack.c.bf16 %v5902_v16, %v5901_v49  ;;  %v5752_v57 = vadd.f32 %v5751_v18, %v5683_v38  ;;  %v6252_v30 = vpop.f32.mrf.mxu3 }
 0x849   :  { %v14891_v59 = vadd.f32 %v6252_v30, %v6213_v56  ;;  %v6215_v5 = vpop.f32.mrf.mxu1  ;;  %v9059_v45 = vld [vmem:[#allocation3 + $0x50] sm:$0xf]  ;;  %v9715_v52 = vld [vmem:[#allocation3 + $0x54] sm:$0xf] }
 0x84a   :  { %5954 = vst [vmem:[#allocation3 + $0x58] sm:$0xff] %v5930_v15  ;;  %v5802_v1 = vadd.f32 %v5752_v57, %v15374_v39  ;;  %v5909_v57 = vmax.f32 %v5861_v23, 0.0 }
 0x84c   :  { %v5856_v63 = vadd.f32 %v14620_v43, %v5802_v1 }
 0x84e   :  { %v5904_v4 = vmax.f32 %v5856_v63, 0.0  ;;  %v9761_v63 = vld [vmem:[#allocation3 + $0x14] sm:$0xf] }
 0x84f   :  { %v5753_v2 = vpop.f32.mrf.mxu2 }
 0x850   :  { %v5931_v10 = vpack.c.bf16 %v5904_v4, %v5903_v14  ;;  %v5754_v12 = vadd.f32 %v5753_v2, %v5685_v25  ;;  %v6254_v27 = vpop.f32.mrf.mxu3  ;;  %v9764_v14 = vld [vmem:[#allocation3 + $0x24] sm:$0xf0]  ;;  %v9173_v25 = vld [vmem:[#allocation3 + $0x28] sm:$0xf0]  ;;  %v6850_v4 = vld [vmem:[%s15036_s7 + $0x78] sm:$0xff] }
 0x851   :  { %v14908_v41 = vadd.f32 %v6254_v27, %v6215_v5  ;;  %v9716_v33 = vld [vmem:[#allocation3 + $0x54] sm:$0xf0]  ;;  %v9061_v7 = vld [vmem:[#allocation3 + $0x58] sm:$0xf0]  ;;  %v9171_v2 = vld [vmem:[#allocation3 + $0x20] sm:$0xf]  ;;  %6851 = vmatpush.msrb.mxu0 %v6850_v4 }
 0x852   :  { %5955 = vst [vmem:[#allocation3 + $0xc0] sm:$0xff] %v5931_v10  ;;  %v5804_v29 = vadd.f32 %v5754_v12, %v15375_v61  ;;  %v9060_v11 = vor.u32 %v9716_v33, %v9059_v45  ;;  %v9064_v62 = vor.u32 %v9715_v52, %v9061_v7  ;;  %v9763_v10 = vld [vmem:[#allocation3 + $0x24] sm:$0xf]  ;;  %v9172_v5 = vor.u32 %v9764_v14, %v9171_v2  ;;  %v6849_v27 = vld [vmem:[%s15036_s7 + $0x70] sm:$0xff]  ;;  %v6848_v52 = vld [vmem:[%s15036_s7 + $0x68] sm:$0xff] }
 0x853   :  { %v9176_v12 = vor.u32 %v9763_v10, %v9173_v25  ;;  %6852 = vmatpush.msrb.mxu0 %v6849_v27  ;;  %v9766_v61 = vld [vmem:[#allocation3 + $0x34] sm:$0xf0]  ;;  %v6836_v4 = vld [vmem:[%s15036_s7 + $0x8] sm:$0xff]  ;;  %v6835_v2 = vld [vmem:[%s15036_s7] sm:$0xff] }
 0x854   :  { %v5858_v37 = vadd.f32 %v14620_v43, %v5804_v29  ;;  %6471 = vmatmul.bf16.gmra.mxu0 %v9060_v11  ;;  %6510 = vmatmul.bf16.gmra.mxu2 %v9064_v62  ;;  %v9181_v29 = vld [vmem:[#allocation3 + $0x38] sm:$0xf0]  ;;  %v9179_v62 = vld [vmem:[#allocation3 + $0x30] sm:$0xf] }
 0x855   :  { %6853 = vmatpush.msrb.mxu0 %v6848_v52 }
 0x856   :  { %v5906_v58 = vmax.f32 %v5858_v37, 0.0  ;;  %v9180_v37 = vor.u32 %v9766_v61, %v9179_v62 }
 0x857   :  { %v5756_v6 = vpop.f32.mrf.mxu2 }
 0x858   :  { %v5932_v31 = vpack.c.bf16 %v5906_v58, %v5905_v40  ;;  %v5757_v36 = vadd.f32 %v5756_v6, %v5688_v3  ;;  %v9184_v40 = vor.u32 %v9765_v21, %v9181_v29  ;;  %v6847_v3 = vld [vmem:[%s15036_s7 + $0x60] sm:$0xff]  ;;  %v6846_v58 = vld [vmem:[%s15036_s7 + $0x58] sm:$0xff]  ;;  %v6845_v6 = vld [vmem:[%s15036_s7 + $0x50] sm:$0xff] }
 0x859   :  { %v8947_v49 = vld [vmem:[#allocation3 + $0xc0] sm:$0xf]  ;;  %v9743_v16 = vld [vmem:[#allocation3 + $0xc4] sm:$0xf]  ;;  %6854 = vmatpush.msrb.mxu0 %v6847_v3 }
 0x85a   :  { %5956 = vst [vmem:[#allocation3 + $0xc8] sm:$0xff] %v5932_v31  ;;  %v5806_v8 = vadd.f32 %v5757_v36, %v15376_v46  ;;  %v9768_v31 = vld [vmem:[#allocation3 + $0x44] sm:$0xf0]  ;;  %v9189_v36 = vld [vmem:[#allocation3 + $0x48] sm:$0xf0] }
 0x85b   :  { %6855 = vmatpush.msrb.mxu0 %v6846_v58  ;;  %v9767_v46 = vld [vmem:[#allocation3 + $0x44] sm:$0xf]  ;;  %v14998_v58 = vld [vmem:[%s15035_s6] ss:$0 sm:$0xff] }
 0x85c   :  { %v5860_v20 = vadd.f32 %v14620_v43, %v5806_v8  ;;  %v9188_v8 = vor.u32 %v9768_v31, %v9187_v0  ;;  %v9192_v55 = vor.u32 %v9767_v46, %v9189_v36 }
 0x85d   :  { %6856 = vmatpush.msrb.mxu0 %v6845_v6 }
 0x85e   :  { %v5908_v19 = vmax.f32 %v5860_v20, 0.0 }
 0x85f   :  { %v5758_v54 = vpop.f32.mrf.mxu2  ;;  %6857 = vmatpush.msrb.mxu0 %v6844_v47 }
 0x860   :  { %v5933_v51 = vpack.c.bf16 %v5908_v19, %v5907_v60  ;;  %v5759_v35 = vadd.f32 %v5758_v54, %v5690_v32  ;;  %v6843_v19 = vld [vmem:[%s15036_s7 + $0x40] sm:$0xff] }
 0x861   :  { %v9744_v38 = vld [vmem:[#allocation3 + $0xc4] sm:$0xf0]  ;;  %v8949_v56 = vld [vmem:[#allocation3 + $0xc8] sm:$0xf0]  ;;  %v6218_v15 = vpop.f32.mrf.mxu1  ;;  %6858 = vmatpush.msrb.mxu0 %v6843_v19 }
 0x862   :  { %5957 = vst [vmem:[#allocation3 + $0x60] sm:$0xff] %v5933_v51  ;;  %v5808_v17 = vadd.f32 %v5759_v35, %v14299_v42  ;;  %v8948_v18 = vor.u32 %v9744_v38, %v8947_v49  ;;  %v8952_v34 = vor.u32 %v9743_v16, %v8949_v56  ;;  %v9163_v42 = vld [vmem:[#allocation3 + $0x10] sm:$0xf]  ;;  %v9770_v35 = vld [vmem:[#allocation3 + $0x54] sm:$0xf0] }
 0x863   :  { %v9164_v53 = vor.u32 %v9762_v50, %v9163_v42  ;;  %v9197_v49 = vld [vmem:[#allocation3 + $0x58] sm:$0xf0]  ;;  %v9195_v16 = vld [vmem:[#allocation3 + $0x50] sm:$0xf]  ;;  %v9769_v56 = vld [vmem:[#allocation3 + $0x54] sm:$0xf] }
 0x864   :  { %v5862_v44 = vadd.f32 %v14620_v43, %v5808_v17  ;;  %6237 = vmatmul.bf16.gmra.mxu1 %v8948_v18  ;;  %6276 = vmatmul.bf16.gmra.mxu3 %v8952_v34  ;;  %v9168_v43 = vor.u32 %v9761_v63, %v9165_v9  ;;  %v9196_v23 = vor.u32 %v9770_v35, %v9195_v16  ;;  %v6842_v18 = vld [vmem:[%s15036_s7 + $0x38] sm:$0xff]  ;;  %v6841_v34 = vld [vmem:[%s15036_s7 + $0x30] sm:$0xff] }
 0x865   :  { %v9200_v17 = vor.u32 %v9769_v56, %v9197_v49  ;;  %6859 = vmatpush.msrb.mxu0 %v6842_v18  ;;  %v6838_v63 = vld [vmem:[%s15036_s7 + $0x18] sm:$0xff] }
 0x866   :  { %v5910_v30 = vmax.f32 %v5862_v44, 0.0  ;;  %v6840_v44 = vld [vmem:[%s15036_s7 + $0x28] sm:$0xff] }
 0x867   :  { %v6257_v24 = vpop.f32.mrf.mxu3  ;;  %6860 = vmatpush.msrb.mxu0 %v6841_v34 }
 0x868   :  { %v5934_v39 = vpack.c.bf16 %v5910_v30, %v5909_v57  ;;  %v14926_v1 = vadd.f32 %v6257_v24, %v6218_v15 }
 0x869   :  { %v6220_v26 = vpop.f32.mrf.mxu1  ;;  %6861 = vmatpush.msrb.mxu0 %v6840_v44  ;;  %v9203_v30 = vld [vmem:[#allocation3 + $0x60] sm:$0xf]  ;;  %v9771_v24 = vld [vmem:[#allocation3 + $0x64] sm:$0xf] }
 0x86a   :  { %5958 = vst [vmem:[#allocation3 + $0x68] sm:$0xff] %v5934_v39  ;;  %v6839_v39 = vld [vmem:[%s15036_s7 + $0x20] sm:$0xff] }
 0x86b   :  { %6862 = vmatpush.msrb.mxu0 %v6839_v39 }
 0x86d   :  { %6863 = vmatpush.msrb.mxu0 %v6838_v63 }
 0x86f   :  { %v6259_v22 = vpop.f32.mrf.mxu3 }
 0x870   :  { %v14928_v13 = vadd.f32 %v6259_v22, %v6220_v26 }
 0x871   :  { %v9772_v15 = vld [vmem:[#allocation3 + $0x64] sm:$0xf0]  ;;  %v9205_v57 = vld [vmem:[#allocation3 + $0x68] sm:$0xf0] }
 0x872   :  { %v9204_v26 = vor.u32 %v9772_v15, %v9203_v30  ;;  %v9208_v22 = vor.u32 %v9771_v24, %v9205_v57 }
 0x874   :  { %6725 = vmatmul.bf16.vlgmr.msrb.gmra.mxu1 %v9164_v53  ;;  %6764 = vmatmul.bf16.vlgmr.msrb.gmra.mxu3 %v9168_v43  ;;  %v6837_v53 = vld [vmem:[%s15036_s7 + $0x10] sm:$0xff] }
 0x875   :  { %6864 = vmatpush.msrb.mxu0 %v6837_v53 }
 0x877   :  { %6865 = vmatpush.msrb.mxu0 %v6836_v4 }
 0x879   :  { %6866 = vmatpush.msrb.mxu0 %v6835_v2 }
 0x881   :  { %v6223_v45 = vpop.f32.mrf.mxu1 }
 0x884   :  { %6730 = vmatmul.bf16.gmra.mxu1 %v9172_v5  ;;  %6769 = vmatmul.bf16.gmra.mxu3 %v9176_v12  ;;  %v6486_v5 = vpop.f32.mrf.mxu2  ;;  %v6447_v12 = vpop.f32.mrf.mxu0 }
 0x885   :  { %v6448_v62 = vadd.f32 %v6447_v12, %v14891_v59 }
 0x887   :  { %v6262_v28 = vpop.f32.mrf.mxu3 }
 0x888   :  { %v14936_v33 = vadd.f32 %v6262_v28, %v6223_v45 }
 0x889   :  { %v6225_v7 = vpop.f32.mrf.mxu1 }
 0x88c   :  { %v6488_v52 = vpop.f32.mrf.mxu2 }
 0x88f   :  { %v6264_v48 = vpop.f32.mrf.mxu3 }
 0x890   :  { %v14941_v11 = vadd.f32 %v6264_v48, %v6225_v7  ;;  %v6449_v7 = vpop.f32.mrf.mxu0 }
 0x891   :  { %v6450_v46 = vadd.f32 %v6449_v7, %v14908_v41 }
 0x893   :  { %v6489_v47 = vadd.f32 %v6488_v52, %v6450_v46 }
 0x894   :  { %6735 = vmatmul.bf16.gmra.mxu1 %v9180_v37  ;;  %6774 = vmatmul.bf16.gmra.mxu3 %v9184_v40  ;;  %v6487_v37 = vadd.f32 %v6486_v5, %v6448_v62  ;;  %v6491_v40 = vpop.f32.mrf.mxu2 }
 0x898   :  { %v6452_v6 = vpop.f32.mrf.mxu0 }
 0x899   :  { %v6453_v35 = vadd.f32 %v6452_v6, %v14926_v1 }
 0x89b   :  { %v6492_v56 = vadd.f32 %v6491_v40, %v6453_v35 }
 0x8a1   :  { %v6228_v20 = vpop.f32.mrf.mxu1 }
 0x8a4   :  { %6740 = vmatmul.bf16.gmra.mxu1 %v9188_v8  ;;  %6779 = vmatmul.bf16.gmra.mxu3 %v9192_v55 }
 0x8a7   :  { %v6267_v60 = vpop.f32.mrf.mxu3 }
 0x8a8   :  { %v14955_v32 = vadd.f32 %v6267_v60, %v6228_v20  ;;  %v6493_v60 = vpop.f32.mrf.mxu2 }
 0x8a9   :  { %v6230_v54 = vpop.f32.mrf.mxu1 }
 0x8af   :  { %v6269_v51 = vpop.f32.mrf.mxu3 }
 0x8b0   :  { %v14960_v38 = vadd.f32 %v6269_v51, %v6230_v54  ;;  %v6454_v54 = vpop.f32.mrf.mxu0  ;;  %v6496_v34 = vpop.f32.mrf.mxu2 }
 0x8b1   :  { %v6455_v15 = vadd.f32 %v6454_v54, %v14928_v13 }
 0x8b3   :  { %v6494_v24 = vadd.f32 %v6493_v60, %v6455_v15 }
 0x8b4   :  { %6745 = vmatmul.bf16.gmra.mxu1 %v9196_v23  ;;  %6784 = vmatmul.bf16.gmra.mxu3 %v9200_v17 }
 0x8b8   :  { %v6457_v18 = vpop.f32.mrf.mxu0  ;;  %v6498_v63 = vpop.f32.mrf.mxu2 }
 0x8c1   :  { %v6233_v50 = vpop.f32.mrf.mxu1 }
 0x8c4   :  { %6750 = vmatmul.bf16.gmra.mxu1 %v9204_v26  ;;  %6789 = vmatmul.bf16.gmra.mxu3 %v9208_v22  ;;  %v6458_v22 = vadd.f32 %v6457_v18, %v14936_v33  ;;  %v6501_v33 = vpop.f32.mrf.mxu2 }
 0x8c7   :  { %v6272_v9 = vpop.f32.mrf.mxu3 }
 0x8c8   :  { %v14974_v42 = vadd.f32 %v6272_v9, %v6233_v50  ;;  %v6459_v9 = vpop.f32.mrf.mxu0 }
 0x8c9   :  { %v6235_v43 = vpop.f32.mrf.mxu1 }
 0x8cf   :  { %v6274_v14 = vpop.f32.mrf.mxu3 }
 0x8d0   :  { %v14982_v25 = vadd.f32 %v6274_v14, %v6235_v43  ;;  %v6497_v14 = vadd.f32 %v6496_v34, %v6458_v22  ;;  %v6462_v12 = vpop.f32.mrf.mxu0 }
 0x8d1   :  { %v6463_v62 = vadd.f32 %v6462_v12, %v14955_v32 }
 0x8d3   :  { %v6502_v6 = vadd.f32 %v6501_v33, %v6463_v62 }
 0x8d8   :  { %v6464_v40 = vpop.f32.mrf.mxu0 }
 0x8d9   :  { %v6465_v46 = vadd.f32 %v6464_v40, %v14960_v38 }
 0x8e1   :  { %v6238_v10 = vpop.f32.mrf.mxu1 }
 0x8e7   :  { %v6277_v27 = vpop.f32.mrf.mxu3 }
 0x8e8   :  { %v14990_v45 = vadd.f32 %v6277_v27, %v6238_v10  ;;  %v6460_v10 = vadd.f32 %v6459_v9, %v14941_v11 }
 0x8e9   :  { %v6240_v28 = vpop.f32.mrf.mxu1 }
 0x8ea   :  { %v6499_v52 = vadd.f32 %v6498_v63, %v6460_v10 }
 0x8ef   :  { %v6279_v48 = vpop.f32.mrf.mxu3 }
 0x8f0   :  { %v14992_v61 = vadd.f32 %v6279_v48, %v6240_v28 }
 0x8f1   :  { %v6726_v29 = vpop.f32.mrf.mxu1 }
 0x8f7   :  { %v6765_v21 = vpop.f32.mrf.mxu3 }
 0x8f8   :  { %v6766_v3 = vadd.f32 %v6765_v21, %v6726_v29 }
 0x8f9   :  { %v6728_v31 = vpop.f32.mrf.mxu1 }
 0x8fa   :  { %v6795_v36 = vadd.f32 %v6766_v3, %v6487_v37 }
 0x8fc   :  { %v6811_v0 = vadd.f32 %v14998_v58, %v6795_v36  ;;  %v6503_v36 = vpop.f32.mrf.mxu2 }
 0x8fe   :  { %v6823_v8 = vmax.f32 %v6811_v0, 0.0 }
 0x8ff   :  { %v6767_v55 = vpop.f32.mrf.mxu3 }
 0x900   :  { %v6768_v59 = vadd.f32 %v6767_v55, %v6728_v31  ;;  %6867 = vmatmul.f32.vlgmr.msrb.gmra.mxu0 %v6823_v8 }
 0x901   :  { %v6731_v20 = vpop.f32.mrf.mxu1 }
 0x902   :  { %v6796_v19 = vadd.f32 %v6768_v59, %v6489_v47  ;;  %v6467_v47 = vpop.f32.mrf.mxu0 }
 0x904   :  { %v6812_v51 = vadd.f32 %v14998_v58, %v6796_v19  ;;  %v6506_v19 = vpop.f32.mrf.mxu2 }
 0x906   :  { %v6824_v49 = vmax.f32 %v6812_v51, 0.0  ;;  %v6468_v51 = vadd.f32 %v6467_v47, %v14974_v42 }
 0x907   :  { %v6770_v16 = vpop.f32.mrf.mxu3 }
 0x908   :  { %v6771_v23 = vadd.f32 %v6770_v16, %v6731_v20  ;;  %6870 = vmatmul.f32.gmra.mxu0 %v6824_v49  ;;  %v6504_v20 = vadd.f32 %v6503_v36, %v6465_v46 }
 0x909   :  { %v6733_v17 = vpop.f32.mrf.mxu1 }
 0x90a   :  { %v6797_v41 = vadd.f32 %v6771_v23, %v6492_v56  ;;  %v6507_v56 = vadd.f32 %v6506_v19, %v6468_v51  ;;  %v6469_v38 = vpop.f32.mrf.mxu0 }
 0x90b   :  { %v6470_v34 = vadd.f32 %v6469_v38, %v14982_v25 }
 0x90c   :  { %v6813_v44 = vadd.f32 %v14998_v58, %v6797_v41  ;;  %v6508_v18 = vpop.f32.mrf.mxu2 }
 0x90e   :  { %v6825_v57 = vmax.f32 %v6813_v44, 0.0 }
 0x90f   :  { %v6772_v30 = vpop.f32.mrf.mxu3 }
 0x910   :  { %v6773_v39 = vadd.f32 %v6772_v30, %v6733_v17  ;;  %6873 = vmatmul.f32.gmra.mxu0 %v6825_v57  ;;  %v6509_v30 = vadd.f32 %v6508_v18, %v6470_v34 }
 0x911   :  { %v6736_v26 = vpop.f32.mrf.mxu1 }
 0x912   :  { %v6798_v1 = vadd.f32 %v6773_v39, %v6494_v24  ;;  %v6472_v42 = vpop.f32.mrf.mxu0 }
 0x914   :  { %v6814_v50 = vadd.f32 %v14998_v58, %v6798_v1  ;;  %v6473_v1 = vadd.f32 %v6472_v42, %v14990_v45 }
 0x916   :  { %v6826_v53 = vmax.f32 %v6814_v50, 0.0 }
 0x917   :  { %v6775_v43 = vpop.f32.mrf.mxu3 }
 0x918   :  { %v6776_v4 = vadd.f32 %v6775_v43, %v6736_v26  ;;  %6876 = vmatmul.f32.gmra.mxu0 %v6826_v53  ;;  %v6511_v26 = vpop.f32.mrf.mxu2 }
 0x919   :  { %v6738_v2 = vpop.f32.mrf.mxu1  ;;  %v6512_v53 = vadd.f32 %v6511_v26, %v6473_v1 }
 0x91a   :  { %v6799_v13 = vadd.f32 %v6776_v4, %v6497_v14  ;;  %v6474_v14 = vpop.f32.mrf.mxu0 }
 0x91b   :  { %v6475_v4 = vadd.f32 %v6474_v14, %v14992_v61 }
 0x91c   :  { %v6815_v5 = vadd.f32 %v14998_v58, %v6799_v13 }
 0x91e   :  { %v6827_v27 = vmax.f32 %v6815_v5, 0.0 }
 0x91f   :  { %v6777_v28 = vpop.f32.mrf.mxu3 }
 0x920   :  { %v6778_v7 = vadd.f32 %v6777_v28, %v6738_v2  ;;  %6879 = vmatmul.f32.gmra.mxu0 %v6827_v27  ;;  %v6513_v13 = vpop.f32.mrf.mxu2 }
 0x921   :  { %v6741_v48 = vpop.f32.mrf.mxu1  ;;  %v6514_v27 = vadd.f32 %v6513_v13, %v6475_v4 }
 0x922   :  { %v6800_v29 = vadd.f32 %v6778_v7, %v6499_v52 }
 0x924   :  { %v6816_v21 = vadd.f32 %v14998_v58, %v6800_v29 }
 0x926   :  { %v6828_v37 = vmax.f32 %v6816_v21, 0.0 }
 0x927   :  { %v6780_v3 = vpop.f32.mrf.mxu3 }
 0x928   :  { %v6781_v11 = vadd.f32 %v6780_v3, %v6741_v48  ;;  %6882 = vmatmul.f32.gmra.mxu0 %v6828_v37 }
 0x929   :  { %v6743_v31 = vpop.f32.mrf.mxu1 }
 0x92a   :  { %v6801_v0 = vadd.f32 %v6781_v11, %v6502_v6 }
 0x92c   :  { %v6817_v8 = vadd.f32 %v14998_v58, %v6801_v0 }
 0x92e   :  { %v6829_v55 = vmax.f32 %v6817_v8, 0.0 }
 0x92f   :  { %v6782_v59 = vpop.f32.mrf.mxu3 }
 0x930   :  { %v6783_v32 = vadd.f32 %v6782_v59, %v6743_v31  ;;  %6885 = vmatmul.f32.gmra.mxu0 %v6829_v55 }
 0x931   :  { %v6746_v60 = vpop.f32.mrf.mxu1 }
 0x932   :  { %v6802_v54 = vadd.f32 %v6783_v32, %v6504_v20 }
 0x934   :  { %v6818_v35 = vadd.f32 %v14998_v58, %v6802_v54 }
 0x936   :  { %v6830_v49 = vmax.f32 %v6818_v35, 0.0 }
 0x937   :  { %v6785_v16 = vpop.f32.mrf.mxu3 }
 0x938   :  { %v6786_v23 = vadd.f32 %v6785_v16, %v6746_v60  ;;  %6888 = vmatmul.f32.gmra.mxu0 %v6830_v49 }
 0x939   :  { %v6748_v41 = vpop.f32.mrf.mxu1 }
 0x93a   :  { %v6803_v17 = vadd.f32 %v6786_v23, %v6507_v56 }
 0x93c   :  { %v6819_v44 = vadd.f32 %v14998_v58, %v6803_v17 }
 0x93e   :  { %v6831_v15 = vmax.f32 %v6819_v44, 0.0 }
 0x93f   :  { %v6787_v57 = vpop.f32.mrf.mxu3 }
 0x940   :  { %v6788_v24 = vadd.f32 %v6787_v57, %v6748_v41  ;;  %6891 = vmatmul.f32.gmra.mxu0 %v6831_v15 }
 0x941   :  { %v6751_v50 = vpop.f32.mrf.mxu1 }
 0x942   :  { %v6804_v39 = vadd.f32 %v6788_v24, %v6509_v30 }
 0x944   :  { %v6820_v22 = vadd.f32 %v14998_v58, %v6804_v39 }
 0x946   :  { %v6832_v9 = vmax.f32 %v6820_v22, 0.0 }
 0x947   :  { %v6790_v63 = vpop.f32.mrf.mxu3 }
 0x948   :  { %v6791_v43 = vadd.f32 %v6790_v63, %v6751_v50  ;;  %6894 = vmatmul.f32.gmra.mxu0 %v6832_v9 }
 0x949   :  { %v6753_v5 = vpop.f32.mrf.mxu1 }
 0x94a   :  { %v6805_v25 = vadd.f32 %v6791_v43, %v6512_v53 }
 0x94c   :  { %v6821_v2 = vadd.f32 %v14998_v58, %v6805_v25 }
 0x94e   :  { %v6833_v10 = vmax.f32 %v6821_v2, 0.0 }
 0x94f   :  { %v6792_v12 = vpop.f32.mrf.mxu3 }
 0x950   :  { %v6793_v45 = vadd.f32 %v6792_v12, %v6753_v5  ;;  %6897 = vmatmul.f32.gmra.mxu0 %v6833_v10 }
 0x952   :  { %v6806_v28 = vadd.f32 %v6793_v45, %v6514_v27 }
 0x954   :  { %v6822_v52 = vadd.f32 %v14998_v58, %v6806_v28 }
 0x956   :  { %v6834_v33 = vmax.f32 %v6822_v52, 0.0 }
 0x958   :  { %6900 = vmatmul.f32.gmra.mxu0 %v6834_v33 }
 0x97d   :  { %v6868_v7 = vpop.f32.mrf.mxu0 }
 0x985   :  { %v6871_v48 = vpop.f32.mrf.mxu0 }
 0x98d   :  { %v6874_v29 = vpop.f32.mrf.mxu0 }
 0x98e   :  { %v6904_v11 = vadd.f32 %v6874_v29, %v6868_v7 }
 0x995   :  { %v6877_v62 = vpop.f32.mrf.mxu0 }
 0x996   :  { %v6905_v8 = vadd.f32 %v6877_v62, %v6871_v48 }
 0x99d   :  { %v6880_v21 = vpop.f32.mrf.mxu0 }
 0x99e   :  { %v6906_v31 = vadd.f32 %v6904_v11, %v6880_v21 }
 0x9a5   :  { %v6883_v61 = vpop.f32.mrf.mxu0 }
 0x9a6   :  { %v6907_v55 = vadd.f32 %v6905_v8, %v6883_v61 }
 0x9ad   :  { %v6886_v37 = vpop.f32.mrf.mxu0 }
 0x9ae   :  { %v6908_v36 = vadd.f32 %v6906_v31, %v6886_v37 }
 0x9b5   :  { %v6889_v40 = vpop.f32.mrf.mxu0 }
 0x9b6   :  { %v6909_v47 = vadd.f32 %v6907_v55, %v6889_v40 }
 0x9bd   :  { %v6892_v3 = vpop.f32.mrf.mxu0 }
 0x9be   :  { %v6910_v0 = vadd.f32 %v6908_v36, %v6892_v3 }
 0x9c5   :  { %v6895_v6 = vpop.f32.mrf.mxu0 }
 0x9c6   :  { %v6911_v59 = vadd.f32 %v6909_v47, %v6895_v6 }
 0x9cd   :  { %v6898_v46 = vpop.f32.mrf.mxu0 }
 0x9ce   :  { %v6912_v58 = vadd.f32 %v6910_v0, %v6898_v46 }
 0x9d0   :  { %6915 = vst.msk [vmem:[%s15037_s8] sm:$0xff] %vm6914_vm1, %v6912_v58 }
 0x9d5   :  { %v6901_v20 = vpop.f32.mrf.mxu0 }
 0x9d6   :  { %v6913_v32 = vadd.f32 %v6911_v59, %v6901_v20 }
 0x9d8   :  { %6916 = vst.msk [vmem:[%s15037_s8 + $0x8] sm:$0xff] %vm6914_vm1, %v6913_v32 }

</bundles_post_ra>
